<compile_context>
chip_gen: v7x
topology: tpu7x:2x2x1
jax: 0.10.0
libtpu: 0.0.40
codegen_flags: <defaults>
</compile_context>

<pallas_src>
import functools
import math

import jax
import jax.numpy as jnp
from jax import lax
from jax.experimental import pallas as pl
from jax.experimental.pallas import tpu as pltpu

F32_EPS = 1.1920928955078125e-07  # torch.finfo(float32).eps (nn.RMSNorm default)
NEG_BIG = -1e30
MXU_DTYPE = jnp.bfloat16


def _mosaic(dim_sem):
    return pltpu.CompilerParams(
        dimension_semantics=dim_sem,
        vmem_limit_bytes=32 * 1024 * 1024,  # safe on v5e/v6e/v7x for these tile sizes
    )


# ----------------------------- Pallas kernels -------------------------------

def _rms_matmul_kernel(x_ref, g_ref, w_ref, o_ref):
    """out = rmsnorm(x) * g @ w   (norm in f32, matmul bf16 on MXU, f32 accumulation)."""
    x = x_ref[...]                                   # (tm, D) f32
    ms = jnp.mean(x * x, axis=-1, keepdims=True)
    h = x * lax.rsqrt(ms + F32_EPS) * g_ref[...]
    o_ref[...] = jnp.dot(h.astype(MXU_DTYPE), w_ref[...],
                         preferred_element_type=jnp.float32)


def _attn_out_ffn_kernel(x_ref, a_ref, wo_ref, g2_ref, w1_ref, w2_ref, o_ref):
    """x2 = x + attn @ Wo ; out = x2 + W2(silu(W1(rmsnorm(x2) * g2)))."""
    x = x_ref[...]                                   # (tm, D) f32
    x = x + jnp.dot(a_ref[...].astype(MXU_DTYPE), wo_ref[...],
                    preferred_element_type=jnp.float32)
    ms = jnp.mean(x * x, axis=-1, keepdims=True)
    h = x * lax.rsqrt(ms + F32_EPS) * g2_ref[...]
    t = jnp.dot(h.astype(MXU_DTYPE), w1_ref[...], preferred_element_type=jnp.float32)
    t = t * jax.nn.sigmoid(t)                        # SiLU in f32
    ff = jnp.dot(t.astype(MXU_DTYPE), w2_ref[...], preferred_element_type=jnp.float32)
    o_ref[...] = x + ff


def _attention_kernel(q_ref, k_ref, v_ref, cos_ref, sin_ref, o_ref, *, n_heads, d_k):
    """Causal SDPA with (head-index) rotary for ONE batch element, all heads per step.

    q/k/v refs are (1, T, D) lane-dense slices of the (B, T, 3D) qkv projection.
    Output is written as one lane-dense (1, T, D) block (heads packed along lanes).
    """
    T = q_ref.shape[1]
    dh = d_k // 2
    scale = 1.0 / math.sqrt(d_k)

    q_all = q_ref[0]                                 # (T, D) f32
    k_all = k_ref[0]
    v_all = v_ref[0]

    row = lax.broadcasted_iota(jnp.int32, (T, T), 0)
    col = lax.broadcasted_iota(jnp.int32, (T, T), 1)
    causal = col <= row

    outs = []
    for h in range(n_heads):                         # static unroll over heads
        lo = h * d_k
        q = q_all[:, lo:lo + d_k]                    # (T, d_k)
        k = k_all[:, lo:lo + d_k]
        v = v_all[:, lo:lo + d_k]
        cos = cos_ref[h:h + 1, :]                    # (1, dh) — per-head angle (module quirk)
        sin = sin_ref[h:h + 1, :]

        # Rotary on halves; scores via two half-width matmuls (no lane concatenate needed).
        q1, q2 = q[:, :dh], q[:, dh:]
        k1, k2 = k[:, :dh], k[:, dh:]
        qr1 = q1 * cos + q2 * sin
        qr2 = q2 * cos - q1 * sin
        kr1 = k1 * cos + k2 * sin
        kr2 = k2 * cos - k1 * sin

        s = (jnp.dot(qr1, kr1.T, preferred_element_type=jnp.float32) +
             jnp.dot(qr2, kr2.T, preferred_element_type=jnp.float32)) * scale
        s = jnp.where(causal, s, NEG_BIG)
        s = s - jnp.max(s, axis=-1, keepdims=True)
        p = jnp.exp(s)
        p = p * pl.reciprocal(jnp.sum(p, axis=-1, keepdims=True), approx=True)
        outs.append(jnp.dot(p, v, preferred_element_type=jnp.float32))

    # Single lane-dense store of all heads.
    o_ref[0] = jnp.concatenate(outs, axis=-1)


# ----------------------------- wrappers --------------------------------------

def rms_qkv(x2d, g, w_t, tm=256):
    """RMSNorm + QKV projection. x: (M, D) f32; g: (1, D); w_t: (D, 3D) bf16."""
    M, D = x2d.shape
    N = w_t.shape[1]
    tm = min(tm, M)
    return pl.pallas_call(
        _rms_matmul_kernel,
        out_shape=jax.ShapeDtypeStruct((M, N), jnp.float32),
        grid=(pl.cdiv(M, tm),),
        in_specs=[pl.BlockSpec((tm, D), lambda m: (m, 0)),
                  pl.BlockSpec((1, D), lambda m: (0, 0)),
                  pl.BlockSpec((D, N), lambda m: (0, 0))],
        out_specs=pl.BlockSpec((tm, N), lambda m: (m, 0)),
        compiler_params=_mosaic(("parallel",)),
    )(x2d, g, w_t)


def attention(qkv_btd, cos_h, sin_h, n_heads):
    """qkv_btd: (B, T, 3D) projection (row layout [Q heads | K heads | V heads]).
    cos_h/sin_h: (H, d_k//2). Returns (B, T, D) attention output (heads packed on lanes)."""
    B, T, threeD = qkv_btd.shape
    D = threeD // 3
    d_k = D // n_heads
    dh = d_k // 2
    kern = functools.partial(_attention_kernel, n_heads=n_heads, d_k=d_k)
    return pl.pallas_call(
        kern,
        out_shape=jax.ShapeDtypeStruct((B, T, D), jnp.float32),
        grid=(B,),
        in_specs=[pl.BlockSpec((1, T, D), lambda b: (b, 0, 0)),   # Q block
                  pl.BlockSpec((1, T, D), lambda b: (b, 0, 1)),   # K block
                  pl.BlockSpec((1, T, D), lambda b: (b, 0, 2)),   # V block
                  pl.BlockSpec((n_heads, dh), lambda b: (0, 0)),
                  pl.BlockSpec((n_heads, dh), lambda b: (0, 0))],
        out_specs=pl.BlockSpec((1, T, D), lambda b: (b, 0, 0)),
        compiler_params=_mosaic(("parallel",)),
    )(qkv_btd, qkv_btd, qkv_btd, cos_h, sin_h)


def attn_out_ffn(x2d, attn2d, wo_t, g2, w1_t, w2_t, tm=256):
    """x + attn@Wo, then RMSNorm + SwiGLU-less FFN (W1/SiLU/W2) + residual. All in one kernel."""
    M, D = x2d.shape
    Dff = w1_t.shape[1]
    tm = min(tm, M)
    return pl.pallas_call(
        _attn_out_ffn_kernel,
        out_shape=jax.ShapeDtypeStruct((M, D), jnp.float32),
        grid=(pl.cdiv(M, tm),),
        in_specs=[pl.BlockSpec((tm, D), lambda m: (m, 0)),
                  pl.BlockSpec((tm, D), lambda m: (m, 0)),
                  pl.BlockSpec((D, D), lambda m: (0, 0)),
                  pl.BlockSpec((1, D), lambda m: (0, 0)),
                  pl.BlockSpec((D, Dff), lambda m: (0, 0)),
                  pl.BlockSpec((Dff, D), lambda m: (0, 0))],
        out_specs=pl.BlockSpec((tm, D), lambda m: (m, 0)),
        compiler_params=_mosaic(("parallel",)),
    )(x2d, attn2d, wo_t, g2, w1_t, w2_t)


def rms_lmhead(x2d, g, w_t, tm=256, tn=512):
    """Final RMSNorm fused into the tied lm_head, tiled over (rows, vocab)."""
    M, D = x2d.shape
    V = w_t.shape[1]
    tm = min(tm, M)
    tn = min(tn, V)
    return pl.pallas_call(
        _rms_matmul_kernel,
        out_shape=jax.ShapeDtypeStruct((M, V), jnp.float32),
        grid=(pl.cdiv(M, tm), pl.cdiv(V, tn)),
        in_specs=[pl.BlockSpec((tm, D), lambda m, n: (m, 0)),
                  pl.BlockSpec((1, D), lambda m, n: (0, 0)),
                  pl.BlockSpec((D, tn), lambda m, n: (0, n))],
        out_specs=pl.BlockSpec((tm, tn), lambda m, n: (m, n)),
        compiler_params=_mosaic(("parallel", "parallel")),
    )(x2d, g, w_t)


# ----------------------------- model ------------------------------------------

def rotary_tables(d_k, max_seq_len):
    quarter = d_k // 4
    ang = (1.0 / 10000.0) ** jnp.linspace(0.0, 1.0, quarter).astype(jnp.float32)
    ang = jnp.concatenate([ang, jnp.zeros((quarter,), jnp.float32)])   # (d_k//2,)
    t = jnp.arange(max_seq_len, dtype=jnp.float32)
    theta = t[:, None] * ang[None, :]
    return jnp.cos(theta), jnp.sin(theta)                              # (max_seq_len, d_k//2)


def init_params(key, cfg):
    """PyTorch-layout f32 parameters (Linear weights stored (out, in))."""
    d_model, n_layers = cfg["d_model"], cfg["n_layers"]
    d_ff, vocab = cfg["d_ff"], cfg["vocab_size"]
    keys = jax.random.split(key, 1 + 4 * n_layers)
    nrm = lambda k, shape: (0.02 * jax.random.normal(k, shape)).astype(jnp.float32)

    params = {
        "embed": nrm(keys[0], (vocab, d_model)),   # tied lm_head
        "layers": [],
        "norm_f": jnp.ones((d_model,), jnp.float32),
    }
    for l in range(n_layers):
        k0, k1, k2, k3 = keys[1 + 4 * l: 5 + 4 * l]
        params["layers"].append({
            "qkv": nrm(k0, (3 * d_model, d_model)),
            "w_o": nrm(k1, (d_model, d_model)),
            "w1": nrm(k2, (d_ff, d_model)),
            "w2": nrm(k3, (d_model, d_ff)),
            "norm1": jnp.ones((d_model,), jnp.float32),
            "norm2": jnp.ones((d_model,), jnp.float32),
        })
    return params


def prep_params(params, cfg):
    """One-time layout prep: transpose Linear weights to (K, N), cast to bf16, build rotary tables."""
    d_model, n_heads = cfg["d_model"], cfg["n_heads"]
    d_k = d_model // n_heads
    cos_t, sin_t = rotary_tables(d_k, cfg["max_seq_len"])
    prepped = {
        "embed": params["embed"],                                        # f32 for the gather
        "lm_head_t": jnp.transpose(params["embed"]).astype(MXU_DTYPE),   # (D, V) bf16
        "norm_f": params["norm_f"].reshape(1, d_model),
        "cos_h": cos_t[:n_heads],   # (H, d_k//2): head-index-as-position, per the PyTorch module
        "sin_h": sin_t[:n_heads],
        "layers": [],
    }
    for layer in params["layers"]:
        prepped["layers"].append({
            "qkv_t": jnp.transpose(layer["qkv"]).astype(MXU_DTYPE),      # (D, 3D)
            "w_o_t": jnp.transpose(layer["w_o"]).astype(MXU_DTYPE),      # (D, D)
            "w1_t": jnp.transpose(layer["w1"]).astype(MXU_DTYPE),        # (D, Dff)
            "w2_t": jnp.transpose(layer["w2"]).astype(MXU_DTYPE),        # (Dff, D)
            "norm1": layer["norm1"].reshape(1, d_model),
            "norm2": layer["norm2"].reshape(1, d_model),
        })
    return prepped


def minimal_llm_forward(prepped, tokens, *, cfg):
    d_model, n_heads = cfg["d_model"], cfg["n_heads"]
    B, T = tokens.shape

    # embedding lookup (gather) + scale -- plain-JAX glue
    x = prepped["embed"][tokens] * jnp.float32(math.sqrt(d_model))       # (B, T, D) f32
    x = x.reshape(B * T, d_model)

    for layer in prepped["layers"]:
        qkv = rms_qkv(x, layer["norm1"], layer["qkv_t"])                 # (B*T, 3D)
        attn = attention(qkv.reshape(B, T, 3 * d_model),
                         prepped["cos_h"], prepped["sin_h"], n_heads)    # (B, T, D)
        x = attn_out_ffn(x, attn.reshape(B * T, d_model),
                         layer["w_o_t"], layer["norm2"],
                         layer["w1_t"], layer["w2_t"])                   # (B*T, D), both residuals

    logits = rms_lmhead(x, prepped["norm_f"], prepped["lm_head_t"])      # (B*T, V)
    return logits.reshape(B, T, -1)


# ----------------------------- main --------------------------------------------

if __name__ == "__main__":
    # Module defaults (d_model=128, n_heads=4, n_layers=2, d_ff=512) at a small seq/vocab.
    cfg = dict(d_model=128, n_heads=4, n_layers=2, d_ff=512,
               max_seq_len=128, vocab_size=1024)
    B, T = 2, 64

    key = jax.random.PRNGKey(0)
    pkey, tkey = jax.random.split(key)
    params = init_params(pkey, cfg)
    prepped = prep_params(params, cfg)
    tokens = jax.random.randint(tkey, (B, T), 0, cfg["vocab_size"], dtype=jnp.int32)

    fwd = jax.jit(functools.partial(minimal_llm_forward, cfg=cfg))
    logits = fwd(prepped, tokens)
    logits = jax.block_until_ready(logits)

    assert logits.shape == (B, T, cfg["vocab_size"])
    assert bool(jnp.all(jnp.isfinite(logits)))
    print("KERNEL_OK")
</pallas_src>

<mosaic_0001>
module attributes {stable_mosaic.version = 11 : i64} {
  func.func @_attn_out_ffn_kernel(%arg0: i32, %arg1: memref<128x128xf32, #tpu.memory_space<vmem>>, %arg2: memref<128x128xf32, #tpu.memory_space<vmem>>, %arg3: memref<128x128xbf16, #tpu.memory_space<vmem>>, %arg4: memref<1x128xf32, #tpu.memory_space<vmem>>, %arg5: memref<128x512xbf16, #tpu.memory_space<vmem>>, %arg6: memref<512x128xbf16, #tpu.memory_space<vmem>>, %arg7: memref<128x128xf32, #tpu.memory_space<vmem>>) attributes {dimension_semantics = [#tpu.dimension_semantics<parallel>], iteration_bounds = array<i64: 1>, scalar_prefetch = 0 : i64, scratch_operands = 0 : i64, tpu.core_type = #tpu.core_type<tc>, window_params = [{transform_indices = @transform_0, window_bounds = array<i64: 128, 128>}, {transform_indices = @transform_1, window_bounds = array<i64: 128, 128>}, {pipeline_mode = #tpu.pipeline_mode<synchronous>, transform_indices = @transform_2, window_bounds = array<i64: 128, 128>}, {pipeline_mode = #tpu.pipeline_mode<synchronous>, transform_indices = @transform_3, window_bounds = array<i64: 1, 128>}, {pipeline_mode = #tpu.pipeline_mode<synchronous>, transform_indices = @transform_4, window_bounds = array<i64: 128, 512>}, {pipeline_mode = #tpu.pipeline_mode<synchronous>, transform_indices = @transform_5, window_bounds = array<i64: 512, 128>}, {transform_indices = @transform_6, window_bounds = array<i64: 128, 128>}]} {
    %c0 = arith.constant 0 : index
    %c0_0 = arith.constant 0 : index
    %0 = vector.load %arg1[%c0, %c0_0] : memref<128x128xf32, #tpu.memory_space<vmem>>, vector<128x128xf32>
    %c0_1 = arith.constant 0 : index
    %c0_2 = arith.constant 0 : index
    %1 = vector.load %arg2[%c0_1, %c0_2] : memref<128x128xf32, #tpu.memory_space<vmem>>, vector<128x128xf32>
    %2 = arith.truncf %1 : vector<128x128xf32> to vector<128x128xbf16>
    %c0_3 = arith.constant 0 : index
    %c0_4 = arith.constant 0 : index
    %3 = vector.load %arg3[%c0_3, %c0_4] : memref<128x128xbf16, #tpu.memory_space<vmem>>, vector<128x128xbf16>
    %cst = arith.constant dense<0.000000e+00> : vector<128x128xf32>
    %4 = tpu.matmul %2, %3, %cst {dimension_numbers = #tpu.dot_dimension_numbers<[1], [0], [0], [1], [0, 0, 1, 1], [], []>} : vector<128x128xbf16>, vector<128x128xbf16>, vector<128x128xf32> -> vector<128x128xf32>
    %5 = arith.addf %0, %4 : vector<128x128xf32>
    %6 = arith.mulf %5, %5 : vector<128x128xf32>
    %cst_5 = arith.constant dense<0.000000e+00> : vector<128xf32>
    %7 = vector.multi_reduction <add>, %6, %cst_5 [1] : vector<128x128xf32> to vector<128xf32>
    %8 = vector.shape_cast %7 : vector<128xf32> to vector<128x1xf32>
    %cst_6 = arith.constant 1.280000e+02 : f32
    %9 = vector.broadcast %cst_6 : f32 to vector<128x1xf32>
    %10 = arith.divf %8, %9 : vector<128x1xf32>
    %cst_7 = arith.constant 1.1920929E-7 : f32
    %11 = vector.broadcast %cst_7 : f32 to vector<128x1xf32>
    %12 = arith.addf %10, %11 : vector<128x1xf32>
    %13 = math.rsqrt %12 : vector<128x1xf32>
    %14 = vector.broadcast %13 : vector<128x1xf32> to vector<128x128xf32>
    %15 = arith.mulf %5, %14 : vector<128x128xf32>
    %c0_8 = arith.constant 0 : index
    %c0_9 = arith.constant 0 : index
    %16 = vector.load %arg4[%c0_8, %c0_9] : memref<1x128xf32, #tpu.memory_space<vmem>>, vector<1x128xf32>
    %17 = vector.broadcast %16 : vector<1x128xf32> to vector<128x128xf32>
    %18 = arith.mulf %15, %17 : vector<128x128xf32>
    %19 = arith.truncf %18 : vector<128x128xf32> to vector<128x128xbf16>
    %c0_10 = arith.constant 0 : index
    %c0_11 = arith.constant 0 : index
    %20 = vector.load %arg5[%c0_10, %c0_11] : memref<128x512xbf16, #tpu.memory_space<vmem>>, vector<128x512xbf16>
    %cst_12 = arith.constant dense<0.000000e+00> : vector<128x512xf32>
    %21 = tpu.matmul %19, %20, %cst_12 {dimension_numbers = #tpu.dot_dimension_numbers<[1], [0], [0], [1], [0, 0, 1, 1], [], []>} : vector<128x128xbf16>, vector<128x512xbf16>, vector<128x512xf32> -> vector<128x512xf32>
    %22 = arith.negf %21 : vector<128x512xf32>
    %23 = math.exp %22 : vector<128x512xf32>
    %cst_13 = arith.constant 1.000000e+00 : f32
    %24 = vector.broadcast %cst_13 : f32 to vector<128x512xf32>
    %25 = arith.addf %24, %23 : vector<128x512xf32>
    %26 = arith.divf %24, %25 : vector<128x512xf32>
    %27 = arith.mulf %21, %26 : vector<128x512xf32>
    %28 = arith.truncf %27 : vector<128x512xf32> to vector<128x512xbf16>
    %c0_14 = arith.constant 0 : index
    %c0_15 = arith.constant 0 : index
    %29 = vector.load %arg6[%c0_14, %c0_15] : memref<512x128xbf16, #tpu.memory_space<vmem>>, vector<512x128xbf16>
    %cst_16 = arith.constant dense<0.000000e+00> : vector<128x128xf32>
    %30 = tpu.matmul %28, %29, %cst_16 {dimension_numbers = #tpu.dot_dimension_numbers<[1], [0], [0], [1], [0, 0, 1, 1], [], []>} : vector<128x512xbf16>, vector<512x128xbf16>, vector<128x128xf32> -> vector<128x128xf32>
    %31 = arith.addf %5, %30 : vector<128x128xf32>
    %c0_17 = arith.constant 0 : index
    %c0_18 = arith.constant 0 : index
    %32 = vector.load %arg7[%c0_17, %c0_18] : memref<128x128xf32, #tpu.memory_space<vmem>>, vector<128x128xf32>
    tpu.vector_store %arg7[%c0_17, %c0_18], %31 {strides = array<i32>} : memref<128x128xf32, #tpu.memory_space<vmem>>, vector<128x128xf32>,
    return
  }
  func.func @transform_0(%arg0: i32) -> (i32, i32) {
    %c0_i32 = arith.constant 0 : i32
    %c0_i32_0 = arith.constant 0 : i32
    return %arg0, %c0_i32 : i32, i32
  }
  func.func @transform_1(%arg0: i32) -> (i32, i32) {
    %c0_i32 = arith.constant 0 : i32
    %c0_i32_0 = arith.constant 0 : i32
    return %arg0, %c0_i32 : i32, i32
  }
  func.func @transform_2(%arg0: i32) -> (i32, i32) {
    %c0_i32 = arith.constant 0 : i32
    %c0_i32_0 = arith.constant 0 : i32
    %c0_i32_1 = arith.constant 0 : i32
    return %c0_i32, %c0_i32_0 : i32, i32
  }
  func.func @transform_3(%arg0: i32) -> (i32, i32) {
    %c0_i32 = arith.constant 0 : i32
    %c0_i32_0 = arith.constant 0 : i32
    %c0_i32_1 = arith.constant 0 : i32
    return %c0_i32, %c0_i32_0 : i32, i32
  }
  func.func @transform_4(%arg0: i32) -> (i32, i32) {
    %c0_i32 = arith.constant 0 : i32
    %c0_i32_0 = arith.constant 0 : i32
    %c0_i32_1 = arith.constant 0 : i32
    return %c0_i32, %c0_i32_0 : i32, i32
  }
  func.func @transform_5(%arg0: i32) -> (i32, i32) {
    %c0_i32 = arith.constant 0 : i32
    %c0_i32_0 = arith.constant 0 : i32
    %c0_i32_1 = arith.constant 0 : i32
    return %c0_i32, %c0_i32_0 : i32, i32
  }
  func.func @transform_6(%arg0: i32) -> (i32, i32) {
    %c0_i32 = arith.constant 0 : i32
    %c0_i32_0 = arith.constant 0 : i32
    return %arg0, %c0_i32 : i32, i32
  }
}

module attributes {stable_mosaic.version = 11 : i64} {
  func.func @_rms_matmul_kernel(%arg0: i32, %arg1: memref<128x128xf32, #tpu.memory_space<vmem>>, %arg2: memref<1x128xf32, #tpu.memory_space<vmem>>, %arg3: memref<128x384xbf16, #tpu.memory_space<vmem>>, %arg4: memref<128x384xf32, #tpu.memory_space<vmem>>) attributes {dimension_semantics = [#tpu.dimension_semantics<parallel>], iteration_bounds = array<i64: 1>, scalar_prefetch = 0 : i64, scratch_operands = 0 : i64, tpu.core_type = #tpu.core_type<tc>, window_params = [{transform_indices = @transform_0, window_bounds = array<i64: 128, 128>}, {pipeline_mode = #tpu.pipeline_mode<synchronous>, transform_indices = @transform_1, window_bounds = array<i64: 1, 128>}, {pipeline_mode = #tpu.pipeline_mode<synchronous>, transform_indices = @transform_2, window_bounds = array<i64: 128, 384>}, {transform_indices = @transform_3, window_bounds = array<i64: 128, 384>}]} {
    %c0 = arith.constant 0 : index
    %c0_0 = arith.constant 0 : index
    %0 = vector.load %arg1[%c0, %c0_0] : memref<128x128xf32, #tpu.memory_space<vmem>>, vector<128x128xf32>
    %1 = arith.mulf %0, %0 : vector<128x128xf32>
    %cst = arith.constant dense<0.000000e+00> : vector<128xf32>
    %2 = vector.multi_reduction <add>, %1, %cst [1] : vector<128x128xf32> to vector<128xf32>
    %3 = vector.shape_cast %2 : vector<128xf32> to vector<128x1xf32>
    %cst_1 = arith.constant 1.280000e+02 : f32
    %4 = vector.broadcast %cst_1 : f32 to vector<128x1xf32>
    %5 = arith.divf %3, %4 : vector<128x1xf32>
    %cst_2 = arith.constant 1.1920929E-7 : f32
    %6 = vector.broadcast %cst_2 : f32 to vector<128x1xf32>
    %7 = arith.addf %5, %6 : vector<128x1xf32>
    %8 = math.rsqrt %7 : vector<128x1xf32>
    %9 = vector.broadcast %8 : vector<128x1xf32> to vector<128x128xf32>
    %10 = arith.mulf %0, %9 : vector<128x128xf32>
    %c0_3 = arith.constant 0 : index
    %c0_4 = arith.constant 0 : index
    %11 = vector.load %arg2[%c0_3, %c0_4] : memref<1x128xf32, #tpu.memory_space<vmem>>, vector<1x128xf32>
    %12 = vector.broadcast %11 : vector<1x128xf32> to vector<128x128xf32>
    %13 = arith.mulf %10, %12 : vector<128x128xf32>
    %14 = arith.truncf %13 : vector<128x128xf32> to vector<128x128xbf16>
    %c0_5 = arith.constant 0 : index
    %c0_6 = arith.constant 0 : index
    %15 = vector.load %arg3[%c0_5, %c0_6] : memref<128x384xbf16, #tpu.memory_space<vmem>>, vector<128x384xbf16>
    %cst_7 = arith.constant dense<0.000000e+00> : vector<128x384xf32>
    %16 = tpu.matmul %14, %15, %cst_7 {dimension_numbers = #tpu.dot_dimension_numbers<[1], [0], [0], [1], [0, 0, 1, 1], [], []>} : vector<128x128xbf16>, vector<128x384xbf16>, vector<128x384xf32> -> vector<128x384xf32>
    %c0_8 = arith.constant 0 : index
    %c0_9 = arith.constant 0 : index
    %17 = vector.load %arg4[%c0_8, %c0_9] : memref<128x384xf32, #tpu.memory_space<vmem>>, vector<128x384xf32>
    tpu.vector_store %arg4[%c0_8, %c0_9], %16 {strides = array<i32>} : memref<128x384xf32, #tpu.memory_space<vmem>>, vector<128x384xf32>,
    return
  }
  func.func @transform_0(%arg0: i32) -> (i32, i32) {
    %c0_i32 = arith.constant 0 : i32
    %c0_i32_0 = arith.constant 0 : i32
    return %arg0, %c0_i32 : i32, i32
  }
  func.func @transform_1(%arg0: i32) -> (i32, i32) {
    %c0_i32 = arith.constant 0 : i32
    %c0_i32_0 = arith.constant 0 : i32
    %c0_i32_1 = arith.constant 0 : i32
    return %c0_i32, %c0_i32_0 : i32, i32
  }
  func.func @transform_2(%arg0: i32) -> (i32, i32) {
    %c0_i32 = arith.constant 0 : i32
    %c0_i32_0 = arith.constant 0 : i32
    %c0_i32_1 = arith.constant 0 : i32
    return %c0_i32, %c0_i32_0 : i32, i32
  }
  func.func @transform_3(%arg0: i32) -> (i32, i32) {
    %c0_i32 = arith.constant 0 : i32
    %c0_i32_0 = arith.constant 0 : i32
    return %arg0, %c0_i32 : i32, i32
  }
}

module attributes {stable_mosaic.version = 11 : i64} {
  func.func @_attention_kernel(%arg0: i32, %arg1: memref<1x64x128xf32, #tpu.memory_space<vmem>>, %arg2: memref<1x64x128xf32, #tpu.memory_space<vmem>>, %arg3: memref<1x64x128xf32, #tpu.memory_space<vmem>>, %arg4: memref<4x16xf32, #tpu.memory_space<vmem>>, %arg5: memref<4x16xf32, #tpu.memory_space<vmem>>, %arg6: memref<1x64x128xf32, #tpu.memory_space<vmem>>) attributes {dimension_semantics = [#tpu.dimension_semantics<parallel>], iteration_bounds = array<i64: 2>, scalar_prefetch = 0 : i64, scratch_operands = 0 : i64, tpu.core_type = #tpu.core_type<tc>, window_params = [{transform_indices = @transform_0, window_bounds = array<i64: 1, 64, 128>}, {transform_indices = @transform_1, window_bounds = array<i64: 1, 64, 128>}, {transform_indices = @transform_2, window_bounds = array<i64: 1, 64, 128>}, {pipeline_mode = #tpu.pipeline_mode<synchronous>, transform_indices = @transform_3, window_bounds = array<i64: 4, 16>}, {pipeline_mode = #tpu.pipeline_mode<synchronous>, transform_indices = @transform_4, window_bounds = array<i64: 4, 16>}, {transform_indices = @transform_5, window_bounds = array<i64: 1, 64, 128>}]} {
    %c0 = arith.constant 0 : index
    %c0_0 = arith.constant 0 : index
    %c0_1 = arith.constant 0 : index
    %0 = vector.load %arg1[%c0, %c0_0, %c0_1] : memref<1x64x128xf32, #tpu.memory_space<vmem>>, vector<1x64x128xf32>
    %1 = vector.shape_cast %0 : vector<1x64x128xf32> to vector<64x128xf32>
    %c0_2 = arith.constant 0 : index
    %c0_3 = arith.constant 0 : index
    %c0_4 = arith.constant 0 : index
    %2 = vector.load %arg2[%c0_2, %c0_3, %c0_4] : memref<1x64x128xf32, #tpu.memory_space<vmem>>, vector<1x64x128xf32>
    %3 = vector.shape_cast %2 : vector<1x64x128xf32> to vector<64x128xf32>
    %c0_5 = arith.constant 0 : index
    %c0_6 = arith.constant 0 : index
    %c0_7 = arith.constant 0 : index
    %4 = vector.load %arg3[%c0_5, %c0_6, %c0_7] : memref<1x64x128xf32, #tpu.memory_space<vmem>>, vector<1x64x128xf32>
    %5 = vector.shape_cast %4 : vector<1x64x128xf32> to vector<64x128xf32>
    %6 = tpu.iota {dimensions = array<i32: 0>} : vector<64x64xi32>
    %7 = tpu.iota {dimensions = array<i32: 1>} : vector<64x64xi32>
    %8 = arith.cmpi sle, %7, %6 : vector<64x64xi32>
    %9 = vector.extract_strided_slice %1 {offsets = [0, 0], sizes = [64, 32], strides = [1, 1]} : vector<64x128xf32> to vector<64x32xf32>
    %10 = vector.extract_strided_slice %3 {offsets = [0, 0], sizes = [64, 32], strides = [1, 1]} : vector<64x128xf32> to vector<64x32xf32>
    %11 = vector.extract_strided_slice %5 {offsets = [0, 0], sizes = [64, 32], strides = [1, 1]} : vector<64x128xf32> to vector<64x32xf32>
    %c0_8 = arith.constant 0 : index
    %c0_9 = arith.constant 0 : index
    %12 = vector.load %arg4[%c0_8, %c0_9] : memref<4x16xf32, #tpu.memory_space<vmem>>, vector<1x16xf32>
    %c0_10 = arith.constant 0 : index
    %c0_11 = arith.constant 0 : index
    %13 = vector.load %arg5[%c0_10, %c0_11] : memref<4x16xf32, #tpu.memory_space<vmem>>, vector<1x16xf32>
    %14 = vector.extract_strided_slice %9 {offsets = [0, 0], sizes = [64, 16], strides = [1, 1]} : vector<64x32xf32> to vector<64x16xf32>
    %15 = vector.extract_strided_slice %9 {offsets = [0, 16], sizes = [64, 16], strides = [1, 1]} : vector<64x32xf32> to vector<64x16xf32>
    %16 = vector.extract_strided_slice %10 {offsets = [0, 0], sizes = [64, 16], strides = [1, 1]} : vector<64x32xf32> to vector<64x16xf32>
    %17 = vector.extract_strided_slice %10 {offsets = [0, 16], sizes = [64, 16], strides = [1, 1]} : vector<64x32xf32> to vector<64x16xf32>
    %18 = vector.broadcast %12 : vector<1x16xf32> to vector<64x16xf32>
    %19 = arith.mulf %14, %18 : vector<64x16xf32>
    %20 = vector.broadcast %13 : vector<1x16xf32> to vector<64x16xf32>
    %21 = arith.mulf %15, %20 : vector<64x16xf32>
    %22 = arith.addf %19, %21 : vector<64x16xf32>
    %23 = vector.broadcast %12 : vector<1x16xf32> to vector<64x16xf32>
    %24 = arith.mulf %15, %23 : vector<64x16xf32>
    %25 = vector.broadcast %13 : vector<1x16xf32> to vector<64x16xf32>
    %26 = arith.mulf %14, %25 : vector<64x16xf32>
    %27 = arith.subf %24, %26 : vector<64x16xf32>
    %28 = vector.broadcast %12 : vector<1x16xf32> to vector<64x16xf32>
    %29 = arith.mulf %16, %28 : vector<64x16xf32>
    %30 = vector.broadcast %13 : vector<1x16xf32> to vector<64x16xf32>
    %31 = arith.mulf %17, %30 : vector<64x16xf32>
    %32 = arith.addf %29, %31 : vector<64x16xf32>
    %33 = vector.broadcast %12 : vector<1x16xf32> to vector<64x16xf32>
    %34 = arith.mulf %17, %33 : vector<64x16xf32>
    %35 = vector.broadcast %13 : vector<1x16xf32> to vector<64x16xf32>
    %36 = arith.mulf %16, %35 : vector<64x16xf32>
    %37 = arith.subf %34, %36 : vector<64x16xf32>
    %38 = tpu.transpose %32, [1, 0] : vector<64x16xf32> -> vector<16x64xf32>
    %cst = arith.constant dense<0.000000e+00> : vector<64x64xf32>
    %39 = tpu.matmul %22, %38, %cst {dimension_numbers = #tpu.dot_dimension_numbers<[1], [0], [0], [1], [0, 0, 1, 1], [], []>} : vector<64x16xf32>, vector<16x64xf32>, vector<64x64xf32> -> vector<64x64xf32>
    %40 = tpu.transpose %37, [1, 0] : vector<64x16xf32> -> vector<16x64xf32>
    %cst_12 = arith.constant dense<0.000000e+00> : vector<64x64xf32>
    %41 = tpu.matmul %27, %40, %cst_12 {dimension_numbers = #tpu.dot_dimension_numbers<[1], [0], [0], [1], [0, 0, 1, 1], [], []>} : vector<64x16xf32>, vector<16x64xf32>, vector<64x64xf32> -> vector<64x64xf32>
    %42 = arith.addf %39, %41 : vector<64x64xf32>
    %cst_13 = arith.constant 0.176776692 : f32
    %43 = vector.broadcast %cst_13 : f32 to vector<64x64xf32>
    %44 = arith.mulf %42, %43 : vector<64x64xf32>
    %cst_14 = arith.constant -1.000000e+30 : f32
    %45 = vector.broadcast %cst_14 : f32 to vector<64x64xf32>
    %46 = arith.select %8, %44, %45 : vector<64x64xi1>, vector<64x64xf32>
    %cst_15 = arith.constant dense<0xFF800000> : vector<64xf32>
    %47 = vector.multi_reduction <maximumf>, %46, %cst_15 [1] : vector<64x64xf32> to vector<64xf32>
    %48 = vector.shape_cast %47 : vector<64xf32> to vector<64x1xf32>
    %49 = vector.broadcast %48 : vector<64x1xf32> to vector<64x64xf32>
    %50 = arith.subf %46, %49 : vector<64x64xf32>
    %51 = math.exp %50 : vector<64x64xf32>
    %cst_16 = arith.constant dense<0.000000e+00> : vector<64xf32>
    %52 = vector.multi_reduction <add>, %51, %cst_16 [1] : vector<64x64xf32> to vector<64xf32>
    %53 = vector.shape_cast %52 : vector<64xf32> to vector<64x1xf32>
    %54 = tpu.reciprocal %53 {approx = true} : vector<64x1xf32> -> vector<64x1xf32>
    %55 = vector.broadcast %54 : vector<64x1xf32> to vector<64x64xf32>
    %56 = arith.mulf %51, %55 : vector<64x64xf32>
    %cst_17 = arith.constant dense<0.000000e+00> : vector<64x32xf32>
    %57 = tpu.matmul %56, %11, %cst_17 {dimension_numbers = #tpu.dot_dimension_numbers<[1], [0], [0], [1], [0, 0, 1, 1], [], []>} : vector<64x64xf32>, vector<64x32xf32>, vector<64x32xf32> -> vector<64x32xf32>
    %58 = vector.extract_strided_slice %1 {offsets = [0, 32], sizes = [64, 32], strides = [1, 1]} : vector<64x128xf32> to vector<64x32xf32>
    %59 = vector.extract_strided_slice %3 {offsets = [0, 32], sizes = [64, 32], strides = [1, 1]} : vector<64x128xf32> to vector<64x32xf32>
    %60 = vector.extract_strided_slice %5 {offsets = [0, 32], sizes = [64, 32], strides = [1, 1]} : vector<64x128xf32> to vector<64x32xf32>
    %c1 = arith.constant 1 : index
    %c0_18 = arith.constant 0 : index
    %61 = vector.load %arg4[%c1, %c0_18] : memref<4x16xf32, #tpu.memory_space<vmem>>, vector<1x16xf32>
    %c1_19 = arith.constant 1 : index
    %c0_20 = arith.constant 0 : index
    %62 = vector.load %arg5[%c1_19, %c0_20] : memref<4x16xf32, #tpu.memory_space<vmem>>, vector<1x16xf32>
    %63 = vector.extract_strided_slice %58 {offsets = [0, 0], sizes = [64, 16], strides = [1, 1]} : vector<64x32xf32> to vector<64x16xf32>
    %64 = vector.extract_strided_slice %58 {offsets = [0, 16], sizes = [64, 16], strides = [1, 1]} : vector<64x32xf32> to vector<64x16xf32>
    %65 = vector.extract_strided_slice %59 {offsets = [0, 0], sizes = [64, 16], strides = [1, 1]} : vector<64x32xf32> to vector<64x16xf32>
    %66 = vector.extract_strided_slice %59 {offsets = [0, 16], sizes = [64, 16], strides = [1, 1]} : vector<64x32xf32> to vector<64x16xf32>
    %67 = vector.broadcast %61 : vector<1x16xf32> to vector<64x16xf32>
    %68 = arith.mulf %63, %67 : vector<64x16xf32>
    %69 = vector.broadcast %62 : vector<1x16xf32> to vector<64x16xf32>
    %70 = arith.mulf %64, %69 : vector<64x16xf32>
    %71 = arith.addf %68, %70 : vector<64x16xf32>
    %72 = vector.broadcast %61 : vector<1x16xf32> to vector<64x16xf32>
    %73 = arith.mulf %64, %72 : vector<64x16xf32>
    %74 = vector.broadcast %62 : vector<1x16xf32> to vector<64x16xf32>
    %75 = arith.mulf %63, %74 : vector<64x16xf32>
    %76 = arith.subf %73, %75 : vector<64x16xf32>
    %77 = vector.broadcast %61 : vector<1x16xf32> to vector<64x16xf32>
    %78 = arith.mulf %65, %77 : vector<64x16xf32>
    %79 = vector.broadcast %62 : vector<1x16xf32> to vector<64x16xf32>
    %80 = arith.mulf %66, %79 : vector<64x16xf32>
    %81 = arith.addf %78, %80 : vector<64x16xf32>
    %82 = vector.broadcast %61 : vector<1x16xf32> to vector<64x16xf32>
    %83 = arith.mulf %66, %82 : vector<64x16xf32>
    %84 = vector.broadcast %62 : vector<1x16xf32> to vector<64x16xf32>
    %85 = arith.mulf %65, %84 : vector<64x16xf32>
    %86 = arith.subf %83, %85 : vector<64x16xf32>
    %87 = tpu.transpose %81, [1, 0] : vector<64x16xf32> -> vector<16x64xf32>
    %cst_21 = arith.constant dense<0.000000e+00> : vector<64x64xf32>
    %88 = tpu.matmul %71, %87, %cst_21 {dimension_numbers = #tpu.dot_dimension_numbers<[1], [0], [0], [1], [0, 0, 1, 1], [], []>} : vector<64x16xf32>, vector<16x64xf32>, vector<64x64xf32> -> vector<64x64xf32>
    %89 = tpu.transpose %86, [1, 0] : vector<64x16xf32> -> vector<16x64xf32>
    %cst_22 = arith.constant dense<0.000000e+00> : vector<64x64xf32>
    %90 = tpu.matmul %76, %89, %cst_22 {dimension_numbers = #tpu.dot_dimension_numbers<[1], [0], [0], [1], [0, 0, 1, 1], [], []>} : vector<64x16xf32>, vector<16x64xf32>, vector<64x64xf32> -> vector<64x64xf32>
    %91 = arith.addf %88, %90 : vector<64x64xf32>
    %cst_23 = arith.constant 0.176776692 : f32
    %92 = vector.broadcast %cst_23 : f32 to vector<64x64xf32>
    %93 = arith.mulf %91, %92 : vector<64x64xf32>
    %cst_24 = arith.constant -1.000000e+30 : f32
    %94 = vector.broadcast %cst_24 : f32 to vector<64x64xf32>
    %95 = arith.select %8, %93, %94 : vector<64x64xi1>, vector<64x64xf32>
    %cst_25 = arith.constant dense<0xFF800000> : vector<64xf32>
    %96 = vector.multi_reduction <maximumf>, %95, %cst_25 [1] : vector<64x64xf32> to vector<64xf32>
    %97 = vector.shape_cast %96 : vector<64xf32> to vector<64x1xf32>
    %98 = vector.broadcast %97 : vector<64x1xf32> to vector<64x64xf32>
    %99 = arith.subf %95, %98 : vector<64x64xf32>
    %100 = math.exp %99 : vector<64x64xf32>
    %cst_26 = arith.constant dense<0.000000e+00> : vector<64xf32>
    %101 = vector.multi_reduction <add>, %100, %cst_26 [1] : vector<64x64xf32> to vector<64xf32>
    %102 = vector.shape_cast %101 : vector<64xf32> to vector<64x1xf32>
    %103 = tpu.reciprocal %102 {approx = true} : vector<64x1xf32> -> vector<64x1xf32>
    %104 = vector.broadcast %103 : vector<64x1xf32> to vector<64x64xf32>
    %105 = arith.mulf %100, %104 : vector<64x64xf32>
    %cst_27 = arith.constant dense<0.000000e+00> : vector<64x32xf32>
    %106 = tpu.matmul %105, %60, %cst_27 {dimension_numbers = #tpu.dot_dimension_numbers<[1], [0], [0], [1], [0, 0, 1, 1], [], []>} : vector<64x64xf32>, vector<64x32xf32>, vector<64x32xf32> -> vector<64x32xf32>
    %107 = vector.extract_strided_slice %1 {offsets = [0, 64], sizes = [64, 32], strides = [1, 1]} : vector<64x128xf32> to vector<64x32xf32>
    %108 = vector.extract_strided_slice %3 {offsets = [0, 64], sizes = [64, 32], strides = [1, 1]} : vector<64x128xf32> to vector<64x32xf32>
    %109 = vector.extract_strided_slice %5 {offsets = [0, 64], sizes = [64, 32], strides = [1, 1]} : vector<64x128xf32> to vector<64x32xf32>
    %c2 = arith.constant 2 : index
    %c0_28 = arith.constant 0 : index
    %110 = vector.load %arg4[%c2, %c0_28] : memref<4x16xf32, #tpu.memory_space<vmem>>, vector<1x16xf32>
    %c2_29 = arith.constant 2 : index
    %c0_30 = arith.constant 0 : index
    %111 = vector.load %arg5[%c2_29, %c0_30] : memref<4x16xf32, #tpu.memory_space<vmem>>, vector<1x16xf32>
    %112 = vector.extract_strided_slice %107 {offsets = [0, 0], sizes = [64, 16], strides = [1, 1]} : vector<64x32xf32> to vector<64x16xf32>
    %113 = vector.extract_strided_slice %107 {offsets = [0, 16], sizes = [64, 16], strides = [1, 1]} : vector<64x32xf32> to vector<64x16xf32>
    %114 = vector.extract_strided_slice %108 {offsets = [0, 0], sizes = [64, 16], strides = [1, 1]} : vector<64x32xf32> to vector<64x16xf32>
    %115 = vector.extract_strided_slice %108 {offsets = [0, 16], sizes = [64, 16], strides = [1, 1]} : vector<64x32xf32> to vector<64x16xf32>
    %116 = vector.broadcast %110 : vector<1x16xf32> to vector<64x16xf32>
    %117 = arith.mulf %112, %116 : vector<64x16xf32>
    %118 = vector.broadcast %111 : vector<1x16xf32> to vector<64x16xf32>
    %119 = arith.mulf %113, %118 : vector<64x16xf32>
    %120 = arith.addf %117, %119 : vector<64x16xf32>
    %121 = vector.broadcast %110 : vector<1x16xf32> to vector<64x16xf32>
    %122 = arith.mulf %113, %121 : vector<64x16xf32>
    %123 = vector.broadcast %111 : vector<1x16xf32> to vector<64x16xf32>
    %124 = arith.mulf %112, %123 : vector<64x16xf32>
    %125 = arith.subf %122, %124 : vector<64x16xf32>
    %126 = vector.broadcast %110 : vector<1x16xf32> to vector<64x16xf32>
    %127 = arith.mulf %114, %126 : vector<64x16xf32>
    %128 = vector.broadcast %111 : vector<1x16xf32> to vector<64x16xf32>
    %129 = arith.mulf %115, %128 : vector<64x16xf32>
    %130 = arith.addf %127, %129 : vector<64x16xf32>
    %131 = vector.broadcast %110 : vector<1x16xf32> to vector<64x16xf32>
    %132 = arith.mulf %115, %131 : vector<64x16xf32>
    %133 = vector.broadcast %111 : vector<1x16xf32> to vector<64x16xf32>
    %134 = arith.mulf %114, %133 : vector<64x16xf32>
    %135 = arith.subf %132, %134 : vector<64x16xf32>
    %136 = tpu.transpose %130, [1, 0] : vector<64x16xf32> -> vector<16x64xf32>
    %cst_31 = arith.constant dense<0.000000e+00> : vector<64x64xf32>
    %137 = tpu.matmul %120, %136, %cst_31 {dimension_numbers = #tpu.dot_dimension_numbers<[1], [0], [0], [1], [0, 0, 1, 1], [], []>} : vector<64x16xf32>, vector<16x64xf32>, vector<64x64xf32> -> vector<64x64xf32>
    %138 = tpu.transpose %135, [1, 0] : vector<64x16xf32> -> vector<16x64xf32>
    %cst_32 = arith.constant dense<0.000000e+00> : vector<64x64xf32>
    %139 = tpu.matmul %125, %138, %cst_32 {dimension_numbers = #tpu.dot_dimension_numbers<[1], [0], [0], [1], [0, 0, 1, 1], [], []>} : vector<64x16xf32>, vector<16x64xf32>, vector<64x64xf32> -> vector<64x64xf32>
    %140 = arith.addf %137, %139 : vector<64x64xf32>
    %cst_33 = arith.constant 0.176776692 : f32
    %141 = vector.broadcast %cst_33 : f32 to vector<64x64xf32>
    %142 = arith.mulf %140, %141 : vector<64x64xf32>
    %cst_34 = arith.constant -1.000000e+30 : f32
    %143 = vector.broadcast %cst_34 : f32 to vector<64x64xf32>
    %144 = arith.select %8, %142, %143 : vector<64x64xi1>, vector<64x64xf32>
    %cst_35 = arith.constant dense<0xFF800000> : vector<64xf32>
    %145 = vector.multi_reduction <maximumf>, %144, %cst_35 [1] : vector<64x64xf32> to vector<64xf32>
    %146 = vector.shape_cast %145 : vector<64xf32> to vector<64x1xf32>
    %147 = vector.broadcast %146 : vector<64x1xf32> to vector<64x64xf32>
    %148 = arith.subf %144, %147 : vector<64x64xf32>
    %149 = math.exp %148 : vector<64x64xf32>
    %cst_36 = arith.constant dense<0.000000e+00> : vector<64xf32>
    %150 = vector.multi_reduction <add>, %149, %cst_36 [1] : vector<64x64xf32> to vector<64xf32>
    %151 = vector.shape_cast %150 : vector<64xf32> to vector<64x1xf32>
    %152 = tpu.reciprocal %151 {approx = true} : vector<64x1xf32> -> vector<64x1xf32>
    %153 = vector.broadcast %152 : vector<64x1xf32> to vector<64x64xf32>
    %154 = arith.mulf %149, %153 : vector<64x64xf32>
    %cst_37 = arith.constant dense<0.000000e+00> : vector<64x32xf32>
    %155 = tpu.matmul %154, %109, %cst_37 {dimension_numbers = #tpu.dot_dimension_numbers<[1], [0], [0], [1], [0, 0, 1, 1], [], []>} : vector<64x64xf32>, vector<64x32xf32>, vector<64x32xf32> -> vector<64x32xf32>
    %156 = vector.extract_strided_slice %1 {offsets = [0, 96], sizes = [64, 32], strides = [1, 1]} : vector<64x128xf32> to vector<64x32xf32>
    %157 = vector.extract_strided_slice %3 {offsets = [0, 96], sizes = [64, 32], strides = [1, 1]} : vector<64x128xf32> to vector<64x32xf32>
    %158 = vector.extract_strided_slice %5 {offsets = [0, 96], sizes = [64, 32], strides = [1, 1]} : vector<64x128xf32> to vector<64x32xf32>
    %c3 = arith.constant 3 : index
    %c0_38 = arith.constant 0 : index
    %159 = vector.load %arg4[%c3, %c0_38] : memref<4x16xf32, #tpu.memory_space<vmem>>, vector<1x16xf32>
    %c3_39 = arith.constant 3 : index
    %c0_40 = arith.constant 0 : index
    %160 = vector.load %arg5[%c3_39, %c0_40] : memref<4x16xf32, #tpu.memory_space<vmem>>, vector<1x16xf32>
    %161 = vector.extract_strided_slice %156 {offsets = [0, 0], sizes = [64, 16], strides = [1, 1]} : vector<64x32xf32> to vector<64x16xf32>
    %162 = vector.extract_strided_slice %156 {offsets = [0, 16], sizes = [64, 16], strides = [1, 1]} : vector<64x32xf32> to vector<64x16xf32>
    %163 = vector.extract_strided_slice %157 {offsets = [0, 0], sizes = [64, 16], strides = [1, 1]} : vector<64x32xf32> to vector<64x16xf32>
    %164 = vector.extract_strided_slice %157 {offsets = [0, 16], sizes = [64, 16], strides = [1, 1]} : vector<64x32xf32> to vector<64x16xf32>
    %165 = vector.broadcast %159 : vector<1x16xf32> to vector<64x16xf32>
    %166 = arith.mulf %161, %165 : vector<64x16xf32>
    %167 = vector.broadcast %160 : vector<1x16xf32> to vector<64x16xf32>
    %168 = arith.mulf %162, %167 : vector<64x16xf32>
    %169 = arith.addf %166, %168 : vector<64x16xf32>
    %170 = vector.broadcast %159 : vector<1x16xf32> to vector<64x16xf32>
    %171 = arith.mulf %162, %170 : vector<64x16xf32>
    %172 = vector.broadcast %160 : vector<1x16xf32> to vector<64x16xf32>
    %173 = arith.mulf %161, %172 : vector<64x16xf32>
    %174 = arith.subf %171, %173 : vector<64x16xf32>
    %175 = vector.broadcast %159 : vector<1x16xf32> to vector<64x16xf32>
    %176 = arith.mulf %163, %175 : vector<64x16xf32>
    %177 = vector.broadcast %160 : vector<1x16xf32> to vector<64x16xf32>
    %178 = arith.mulf %164, %177 : vector<64x16xf32>
    %179 = arith.addf %176, %178 : vector<64x16xf32>
    %180 = vector.broadcast %159 : vector<1x16xf32> to vector<64x16xf32>
    %181 = arith.mulf %164, %180 : vector<64x16xf32>
    %182 = vector.broadcast %160 : vector<1x16xf32> to vector<64x16xf32>
    %183 = arith.mulf %163, %182 : vector<64x16xf32>
    %184 = arith.subf %181, %183 : vector<64x16xf32>
    %185 = tpu.transpose %179, [1, 0] : vector<64x16xf32> -> vector<16x64xf32>
    %cst_41 = arith.constant dense<0.000000e+00> : vector<64x64xf32>
    %186 = tpu.matmul %169, %185, %cst_41 {dimension_numbers = #tpu.dot_dimension_numbers<[1], [0], [0], [1], [0, 0, 1, 1], [], []>} : vector<64x16xf32>, vector<16x64xf32>, vector<64x64xf32> -> vector<64x64xf32>
    %187 = tpu.transpose %184, [1, 0] : vector<64x16xf32> -> vector<16x64xf32>
    %cst_42 = arith.constant dense<0.000000e+00> : vector<64x64xf32>
    %188 = tpu.matmul %174, %187, %cst_42 {dimension_numbers = #tpu.dot_dimension_numbers<[1], [0], [0], [1], [0, 0, 1, 1], [], []>} : vector<64x16xf32>, vector<16x64xf32>, vector<64x64xf32> -> vector<64x64xf32>
    %189 = arith.addf %186, %188 : vector<64x64xf32>
    %cst_43 = arith.constant 0.176776692 : f32
    %190 = vector.broadcast %cst_43 : f32 to vector<64x64xf32>
    %191 = arith.mulf %189, %190 : vector<64x64xf32>
    %cst_44 = arith.constant -1.000000e+30 : f32
    %192 = vector.broadcast %cst_44 : f32 to vector<64x64xf32>
    %193 = arith.select %8, %191, %192 : vector<64x64xi1>, vector<64x64xf32>
    %cst_45 = arith.constant dense<0xFF800000> : vector<64xf32>
    %194 = vector.multi_reduction <maximumf>, %193, %cst_45 [1] : vector<64x64xf32> to vector<64xf32>
    %195 = vector.shape_cast %194 : vector<64xf32> to vector<64x1xf32>
    %196 = vector.broadcast %195 : vector<64x1xf32> to vector<64x64xf32>
    %197 = arith.subf %193, %196 : vector<64x64xf32>
    %198 = math.exp %197 : vector<64x64xf32>
    %cst_46 = arith.constant dense<0.000000e+00> : vector<64xf32>
    %199 = vector.multi_reduction <add>, %198, %cst_46 [1] : vector<64x64xf32> to vector<64xf32>
    %200 = vector.shape_cast %199 : vector<64xf32> to vector<64x1xf32>
    %201 = tpu.reciprocal %200 {approx = true} : vector<64x1xf32> -> vector<64x1xf32>
    %202 = vector.broadcast %201 : vector<64x1xf32> to vector<64x64xf32>
    %203 = arith.mulf %198, %202 : vector<64x64xf32>
    %cst_47 = arith.constant dense<0.000000e+00> : vector<64x32xf32>
    %204 = tpu.matmul %203, %158, %cst_47 {dimension_numbers = #tpu.dot_dimension_numbers<[1], [0], [0], [1], [0, 0, 1, 1], [], []>} : vector<64x64xf32>, vector<64x32xf32>, vector<64x32xf32> -> vector<64x32xf32>
    %205 = tpu.concatenate %57, %106, %155, %204 in 1 : vector<64x32xf32>, vector<64x32xf32>, vector<64x32xf32>, vector<64x32xf32> -> vector<64x128xf32>
    %c0_48 = arith.constant 0 : index
    %c0_49 = arith.constant 0 : index
    %c0_50 = arith.constant 0 : index
    %206 = vector.load %arg6[%c0_48, %c0_49, %c0_50] : memref<1x64x128xf32, #tpu.memory_space<vmem>>, vector<1x64x128xf32>
    %207 = vector.shape_cast %206 : vector<1x64x128xf32> to vector<64x128xf32>
    %208 = vector.shape_cast %205 : vector<64x128xf32> to vector<1x64x128xf32>
    tpu.vector_store %arg6[%c0_48, %c0_49, %c0_50], %208 {strides = array<i32>} : memref<1x64x128xf32, #tpu.memory_space<vmem>>, vector<1x64x128xf32>,
    return
  }
  func.func @transform_0(%arg0: i32) -> (i32, i32, i32) {
    %c0_i32 = arith.constant 0 : i32
    %c0_i32_0 = arith.constant 0 : i32
    %c0_i32_1 = arith.constant 0 : i32
    return %arg0, %c0_i32, %c0_i32_0 : i32, i32, i32
  }
  func.func @transform_1(%arg0: i32) -> (i32, i32, i32) {
    %c0_i32 = arith.constant 0 : i32
    %c1_i32 = arith.constant 1 : i32
    %c0_i32_0 = arith.constant 0 : i32
    return %arg0, %c0_i32, %c1_i32 : i32, i32, i32
  }
  func.func @transform_2(%arg0: i32) -> (i32, i32, i32) {
    %c0_i32 = arith.constant 0 : i32
    %c2_i32 = arith.constant 2 : i32
    %c0_i32_0 = arith.constant 0 : i32
    return %arg0, %c0_i32, %c2_i32 : i32, i32, i32
  }
  func.func @transform_3(%arg0: i32) -> (i32, i32) {
    %c0_i32 = arith.constant 0 : i32
    %c0_i32_0 = arith.constant 0 : i32
    %c0_i32_1 = arith.constant 0 : i32
    return %c0_i32, %c0_i32_0 : i32, i32
  }
  func.func @transform_4(%arg0: i32) -> (i32, i32) {
    %c0_i32 = arith.constant 0 : i32
    %c0_i32_0 = arith.constant 0 : i32
    %c0_i32_1 = arith.constant 0 : i32
    return %c0_i32, %c0_i32_0 : i32, i32
  }
  func.func @transform_5(%arg0: i32) -> (i32, i32, i32) {
    %c0_i32 = arith.constant 0 : i32
    %c0_i32_0 = arith.constant 0 : i32
    %c0_i32_1 = arith.constant 0 : i32
    return %arg0, %c0_i32, %c0_i32_0 : i32, i32, i32
  }
}

module attributes {stable_mosaic.version = 11 : i64} {
  func.func @_rms_matmul_kernel(%arg0: i32, %arg1: i32, %arg2: memref<128x128xf32, #tpu.memory_space<vmem>>, %arg3: memref<1x128xf32, #tpu.memory_space<vmem>>, %arg4: memref<128x512xbf16, #tpu.memory_space<vmem>>, %arg5: memref<128x512xf32, #tpu.memory_space<vmem>>) attributes {dimension_semantics = [#tpu.dimension_semantics<parallel>, #tpu.dimension_semantics<parallel>], iteration_bounds = array<i64: 1, 2>, scalar_prefetch = 0 : i64, scratch_operands = 0 : i64, tpu.core_type = #tpu.core_type<tc>, window_params = [{transform_indices = @transform_0, window_bounds = array<i64: 128, 128>}, {pipeline_mode = #tpu.pipeline_mode<synchronous>, transform_indices = @transform_1, window_bounds = array<i64: 1, 128>}, {transform_indices = @transform_2, window_bounds = array<i64: 128, 512>}, {transform_indices = @transform_3, window_bounds = array<i64: 128, 512>}]} {
    %c0 = arith.constant 0 : index
    %c0_0 = arith.constant 0 : index
    %0 = vector.load %arg2[%c0, %c0_0] : memref<128x128xf32, #tpu.memory_space<vmem>>, vector<128x128xf32>
    %1 = arith.mulf %0, %0 : vector<128x128xf32>
    %cst = arith.constant dense<0.000000e+00> : vector<128xf32>
    %2 = vector.multi_reduction <add>, %1, %cst [1] : vector<128x128xf32> to vector<128xf32>
    %3 = vector.shape_cast %2 : vector<128xf32> to vector<128x1xf32>
    %cst_1 = arith.constant 1.280000e+02 : f32
    %4 = vector.broadcast %cst_1 : f32 to vector<128x1xf32>
    %5 = arith.divf %3, %4 : vector<128x1xf32>
    %cst_2 = arith.constant 1.1920929E-7 : f32
    %6 = vector.broadcast %cst_2 : f32 to vector<128x1xf32>
    %7 = arith.addf %5, %6 : vector<128x1xf32>
    %8 = math.rsqrt %7 : vector<128x1xf32>
    %9 = vector.broadcast %8 : vector<128x1xf32> to vector<128x128xf32>
    %10 = arith.mulf %0, %9 : vector<128x128xf32>
    %c0_3 = arith.constant 0 : index
    %c0_4 = arith.constant 0 : index
    %11 = vector.load %arg3[%c0_3, %c0_4] : memref<1x128xf32, #tpu.memory_space<vmem>>, vector<1x128xf32>
    %12 = vector.broadcast %11 : vector<1x128xf32> to vector<128x128xf32>
    %13 = arith.mulf %10, %12 : vector<128x128xf32>
    %14 = arith.truncf %13 : vector<128x128xf32> to vector<128x128xbf16>
    %c0_5 = arith.constant 0 : index
    %c0_6 = arith.constant 0 : index
    %15 = vector.load %arg4[%c0_5, %c0_6] : memref<128x512xbf16, #tpu.memory_space<vmem>>, vector<128x512xbf16>
    %cst_7 = arith.constant dense<0.000000e+00> : vector<128x512xf32>
    %16 = tpu.matmul %14, %15, %cst_7 {dimension_numbers = #tpu.dot_dimension_numbers<[1], [0], [0], [1], [0, 0, 1, 1], [], []>} : vector<128x128xbf16>, vector<128x512xbf16>, vector<128x512xf32> -> vector<128x512xf32>
    %c0_8 = arith.constant 0 : index
    %c0_9 = arith.constant 0 : index
    %17 = vector.load %arg5[%c0_8, %c0_9] : memref<128x512xf32, #tpu.memory_space<vmem>>, vector<128x512xf32>
    tpu.vector_store %arg5[%c0_8, %c0_9], %16 {strides = array<i32>} : memref<128x512xf32, #tpu.memory_space<vmem>>, vector<128x512xf32>,
    return
  }
  func.func @transform_0(%arg0: i32, %arg1: i32) -> (i32, i32) {
    %c0_i32 = arith.constant 0 : i32
    %c0_i32_0 = arith.constant 0 : i32
    return %arg0, %c0_i32 : i32, i32
  }
  func.func @transform_1(%arg0: i32, %arg1: i32) -> (i32, i32) {
    %c0_i32 = arith.constant 0 : i32
    %c0_i32_0 = arith.constant 0 : i32
    %c0_i32_1 = arith.constant 0 : i32
    return %c0_i32, %c0_i32_0 : i32, i32
  }
  func.func @transform_2(%arg0: i32, %arg1: i32) -> (i32, i32) {
    %c0_i32 = arith.constant 0 : i32
    %c0_i32_0 = arith.constant 0 : i32
    return %c0_i32, %arg1 : i32, i32
  }
  func.func @transform_3(%arg0: i32, %arg1: i32) -> (i32, i32) {
    %c0_i32 = arith.constant 0 : i32
    return %arg0, %arg1 : i32, i32
  }
}

</mosaic_0001>

<bundles_post_ra>
// kernel: minimal_llm_forward.13
= control target key start
LH: loop header
LB: loop body
LE: loop exit
PB: predicated region body
PF: predicated region fallthrough
CT: control target
= control target key end

     0   :  { %8 = vsyncpa [#allocation4], 0  ;;  %s1797_s0 = inlined_call_operand.vmem [shape: f32[128,128], index: 0, kind: input, shape index: {}]   ;;  %s1798_s1 = inlined_call_operand.vmem [shape: f32[1,128], index: 1, kind: input, shape index: {}]   ;;  %s1799_s2 = inlined_call_operand.vmem [shape: bf16[128,1024], index: 2, kind: input, shape index: {}]   ;;  %s1800_s3 = inlined_call_operand.hbm [shape: f32[128,1024], index: 3, kind: output, shape index: {}]  }
   0x1   :  { %10 = vsyncpa [#allocation4 + $0x1], 0  ;;  %s1339_s12 = smov 0   ;;  %s1341_s13 = smov 0  }
   0x2   :  { %s1343_s14 = smov 0   ;;  %s1345_s15 = smov 0  }
   0x3   :  { %s1347_s16 = smov 0   ;;  %s1349_s17 = smov 0  }
   0x4 LB: > { %s1044_s18 = sadd.s32 4294967295, %s1312_s17   ;;  %s1045_s19 = sadd.s32 4294967294, %s1312_s17   ;;  %s1312_s17 = sphi %s1349_s17, %s16_s17   ;;  %s1308_s16 = sphi %s1347_s16, %s1807_s16   ;;  %s1304_s15 = sphi %s1345_s15, %s1806_s15   ;;  %s1300_s14 = sphi %s1343_s14, %s1805_s14   ;;  %s1296_s13 = sphi %s1341_s13, %s1804_s13   ;;  %s1292_s12 = sphi %s1339_s12, %s1803_s12  }
   0x5   : > { %s25_s20 = sadd.s32 1, %s1308_s16  ;;  %s82_s21 = sadd.s32 1, %s1300_s14 }
   0x6   : > { %p26_p0 = scmp.ge.s32.totalorder %s25_s20, 2  ;;  %p89_p1 = scmp.ne.s32.totalorder %s1300_s14, %s1296_s13 }
   0x7   : > { %p90_p2 = scmp.eq.s32.totalorder %s1312_s17, 0  ;;  %p121_p3 = scmp.eq.s32.totalorder %s1044_s18, 1 }
   0x8   : > { %s1809_s20 = smov (%p26_p0, %s25_s20), 0  ;;  %p126_p6 = scmp.ne.s32.totalorder %s1296_s13, %s1292_s12 }
   0x9   : > { %p91_p4 = por %p90_p2, %p89_p1  ;;  %p1378_p5 = por %p121_p3, %p89_p1 }
   0xa   : > { %s79_s23 = ssub.s32 %s1308_s16, %s1809_s20  ;;  %p127_p8 = scmp.eq.s32.totalorder %s1045_s19, 1 }
   0xb   : > { %p80_p7 = scmp.eq.s32.totalorder %s79_s23, 0  ;;  %p1048_p10 = scmp.ge.s32.totalorder %s1312_s17, 2 }
   0xc   : > { %p1389_p9 = por %p127_p8, %p126_p6 }
   0xd   : > { %s1387_s24 = scalar_select %p80_p7, %s1300_s14, %s82_s21  }
   0xe   : > { %155 = sbr.rel (%p1048_p10) target bundleno = 41 (0x29), region = 24 }
  0x15   : > { %158 = sbr.rel (!%p91_p4) target bundleno = 41 (0x29), region = 28  ;;  %s160_s26 = sand.u32 (%p91_p4), 1, %s1300_s14  }
  0x16   : > { %s1093_s27 = sshll.u32 (%p91_p4), %s1308_s16, 4  ;;  %s1049_s28 = sshll.u32 (%p91_p4), %s160_s26, 8 }
  0x17   : > { %s1401_s4 = scalar_lea.vmem (%p91_p4), %s1799_s2, %s1093_s27  ;;  %s1406_s5 = scalar_lea.vmem (%p91_p4), [#allocation2], %s1049_s28 }
  0x18   : > { %v178_v0 = vld [vmem:[%s1401_s4] sm:$0xff] (%p91_p4)  ;;  %v180_v1 = vld [vmem:[%s1401_s4 + $0x8] sm:$0xff] (%p91_p4) }
  0x19   : > { %v182_v2 = vld [vmem:[%s1401_s4 + $0x20] sm:$0xff] (%p91_p4)  ;;  %179 = vst [vmem:[%s1406_s5] sm:$0xff] (%p91_p4), %v178_v0  ;;  %181 = vst [vmem:[%s1406_s5 + $0x8] sm:$0xff] (%p91_p4), %v180_v1  ;;  %v184_v3 = vld [vmem:[%s1401_s4 + $0x28] sm:$0xff] (%p91_p4) }
  0x1a   : > { %183 = vst [vmem:[%s1406_s5 + $0x10] sm:$0xff] (%p91_p4), %v182_v2  ;;  %v186_v4 = vld [vmem:[%s1401_s4 + $0x40] sm:$0xff] (%p91_p4)  ;;  %v188_v5 = vld [vmem:[%s1401_s4 + $0x48] sm:$0xff] (%p91_p4)  ;;  %185 = vst [vmem:[%s1406_s5 + $0x18] sm:$0xff] (%p91_p4), %v184_v3 }
  0x1b   : > { %187 = vst [vmem:[%s1406_s5 + $0x20] sm:$0xff] (%p91_p4), %v186_v4  ;;  %189 = vst [vmem:[%s1406_s5 + $0x28] sm:$0xff] (%p91_p4), %v188_v5  ;;  %v190_v6 = vld [vmem:[%s1401_s4 + $0x60] sm:$0xff] (%p91_p4)  ;;  %v192_v7 = vld [vmem:[%s1401_s4 + $0x68] sm:$0xff] (%p91_p4) }
  0x1c   : > { %v194_v8 = vld [vmem:[%s1401_s4 + $0x80] sm:$0xff]  ;;  %191 = vst [vmem:[%s1406_s5 + $0x30] sm:$0xff] %v190_v6  ;;  %193 = vst [vmem:[%s1406_s5 + $0x38] sm:$0xff] %v192_v7  ;;  %v196_v9 = vld [vmem:[%s1401_s4 + $0x88] sm:$0xff] }
  0x1d   : > { %195 = vst [vmem:[%s1406_s5 + $0x40] sm:$0xff] %v194_v8  ;;  %v198_v10 = vld [vmem:[%s1401_s4 + $0xa0] sm:$0xff]  ;;  %v200_v11 = vld [vmem:[%s1401_s4 + $0xa8] sm:$0xff]  ;;  %197 = vst [vmem:[%s1406_s5 + $0x48] sm:$0xff] %v196_v9 }
  0x1e   : > { %199 = vst [vmem:[%s1406_s5 + $0x50] sm:$0xff] %v198_v10  ;;  %201 = vst [vmem:[%s1406_s5 + $0x58] sm:$0xff] %v200_v11  ;;  %v202_v12 = vld [vmem:[%s1401_s4 + $0xc0] sm:$0xff]  ;;  %v204_v13 = vld [vmem:[%s1401_s4 + $0xc8] sm:$0xff] }
  0x1f   : > { %v206_v14 = vld [vmem:[%s1401_s4 + $0xe0] sm:$0xff]  ;;  %203 = vst [vmem:[%s1406_s5 + $0x60] sm:$0xff] %v202_v12  ;;  %205 = vst [vmem:[%s1406_s5 + $0x68] sm:$0xff] %v204_v13  ;;  %v208_v15 = vld [vmem:[%s1401_s4 + $0xe8] sm:$0xff] }
  0x20   : > { %207 = vst [vmem:[%s1406_s5 + $0x70] sm:$0xff] %v206_v14  ;;  %v210_v16 = vld [vmem:[%s1401_s4 + $0x100] sm:$0xff]  ;;  %v212_v17 = vld [vmem:[%s1401_s4 + $0x108] sm:$0xff]  ;;  %209 = vst [vmem:[%s1406_s5 + $0x78] sm:$0xff] %v208_v15 }
  0x21   : > { %211 = vst [vmem:[%s1406_s5 + $0x80] sm:$0xff] %v210_v16  ;;  %213 = vst [vmem:[%s1406_s5 + $0x88] sm:$0xff] %v212_v17  ;;  %v214_v18 = vld [vmem:[%s1401_s4 + $0x120] sm:$0xff]  ;;  %v216_v19 = vld [vmem:[%s1401_s4 + $0x128] sm:$0xff] }
  0x22   : > { %v218_v20 = vld [vmem:[%s1401_s4 + $0x140] sm:$0xff]  ;;  %215 = vst [vmem:[%s1406_s5 + $0x90] sm:$0xff] %v214_v18  ;;  %217 = vst [vmem:[%s1406_s5 + $0x98] sm:$0xff] %v216_v19  ;;  %v220_v21 = vld [vmem:[%s1401_s4 + $0x148] sm:$0xff] }
  0x23   : > { %219 = vst [vmem:[%s1406_s5 + $0xa0] sm:$0xff] %v218_v20  ;;  %v222_v22 = vld [vmem:[%s1401_s4 + $0x160] sm:$0xff]  ;;  %v224_v23 = vld [vmem:[%s1401_s4 + $0x168] sm:$0xff]  ;;  %221 = vst [vmem:[%s1406_s5 + $0xa8] sm:$0xff] %v220_v21 }
  0x24   : > { %223 = vst [vmem:[%s1406_s5 + $0xb0] sm:$0xff] %v222_v22  ;;  %225 = vst [vmem:[%s1406_s5 + $0xb8] sm:$0xff] %v224_v23  ;;  %v226_v24 = vld [vmem:[%s1401_s4 + $0x180] sm:$0xff]  ;;  %v228_v25 = vld [vmem:[%s1401_s4 + $0x188] sm:$0xff] }
  0x25   : > { %v230_v26 = vld [vmem:[%s1401_s4 + $0x1a0] sm:$0xff]  ;;  %227 = vst [vmem:[%s1406_s5 + $0xc0] sm:$0xff] %v226_v24  ;;  %229 = vst [vmem:[%s1406_s5 + $0xc8] sm:$0xff] %v228_v25  ;;  %v232_v27 = vld [vmem:[%s1401_s4 + $0x1a8] sm:$0xff] }
  0x26   : > { %231 = vst [vmem:[%s1406_s5 + $0xd0] sm:$0xff] %v230_v26  ;;  %v234_v28 = vld [vmem:[%s1401_s4 + $0x1c0] sm:$0xff]  ;;  %v236_v29 = vld [vmem:[%s1401_s4 + $0x1c8] sm:$0xff]  ;;  %233 = vst [vmem:[%s1406_s5 + $0xd8] sm:$0xff] %v232_v27 }
  0x27   : > { %235 = vst [vmem:[%s1406_s5 + $0xe0] sm:$0xff] %v234_v28  ;;  %237 = vst [vmem:[%s1406_s5 + $0xe8] sm:$0xff] %v236_v29  ;;  %v238_v30 = vld [vmem:[%s1401_s4 + $0x1e0] sm:$0xff]  ;;  %v240_v31 = vld [vmem:[%s1401_s4 + $0x1e8] sm:$0xff] }
  0x28   : > { %239 = vst [vmem:[%s1406_s5 + $0xf0] sm:$0xff] %v238_v30  ;;  %241 = vst [vmem:[%s1406_s5 + $0xf8] sm:$0xff] %v240_v31 }
  0x29 PF: > { %p1052_p11 = scmp.ge.s32.totalorder %s1312_s17, 1  ;;  %p246_p12 = scmp.lt.s32.totalorder %s1312_s17, 3 }
  0x2b   : > { %p247_p13 = pnand %p1052_p11, %p246_p12 }
  0x2c   : > { %v1474_v32 = vld [vmem:[%s1797_s0] sm:$0xff] (!%p247_p13)  ;;  %v1479_v33 = vld [vmem:[%s1797_s0 + $0x10] sm:$0xff] (!%p247_p13)  ;;  %v1484_v34 = vld [vmem:[%s1797_s0 + $0x8] sm:$0xff] (!%p247_p13)  ;;  %s1487_s18 = sand.u32 (!%p247_p13), 1, %s1296_s13   ;;  %v1314_v30 = vmov (!%p247_p13), 0   ;;  %s1094_s19 = sshll.u32 (!%p247_p13), %s1304_s15, 9 }
  0x2d   : > { %250 = sbr.rel (%p247_p13) target bundleno = 501 (0x1f5), region = 51  ;;  %v307_v35 = vmul.f32 (!%p247_p13), %v1474_v32, %v1474_v32  ;;  %v309_v36 = vmul.f32 (!%p247_p13), %v1479_v33, %v1479_v33  ;;  %v1496_v37 = vld [vmem:[%s1797_s0 + $0x18] sm:$0xff] (!%p247_p13)  ;;  %s1053_s23 = sshll.u32 (!%p247_p13), %s1487_s18, 8  ;;  %v308_v38 = vmul.f32 (!%p247_p13), %v1484_v34, %v1484_v34  ;;  %v1506_v40 = vld [vmem:[%s1797_s0 + $0x28] sm:$0xff] (!%p247_p13)  ;;  %v1511_v41 = vld [vmem:[%s1797_s0 + $0x20] sm:$0xff] (!%p247_p13)  ;;  %675 = vmatprep.mubr.bf16.mxu0 (!%p247_p13), %v1314_v30  ;;  %788 = vmatprep.mubr.bf16.mxu1 (!%p247_p13), %v1314_v30 }
  0x2e   : > { %v310_v39 = vmul.f32 (!%p247_p13), %v1496_v37, %v1496_v37  ;;  %s1513_s30 = scalar_lea.vmem (!%p247_p13), [#allocation2], %s1053_s23  ;;  %v1518_v42 = vld [vmem:[%s1797_s0 + $0x38] sm:$0xff] (!%p247_p13)  ;;  %v1523_v43 = vld [vmem:[%s1797_s0 + $0x30] sm:$0xff] (!%p247_p13)  ;;  %v312_v45 = vmul.f32 (!%p247_p13), %v1506_v40, %v1506_v40  ;;  %v311_v46 = vmul.f32 (!%p247_p13), %v1511_v41, %v1511_v41  ;;  %v1538_v52 = vld [vmem:[%s1797_s0 + $0x48] sm:$0xff] (!%p247_p13)  ;;  %s1054_s10 = sshll.u32 (!%p247_p13), %s1487_s18, 9 }
  0x2f   : > { %323 = vadd.xlane.f32.xlu0 (!%p247_p13), %v307_v35  ;;  %327 = vadd.xlane.f32.xlu1 (!%p247_p13), %v309_v36  ;;  %v1154_v44 = vld [vmem:[%s1513_s30 + $0x4] ss:$16 sps:$4 sm:$0xff] (!%p247_p13)   ;;  %v1156_v47 = vld [vmem:[%s1513_s30 + $0xc] ss:$16 sps:$4 sm:$0xff] (!%p247_p13)   ;;  %v1158_v48 = vld [vmem:[%s1513_s30] ss:$16 sps:$4 sm:$0xff] (!%p247_p13)   ;;  %v314_v56 = vmul.f32 (!%p247_p13), %v1518_v42, %v1518_v42  ;;  %v313_v57 = vmul.f32 (!%p247_p13), %v1523_v43, %v1523_v43  ;;  %v316_v60 = vmul.f32 (!%p247_p13), %v1538_v52, %v1538_v52  ;;  %s1738_s27 = scalar_lea.hbm (!%p247_p13), %s1800_s3, %s1094_s19 }
  0x30   : > { %v1159_v49 = vld [vmem:[%s1513_s30 + $0x8] ss:$16 sps:$4 sm:$0xff] (!%p247_p13)   ;;  %643 = vmatprep.subr.bf16.mxu0 (!%p247_p13), %v1154_v44  ;;  %v1160_v50 = vld [vmem:[%s1513_s30 + $0x24] ss:$16 sps:$4 sm:$0xff] (!%p247_p13)   ;;  %756 = vmatprep.subr.bf16.mxu1 (!%p247_p13), %v1156_v47  ;;  %v1162_v51 = vld [vmem:[%s1513_s30 + $0x2c] ss:$16 sps:$4 sm:$0xff] (!%p247_p13)  }
  0x31   : > { %644 = vmatpush1.bf16.msra.mxu0 (!%p247_p13), %v1158_v48  ;;  %v1543_v53 = vld [vmem:[%s1797_s0 + $0x40] sm:$0xff] (!%p247_p13)  ;;  %757 = vmatpush1.bf16.msra.mxu1 (!%p247_p13), %v1159_v49  ;;  %v1165_v55 = vld [vmem:[%s1513_s30 + $0x28] ss:$16 sps:$4 sm:$0xff] (!%p247_p13)   ;;  %v1559_v59 = vld [vmem:[%s1797_s0 + $0x50] sm:$0xff] (!%p247_p13)  ;;  %s1675_s11 = scalar_lea.vmem (!%p247_p13), [#allocation3], %s1054_s10  ;;  %s934_s15 = scalar_lea.sflag (!%p247_p13), [#allocation4], %s1487_s18 }
  0x32   : > { %645 = vmatprep.subr.bf16.mxu0 (!%p247_p13), %v1160_v50  ;;  %v1164_v54 = vld [vmem:[%s1513_s30 + $0x20] ss:$16 sps:$4 sm:$0xff] (!%p247_p13)   ;;  %758 = vmatprep.subr.bf16.mxu1 (!%p247_p13), %v1162_v51  ;;  %v1554_v58 = vld [vmem:[%s1797_s0 + $0x58] sm:$0xff] (!%p247_p13)  ;;  %v315_v61 = vmul.f32 (!%p247_p13), %v1543_v53, %v1543_v53  ;;  %v1166_v62 = vld [vmem:[%s1513_s30 + $0x44] ss:$16 sps:$4 sm:$0xff] (!%p247_p13)   ;;  %v317_v4 = vmul.f32 (!%p247_p13), %v1559_v59, %v1559_v59  ;;  %s950_s21 = sshll.u32 (!%p247_p13), %s1675_s11, 4  ;;  %s1742_s21 = int_to_ptr.vmem [resolvable:$true] %s950_s21 }
  0x33   : > { %325 = vadd.xlane.f32.xlu0 (!%p247_p13), %v308_v38  ;;  %329 = vadd.xlane.f32.xlu1 (!%p247_p13), %v310_v39  ;;  %v1168_v63 = vld [vmem:[%s1513_s30 + $0x4c] ss:$16 sps:$4 sm:$0xff] (!%p247_p13)   ;;  %v1170_v0 = vld [vmem:[%s1513_s30 + $0x40] ss:$16 sps:$4 sm:$0xff] (!%p247_p13)   ;;  %v1171_v1 = vld [vmem:[%s1513_s30 + $0x48] ss:$16 sps:$4 sm:$0xff] (!%p247_p13)   ;;  %v318_v3 = vmul.f32 (!%p247_p13), %v1554_v58, %v1554_v58 }
  0x34   : > { %v1572_v2 = vld [vmem:[%s1797_s0 + $0x68] sm:$0xff]  ;;  %v1581_v5 = vld [vmem:[%s1797_s0 + $0x60] sm:$0xff]  ;;  %v1594_v12 = vld [vmem:[%s1797_s0 + $0x78] sm:$0xff]  ;;  %s1234_s28 = scalar_lea.vmem %s1742_s21, 8192  ;;  %s1315_s29 = smov [#allocation3]  }
  0x35   : > { %646 = vmatpush1.bf16.msra.mxu0 %v1164_v54  ;;  %759 = vmatpush1.bf16.msra.mxu1 %v1165_v55  ;;  %v1172_v6 = vld [vmem:[%s1513_s30 + $0x64] ss:$16 sps:$4 sm:$0xff]   ;;  %v1174_v7 = vld [vmem:[%s1513_s30 + $0x6c] ss:$16 sps:$4 sm:$0xff]   ;;  %v1176_v8 = vld [vmem:[%s1513_s30 + $0x60] ss:$16 sps:$4 sm:$0xff]   ;;  %v320_v10 = vmul.f32 %v1572_v2, %v1572_v2  ;;  %v319_v11 = vmul.f32 %v1581_v5, %v1581_v5  ;;  %v322_v20 = vmul.f32 %v1594_v12, %v1594_v12  ;;  %p1235_p0 = scmp.ne.s32.totalorder %s1742_s21, %s1234_s28 }
  0x36   : > { %647 = vmatprep.subr.bf16.mxu0 %v1166_v62  ;;  %760 = vmatprep.subr.bf16.mxu1 %v1168_v63  ;;  %v1177_v9 = vld [vmem:[%s1513_s30 + $0x68] ss:$16 sps:$4 sm:$0xff]   ;;  %v1599_v13 = vld [vmem:[%s1797_s0 + $0x70] sm:$0xff]  ;;  %v1180_v15 = vld [vmem:[%s1513_s30 + $0x8c] ss:$16 sps:$4 sm:$0xff]   ;;  %s1238_s4 = sshll.u32 %s1315_s29, 4  ;;  %s1239_s4 = int_to_ptr.vmem [resolvable:$false] %s1238_s4 }
  0x37   : > { %333 = vadd.xlane.f32.xlu1 %v312_v45  ;;  %331 = vadd.xlane.f32.xlu0 %v311_v46  ;;  %v1178_v14 = vld [vmem:[%s1513_s30 + $0x84] ss:$16 sps:$4 sm:$0xff]   ;;  %v1182_v16 = vld [vmem:[%s1513_s30 + $0x80] ss:$16 sps:$4 sm:$0xff]   ;;  %v1183_v17 = vld [vmem:[%s1513_s30 + $0x88] ss:$16 sps:$4 sm:$0xff]   ;;  %v321_v21 = vmul.f32 %v1599_v13, %v1599_v13  ;;  %p1236_p1 = pnand %p1235_p0, %p1378_p5  ;;  %p1241_p3 = scmp.lt.s32.totalorder %s1742_s21, %s1239_s4 }
  0x38   : > { %v1184_v18 = vld [vmem:[%s1513_s30 + $0xa4] ss:$16 sps:$4 sm:$0xff]   ;;  %v1186_v19 = vld [vmem:[%s1513_s30 + $0xac] ss:$16 sps:$4 sm:$0xff]   ;;  %v1188_v22 = vld [vmem:[%s1513_s30 + $0xa0] ss:$16 sps:$4 sm:$0xff]  }
  0x39   : > { %648 = vmatpush1.bf16.msra.mxu0 %v1170_v0  ;;  %761 = vmatpush1.bf16.msra.mxu1 %v1171_v1  ;;  %v1189_v23 = vld [vmem:[%s1513_s30 + $0xa8] ss:$16 sps:$4 sm:$0xff]   ;;  %v1190_v24 = vld [vmem:[%s1513_s30 + $0xc4] ss:$16 sps:$4 sm:$0xff]   ;;  %v1192_v25 = vld [vmem:[%s1513_s30 + $0xcc] ss:$16 sps:$4 sm:$0xff]   ;;  %p1237_p2 = pneg %p1236_p1 }
  0x3a   : > { %649 = vmatprep.subr.bf16.mxu0 %v1172_v6  ;;  %762 = vmatprep.subr.bf16.mxu1 %v1174_v7  ;;  %v1194_v26 = vld [vmem:[%s1513_s30 + $0xc0] ss:$16 sps:$4 sm:$0xff]   ;;  %v1195_v27 = vld [vmem:[%s1513_s30 + $0xc8] ss:$16 sps:$4 sm:$0xff]   ;;  %v1196_v28 = vld [vmem:[%s1513_s30 + $0xe4] ss:$16 sps:$4 sm:$0xff]  }
  0x3b   : > { %337 = vadd.xlane.f32.xlu1 %v314_v56  ;;  %335 = vadd.xlane.f32.xlu0 %v313_v57  ;;  %v1198_v29 = vld [vmem:[%s1513_s30 + $0xec] ss:$16 sps:$4 sm:$0xff]   ;;  %v1200_v31 = vld [vmem:[%s1513_s30 + $0xe0] ss:$16 sps:$4 sm:$0xff]   ;;  %v1201_v35 = vld [vmem:[%s1513_s30 + $0xe8] ss:$16 sps:$4 sm:$0xff]  }
  0x3c   : > { %s1240_s5 = scalar_lea.vmem %s1239_s4, 16384 }
  0x3d   : > { %650 = vmatpush1.bf16.msra.mxu0 %v1176_v8  ;;  %763 = vmatpush1.bf16.msra.mxu1 %v1177_v9  ;;  %v1627_v8 = vld [vmem:[%s1798_s1] ss:$0 sm:$0xff]  ;;  %p1242_p4 = scmp.lt.s32.totalorder %s1240_s5, %s1234_s28 }
  0x3e   : > { %651 = vmatprep.subr.bf16.mxu0 %v1178_v14  ;;  %764 = vmatprep.subr.bf16.mxu1 %v1180_v15 }
  0x3f   : > { %341 = vadd.xlane.f32.xlu1 %v316_v60  ;;  %339 = vadd.xlane.f32.xlu0 %v315_v61  ;;  %p1243_p6 = por %p1242_p4, %p1241_p3 }
  0x41   : > { %652 = vmatpush1.bf16.msra.mxu0 %v1182_v16  ;;  %765 = vmatpush1.bf16.msra.mxu1 %v1183_v17  ;;  %p1244_p7 = pnand %p1243_p6, %p1237_p2 }
  0x42   : > { %653 = vmatprep.subr.bf16.mxu0 %v1184_v18  ;;  %766 = vmatprep.subr.bf16.mxu1 %v1186_v19 }
  0x43   : > { %345 = vadd.xlane.f32.xlu1 %v318_v3  ;;  %343 = vadd.xlane.f32.xlu0 %v317_v4 }
  0x45   : > { %654 = vmatpush1.bf16.msra.mxu0 %v1188_v22  ;;  %767 = vmatpush1.bf16.msra.mxu1 %v1189_v23 }
  0x46   : > { %655 = vmatprep.subr.bf16.mxu0 %v1190_v24  ;;  %768 = vmatprep.subr.bf16.mxu1 %v1192_v25 }
  0x47   : > { %349 = vadd.xlane.f32.xlu1 %v320_v10  ;;  %347 = vadd.xlane.f32.xlu0 %v319_v11 }
  0x49   : > { %656 = vmatpush1.bf16.msra.mxu0 %v1194_v26  ;;  %769 = vmatpush1.bf16.msra.mxu1 %v1195_v27 }
  0x4a   : > { %657 = vmatprep.subr.bf16.mxu0 %v1196_v28  ;;  %770 = vmatprep.subr.bf16.mxu1 %v1198_v29 }
  0x4b   : > { %353 = vadd.xlane.f32.xlu1 %v322_v20  ;;  %351 = vadd.xlane.f32.xlu0 %v321_v21 }
  0x4d   : > { %658 = vmatpush1.bf16.msra.mxu0 %v1200_v31  ;;  %771 = vmatpush1.bf16.msra.mxu1 %v1201_v35 }
  0xbc   : > { %v324_v36 = vpop.xlane.xlu0 %323  ;;  %v328_v38 = vpop.xlane.xlu1 %327 }
  0xbd   : > { %v356_v39 = vmul.f32 0.0078125, %v324_v36  ;;  %v358_v44 = vmul.f32 0.0078125, %v328_v38 }
  0xbf   : > { %v372_v45 = vadd.f32 1.1920929e-07, %v356_v39  ;;  %v374_v50 = vadd.f32 1.1920929e-07, %v358_v44 }
  0xc0   : > { %v326_v46 = vpop.xlane.xlu0 %325  ;;  %v330_v47 = vpop.xlane.xlu1 %329 }
  0xc1   : > { %1202 = vrsqrt.f32 %v372_v45  ;;  %v357_v48 = vmul.f32 0.0078125, %v326_v46  ;;  %v359_v49 = vmul.f32 0.0078125, %v330_v47 }
  0xc3   : > { %v373_v51 = vadd.f32 1.1920929e-07, %v357_v48  ;;  %v375_v54 = vadd.f32 1.1920929e-07, %v359_v49 }
  0xc4   : > { %v334_v55 = vpop.xlane.xlu1 %333  ;;  %v332_v56 = vpop.xlane.xlu0 %331 }
  0xc5   : > { %1204 = vrsqrt.f32 %v373_v51  ;;  %v361_v57 = vmul.f32 0.0078125, %v334_v55  ;;  %v360_v60 = vmul.f32 0.0078125, %v332_v56 }
  0xc6   : > { %1206 = vrsqrt.f32 %v374_v50 }
  0xc7   : > { %1208 = vrsqrt.f32 %v375_v54  ;;  %v377_v61 = vadd.f32 1.1920929e-07, %v361_v57  ;;  %v376_v63 = vadd.f32 1.1920929e-07, %v360_v60 }
  0xc8   : > { %v338_v62 = vpop.xlane.xlu1 %337  ;;  %v336_v0 = vpop.xlane.xlu0 %335 }
  0xc9   : > { %v363_v3 = vmul.f32 0.0078125, %v338_v62  ;;  %1210 = vrsqrt.f32 %v377_v61  ;;  %v362_v4 = vmul.f32 0.0078125, %v336_v0 }
  0xca   : > { %1212 = vrsqrt.f32 %v376_v63 }
  0xcb   : > { %v1203_v1 = vpop.eup %1202  ;;  %v379_v9 = vadd.f32 1.1920929e-07, %v363_v3  ;;  %v378_v15 = vadd.f32 1.1920929e-07, %v362_v4 }
  0xcc   : > { %v404_v6 = vmul.f32 %v1203_v1, %v1474_v32  ;;  %v342_v16 = vpop.xlane.xlu1 %341  ;;  %v340_v19 = vpop.xlane.xlu0 %339 }
  0xcd   : > { %1214 = vrsqrt.f32 %v379_v9  ;;  %v365_v22 = vmul.f32 0.0078125, %v342_v16  ;;  %v364_v23 = vmul.f32 0.0078125, %v340_v19 }
  0xce   : > { %v427_v17 = vmul.f32 %v1627_v8, %v404_v6  ;;  %1216 = vrsqrt.f32 %v378_v15 }
  0xcf   : > { %v1205_v7 = vpop.eup %1204  ;;  %v381_v27 = vadd.f32 1.1920929e-07, %v365_v22  ;;  %v380_v28 = vadd.f32 1.1920929e-07, %v364_v23 }
  0xd0   : > { %v1207_v10 = vpop.eup %1206  ;;  %v405_v11 = vmul.f32 %v1205_v7, %v1484_v34  ;;  %v344_v31 = vpop.xlane.xlu0 %343 }
  0xd1   : > { %v1209_v14 = vpop.eup %1208  ;;  %v406_v20 = vmul.f32 %v1207_v10, %v1479_v33  ;;  %v346_v33 = vpop.xlane.xlu1 %345  ;;  %1218 = vrsqrt.f32 %v381_v27  ;;  %v366_v39 = vmul.f32 0.0078125, %v344_v31 }
  0xd2   : > { %v428_v18 = vmul.f32 %v1627_v8, %v405_v11  ;;  %v407_v21 = vmul.f32 %v1209_v14, %v1496_v37  ;;  %v367_v36 = vmul.f32 0.0078125, %v346_v33  ;;  %1220 = vrsqrt.f32 %v380_v28 }
  0xd3   : > { %v1211_v24 = vpop.eup %1210  ;;  %v429_v25 = vmul.f32 %v1627_v8, %v406_v20 }
  0xd4   : > { %v443_v32 = vpack.c.bf16 %v428_v18, %v427_v17  ;;  %v1213_v34 = vpop.eup %1212  ;;  %v430_v26 = vmul.f32 %v1627_v8, %v407_v21  ;;  %v409_v29 = vmul.f32 %v1211_v24, %v1506_v40  ;;  %v382_v40 = vadd.f32 1.1920929e-07, %v366_v39  ;;  %v348_v51 = vpop.xlane.xlu0 %347 }
  0xd5   : > { %v408_v37 = vmul.f32 %v1213_v34, %v1511_v41  ;;  %v383_v41 = vadd.f32 1.1920929e-07, %v367_v36  ;;  %v350_v47 = vpop.xlane.xlu1 %349  ;;  %v368_v55 = vmul.f32 0.0078125, %v348_v51 }
  0xd6   : > { %676 = vmatmul.mubr.bf16.vlgmr.msra.gmra.mrb[0].mxu0 %v443_v32  ;;  %789 = vmatmul.mubr.bf16.vlgmr.msra.gmra.mrb[0].mxu1 %v443_v32  ;;  %v444_v35 = vpack.c.bf16 %v430_v26, %v429_v25  ;;  %v432_v45 = vmul.f32 %v1627_v8, %v409_v29  ;;  %v369_v54 = vmul.f32 0.0078125, %v350_v47 }
  0xd7   : > { %685 = vmatprep.mubr.bf16.mxu0 %v1314_v30  ;;  %798 = vmatprep.mubr.bf16.mxu1 %v1314_v30  ;;  %v1215_v38 = vpop.eup %1214  ;;  %v431_v44 = vmul.f32 %v1627_v8, %v408_v37  ;;  %1222 = vrsqrt.f32 %v383_v41  ;;  %v384_v62 = vadd.f32 1.1920929e-07, %v368_v55 }
  0xd8   : > { %v1217_v46 = vpop.eup %1216  ;;  %v411_v50 = vmul.f32 %v1215_v38, %v1518_v42  ;;  %1224 = vrsqrt.f32 %v382_v40  ;;  %v352_v3 = vpop.xlane.xlu0 %351 }
  0xd9   : > { %v445_v48 = vpack.c.bf16 %v432_v45, %v431_v44  ;;  %v410_v49 = vmul.f32 %v1217_v46, %v1523_v43  ;;  %v385_v43 = vadd.f32 1.1920929e-07, %v369_v54  ;;  %v354_v42 = vpop.xlane.xlu1 %353  ;;  %v370_v6 = vmul.f32 0.0078125, %v352_v3 }
  0xda   : > { %v434_v60 = vmul.f32 %v1627_v8, %v411_v50  ;;  %v371_v4 = vmul.f32 0.0078125, %v354_v42 }
  0xdb   : > { %v1219_v56 = vpop.eup %1218  ;;  %v433_v57 = vmul.f32 %v1627_v8, %v410_v49  ;;  %1226 = vrsqrt.f32 %v385_v43  ;;  %v386_v14 = vadd.f32 1.1920929e-07, %v370_v6 }
  0xdc   : > { %v1221_v61 = vpop.eup %1220  ;;  %v413_v1 = vmul.f32 %v1219_v56, %v1538_v52  ;;  %1228 = vrsqrt.f32 %v384_v62 }
  0xdd   : > { %v446_v63 = vpack.c.bf16 %v434_v60, %v433_v57  ;;  %v412_v0 = vmul.f32 %v1221_v61, %v1543_v53  ;;  %v387_v53 = vadd.f32 1.1920929e-07, %v371_v4 }
  0xde   : > { %686 = vmatmul.mubr.bf16.gmra.mrb[4].mxu0 %v444_v35  ;;  %799 = vmatmul.mubr.bf16.gmra.mrb[4].mxu1 %v444_v35  ;;  %v436_v10 = vmul.f32 %v1627_v8, %v413_v1 }
  0xdf   : > { %695 = vmatprep.mubr.bf16.mxu0 %v1314_v30  ;;  %808 = vmatprep.mubr.bf16.mxu1 %v1314_v30  ;;  %v435_v9 = vmul.f32 %v1627_v8, %v412_v0  ;;  %1230 = vrsqrt.f32 %v387_v53 }
  0xe0   : > { %1232 = vrsqrt.f32 %v386_v14 }
  0xe1   : > { %v1223_v7 = vpop.eup %1222  ;;  %v447_v52 = vpack.c.bf16 %v436_v10, %v435_v9 }
  0xe2   : > { %v1225_v11 = vpop.eup %1224  ;;  %v415_v16 = vmul.f32 %v1223_v7, %v1554_v58 }
  0xe3   : > { %v414_v15 = vmul.f32 %v1225_v11, %v1559_v59 }
  0xe4   : > { %v438_v19 = vmul.f32 %v1627_v8, %v415_v16 }
  0xe5   : > { %v1227_v17 = vpop.eup %1226  ;;  %v437_v18 = vmul.f32 %v1627_v8, %v414_v15 }
  0xe6   : > { %696 = vmatmul.mubr.bf16.gmra.mrb[8].mxu0 %v445_v48  ;;  %809 = vmatmul.mubr.bf16.gmra.mrb[8].mxu1 %v445_v48  ;;  %v1229_v32 = vpop.eup %1228  ;;  %v417_v59 = vmul.f32 %v1227_v17, %v1572_v2 }
  0xe7   : > { %705 = vmatprep.mubr.bf16.mxu0 %v1314_v30  ;;  %818 = vmatprep.mubr.bf16.mxu1 %v1314_v30  ;;  %v448_v20 = vpack.c.bf16 %v438_v19, %v437_v18  ;;  %v416_v21 = vmul.f32 %v1229_v32, %v1581_v5 }
  0xe8   : > { %v440_v23 = vmul.f32 %v1627_v8, %v417_v59 }
  0xe9   : > { %v1231_v58 = vpop.eup %1230  ;;  %v439_v22 = vmul.f32 %v1627_v8, %v416_v21 }
  0xea   : > { %v1233_v24 = vpop.eup %1232  ;;  %v419_v5 = vmul.f32 %v1231_v58, %v1594_v12 }
  0xeb   : > { %v449_v34 = vpack.c.bf16 %v440_v23, %v439_v22  ;;  %v418_v25 = vmul.f32 %v1233_v24, %v1599_v13 }
  0xec   : > { %v442_v26 = vmul.f32 %v1627_v8, %v419_v5 }
  0xed   : > { %v441_v2 = vmul.f32 %v1627_v8, %v418_v25 }
  0xee   : > { %706 = vmatmul.mubr.bf16.gmra.mrb[12].mxu0 %v446_v63  ;;  %819 = vmatmul.mubr.bf16.gmra.mrb[12].mxu1 %v446_v63 }
  0xef   : > { %715 = vmatprep.mubr.bf16.mxu0 %v1314_v30  ;;  %828 = vmatprep.mubr.bf16.mxu1 %v1314_v30  ;;  %v450_v27 = vpack.c.bf16 %v442_v26, %v441_v2 }
  0xf6   : > { %716 = vmatmul.mubr.bf16.gmra.mrb[16].mxu0 %v447_v52  ;;  %829 = vmatmul.mubr.bf16.gmra.mrb[16].mxu1 %v447_v52 }
  0xf7   : > { %725 = vmatprep.mubr.bf16.mxu0 %v1314_v30  ;;  %838 = vmatprep.mubr.bf16.mxu1 %v1314_v30 }
  0xfe   : > { %726 = vmatmul.mubr.bf16.gmra.mrb[20].mxu0 %v448_v20  ;;  %839 = vmatmul.mubr.bf16.gmra.mrb[20].mxu1 %v448_v20 }
  0xff   : > { %735 = vmatprep.mubr.bf16.mxu0 %v1314_v30  ;;  %848 = vmatprep.mubr.bf16.mxu1 %v1314_v30 }
 0x106   : > { %736 = vmatmul.mubr.bf16.gmra.mrb[24].mxu0 %v449_v34  ;;  %849 = vmatmul.mubr.bf16.gmra.mrb[24].mxu1 %v449_v34 }
 0x107   : > { %745 = vmatprep.mubr.bf16.mxu0 %v1314_v30  ;;  %858 = vmatprep.mubr.bf16.mxu1 %v1314_v30 }
 0x10e   : > { %746 = vmatmul.mubr.bf16.gmra.mrb[28].mxu0 %v450_v27  ;;  %859 = vmatmul.mubr.bf16.gmra.mrb[28].mxu1 %v450_v27 }
 0x1a9   : > { %v677_v28 = vpop.f32.mrb[0].mxu0  ;;  %v790_v33 = vpop.f32.mrb[0].mxu1 }
 0x1aa   : > { %869 = vst [vmem:[%s1675_s11] sm:$0xff] %v677_v28  ;;  %871 = vst [vmem:[%s1675_s11 + $0x10] sm:$0xff] %v790_v33  ;;  %v679_v12 = vpop.f32.mrb[1].mxu0  ;;  %v792_v13 = vpop.f32.mrb[1].mxu1 }
 0x1ab   : > { %870 = vst [vmem:[%s1675_s11 + $0x8] sm:$0xff] %v679_v12  ;;  %872 = vst [vmem:[%s1675_s11 + $0x18] sm:$0xff] %v792_v13  ;;  %v681_v30 = vpop.f32.mrb[2].mxu0  ;;  %v794_v8 = vpop.f32.mrb[2].mxu1 }
 0x1ac   : > { %873 = vst [vmem:[%s1675_s11 + $0x20] sm:$0xff] %v681_v30  ;;  %875 = vst [vmem:[%s1675_s11 + $0x30] sm:$0xff] %v794_v8  ;;  %v683_v37 = vpop.f32.mrb[3].mxu0  ;;  %v796_v29 = vpop.f32.mrb[3].mxu1 }
 0x1ad   : > { %874 = vst [vmem:[%s1675_s11 + $0x28] sm:$0xff] %v683_v37  ;;  %876 = vst [vmem:[%s1675_s11 + $0x38] sm:$0xff] %v796_v29 }
 0x1b1   : > { %v687_v31 = vpop.f32.mrb[4].mxu0  ;;  %v800_v35 = vpop.f32.mrb[4].mxu1 }
 0x1b2   : > { %877 = vst [vmem:[%s1675_s11 + $0x40] sm:$0xff] %v687_v31  ;;  %879 = vst [vmem:[%s1675_s11 + $0x50] sm:$0xff] %v800_v35  ;;  %v689_v36 = vpop.f32.mrb[5].mxu0  ;;  %v802_v38 = vpop.f32.mrb[5].mxu1 }
 0x1b3   : > { %878 = vst [vmem:[%s1675_s11 + $0x48] sm:$0xff] %v689_v36  ;;  %880 = vst [vmem:[%s1675_s11 + $0x58] sm:$0xff] %v802_v38  ;;  %v691_v39 = vpop.f32.mrb[6].mxu0  ;;  %v804_v44 = vpop.f32.mrb[6].mxu1 }
 0x1b4   : > { %881 = vst [vmem:[%s1675_s11 + $0x60] sm:$0xff] %v691_v39  ;;  %883 = vst [vmem:[%s1675_s11 + $0x70] sm:$0xff] %v804_v44  ;;  %v693_v45 = vpop.f32.mrb[7].mxu0  ;;  %v806_v46 = vpop.f32.mrb[7].mxu1 }
 0x1b5   : > { %882 = vst [vmem:[%s1675_s11 + $0x68] sm:$0xff] %v693_v45  ;;  %884 = vst [vmem:[%s1675_s11 + $0x78] sm:$0xff] %v806_v46 }
 0x1b9   : > { %v697_v41 = vpop.f32.mrb[8].mxu0  ;;  %v810_v40 = vpop.f32.mrb[8].mxu1 }
 0x1ba   : > { %885 = vst [vmem:[%s1675_s11 + $0x80] sm:$0xff] %v697_v41  ;;  %887 = vst [vmem:[%s1675_s11 + $0x90] sm:$0xff] %v810_v40  ;;  %v699_v47 = vpop.f32.mrb[9].mxu0  ;;  %v812_v48 = vpop.f32.mrb[9].mxu1 }
 0x1bb   : > { %886 = vst [vmem:[%s1675_s11 + $0x88] sm:$0xff] %v699_v47  ;;  %888 = vst [vmem:[%s1675_s11 + $0x98] sm:$0xff] %v812_v48  ;;  %v701_v49 = vpop.f32.mrb[10].mxu0  ;;  %v814_v50 = vpop.f32.mrb[10].mxu1 }
 0x1bc   : > { %889 = vst [vmem:[%s1675_s11 + $0xa0] sm:$0xff] %v701_v49  ;;  %891 = vst [vmem:[%s1675_s11 + $0xb0] sm:$0xff] %v814_v50  ;;  %v703_v51 = vpop.f32.mrb[11].mxu0  ;;  %v816_v54 = vpop.f32.mrb[11].mxu1 }
 0x1bd   : > { %890 = vst [vmem:[%s1675_s11 + $0xa8] sm:$0xff] %v703_v51  ;;  %892 = vst [vmem:[%s1675_s11 + $0xb8] sm:$0xff] %v816_v54 }
 0x1c1   : > { %v707_v55 = vpop.f32.mrb[12].mxu0  ;;  %v820_v56 = vpop.f32.mrb[12].mxu1 }
 0x1c2   : > { %893 = vst [vmem:[%s1675_s11 + $0xc0] sm:$0xff] %v707_v55  ;;  %895 = vst [vmem:[%s1675_s11 + $0xd0] sm:$0xff] %v820_v56  ;;  %v709_v57 = vpop.f32.mrb[13].mxu0  ;;  %v822_v60 = vpop.f32.mrb[13].mxu1 }
 0x1c3   : > { %894 = vst [vmem:[%s1675_s11 + $0xc8] sm:$0xff] %v709_v57  ;;  %896 = vst [vmem:[%s1675_s11 + $0xd8] sm:$0xff] %v822_v60  ;;  %v711_v61 = vpop.f32.mrb[14].mxu0  ;;  %v824_v43 = vpop.f32.mrb[14].mxu1 }
 0x1c4   : > { %897 = vst [vmem:[%s1675_s11 + $0xe0] sm:$0xff] %v711_v61  ;;  %899 = vst [vmem:[%s1675_s11 + $0xf0] sm:$0xff] %v824_v43  ;;  %v713_v62 = vpop.f32.mrb[15].mxu0  ;;  %v826_v42 = vpop.f32.mrb[15].mxu1 }
 0x1c5   : > { %898 = vst [vmem:[%s1675_s11 + $0xe8] sm:$0xff] %v713_v62  ;;  %900 = vst [vmem:[%s1675_s11 + $0xf8] sm:$0xff] %v826_v42 }
 0x1c9   : > { %v717_v63 = vpop.f32.mrb[16].mxu0  ;;  %v830_v0 = vpop.f32.mrb[16].mxu1 }
 0x1ca   : > { %901 = vst [vmem:[%s1675_s11 + $0x100] sm:$0xff] %v717_v63  ;;  %903 = vst [vmem:[%s1675_s11 + $0x110] sm:$0xff] %v830_v0  ;;  %v719_v1 = vpop.f32.mrb[17].mxu0  ;;  %v832_v3 = vpop.f32.mrb[17].mxu1 }
 0x1cb   : > { %902 = vst [vmem:[%s1675_s11 + $0x108] sm:$0xff] %v719_v1  ;;  %904 = vst [vmem:[%s1675_s11 + $0x118] sm:$0xff] %v832_v3  ;;  %v721_v4 = vpop.f32.mrb[18].mxu0  ;;  %v834_v6 = vpop.f32.mrb[18].mxu1 }
 0x1cc   : > { %905 = vst [vmem:[%s1675_s11 + $0x120] sm:$0xff] %v721_v4  ;;  %907 = vst [vmem:[%s1675_s11 + $0x130] sm:$0xff] %v834_v6  ;;  %v723_v7 = vpop.f32.mrb[19].mxu0  ;;  %v836_v9 = vpop.f32.mrb[19].mxu1 }
 0x1cd   : > { %906 = vst [vmem:[%s1675_s11 + $0x128] sm:$0xff] %v723_v7  ;;  %908 = vst [vmem:[%s1675_s11 + $0x138] sm:$0xff] %v836_v9 }
 0x1d1   : > { %v727_v10 = vpop.f32.mrb[20].mxu0  ;;  %v840_v11 = vpop.f32.mrb[20].mxu1 }
 0x1d2   : > { %909 = vst [vmem:[%s1675_s11 + $0x140] sm:$0xff] %v727_v10  ;;  %911 = vst [vmem:[%s1675_s11 + $0x150] sm:$0xff] %v840_v11  ;;  %v729_v53 = vpop.f32.mrb[21].mxu0  ;;  %v842_v14 = vpop.f32.mrb[21].mxu1 }
 0x1d3   : > { %910 = vst [vmem:[%s1675_s11 + $0x148] sm:$0xff] %v729_v53  ;;  %912 = vst [vmem:[%s1675_s11 + $0x158] sm:$0xff] %v842_v14  ;;  %v731_v52 = vpop.f32.mrb[22].mxu0  ;;  %v844_v15 = vpop.f32.mrb[22].mxu1 }
 0x1d4   : > { %913 = vst [vmem:[%s1675_s11 + $0x160] sm:$0xff] %v731_v52  ;;  %915 = vst [vmem:[%s1675_s11 + $0x170] sm:$0xff] %v844_v15  ;;  %v733_v16 = vpop.f32.mrb[23].mxu0  ;;  %v846_v17 = vpop.f32.mrb[23].mxu1 }
 0x1d5   : > { %914 = vst [vmem:[%s1675_s11 + $0x168] sm:$0xff] %v733_v16  ;;  %916 = vst [vmem:[%s1675_s11 + $0x178] sm:$0xff] %v846_v17 }
 0x1d9   : > { %v737_v18 = vpop.f32.mrb[24].mxu0  ;;  %v850_v19 = vpop.f32.mrb[24].mxu1 }
 0x1da   : > { %917 = vst [vmem:[%s1675_s11 + $0x180] sm:$0xff] %v737_v18  ;;  %919 = vst [vmem:[%s1675_s11 + $0x190] sm:$0xff] %v850_v19  ;;  %v739_v32 = vpop.f32.mrb[25].mxu0  ;;  %v852_v20 = vpop.f32.mrb[25].mxu1 }
 0x1db   : > { %918 = vst [vmem:[%s1675_s11 + $0x188] sm:$0xff] %v739_v32  ;;  %920 = vst [vmem:[%s1675_s11 + $0x198] sm:$0xff] %v852_v20  ;;  %v741_v21 = vpop.f32.mrb[26].mxu0  ;;  %v854_v59 = vpop.f32.mrb[26].mxu1 }
 0x1dc   : > { %921 = vst [vmem:[%s1675_s11 + $0x1a0] sm:$0xff] %v741_v21  ;;  %923 = vst [vmem:[%s1675_s11 + $0x1b0] sm:$0xff] %v854_v59  ;;  %v743_v58 = vpop.f32.mrb[27].mxu0  ;;  %v856_v22 = vpop.f32.mrb[27].mxu1 }
 0x1dd   : > { %922 = vst [vmem:[%s1675_s11 + $0x1a8] sm:$0xff] %v743_v58  ;;  %924 = vst [vmem:[%s1675_s11 + $0x1b8] sm:$0xff] %v856_v22 }
 0x1e1   : > { %v747_v23 = vpop.f32.mrb[28].mxu0  ;;  %v860_v24 = vpop.f32.mrb[28].mxu1 }
 0x1e2   : > { %925 = vst [vmem:[%s1675_s11 + $0x1c0] sm:$0xff] %v747_v23  ;;  %927 = vst [vmem:[%s1675_s11 + $0x1d0] sm:$0xff] %v860_v24  ;;  %v749_v34 = vpop.f32.mrb[29].mxu0  ;;  %v862_v25 = vpop.f32.mrb[29].mxu1 }
 0x1e3   : > { %926 = vst [vmem:[%s1675_s11 + $0x1c8] sm:$0xff] %v749_v34  ;;  %928 = vst [vmem:[%s1675_s11 + $0x1d8] sm:$0xff] %v862_v25  ;;  %v751_v5 = vpop.f32.mrb[30].mxu0  ;;  %v864_v2 = vpop.f32.mrb[30].mxu1 }
 0x1e4   : > { %929 = vst [vmem:[%s1675_s11 + $0x1e0] sm:$0xff] %v751_v5  ;;  %931 = vst [vmem:[%s1675_s11 + $0x1f0] sm:$0xff] %v864_v2  ;;  %v753_v26 = vpop.f32.mrb[31].mxu0  ;;  %v866_v27 = vpop.f32.mrb[31].mxu1 }
 0x1e5   : > { %930 = vst [vmem:[%s1675_s11 + $0x1e8] sm:$0xff] %v753_v26  ;;  %932 = vst [vmem:[%s1675_s11 + $0x1f8] sm:$0xff] %v866_v27 }
 0x1e6   : > { %1247 = shalt.err (!%p1244_p7)
}
 0x1e7   : > { %s1248_s6 = scalar_lea.hbm %s1738_s27, 8192  ;;  %s1252_s30 = scalar_lea.hbm %s1800_s3, 16384 }
 0x1e8   : > { %p1249_p8 = scmp.ne.s32.totalorder %s1738_s27, %s1248_s6  ;;  %p1253_p13 = scmp.lt.u32.totalorder %s1738_s27, %s1800_s3 }
 0x1e9   : > { %p1254_p0 = scmp.lt.u32.totalorder %s1252_s30, %s1248_s6  ;;  %p1256_p2 = scmp.lt.u32.totalorder %s1248_s6, %s1738_s27 }
 0x1ea   : > { %p1250_p11 = pnand %p1249_p8, %p1378_p5 }
 0x1eb   : > { %p1255_p1 = por %p1254_p0, %p1253_p13 }
 0x1ec   : > { %p1251_p12 = pneg %p1250_p11 }
 0x1ed   : > { %p1257_p3 = por %p1256_p2, %p1255_p1 }
 0x1ef   : > { %p1258_p4 = pnand %p1257_p3, %p1251_p12 }
 0x1f1   : > { %1261 = shalt.err (!%p1258_p4)
}
 0x1f2   : > { %s1316_s11 = smov 512   ;;  %s1317_s19 = smov 1024  }
 0x1f3   : > { %s1318_s23 = smov 32  }
 0x1f4   : > { %1095 = dma.vmem_to_hbm [thread:$0]  (%p1378_p5), %s1742_s21, 8192, %s1738_s27, %s934_s15, %s1316_s11, %s1317_s19, %s1318_s23  }
 0x1f5 PF: > { %s965_s26 = sand.u32 1, %s1292_s12   ;;  %p1098_p6 = pnand %p1048_p10, %p1389_p9 }
 0x1f6   : > { %s966_s28 = scalar_lea.sflag [#allocation4], %s965_s26 }
 0x1f7   : > { %1287 = dma.done.wait (!%p1098_p6), %s966_s28, 8192  }
 0x1f8   : > { %1289 = vsyncadd (!%p1098_p6), %s966_s28, 4294959104  ;;  %s16_s17 = sadd.s32 1, %s1312_s17   ;;  %s1803_s12 = smov %s1296_s13 }
 0x1f9   : > { %p13_p7 = scmp.ge.s32.totalorder %s16_s17, 4   ;;  %s1804_s13 = smov %s1300_s14 }
 0x1fa   : > { %s1805_s14 = smov %s1387_s24  ;;  %s1806_s15 = smov %s1308_s16 }
 0x1fb   : > { %s1807_s16 = smov %s1809_s20  ;;  %15 = sbr.rel (!%p13_p7) target bundleno = 4 (0x4), region = 98 }
 0x202   :  { %971 = vsyncpa [#allocation4], 1 }
 0x203   :  { %973 = vsyncpa [#allocation4 + $0x1], 1 }

// kernel: minimal_llm_forward.7
= control target key start
LH: loop header
LB: loop body
LE: loop exit
PB: predicated region body
PF: predicated region fallthrough
CT: control target
= control target key end

     0   :  { %v735_v53 = vmov 0   ;;  %s1129_s0 = inlined_call_operand.vmem [shape: f32[128,128], index: 0, kind: input, shape index: {}]   ;;  %s1130_s2 = inlined_call_operand.vmem [shape: bf16[128,384], index: 2, kind: input, shape index: {}]   ;;  %s1131_s1 = inlined_call_operand.vmem [shape: f32[1,128], index: 1, kind: input, shape index: {}]   ;;  %s1132_s3 = inlined_call_operand.vmem [shape: f32[128,384], index: 3, kind: output, shape index: {}]  }
   0x1   :  { %v759_v0 = vld [vmem:[%s1129_s0] sm:$0xff]  ;;  %v764_v1 = vld [vmem:[%s1129_s0 + $0x10] sm:$0xff]  ;;  %v769_v2 = vld [vmem:[%s1129_s0 + $0x8] sm:$0xff]  ;;  %367 = vmatprep.mubr.bf16.mxu0 %v735_v53 }
   0x2   :  { %v31_v3 = vmul.f32 %v759_v0, %v759_v0  ;;  %v33_v4 = vmul.f32 %v764_v1, %v764_v1  ;;  %v778_v5 = vld [vmem:[%s1129_s0 + $0x18] sm:$0xff]  ;;  %v32_v6 = vmul.f32 %v769_v2, %v769_v2  ;;  %v787_v8 = vld [vmem:[%s1129_s0 + $0x28] sm:$0xff]  ;;  %v792_v9 = vld [vmem:[%s1129_s0 + $0x20] sm:$0xff] }
   0x3   :  { %v34_v7 = vmul.f32 %v778_v5, %v778_v5  ;;  %v797_v10 = vld [vmem:[%s1129_s0 + $0x38] sm:$0xff]  ;;  %v802_v11 = vld [vmem:[%s1129_s0 + $0x30] sm:$0xff]  ;;  %v673_v13 = vld [vmem:[%s1130_s2] ss:$12 sps:$4 sm:$0xff]   ;;  %v36_v14 = vmul.f32 %v787_v8, %v787_v8  ;;  %v35_v15 = vmul.f32 %v792_v9, %v792_v9 }
   0x4   :  { %47 = vadd.xlane.f32.xlu0 %v31_v3  ;;  %51 = vadd.xlane.f32.xlu1 %v33_v4  ;;  %v671_v12 = vld [vmem:[%s1130_s2 + $0x4] ss:$12 sps:$4 sm:$0xff]   ;;  %v674_v16 = vld [vmem:[%s1130_s2 + $0x8] ss:$12 sps:$4 sm:$0xff]   ;;  %v678_v19 = vld [vmem:[%s1130_s2 + $0x20] ss:$12 sps:$4 sm:$0xff]   ;;  %v38_v22 = vmul.f32 %v797_v10, %v797_v10  ;;  %v37_v23 = vmul.f32 %v802_v11, %v802_v11 }
   0x5   :  { %335 = vmatprep.subr.bf16.mxu0 %v671_v12  ;;  %v675_v17 = vld [vmem:[%s1130_s2 + $0x1c] ss:$12 sps:$4 sm:$0xff]   ;;  %v677_v18 = vld [vmem:[%s1130_s2 + $0x18] ss:$12 sps:$4 sm:$0xff]   ;;  %638 = vmatprep.subr.bf16.mxu1 %v674_v16  ;;  %v848_v25 = vld [vmem:[%s1129_s0 + $0x50] sm:$0xff] }
   0x6   :  { %336 = vmatpush1.bf16.msra.mxu0 %v673_v13  ;;  %v829_v20 = vld [vmem:[%s1129_s0 + $0x48] sm:$0xff]  ;;  %v834_v21 = vld [vmem:[%s1129_s0 + $0x40] sm:$0xff]  ;;  %639 = vmatpush3.bf16.msra.mxu1 %v674_v16  ;;  %v843_v24 = vld [vmem:[%s1129_s0 + $0x58] sm:$0xff]  ;;  %v41_v32 = vmul.f32 %v848_v25, %v848_v25 }
   0x7   :  { %337 = vmatprep.subr.bf16.mxu0 %v675_v17  ;;  %640 = vmatprep.subr.bf16.mxu1 %v678_v19  ;;  %v40_v26 = vmul.f32 %v829_v20, %v829_v20  ;;  %v39_v27 = vmul.f32 %v834_v21, %v834_v21  ;;  %v679_v28 = vld [vmem:[%s1130_s2 + $0x34] ss:$12 sps:$4 sm:$0xff]   ;;  %v681_v29 = vld [vmem:[%s1130_s2 + $0x30] ss:$12 sps:$4 sm:$0xff]   ;;  %v682_v30 = vld [vmem:[%s1130_s2 + $0x38] ss:$12 sps:$4 sm:$0xff]   ;;  %v42_v31 = vmul.f32 %v843_v24, %v843_v24 }
   0x8   :  { %49 = vadd.xlane.f32.xlu0 %v32_v6  ;;  %53 = vadd.xlane.f32.xlu1 %v34_v7  ;;  %v870_v33 = vld [vmem:[%s1129_s0 + $0x68] sm:$0xff]  ;;  %v875_v34 = vld [vmem:[%s1129_s0 + $0x60] sm:$0xff]  ;;  %v686_v37 = vld [vmem:[%s1130_s2 + $0x50] ss:$12 sps:$4 sm:$0xff]  }
   0x9   :  { %v683_v35 = vld [vmem:[%s1130_s2 + $0x4c] ss:$12 sps:$4 sm:$0xff]   ;;  %v685_v36 = vld [vmem:[%s1130_s2 + $0x48] ss:$12 sps:$4 sm:$0xff]   ;;  %v44_v38 = vmul.f32 %v870_v33, %v870_v33  ;;  %v43_v39 = vmul.f32 %v875_v34, %v875_v34  ;;  %v687_v42 = vld [vmem:[%s1130_s2 + $0x64] ss:$12 sps:$4 sm:$0xff]  }
   0xa   :  { %338 = vmatpush1.bf16.msra.mxu0 %v677_v18  ;;  %641 = vmatpush3.bf16.msra.mxu1 %v678_v19  ;;  %v893_v40 = vld [vmem:[%s1129_s0 + $0x78] sm:$0xff]  ;;  %v898_v41 = vld [vmem:[%s1129_s0 + $0x70] sm:$0xff]  ;;  %v689_v43 = vld [vmem:[%s1130_s2 + $0x60] ss:$12 sps:$4 sm:$0xff]  }
   0xb   :  { %339 = vmatprep.subr.bf16.mxu0 %v679_v28  ;;  %642 = vmatprep.subr.bf16.mxu1 %v682_v30  ;;  %v690_v44 = vld [vmem:[%s1130_s2 + $0x68] ss:$12 sps:$4 sm:$0xff]   ;;  %v694_v46 = vld [vmem:[%s1130_s2 + $0x80] ss:$12 sps:$4 sm:$0xff]   ;;  %v46_v47 = vmul.f32 %v893_v40, %v893_v40  ;;  %v45_v48 = vmul.f32 %v898_v41, %v898_v41  ;;  %v693_v49 = vld [vmem:[%s1130_s2 + $0x78] ss:$12 sps:$4 sm:$0xff]  }
   0xc   :  { %57 = vadd.xlane.f32.xlu1 %v36_v14  ;;  %55 = vadd.xlane.f32.xlu0 %v35_v15  ;;  %v691_v45 = vld [vmem:[%s1130_s2 + $0x7c] ss:$12 sps:$4 sm:$0xff]   ;;  %v695_v50 = vld [vmem:[%s1130_s2 + $0x94] ss:$12 sps:$4 sm:$0xff]   ;;  %v698_v51 = vld [vmem:[%s1130_s2 + $0x98] ss:$12 sps:$4 sm:$0xff]  }
   0xd   :  { %v697_v52 = vld [vmem:[%s1130_s2 + $0x90] ss:$12 sps:$4 sm:$0xff]   ;;  %v699_v54 = vld [vmem:[%s1130_s2 + $0xac] ss:$12 sps:$4 sm:$0xff]   ;;  %v701_v56 = vld [vmem:[%s1130_s2 + $0xa8] ss:$12 sps:$4 sm:$0xff]  }
   0xe   :  { %340 = vmatpush1.bf16.msra.mxu0 %v681_v29  ;;  %643 = vmatpush3.bf16.msra.mxu1 %v682_v30  ;;  %v702_v55 = vld [vmem:[%s1130_s2 + $0xb0] ss:$12 sps:$4 sm:$0xff]  }
   0xf   :  { %341 = vmatprep.subr.bf16.mxu0 %v683_v35  ;;  %644 = vmatprep.subr.bf16.mxu1 %v686_v37 }
  0x10   :  { %61 = vadd.xlane.f32.xlu1 %v38_v22  ;;  %59 = vadd.xlane.f32.xlu0 %v37_v23 }
  0x12   :  { %342 = vmatpush1.bf16.msra.mxu0 %v685_v36  ;;  %645 = vmatpush3.bf16.msra.mxu1 %v686_v37 }
  0x13   :  { %343 = vmatprep.subr.bf16.mxu0 %v687_v42  ;;  %646 = vmatprep.subr.bf16.mxu1 %v690_v44  ;;  %v946_v42 = vld [vmem:[%s1131_s1] ss:$0 sm:$0xff] }
  0x14   :  { %65 = vadd.xlane.f32.xlu1 %v40_v26  ;;  %63 = vadd.xlane.f32.xlu0 %v39_v27 }
  0x16   :  { %344 = vmatpush1.bf16.msra.mxu0 %v689_v43  ;;  %647 = vmatpush3.bf16.msra.mxu1 %v690_v44 }
  0x17   :  { %345 = vmatprep.subr.bf16.mxu0 %v691_v45  ;;  %648 = vmatprep.subr.bf16.mxu1 %v694_v46 }
  0x18   :  { %69 = vadd.xlane.f32.xlu1 %v42_v31  ;;  %67 = vadd.xlane.f32.xlu0 %v41_v32 }
  0x1a   :  { %346 = vmatpush1.bf16.msra.mxu0 %v693_v49  ;;  %649 = vmatpush3.bf16.msra.mxu1 %v694_v46 }
  0x1b   :  { %347 = vmatprep.subr.bf16.mxu0 %v695_v50  ;;  %650 = vmatprep.subr.bf16.mxu1 %v698_v51 }
  0x1c   :  { %73 = vadd.xlane.f32.xlu1 %v44_v38  ;;  %71 = vadd.xlane.f32.xlu0 %v43_v39 }
  0x1e   :  { %348 = vmatpush1.bf16.msra.mxu0 %v697_v52  ;;  %651 = vmatpush3.bf16.msra.mxu1 %v698_v51 }
  0x1f   :  { %349 = vmatprep.subr.bf16.mxu0 %v699_v54  ;;  %652 = vmatprep.subr.bf16.mxu1 %v702_v55 }
  0x20   :  { %77 = vadd.xlane.f32.xlu1 %v46_v47  ;;  %75 = vadd.xlane.f32.xlu0 %v45_v48 }
  0x22   :  { %350 = vmatpush1.bf16.msra.mxu0 %v701_v56  ;;  %653 = vmatpush3.bf16.msra.mxu1 %v702_v55 }
  0x91   :  { %v48_v57 = vpop.xlane.xlu0 %47  ;;  %v52_v58 = vpop.xlane.xlu1 %51 }
  0x92   :  { %v80_v59 = vmul.f32 0.0078125, %v48_v57  ;;  %v82_v60 = vmul.f32 0.0078125, %v52_v58 }
  0x94   :  { %v96_v61 = vadd.f32 1.1920929e-07, %v80_v59  ;;  %v98_v62 = vadd.f32 1.1920929e-07, %v82_v60 }
  0x95   :  { %v50_v63 = vpop.xlane.xlu0 %49  ;;  %v54_v3 = vpop.xlane.xlu1 %53 }
  0x96   :  { %703 = vrsqrt.f32 %v96_v61  ;;  %v81_v4 = vmul.f32 0.0078125, %v50_v63  ;;  %v83_v6 = vmul.f32 0.0078125, %v54_v3 }
  0x97   :  { %705 = vrsqrt.f32 %v98_v62 }
  0x98   :  { %v97_v7 = vadd.f32 1.1920929e-07, %v81_v4  ;;  %v99_v12 = vadd.f32 1.1920929e-07, %v83_v6 }
  0x99   :  { %v58_v13 = vpop.xlane.xlu1 %57  ;;  %v56_v14 = vpop.xlane.xlu0 %55 }
  0x9a   :  { %707 = vrsqrt.f32 %v97_v7  ;;  %v85_v15 = vmul.f32 0.0078125, %v58_v13  ;;  %v84_v16 = vmul.f32 0.0078125, %v56_v14 }
  0x9b   :  { %709 = vrsqrt.f32 %v99_v12 }
  0x9c   :  { %v101_v17 = vadd.f32 1.1920929e-07, %v85_v15  ;;  %v100_v18 = vadd.f32 1.1920929e-07, %v84_v16 }
  0x9d   :  { %v62_v19 = vpop.xlane.xlu1 %61  ;;  %v60_v22 = vpop.xlane.xlu0 %59 }
  0x9e   :  { %711 = vrsqrt.f32 %v101_v17  ;;  %v87_v23 = vmul.f32 0.0078125, %v62_v19  ;;  %v86_v26 = vmul.f32 0.0078125, %v60_v22 }
  0x9f   :  { %713 = vrsqrt.f32 %v100_v18 }
  0xa0   :  { %v704_v27 = vpop.eup %703  ;;  %v103_v28 = vadd.f32 1.1920929e-07, %v87_v23  ;;  %v102_v29 = vadd.f32 1.1920929e-07, %v86_v26 }
  0xa1   :  { %v706_v30 = vpop.eup %705  ;;  %v66_v31 = vpop.xlane.xlu1 %65  ;;  %v128_v38 = vmul.f32 %v704_v27, %v759_v0 }
  0xa2   :  { %v64_v32 = vpop.xlane.xlu0 %63  ;;  %715 = vrsqrt.f32 %v103_v28  ;;  %v130_v35 = vmul.f32 %v706_v30, %v764_v1  ;;  %v89_v36 = vmul.f32 0.0078125, %v66_v31 }
  0xa3   :  { %v88_v37 = vmul.f32 0.0078125, %v64_v32  ;;  %717 = vrsqrt.f32 %v102_v29  ;;  %v151_v51 = vmul.f32 %v946_v42, %v128_v38 }
  0xa4   :  { %v708_v39 = vpop.eup %707  ;;  %v105_v43 = vadd.f32 1.1920929e-07, %v89_v36  ;;  %v153_v47 = vmul.f32 %v946_v42, %v130_v35 }
  0xa5   :  { %v104_v44 = vadd.f32 1.1920929e-07, %v88_v37  ;;  %v710_v45 = vpop.eup %709  ;;  %v129_v46 = vmul.f32 %v708_v39, %v769_v2  ;;  %v70_v48 = vpop.xlane.xlu1 %69 }
  0xa6   :  { %v68_v1 = vpop.xlane.xlu0 %67  ;;  %v131_v49 = vmul.f32 %v710_v45, %v778_v5  ;;  %719 = vrsqrt.f32 %v105_v43  ;;  %v91_v50 = vmul.f32 0.0078125, %v70_v48 }
  0xa7   :  { %v90_v0 = vmul.f32 0.0078125, %v68_v1  ;;  %v152_v52 = vmul.f32 %v946_v42, %v129_v46  ;;  %721 = vrsqrt.f32 %v104_v44 }
  0xa8   :  { %v712_v54 = vpop.eup %711  ;;  %v154_v55 = vmul.f32 %v946_v42, %v131_v49  ;;  %v107_v56 = vadd.f32 1.1920929e-07, %v91_v50 }
  0xa9   :  { %v106_v57 = vadd.f32 1.1920929e-07, %v90_v0  ;;  %v714_v2 = vpop.eup %713  ;;  %v167_v58 = vpack.c.bf16 %v152_v52, %v151_v51  ;;  %v133_v59 = vmul.f32 %v712_v54, %v787_v8  ;;  %v74_v60 = vpop.xlane.xlu1 %73 }
  0xaa   :  { %v72_v61 = vpop.xlane.xlu0 %71  ;;  %v168_v5 = vpack.c.bf16 %v154_v55, %v153_v47  ;;  %723 = vrsqrt.f32 %v107_v56  ;;  %v132_v62 = vmul.f32 %v714_v2, %v792_v9  ;;  %v93_v63 = vmul.f32 0.0078125, %v74_v60 }
  0xab   :  { %368 = vmatmul.mubr.bf16.vlgmr.msra.gmra.mrb[0].mxu0 %v167_v58  ;;  %654 = vmatprep.mubr.bf16.mxu1 %v167_v58  ;;  %725 = vrsqrt.f32 %v106_v57  ;;  %v156_v3 = vmul.f32 %v946_v42, %v133_v59  ;;  %v92_v4 = vmul.f32 0.0078125, %v72_v61 }
  0xac   :  { %v716_v6 = vpop.eup %715  ;;  %655 = vmatmul.mubr.bf16.vlgmr.msra.gmra.mrb[0].mxu1 %v168_v5  ;;  %377 = vmatprep.mubr.bf16.mxu0 %v735_v53  ;;  %v155_v7 = vmul.f32 %v946_v42, %v132_v62  ;;  %v109_v8 = vadd.f32 1.1920929e-07, %v93_v63 }
  0xad   :  { %v718_v12 = vpop.eup %717  ;;  %v135_v13 = vmul.f32 %v716_v6, %v797_v10  ;;  %v108_v14 = vadd.f32 1.1920929e-07, %v92_v4  ;;  %v78_v15 = vpop.xlane.xlu1 %77 }
  0xae   :  { %v76_v9 = vpop.xlane.xlu0 %75  ;;  %v169_v16 = vpack.c.bf16 %v156_v3, %v155_v7  ;;  %v134_v17 = vmul.f32 %v718_v12, %v802_v11  ;;  %727 = vrsqrt.f32 %v109_v8  ;;  %v95_v18 = vmul.f32 0.0078125, %v78_v15 }
  0xaf   :  { %v158_v19 = vmul.f32 %v946_v42, %v135_v13  ;;  %729 = vrsqrt.f32 %v108_v14  ;;  %v94_v22 = vmul.f32 0.0078125, %v76_v9 }
  0xb0   :  { %v720_v23 = vpop.eup %719  ;;  %658 = vmatprep.mubr.bf16.mxu1 %v169_v16  ;;  %v157_v26 = vmul.f32 %v946_v42, %v134_v17  ;;  %v111_v27 = vadd.f32 1.1920929e-07, %v95_v18 }
  0xb1   :  { %v722_v28 = vpop.eup %721  ;;  %v110_v29 = vadd.f32 1.1920929e-07, %v94_v22  ;;  %v137_v10 = vmul.f32 %v720_v23, %v829_v20 }
  0xb2   :  { %v170_v30 = vpack.c.bf16 %v158_v19, %v157_v26  ;;  %731 = vrsqrt.f32 %v111_v27  ;;  %v136_v31 = vmul.f32 %v722_v28, %v834_v21 }
  0xb3   :  { %378 = vmatmul.mubr.bf16.gmra.mrb[4].mxu0 %v168_v5  ;;  %733 = vrsqrt.f32 %v110_v29  ;;  %v160_v11 = vmul.f32 %v946_v42, %v137_v10 }
  0xb4   :  { %v724_v32 = vpop.eup %723  ;;  %387 = vmatprep.mubr.bf16.mxu0 %v735_v53  ;;  %659 = vmatmul.mubr.bf16.gmra.mrb[4].mxu1 %v170_v30  ;;  %v159_v35 = vmul.f32 %v946_v42, %v136_v31 }
  0xb5   :  { %v726_v36 = vpop.eup %725  ;;  %v139_v37 = vmul.f32 %v724_v32, %v843_v24 }
  0xb6   :  { %v171_v38 = vpack.c.bf16 %v160_v11, %v159_v35  ;;  %v138_v20 = vmul.f32 %v726_v36, %v848_v25 }
  0xb7   :  { %v162_v39 = vmul.f32 %v946_v42, %v139_v37 }
  0xb8   :  { %v728_v43 = vpop.eup %727  ;;  %662 = vmatprep.mubr.bf16.mxu1 %v171_v38  ;;  %v161_v21 = vmul.f32 %v946_v42, %v138_v20 }
  0xb9   :  { %v730_v44 = vpop.eup %729  ;;  %v141_v45 = vmul.f32 %v728_v43, %v870_v33 }
  0xba   :  { %v172_v46 = vpack.c.bf16 %v162_v39, %v161_v21  ;;  %v140_v47 = vmul.f32 %v730_v44, %v875_v34 }
  0xbb   :  { %388 = vmatmul.mubr.bf16.gmra.mrb[8].mxu0 %v169_v16  ;;  %v164_v48 = vmul.f32 %v946_v42, %v141_v45 }
  0xbc   :  { %v732_v1 = vpop.eup %731  ;;  %397 = vmatprep.mubr.bf16.mxu0 %v735_v53  ;;  %663 = vmatmul.mubr.bf16.gmra.mrb[8].mxu1 %v172_v46  ;;  %v163_v24 = vmul.f32 %v946_v42, %v140_v47 }
  0xbd   :  { %v734_v25 = vpop.eup %733  ;;  %v143_v49 = vmul.f32 %v732_v1, %v893_v40 }
  0xbe   :  { %v173_v50 = vpack.c.bf16 %v164_v48, %v163_v24  ;;  %v142_v0 = vmul.f32 %v734_v25, %v898_v41 }
  0xbf   :  { %v166_v33 = vmul.f32 %v946_v42, %v143_v49 }
  0xc0   :  { %666 = vmatprep.mubr.bf16.mxu1 %v173_v50  ;;  %v165_v34 = vmul.f32 %v946_v42, %v142_v0 }
  0xc2   :  { %v174_v51 = vpack.c.bf16 %v166_v33, %v165_v34 }
  0xc3   :  { %398 = vmatmul.mubr.bf16.gmra.mrb[12].mxu0 %v170_v30 }
  0xc4   :  { %407 = vmatprep.mubr.bf16.mxu0 %v735_v53  ;;  %667 = vmatmul.mubr.bf16.gmra.mrb[12].mxu1 %v174_v51 }
  0xcb   :  { %408 = vmatmul.mubr.bf16.gmra.mrb[16].mxu0 %v171_v38 }
  0xcc   :  { %417 = vmatprep.mubr.bf16.mxu0 %v735_v53 }
  0xd3   :  { %418 = vmatmul.mubr.bf16.gmra.mrb[20].mxu0 %v172_v46 }
  0xd4   :  { %427 = vmatprep.mubr.bf16.mxu0 %v735_v53 }
  0xdb   :  { %428 = vmatmul.mubr.bf16.gmra.mrb[24].mxu0 %v173_v50 }
  0xdc   :  { %437 = vmatprep.mubr.bf16.mxu0 %v735_v53 }
  0xe3   :  { %438 = vmatmul.mubr.bf16.gmra.mrb[28].mxu0 %v174_v51 }
 0x17e   :  { %v369_v40 = vpop.f32.mrb[0].mxu0 }
 0x17f   :  { %545 = vst [vmem:[%s1132_s3] sm:$0xff] %v369_v40  ;;  %v371_v41 = vpop.f32.mrb[1].mxu0  ;;  %v656_v42 = vpop.f32.mrb[0].mxu1 }
 0x180   :  { %546 = vst [vmem:[%s1132_s3 + $0x8] sm:$0xff] %v371_v41  ;;  %553 = vst [vmem:[%s1132_s3 + $0x40] sm:$0xff] %v656_v42  ;;  %v373_v52 = vpop.f32.mrb[2].mxu0  ;;  %v482_v54 = vpop.f32.mrb[1].mxu1 }
 0x181   :  { %548 = vst [vmem:[%s1132_s3 + $0x18] sm:$0xff] %v373_v52  ;;  %547 = vst [vmem:[%s1132_s3 + $0x10] sm:$0xff] %v482_v54  ;;  %v375_v53 = vpop.f32.mrb[3].mxu0  ;;  %v657_v55 = vpop.f32.mrb[2].mxu1 }
 0x182   :  { %549 = vst [vmem:[%s1132_s3 + $0x20] sm:$0xff] %v375_v53  ;;  %556 = vst [vmem:[%s1132_s3 + $0x58] sm:$0xff] %v657_v55  ;;  %v485_v56 = vpop.f32.mrb[3].mxu1 }
 0x183   :  { %550 = vst [vmem:[%s1132_s3 + $0x28] sm:$0xff] %v485_v56 }
 0x186   :  { %v379_v57 = vpop.f32.mrb[4].mxu0 }
 0x187   :  { %551 = vst [vmem:[%s1132_s3 + $0x30] sm:$0xff] %v379_v57  ;;  %v381_v2 = vpop.f32.mrb[5].mxu0  ;;  %v660_v58 = vpop.f32.mrb[4].mxu1 }
 0x188   :  { %552 = vst [vmem:[%s1132_s3 + $0x38] sm:$0xff] %v381_v2  ;;  %v383_v59 = vpop.f32.mrb[6].mxu0  ;;  %565 = vst [vmem:[%s1132_s3 + $0xa0] sm:$0xff] %v660_v58  ;;  %v498_v60 = vpop.f32.mrb[5].mxu1 }
 0x189   :  { %554 = vst [vmem:[%s1132_s3 + $0x48] sm:$0xff] %v383_v59  ;;  %v385_v61 = vpop.f32.mrb[7].mxu0  ;;  %559 = vst [vmem:[%s1132_s3 + $0x70] sm:$0xff] %v498_v60  ;;  %v661_v5 = vpop.f32.mrb[6].mxu1 }
 0x18a   :  { %555 = vst [vmem:[%s1132_s3 + $0x50] sm:$0xff] %v385_v61  ;;  %568 = vst [vmem:[%s1132_s3 + $0xb8] sm:$0xff] %v661_v5  ;;  %v501_v62 = vpop.f32.mrb[7].mxu1 }
 0x18b   :  { %562 = vst [vmem:[%s1132_s3 + $0x88] sm:$0xff] %v501_v62 }
 0x18e   :  { %v389_v63 = vpop.f32.mrb[8].mxu0 }
 0x18f   :  { %557 = vst [vmem:[%s1132_s3 + $0x60] sm:$0xff] %v389_v63  ;;  %v391_v3 = vpop.f32.mrb[9].mxu0  ;;  %v664_v4 = vpop.f32.mrb[8].mxu1 }
 0x190   :  { %558 = vst [vmem:[%s1132_s3 + $0x68] sm:$0xff] %v391_v3  ;;  %v393_v6 = vpop.f32.mrb[10].mxu0  ;;  %577 = vst [vmem:[%s1132_s3 + $0x100] sm:$0xff] %v664_v4  ;;  %v514_v7 = vpop.f32.mrb[9].mxu1 }
 0x191   :  { %560 = vst [vmem:[%s1132_s3 + $0x78] sm:$0xff] %v393_v6  ;;  %v395_v8 = vpop.f32.mrb[11].mxu0  ;;  %571 = vst [vmem:[%s1132_s3 + $0xd0] sm:$0xff] %v514_v7  ;;  %v665_v12 = vpop.f32.mrb[10].mxu1 }
 0x192   :  { %561 = vst [vmem:[%s1132_s3 + $0x80] sm:$0xff] %v395_v8  ;;  %580 = vst [vmem:[%s1132_s3 + $0x118] sm:$0xff] %v665_v12  ;;  %v517_v13 = vpop.f32.mrb[11].mxu1 }
 0x193   :  { %574 = vst [vmem:[%s1132_s3 + $0xe8] sm:$0xff] %v517_v13 }
 0x196   :  { %v399_v14 = vpop.f32.mrb[12].mxu0 }
 0x197   :  { %563 = vst [vmem:[%s1132_s3 + $0x90] sm:$0xff] %v399_v14  ;;  %v401_v15 = vpop.f32.mrb[13].mxu0  ;;  %v668_v9 = vpop.f32.mrb[12].mxu1 }
 0x198   :  { %564 = vst [vmem:[%s1132_s3 + $0x98] sm:$0xff] %v401_v15  ;;  %v403_v16 = vpop.f32.mrb[14].mxu0  ;;  %589 = vst [vmem:[%s1132_s3 + $0x160] sm:$0xff] %v668_v9  ;;  %v530_v17 = vpop.f32.mrb[13].mxu1 }
 0x199   :  { %566 = vst [vmem:[%s1132_s3 + $0xa8] sm:$0xff] %v403_v16  ;;  %v405_v18 = vpop.f32.mrb[15].mxu0  ;;  %583 = vst [vmem:[%s1132_s3 + $0x130] sm:$0xff] %v530_v17  ;;  %v669_v19 = vpop.f32.mrb[14].mxu1 }
 0x19a   :  { %567 = vst [vmem:[%s1132_s3 + $0xb0] sm:$0xff] %v405_v18  ;;  %592 = vst [vmem:[%s1132_s3 + $0x178] sm:$0xff] %v669_v19  ;;  %v533_v22 = vpop.f32.mrb[15].mxu1 }
 0x19b   :  { %586 = vst [vmem:[%s1132_s3 + $0x148] sm:$0xff] %v533_v22 }
 0x19e   :  { %v409_v23 = vpop.f32.mrb[16].mxu0 }
 0x19f   :  { %569 = vst [vmem:[%s1132_s3 + $0xc0] sm:$0xff] %v409_v23  ;;  %v411_v26 = vpop.f32.mrb[17].mxu0 }
 0x1a0   :  { %570 = vst [vmem:[%s1132_s3 + $0xc8] sm:$0xff] %v411_v26  ;;  %v413_v27 = vpop.f32.mrb[18].mxu0 }
 0x1a1   :  { %572 = vst [vmem:[%s1132_s3 + $0xd8] sm:$0xff] %v413_v27  ;;  %v415_v28 = vpop.f32.mrb[19].mxu0 }
 0x1a2   :  { %573 = vst [vmem:[%s1132_s3 + $0xe0] sm:$0xff] %v415_v28 }
 0x1a6   :  { %v419_v29 = vpop.f32.mrb[20].mxu0 }
 0x1a7   :  { %575 = vst [vmem:[%s1132_s3 + $0xf0] sm:$0xff] %v419_v29  ;;  %v421_v10 = vpop.f32.mrb[21].mxu0 }
 0x1a8   :  { %576 = vst [vmem:[%s1132_s3 + $0xf8] sm:$0xff] %v421_v10  ;;  %v423_v30 = vpop.f32.mrb[22].mxu0 }
 0x1a9   :  { %578 = vst [vmem:[%s1132_s3 + $0x108] sm:$0xff] %v423_v30  ;;  %v425_v31 = vpop.f32.mrb[23].mxu0 }
 0x1aa   :  { %579 = vst [vmem:[%s1132_s3 + $0x110] sm:$0xff] %v425_v31 }
 0x1ae   :  { %v429_v11 = vpop.f32.mrb[24].mxu0 }
 0x1af   :  { %581 = vst [vmem:[%s1132_s3 + $0x120] sm:$0xff] %v429_v11  ;;  %v431_v32 = vpop.f32.mrb[25].mxu0 }
 0x1b0   :  { %582 = vst [vmem:[%s1132_s3 + $0x128] sm:$0xff] %v431_v32  ;;  %v433_v35 = vpop.f32.mrb[26].mxu0 }
 0x1b1   :  { %584 = vst [vmem:[%s1132_s3 + $0x138] sm:$0xff] %v433_v35  ;;  %v435_v36 = vpop.f32.mrb[27].mxu0 }
 0x1b2   :  { %585 = vst [vmem:[%s1132_s3 + $0x140] sm:$0xff] %v435_v36 }
 0x1b6   :  { %v439_v37 = vpop.f32.mrb[28].mxu0 }
 0x1b7   :  { %587 = vst [vmem:[%s1132_s3 + $0x150] sm:$0xff] %v439_v37  ;;  %v441_v38 = vpop.f32.mrb[29].mxu0 }
 0x1b8   :  { %588 = vst [vmem:[%s1132_s3 + $0x158] sm:$0xff] %v441_v38  ;;  %v443_v20 = vpop.f32.mrb[30].mxu0 }
 0x1b9   :  { %590 = vst [vmem:[%s1132_s3 + $0x168] sm:$0xff] %v443_v20  ;;  %v445_v39 = vpop.f32.mrb[31].mxu0 }
 0x1ba   :  { %591 = vst [vmem:[%s1132_s3 + $0x170] sm:$0xff] %v445_v39 }

// kernel: minimal_llm_forward.9
= control target key start
LH: loop header
LB: loop body
LE: loop exit
PB: predicated region body
PF: predicated region fallthrough
CT: control target
= control target key end

     0   :  { %s3356_s2 = inlined_call_operand.vmem [shape: bf16[128,128], index: 2, kind: input, shape index: {}]   ;;  %s3357_s1 = inlined_call_operand.vmem [shape: f32[128,128], index: 1, kind: input, shape index: {}]   ;;  %s3358_s4 = inlined_call_operand.vmem [shape: bf16[128,512], index: 4, kind: input, shape index: {}]   ;;  %s3359_s0 = inlined_call_operand.vmem [shape: f32[128,128], index: 0, kind: input, shape index: {}]   ;;  %s3360_s5 = inlined_call_operand.vmem [shape: bf16[512,128], index: 5, kind: input, shape index: {}]   ;;  %s3361_s3 = inlined_call_operand.vmem [shape: f32[1,128], index: 3, kind: input, shape index: {}]   ;;  %s3362_s6 = inlined_call_operand.vmem [shape: f32[128,128], index: 6, kind: output, shape index: {}]  }
   0x1   :  { %v2099_v0 = vld [vmem:[%s3356_s2] sm:$0xff]   ;;  %v2100_v1 = vld [vmem:[%s3356_s2 + $0x8] sm:$0xff]   ;;  %v2101_v2 = vld [vmem:[%s3356_s2 + $0x10] sm:$0xff]  }
   0x2   :  { %2050 = vmatprep.subr.bf16.mxu0 %v2099_v0  ;;  %v2102_v3 = vld [vmem:[%s3356_s2 + $0x18] sm:$0xff]   ;;  %v40_v4 = vld [vmem:[%s3357_s1] sm:$0xff]  ;;  %v41_v5 = vld [vmem:[%s3357_s1 + $0x8] sm:$0xff] }
   0x3   :  { %2051 = vmatpush3.bf16.msra.mxu0 %v2099_v0  ;;  %v56_v6 = vpack.c.bf16 %v41_v5, %v40_v4  ;;  %v2103_v7 = vld [vmem:[%s3356_s2 + $0x20] sm:$0xff]   ;;  %v2104_v8 = vld [vmem:[%s3356_s2 + $0x28] sm:$0xff]   ;;  %v2105_v9 = vld [vmem:[%s3356_s2 + $0x30] sm:$0xff]  }
   0x4   :  { %2052 = vmatprep.subr.bf16.mxu0 %v2100_v1  ;;  %v2106_v10 = vld [vmem:[%s3356_s2 + $0x38] sm:$0xff]   ;;  %v42_v11 = vld [vmem:[%s3357_s1 + $0x10] sm:$0xff]  ;;  %v44_v13 = vld [vmem:[%s3357_s1 + $0x20] sm:$0xff] }
   0x5   :  { %2066 = vmatprep.mubr.bf16.mxu0 %v56_v6  ;;  %v43_v12 = vld [vmem:[%s3357_s1 + $0x18] sm:$0xff]  ;;  %v45_v14 = vld [vmem:[%s3357_s1 + $0x28] sm:$0xff]  ;;  %v46_v17 = vld [vmem:[%s3357_s1 + $0x30] sm:$0xff] }
   0x6   :  { %v57_v15 = vpack.c.bf16 %v43_v12, %v42_v11  ;;  %v58_v16 = vpack.c.bf16 %v45_v14, %v44_v13  ;;  %v47_v18 = vld [vmem:[%s3357_s1 + $0x38] sm:$0xff]  ;;  %v48_v19 = vld [vmem:[%s3357_s1 + $0x40] sm:$0xff]  ;;  %v49_v20 = vld [vmem:[%s3357_s1 + $0x48] sm:$0xff] }
   0x7   :  { %2053 = vmatpush3.bf16.msra.mxu0 %v2100_v1  ;;  %v59_v21 = vpack.c.bf16 %v47_v18, %v46_v17  ;;  %v60_v22 = vpack.c.bf16 %v49_v20, %v48_v19  ;;  %v50_v23 = vld [vmem:[%s3357_s1 + $0x50] sm:$0xff]  ;;  %v51_v24 = vld [vmem:[%s3357_s1 + $0x58] sm:$0xff]  ;;  %v52_v25 = vld [vmem:[%s3357_s1 + $0x60] sm:$0xff] }
   0x8   :  { %2054 = vmatprep.subr.bf16.mxu0 %v2101_v2  ;;  %v53_v26 = vld [vmem:[%s3357_s1 + $0x68] sm:$0xff]  ;;  %v61_v27 = vpack.c.bf16 %v51_v24, %v50_v23  ;;  %v54_v29 = vld [vmem:[%s3357_s1 + $0x70] sm:$0xff]  ;;  %v55_v30 = vld [vmem:[%s3357_s1 + $0x78] sm:$0xff] }
   0x9   :  { %v62_v28 = vpack.c.bf16 %v53_v26, %v52_v25  ;;  %v63_v31 = vpack.c.bf16 %v55_v30, %v54_v29  ;;  %v2107_v32 = vld [vmem:[%s3358_s4 + $0x4] ss:$16 sps:$4 sm:$0xff]   ;;  %v2109_v33 = vld [vmem:[%s3358_s4 + $0x8] ss:$16 sps:$4 sm:$0xff]   ;;  %v2111_v34 = vld [vmem:[%s3358_s4 + $0xc] ss:$16 sps:$4 sm:$0xff]  }
   0xa   :  { %577 = vmatprep.subr.bf16.mxu1 %v2107_v32  ;;  %v2112_v35 = vld [vmem:[%s3358_s4] ss:$16 sps:$4 sm:$0xff]   ;;  %v2113_v36 = vld [vmem:[%s3358_s4 + $0x24] ss:$16 sps:$4 sm:$0xff]   ;;  %v2115_v37 = vld [vmem:[%s3358_s4 + $0x28] ss:$16 sps:$4 sm:$0xff]  }
   0xb   :  { %2055 = vmatpush3.bf16.msra.mxu0 %v2101_v2  ;;  %578 = vmatpush1.bf16.msra.mxu1 %v2112_v35  ;;  %v2117_v38 = vld [vmem:[%s3358_s4 + $0x2c] ss:$16 sps:$4 sm:$0xff]   ;;  %v2118_v39 = vld [vmem:[%s3358_s4 + $0x20] ss:$16 sps:$4 sm:$0xff]   ;;  %v2119_v18 = vld [vmem:[%s3358_s4 + $0x44] ss:$16 sps:$4 sm:$0xff]  }
   0xc   :  { %2056 = vmatprep.subr.bf16.mxu0 %v2102_v3  ;;  %579 = vmatprep.subr.bf16.mxu1 %v2113_v36  ;;  %v26_v40 = vld [vmem:[%s3359_s0 + $0x10] sm:$0xff]  ;;  %v24_v41 = vld [vmem:[%s3359_s0] sm:$0xff]  ;;  %v27_v43 = vld [vmem:[%s3359_s0 + $0x18] sm:$0xff] }
   0xd   :  { %v25_v46 = vld [vmem:[%s3359_s0 + $0x8] sm:$0xff]  ;;  %v30_v54 = vld [vmem:[%s3359_s0 + $0x30] sm:$0xff]  ;;  %v28_v55 = vld [vmem:[%s3359_s0 + $0x20] sm:$0xff] }
   0xe   :  { %v31_v60 = vld [vmem:[%s3359_s0 + $0x38] sm:$0xff]  ;;  %v29_v61 = vld [vmem:[%s3359_s0 + $0x28] sm:$0xff]  ;;  %v2124_v24 = vld [vmem:[%s3358_s4 + $0x40] ss:$16 sps:$4 sm:$0xff]  }
   0xf   :  { %2057 = vmatpush3.bf16.msra.mxu0 %v2102_v3  ;;  %580 = vmatpush1.bf16.msra.mxu1 %v2118_v39  ;;  %v35_v12 = vld [vmem:[%s3359_s0 + $0x58] sm:$0xff]  ;;  %v33_v13 = vld [vmem:[%s3359_s0 + $0x48] sm:$0xff]  ;;  %v38_v25 = vld [vmem:[%s3359_s0 + $0x70] sm:$0xff] }
  0x10   :  { %2058 = vmatprep.subr.bf16.mxu0 %v2103_v7  ;;  %v2123_v19 = vld [vmem:[%s3358_s4 + $0x4c] ss:$16 sps:$4 sm:$0xff]   ;;  %v2121_v23 = vld [vmem:[%s3358_s4 + $0x48] ss:$16 sps:$4 sm:$0xff]   ;;  %581 = vmatprep.subr.bf16.mxu1 %v2119_v18  ;;  %v2125_v29 = vld [vmem:[%s3358_s4 + $0x64] ss:$16 sps:$4 sm:$0xff]  }
  0x11   :  { %v2129_v30 = vld [vmem:[%s3358_s4 + $0x6c] ss:$16 sps:$4 sm:$0xff]  }
  0x12   :  { %v39_v36 = vld [vmem:[%s3359_s0 + $0x78] sm:$0xff] }
  0x13   :  { %2059 = vmatpush3.bf16.msra.mxu0 %v2103_v7  ;;  %v34_v7 = vld [vmem:[%s3359_s0 + $0x50] sm:$0xff]  ;;  %582 = vmatpush1.bf16.msra.mxu1 %v2124_v24 }
  0x14   :  { %2060 = vmatprep.subr.bf16.mxu0 %v2104_v8  ;;  %583 = vmatprep.subr.bf16.mxu1 %v2125_v29 }
  0x17   :  { %2061 = vmatpush3.bf16.msra.mxu0 %v2104_v8  ;;  %v32_v8 = vld [vmem:[%s3359_s0 + $0x40] sm:$0xff] }
  0x18   :  { %2062 = vmatprep.subr.bf16.mxu0 %v2105_v9 }
  0x1b   :  { %2063 = vmatpush3.bf16.msra.mxu0 %v2105_v9 }
  0x1c   :  { %2064 = vmatprep.subr.bf16.mxu0 %v2106_v10 }
  0x1f   :  { %2065 = vmatpush3.bf16.msra.mxu0 %v2106_v10 }
  0x20   :  { %690 = vmatprep.subr.bf16.mxu0 %v2111_v34  ;;  %v2130_v34 = vld [vmem:[%s3358_s4 + $0x60] ss:$16 sps:$4 sm:$0xff]  }
  0x21   :  { %584 = vmatpush1.bf16.msra.mxu1 %v2130_v34 }
  0x22   :  { %2067 = vmatmul.mubr.bf16.vlgmr.msra.gmra.mrb[0].mxu0 %v57_v15 }
  0x23   :  { %2070 = vmatprep.mubr.bf16.mxu0 %v58_v16  ;;  %691 = vmatpush1.bf16.msra.mxu0 %v2109_v33  ;;  %v2127_v33 = vld [vmem:[%s3358_s4 + $0x68] ss:$16 sps:$4 sm:$0xff]  }
  0x24   :  { %692 = vmatprep.subr.bf16.mxu0 %v2117_v38 }
  0x27   :  { %693 = vmatpush1.bf16.msra.mxu0 %v2115_v37  ;;  %v37_v37 = vld [vmem:[%s3359_s0 + $0x68] sm:$0xff] }
  0x28   :  { %694 = vmatprep.subr.bf16.mxu0 %v2123_v19 }
  0x2a   :  { %2071 = vmatmul.mubr.bf16.gmra.mrb[4].mxu0 %v59_v21 }
  0x2b   :  { %2074 = vmatprep.mubr.bf16.mxu0 %v60_v22  ;;  %695 = vmatpush1.bf16.msra.mxu0 %v2121_v23 }
  0x2c   :  { %696 = vmatprep.subr.bf16.mxu0 %v2129_v30 }
  0x2f   :  { %697 = vmatpush1.bf16.msra.mxu0 %v2127_v33 }
  0x32   :  { %2075 = vmatmul.mubr.bf16.gmra.mrb[8].mxu0 %v61_v27 }
  0x33   :  { %2078 = vmatprep.mubr.bf16.mxu0 %v62_v28  ;;  %v36_v28 = vld [vmem:[%s3359_s0 + $0x60] sm:$0xff] }
  0x3a   :  { %2079 = vmatmul.mubr.bf16.gmra.mrb[12].mxu0 %v63_v31 }
  0xf5   :  { %v2068_v42 = vpop.f32.mrb[0].mxu0 }
  0xf6   :  { %v2616_v44 = vadd.f32 %v2068_v42, %v26_v40  ;;  %v162_v45 = vpop.f32.mrb[1].mxu0  ;;  %v2131_v42 = vld [vmem:[%s3358_s4 + $0x84] ss:$16 sps:$4 sm:$0xff]  }
  0xf7   :  { %v2621_v47 = vadd.f32 %v162_v45, %v24_v41  ;;  %v2069_v48 = vpop.f32.mrb[2].mxu0  ;;  %585 = vmatprep.subr.bf16.mxu1 %v2131_v42 }
  0xf8   :  { %3391 = vst [vmem:[#allocation2_spill] sm:$0xff] %v2616_v44  ;;  %v2623_v49 = vadd.f32 %v2069_v48, %v27_v43  ;;  %v165_v50 = vpop.f32.mrb[3].mxu0  ;;  %v243_v51 = vmul.f32 %v2616_v44, %v2616_v44  ;;  %v2135_v43 = vld [vmem:[%s3358_s4 + $0x8c] ss:$16 sps:$4 sm:$0xff]  }
  0xf9   :  { %3392 = vst [vmem:[#allocation3_spill] sm:$0xff] %v2621_v47  ;;  %v2627_v52 = vadd.f32 %v165_v50, %v25_v46  ;;  %v241_v53 = vmul.f32 %v2621_v47, %v2621_v47  ;;  %v2133_v50 = vld [vmem:[%s3358_s4 + $0x88] ss:$16 sps:$4 sm:$0xff]   ;;  %698 = vmatprep.subr.bf16.mxu0 %v2135_v43 }
  0xfa   :  { %3393 = vst [vmem:[#allocation4_spill] sm:$0xff] %v2623_v49  ;;  %261 = vadd.xlane.f32.xlu1 %v243_v51  ;;  %v244_v56 = vmul.f32 %v2623_v49, %v2623_v49  ;;  %v2136_v51 = vld [vmem:[%s3358_s4 + $0x80] ss:$16 sps:$4 sm:$0xff]   ;;  %699 = vmatpush1.bf16.msra.mxu0 %v2133_v50 }
  0xfb   :  { %3394 = vst [vmem:[#allocation5_spill] sm:$0xff] %v2627_v52  ;;  %257 = vadd.xlane.f32.xlu0 %v241_v53  ;;  %v242_v58 = vmul.f32 %v2627_v52, %v2627_v52  ;;  %586 = vmatpush1.bf16.msra.mxu1 %v2136_v51 }
  0xfd   :  { %v2072_v57 = vpop.f32.mrb[4].mxu0 }
  0xfe   :  { %v178_v59 = vpop.f32.mrb[5].mxu0  ;;  %263 = vadd.xlane.f32.xlu1 %v244_v56  ;;  %v2647_v62 = vadd.f32 %v2072_v57, %v30_v54  ;;  %v2141_v56 = vld [vmem:[%s3358_s4 + $0xac] ss:$16 sps:$4 sm:$0xff]  }
  0xff   :  { %v2649_v63 = vadd.f32 %v178_v59, %v28_v55  ;;  %v2073_v0 = vpop.f32.mrb[6].mxu0  ;;  %259 = vadd.xlane.f32.xlu0 %v242_v58  ;;  %v2137_v55 = vld [vmem:[%s3358_s4 + $0xa4] ss:$16 sps:$4 sm:$0xff]   ;;  %v2139_v58 = vld [vmem:[%s3358_s4 + $0xa8] ss:$16 sps:$4 sm:$0xff]   ;;  %700 = vmatprep.subr.bf16.mxu0 %v2141_v56 }
 0x100   :  { %3395 = vst [vmem:[#allocation6_spill] sm:$0xff] %v2647_v62  ;;  %v181_v1 = vpop.f32.mrb[7].mxu0  ;;  %v2651_v2 = vadd.f32 %v2073_v0, %v31_v60  ;;  %v247_v6 = vmul.f32 %v2647_v62, %v2647_v62  ;;  %v2142_v59 = vld [vmem:[%s3358_s4 + $0xa0] ss:$16 sps:$4 sm:$0xff]   ;;  %587 = vmatprep.subr.bf16.mxu1 %v2137_v55  ;;  %701 = vmatpush1.bf16.msra.mxu0 %v2139_v58  ;;  %v2143_v60 = vld [vmem:[%s3358_s4 + $0xc4] ss:$16 sps:$4 sm:$0xff]  }
 0x101   :  { %3396 = vst [vmem:[#allocation7_spill] sm:$0xff] %v2649_v63  ;;  %v2653_v3 = vadd.f32 %v181_v1, %v29_v61  ;;  %v245_v4 = vmul.f32 %v2649_v63, %v2649_v63  ;;  %588 = vmatpush1.bf16.msra.mxu1 %v2142_v59  ;;  %v2147_v61 = vld [vmem:[%s3358_s4 + $0xcc] ss:$16 sps:$4 sm:$0xff]   ;;  %v2145_v0 = vld [vmem:[%s3358_s4 + $0xc8] ss:$16 sps:$4 sm:$0xff]  }
 0x102   :  { %3397 = vst [vmem:[#allocation8_spill] sm:$0xff] %v2651_v2  ;;  %v248_v10 = vmul.f32 %v2651_v2, %v2651_v2  ;;  %v2148_v1 = vld [vmem:[%s3358_s4 + $0xc0] ss:$16 sps:$4 sm:$0xff]   ;;  %589 = vmatprep.subr.bf16.mxu1 %v2143_v60  ;;  %702 = vmatprep.subr.bf16.mxu0 %v2147_v61  ;;  %v2157_v59 = vld [vmem:[%s3360_s5 + $0x48] sm:$0xff]  }
 0x103   :  { %3398 = vst [vmem:[#allocation9_spill] sm:$0xff] %v2653_v3  ;;  %265 = vadd.xlane.f32.xlu0 %v245_v4  ;;  %v246_v5 = vmul.f32 %v2653_v3, %v2653_v3  ;;  %v2149_v4 = vld [vmem:[%s3358_s4 + $0xe4] ss:$16 sps:$4 sm:$0xff]  }
 0x104   :  { %703 = vmatpush1.bf16.msra.mxu0 %v2145_v0 }
 0x105   :  { %v2076_v9 = vpop.f32.mrb[8].mxu0  ;;  %267 = vadd.xlane.f32.xlu1 %v246_v5  ;;  %590 = vmatpush1.bf16.msra.mxu1 %v2148_v1  ;;  %v2153_v5 = vld [vmem:[%s3358_s4 + $0xec] ss:$16 sps:$4 sm:$0xff]  }
 0x106   :  { %v194_v11 = vpop.f32.mrb[9].mxu0  ;;  %v2675_v14 = vadd.f32 %v2076_v9, %v34_v7  ;;  %v2154_v7 = vld [vmem:[%s3358_s4 + $0xe0] ss:$16 sps:$4 sm:$0xff]   ;;  %591 = vmatprep.subr.bf16.mxu1 %v2149_v4  ;;  %704 = vmatprep.subr.bf16.mxu0 %v2153_v5  ;;  %v2158_v4 = vld [vmem:[%s3360_s5 + $0x8] sm:$0xff]  }
 0x107   :  { %v2677_v15 = vadd.f32 %v194_v11, %v32_v8  ;;  %v2077_v16 = vpop.f32.mrb[10].mxu0  ;;  %269 = vadd.xlane.f32.xlu0 %v247_v6  ;;  %v2151_v6 = vld [vmem:[%s3358_s4 + $0xe8] ss:$16 sps:$4 sm:$0xff]   ;;  %v2475_v8 = vmov 0   ;;  %v2155_v9 = vld [vmem:[%s3360_s5 + $0x40] sm:$0xff]  }
 0x108   :  { %3399 = vst [vmem:[#allocation10_spill] sm:$0xff] %v2675_v14  ;;  %v197_v17 = vpop.f32.mrb[11].mxu0  ;;  %v2685_v20 = vadd.f32 %v2077_v16, %v35_v12  ;;  %v251_v27 = vmul.f32 %v2675_v14, %v2675_v14  ;;  %705 = vmatpush1.bf16.msra.mxu0 %v2151_v6  ;;  %609 = vmatprep.mubr.bf16.mxu1 %v2475_v8 }
 0x109   :  { %3400 = vst [vmem:[#allocation11_spill] sm:$0xff] %v2677_v15  ;;  %v2687_v21 = vadd.f32 %v197_v17, %v33_v13  ;;  %271 = vadd.xlane.f32.xlu1 %v248_v10  ;;  %v249_v22 = vmul.f32 %v2677_v15, %v2677_v15  ;;  %592 = vmatpush1.bf16.msra.mxu1 %v2154_v7  ;;  %v2159_v7 = vld [vmem:[%s3360_s5 + $0x50] sm:$0xff]  }
 0x10a   :  { %3401 = vst [vmem:[#allocation12_spill] sm:$0xff] %v2685_v20  ;;  %v252_v32 = vmul.f32 %v2685_v20, %v2685_v20  ;;  %722 = vmatprep.mubr.bf16.mxu0 %v2475_v8  ;;  %1922 = vmatprep.subr.bf16.mxu1 %v2155_v9 }
 0x10b   :  { %3402 = vst [vmem:[#allocation13_spill] sm:$0xff] %v2687_v21  ;;  %273 = vadd.xlane.f32.xlu0 %v249_v22  ;;  %v250_v26 = vmul.f32 %v2687_v21, %v2687_v21 }
 0x10d   :  { %v2080_v31 = vpop.f32.mrb[12].mxu0  ;;  %275 = vadd.xlane.f32.xlu1 %v250_v26 }
 0x10e   :  { %v210_v35 = vpop.f32.mrb[13].mxu0  ;;  %v2727_v38 = vadd.f32 %v2080_v31, %v38_v25 }
 0x10f   :  { %v2729_v39 = vadd.f32 %v210_v35, %v36_v28  ;;  %v2081_v40 = vpop.f32.mrb[14].mxu0  ;;  %277 = vadd.xlane.f32.xlu0 %v251_v27 }
 0x110   :  { %3403 = vst [vmem:[#allocation14_spill] sm:$0xff] %v2727_v38  ;;  %v213_v41 = vpop.f32.mrb[15].mxu0  ;;  %v2737_v45 = vadd.f32 %v2081_v40, %v39_v36  ;;  %v255_v54 = vmul.f32 %v2727_v38, %v2727_v38  ;;  %v2800_v40 = vld [vmem:[%s3361_s3] ss:$0 sm:$0xff] }
 0x111   :  { %3404 = vst [vmem:[#allocation15_spill] sm:$0xff] %v2729_v39  ;;  %v2739_v46 = vadd.f32 %v213_v41, %v37_v37  ;;  %279 = vadd.xlane.f32.xlu1 %v252_v32  ;;  %v253_v48 = vmul.f32 %v2729_v39, %v2729_v39 }
 0x112   :  { %3405 = vst [vmem:[#allocation16_spill] sm:$0xff] %v2737_v45  ;;  %v256_v57 = vmul.f32 %v2737_v45, %v2737_v45 }
 0x113   :  { %3406 = vst [vmem:[#allocation17_spill] sm:$0xff] %v2739_v46  ;;  %281 = vadd.xlane.f32.xlu0 %v253_v48  ;;  %v254_v53 = vmul.f32 %v2739_v46, %v2739_v46 }
 0x115   :  { %283 = vadd.xlane.f32.xlu1 %v254_v53 }
 0x117   :  { %285 = vadd.xlane.f32.xlu0 %v255_v54 }
 0x119   :  { %287 = vadd.xlane.f32.xlu1 %v256_v57  ;;  %v2156_v57 = vld [vmem:[%s3360_s5] sm:$0xff]  }
 0x187   :  { %v262_v10 = vpop.xlane.xlu1 %261 }
 0x188   :  { %v258_v11 = vpop.xlane.xlu0 %257  ;;  %v292_v19 = vmul.f32 0.0078125, %v262_v10 }
 0x189   :  { %v290_v12 = vmul.f32 0.0078125, %v258_v11 }
 0x18a   :  { %v308_v25 = vadd.f32 1.1920929e-07, %v292_v19  ;;  %v2161_v19 = vld [vmem:[%s3360_s5 + $0x58] sm:$0xff]  }
 0x18b   :  { %v306_v13 = vadd.f32 1.1920929e-07, %v290_v12  ;;  %v264_v16 = vpop.xlane.xlu1 %263 }
 0x18c   :  { %v293_v17 = vmul.f32 0.0078125, %v264_v16  ;;  %v260_v18 = vpop.xlane.xlu0 %259 }
 0x18d   :  { %2187 = vrsqrt.f32 %v306_v13  ;;  %v291_v22 = vmul.f32 0.0078125, %v260_v18 }
 0x18e   :  { %v309_v23 = vadd.f32 1.1920929e-07, %v293_v17  ;;  %v2160_v17 = vld [vmem:[%s3360_s5 + $0x10] sm:$0xff]  }
 0x18f   :  { %v307_v24 = vadd.f32 1.1920929e-07, %v291_v22 }
 0x190   :  { %v266_v26 = vpop.xlane.xlu0 %265 }
 0x191   :  { %2189 = vrsqrt.f32 %v307_v24  ;;  %v294_v29 = vmul.f32 0.0078125, %v266_v26  ;;  %v2162_v26 = vld [vmem:[%s3360_s5 + $0x18] sm:$0xff]  }
 0x192   :  { %v268_v27 = vpop.xlane.xlu1 %267  ;;  %2191 = vrsqrt.f32 %v309_v23 }
 0x193   :  { %v295_v28 = vmul.f32 0.0078125, %v268_v27  ;;  %2193 = vrsqrt.f32 %v308_v25  ;;  %v310_v33 = vadd.f32 1.1920929e-07, %v294_v29 }
 0x194   :  { %v270_v34 = vpop.xlane.xlu0 %269 }
 0x195   :  { %v311_v31 = vadd.f32 1.1920929e-07, %v295_v28  ;;  %v296_v43 = vmul.f32 0.0078125, %v270_v34 }
 0x196   :  { %v272_v32 = vpop.xlane.xlu1 %271 }
 0x197   :  { %v2188_v30 = vpop.eup %2187  ;;  %2195 = vrsqrt.f32 %v311_v31  ;;  %v297_v37 = vmul.f32 0.0078125, %v272_v32  ;;  %v312_v58 = vadd.f32 1.1920929e-07, %v296_v43 }
 0x198   :  { %v338_v35 = vmul.f32 %v2188_v30, %v2621_v47  ;;  %2197 = vrsqrt.f32 %v310_v33  ;;  %v274_v60 = vpop.xlane.xlu0 %273 }
 0x199   :  { %v313_v53 = vadd.f32 1.1920929e-07, %v297_v37  ;;  %v298_v6 = vmul.f32 0.0078125, %v274_v60 }
 0x19a   :  { %v361_v48 = vmul.f32 %v2800_v40, %v338_v35  ;;  %v276_v54 = vpop.xlane.xlu1 %275 }
 0x19b   :  { %v2190_v36 = vpop.eup %2189  ;;  %2199 = vrsqrt.f32 %v313_v53  ;;  %v299_v0 = vmul.f32 0.0078125, %v276_v54  ;;  %v314_v18 = vadd.f32 1.1920929e-07, %v298_v6 }
 0x19c   :  { %v339_v41 = vmul.f32 %v2190_v36, %v2627_v52  ;;  %v2192_v42 = vpop.eup %2191  ;;  %2201 = vrsqrt.f32 %v312_v58  ;;  %v278_v22 = vpop.xlane.xlu0 %277 }
 0x19d   :  { %v2194_v51 = vpop.eup %2193  ;;  %v341_v56 = vmul.f32 %v2192_v42, %v2623_v49  ;;  %v315_v11 = vadd.f32 1.1920929e-07, %v299_v0  ;;  %v300_v28 = vmul.f32 0.0078125, %v278_v22 }
 0x19e   :  { %v362_v50 = vmul.f32 %v2800_v40, %v339_v41  ;;  %v340_v61 = vmul.f32 %v2194_v51, %v2616_v44  ;;  %v280_v12 = vpop.xlane.xlu1 %279 }
 0x19f   :  { %v364_v1 = vmul.f32 %v2800_v40, %v341_v56  ;;  %2203 = vrsqrt.f32 %v315_v11  ;;  %v301_v24 = vmul.f32 0.0078125, %v280_v12  ;;  %v316_v35 = vadd.f32 1.1920929e-07, %v300_v28 }
 0x1a0   :  { %v377_v55 = vpack.c.bf16 %v362_v50, %v361_v48  ;;  %v363_v9 = vmul.f32 %v2800_v40, %v340_v61  ;;  %2205 = vrsqrt.f32 %v314_v18  ;;  %v282_v36 = vpop.xlane.xlu0 %281 }
 0x1a1   :  { %v2196_v5 = vpop.eup %2195  ;;  %v317_v31 = vadd.f32 1.1920929e-07, %v301_v24  ;;  %v302_v48 = vmul.f32 0.0078125, %v282_v36  ;;  %v2165_v36 = vld [vmem:[%s3360_s5 + $0x20] sm:$0xff]  }
 0x1a2   :  { %610 = vmatmul.mubr.bf16.vlgmr.msra.gmra.mrb[0].mxu1 %v377_v55  ;;  %723 = vmatmul.mubr.bf16.vlgmr.msra.gmra.mrb[16].mxu0 %v377_v55  ;;  %v2198_v10 = vpop.eup %2197  ;;  %v378_v13 = vpack.c.bf16 %v364_v1, %v363_v9  ;;  %v343_v16 = vmul.f32 %v2196_v5, %v2653_v3  ;;  %v284_v32 = vpop.xlane.xlu1 %283 }
 0x1a3   :  { %619 = vmatprep.mubr.bf16.mxu1 %v2475_v8  ;;  %732 = vmatprep.mubr.bf16.mxu0 %v2475_v8  ;;  %v342_v23 = vmul.f32 %v2198_v10, %v2649_v63  ;;  %2207 = vrsqrt.f32 %v317_v31  ;;  %v303_v41 = vmul.f32 0.0078125, %v284_v32 }
 0x1a4   :  { %1923 = vmatpush3.bf16.msra.mxu1 %v2156_v57  ;;  %v366_v25 = vmul.f32 %v2800_v40, %v343_v16  ;;  %2209 = vrsqrt.f32 %v316_v35  ;;  %v318_v57 = vadd.f32 1.1920929e-07, %v302_v48  ;;  %v286_v58 = vpop.xlane.xlu0 %285  ;;  %v2163_v35 = vld [vmem:[%s3360_s5 + $0x60] sm:$0xff]  }
 0x1a5   :  { %1924 = vmatprep.subr.bf16.mxu1 %v2157_v59  ;;  %v2200_v27 = vpop.eup %2199  ;;  %v365_v29 = vmul.f32 %v2800_v40, %v342_v23  ;;  %v319_v53 = vadd.f32 1.1920929e-07, %v303_v41  ;;  %v304_v1 = vmul.f32 0.0078125, %v286_v58  ;;  %v2903_v41 = vld [vmem:[%s3360_s5 + $0x90] sm:$0xff]   ;;  %v2922_v48 = vld [vmem:[%s3360_s5 + $0xe0] sm:$0xff]  }
 0x1a6   :  { %v2202_v30 = vpop.eup %2201  ;;  %v345_v34 = vmul.f32 %v2200_v27, %v2651_v2  ;;  %v288_v54 = vpop.xlane.xlu1 %287  ;;  %v2958_v58 = vld [vmem:[%s3360_s5 + $0xf0] sm:$0xff]  }
 0x1a7   :  { %v379_v33 = vpack.c.bf16 %v366_v25, %v365_v29  ;;  %v344_v37 = vmul.f32 %v2202_v30, %v2647_v62  ;;  %2211 = vrsqrt.f32 %v319_v53  ;;  %v305_v60 = vmul.f32 0.0078125, %v288_v54  ;;  %v2937_v53 = vld [vmem:[%s3360_s5 + $0xe8] sm:$0xff]  }
 0x1a8   :  { %1925 = vmatpush3.bf16.msra.mxu1 %v2158_v4  ;;  %v368_v42 = vmul.f32 %v2800_v40, %v345_v34  ;;  %2213 = vrsqrt.f32 %v318_v57  ;;  %v320_v10 = vadd.f32 1.1920929e-07, %v304_v1  ;;  %v2874_v34 = vld [vmem:[%s3360_s5 + $0x80] sm:$0xff]   ;;  %v2170_v54 = vld [vmem:[%s3360_s5 + $0x28] sm:$0xff]   ;;  %v2176_v57 = vld [vmem:[%s3360_s5 + $0x30] sm:$0xff]  }
 0x1a9   :  { %1926 = vmatprep.subr.bf16.mxu1 %v2159_v7  ;;  %v2204_v43 = vpop.eup %2203  ;;  %v367_v50 = vmul.f32 %v2800_v40, %v344_v37  ;;  %v321_v6 = vadd.f32 1.1920929e-07, %v305_v60  ;;  %v2898_v37 = vld [vmem:[%s3360_s5 + $0xd0] sm:$0xff]   ;;  %v2181_v60 = vld [vmem:[%s3360_s5 + $0x78] sm:$0xff]  }
 0x1aa   :  { %620 = vmatmul.mubr.bf16.gmra.mrb[4].mxu1 %v378_v13  ;;  %733 = vmatmul.mubr.bf16.gmra.mrb[20].mxu0 %v378_v13  ;;  %v2206_v51 = vpop.eup %2205  ;;  %v347_v56 = vmul.f32 %v2204_v43, %v2687_v21  ;;  %v2915_v43 = vld [vmem:[%s3360_s5 + $0x98] sm:$0xff]  }
 0x1ab   :  { %629 = vmatprep.mubr.bf16.mxu1 %v2475_v8  ;;  %742 = vmatprep.mubr.bf16.mxu0 %v2475_v8  ;;  %v380_v55 = vpack.c.bf16 %v368_v42, %v367_v50  ;;  %v346_v59 = vmul.f32 %v2206_v51, %v2677_v15  ;;  %2215 = vrsqrt.f32 %v321_v6  ;;  %v2910_v42 = vld [vmem:[%s3360_s5 + $0xd8] sm:$0xff]   ;;  %v2927_v50 = vld [vmem:[%s3360_s5 + $0xa0] sm:$0xff]   ;;  %v2169_v51 = vld [vmem:[%s3360_s5 + $0x68] sm:$0xff]  }
 0x1ac   :  { %1927 = vmatpush3.bf16.msra.mxu1 %v2160_v17  ;;  %v370_v61 = vmul.f32 %v2800_v40, %v347_v56  ;;  %2217 = vrsqrt.f32 %v320_v10  ;;  %v2175_v56 = vld [vmem:[%s3360_s5 + $0x70] sm:$0xff]   ;;  %v2981_v1 = vld [vmem:[%s3360_s5 + $0xb8] sm:$0xff]  }
 0x1ad   :  { %1928 = vmatprep.subr.bf16.mxu1 %v2161_v19  ;;  %v2208_v0 = vpop.eup %2207  ;;  %v369_v4 = vmul.f32 %v2800_v40, %v346_v59  ;;  %v2963_v59 = vld [vmem:[%s3360_s5 + $0xb0] sm:$0xff]   ;;  %3409 = vst [vmem:[#allocation20_spill] sm:$0xff] %v2981_v1 }
 0x1ae   :  { %v2210_v5 = vpop.eup %2209  ;;  %v349_v9 = vmul.f32 %v2208_v0, %v2685_v20  ;;  %3407 = vst [vmem:[#allocation18_spill] sm:$0xff] %v2963_v59  ;;  %v2182_v0 = vld [vmem:[%s3360_s5 + $0x38] sm:$0xff]  }
 0x1af   :  { %v381_v7 = vpack.c.bf16 %v370_v61, %v369_v4  ;;  %v348_v11 = vmul.f32 %v2210_v5, %v2675_v14  ;;  %v2973_v61 = vld [vmem:[%s3360_s5 + $0xf8] sm:$0xff]  }
 0x1b0   :  { %1929 = vmatpush3.bf16.msra.mxu1 %v2162_v26  ;;  %v372_v12 = vmul.f32 %v2800_v40, %v349_v9  ;;  %3408 = vst [vmem:[#allocation19_spill] sm:$0xff] %v2973_v61 }
 0x1b1   :  { %v2212_v13 = vpop.eup %2211  ;;  %v371_v16 = vmul.f32 %v2800_v40, %v348_v11  ;;  %1930 = vmatprep.subr.bf16.mxu1 %v2163_v35 }
 0x1b2   :  { %630 = vmatmul.mubr.bf16.gmra.mrb[8].mxu1 %v379_v33  ;;  %743 = vmatmul.mubr.bf16.gmra.mrb[24].mxu0 %v379_v33  ;;  %v2214_v17 = vpop.eup %2213  ;;  %v351_v19 = vmul.f32 %v2212_v13, %v2739_v46  ;;  %v2164_v33 = vld [vmem:[%s3360_s5 + $0xc0] sm:$0xff]  }
 0x1b3   :  { %639 = vmatprep.mubr.bf16.mxu1 %v2475_v8  ;;  %752 = vmatprep.mubr.bf16.mxu0 %v2475_v8  ;;  %v382_v18 = vpack.c.bf16 %v372_v12, %v371_v16  ;;  %v350_v22 = vmul.f32 %v2214_v17, %v2729_v39 }
 0x1b4   :  { %v374_v23 = vmul.f32 %v2800_v40, %v351_v19  ;;  %1986 = vmatprep.subr.bf16.mxu0 %v2164_v33  ;;  %1931 = vmatpush3.bf16.msra.mxu1 %v2165_v36 }
 0x1b5   :  { %v2216_v24 = vpop.eup %2215  ;;  %v373_v25 = vmul.f32 %v2800_v40, %v350_v22  ;;  %1987 = vmatpush3.bf16.msra.mxu0 %v2874_v34  ;;  %1932 = vmatprep.subr.bf16.mxu1 %v2169_v51 }
 0x1b6   :  { %v2218_v26 = vpop.eup %2217  ;;  %v353_v28 = vmul.f32 %v2216_v24, %v2737_v45 }
 0x1b7   :  { %v383_v27 = vpack.c.bf16 %v374_v23, %v373_v25  ;;  %v352_v29 = vmul.f32 %v2218_v26, %v2727_v38 }
 0x1b8   :  { %v376_v30 = vmul.f32 %v2800_v40, %v353_v28  ;;  %1933 = vmatpush3.bf16.msra.mxu1 %v2170_v54 }
 0x1b9   :  { %v375_v31 = vmul.f32 %v2800_v40, %v352_v29  ;;  %v2885_v40 = vld [vmem:[%s3360_s5 + $0x88] sm:$0xff]   ;;  %1934 = vmatprep.subr.bf16.mxu1 %v2175_v56 }
 0x1ba   :  { %640 = vmatmul.mubr.bf16.gmra.mrb[12].mxu1 %v380_v55  ;;  %753 = vmatmul.mubr.bf16.gmra.mrb[28].mxu0 %v380_v55  ;;  %v2945_v55 = vld [vmem:[%s3360_s5 + $0xa8] sm:$0xff]  }
 0x1bb   :  { %649 = vmatprep.mubr.bf16.mxu1 %v2475_v8  ;;  %762 = vmatprep.mubr.bf16.mxu0 %v2475_v8  ;;  %v384_v32 = vpack.c.bf16 %v376_v30, %v375_v31 }
 0x1bc   :  { %1935 = vmatpush3.bf16.msra.mxu1 %v2176_v57 }
 0x1bd   :  { %1936 = vmatprep.subr.bf16.mxu1 %v2181_v60 }
 0x1c0   :  { %1937 = vmatpush3.bf16.msra.mxu1 %v2182_v0 }
 0x1c1   :  { %2082 = vmatprep.subr.bf16.mxu1 %v2164_v33 }
 0x1c2   :  { %650 = vmatmul.mubr.bf16.gmra.mrb[16].mxu1 %v381_v7  ;;  %763 = vmatmul.mubr.bf16.gmra.mrb[32].mxu0 %v381_v7 }
 0x1c3   :  { %659 = vmatprep.mubr.bf16.mxu1 %v2475_v8  ;;  %772 = vmatprep.mubr.bf16.mxu0 %v2475_v8 }
 0x1ca   :  { %660 = vmatmul.mubr.bf16.gmra.mrb[20].mxu1 %v382_v18  ;;  %773 = vmatmul.mubr.bf16.gmra.mrb[36].mxu0 %v382_v18 }
 0x1cb   :  { %669 = vmatprep.mubr.bf16.mxu1 %v2475_v8  ;;  %782 = vmatprep.mubr.bf16.mxu0 %v2475_v8 }
 0x1d2   :  { %670 = vmatmul.mubr.bf16.gmra.mrb[24].mxu1 %v383_v27  ;;  %783 = vmatmul.mubr.bf16.gmra.mrb[40].mxu0 %v383_v27 }
 0x1d3   :  { %679 = vmatprep.mubr.bf16.mxu1 %v2475_v8  ;;  %792 = vmatprep.mubr.bf16.mxu0 %v2475_v8  ;;  %v2880_v8 = vld [vmem:[%s3360_s5 + $0xc8] sm:$0xff]  }
 0x1d4   :  { %1988 = vmatprep.subr.bf16.mxu0 %v2880_v8 }
 0x1d5   :  { %1989 = vmatpush3.bf16.msra.mxu0 %v2885_v40 }
 0x1d6   :  { %1990 = vmatprep.subr.bf16.mxu0 %v2898_v37 }
 0x1d9   :  { %1991 = vmatpush3.bf16.msra.mxu0 %v2903_v41 }
 0x1da   :  { %680 = vmatmul.mubr.bf16.gmra.mrb[28].mxu1 %v384_v32  ;;  %793 = vmatmul.mubr.bf16.gmra.mrb[44].mxu0 %v384_v32 }
 0x1db   :  { %1992 = vmatprep.subr.bf16.mxu0 %v2910_v42 }
 0x1dd   :  { %1993 = vmatpush3.bf16.msra.mxu0 %v2915_v43 }
 0x1de   :  { %1994 = vmatprep.subr.bf16.mxu0 %v2922_v48 }
 0x1e1   :  { %1995 = vmatpush3.bf16.msra.mxu0 %v2927_v50 }
 0x1e2   :  { %1996 = vmatprep.subr.bf16.mxu0 %v2937_v53 }
 0x1e5   :  { %1997 = vmatpush3.bf16.msra.mxu0 %v2945_v55 }
 0x1e6   :  { %1998 = vmatprep.subr.bf16.mxu0 %v2958_v58 }
 0x1e9   :  { %1999 = vmatpush3.bf16.msra.mxu0 %v2963_v59 }
 0x1ea   :  { %2000 = vmatprep.subr.bf16.mxu0 %v2973_v61 }
 0x1ed   :  { %2001 = vmatpush3.bf16.msra.mxu0 %v2981_v1 }
 0x275   :  { %v2985_v4 = vpop.f32.mrb[0].mxu1  ;;  %v2987_v5 = vpop.f32.mrb[16].mxu0 }
 0x276   :  { %v1810_v6 = vmul.f32 -1.442695, %v2985_v4  ;;  %v1812_v7 = vmul.f32 -1.442695, %v2987_v5  ;;  %v2991_v9 = vpop.f32.mrb[1].mxu1  ;;  %v2993_v10 = vpop.f32.mrb[17].mxu0 }
 0x277   :  { %v1811_v11 = vmul.f32 -1.442695, %v2991_v9  ;;  %v1813_v12 = vmul.f32 -1.442695, %v2993_v10  ;;  %v2997_v13 = vpop.f32.mrb[2].mxu1  ;;  %v2999_v16 = vpop.f32.mrb[18].mxu0 }
 0x278   :  { %2219 = vpow2.f32 %v1810_v6  ;;  %v1814_v17 = vmul.f32 -1.442695, %v2997_v13  ;;  %v3002_v18 = vpop.f32.mrb[3].mxu1  ;;  %v3004_v19 = vpop.f32.mrb[19].mxu0  ;;  %v1816_v22 = vmul.f32 -1.442695, %v2999_v16 }
 0x279   :  { %2221 = vpow2.f32 %v1812_v7  ;;  %v1815_v23 = vmul.f32 -1.442695, %v3002_v18  ;;  %v1817_v24 = vmul.f32 -1.442695, %v3004_v19 }
 0x27a   :  { %2223 = vpow2.f32 %v1811_v11 }
 0x27b   :  { %2225 = vpow2.f32 %v1813_v12 }
 0x27c   :  { %2227 = vpow2.f32 %v1814_v17 }
 0x27d   :  { %2229 = vpow2.f32 %v1816_v22  ;;  %v3009_v25 = vpop.f32.mrb[4].mxu1  ;;  %v3011_v26 = vpop.f32.mrb[20].mxu0 }
 0x27e   :  { %2231 = vpow2.f32 %v1815_v23  ;;  %v1818_v27 = vmul.f32 -1.442695, %v3009_v25  ;;  %v1820_v28 = vmul.f32 -1.442695, %v3011_v26  ;;  %v3015_v29 = vpop.f32.mrb[5].mxu1  ;;  %v3017_v30 = vpop.f32.mrb[21].mxu0 }
 0x27f   :  { %2233 = vpow2.f32 %v1817_v24  ;;  %v1819_v31 = vmul.f32 -1.442695, %v3015_v29  ;;  %v1821_v32 = vmul.f32 -1.442695, %v3017_v30  ;;  %v3021_v33 = vpop.f32.mrb[6].mxu1  ;;  %v3023_v35 = vpop.f32.mrb[22].mxu0 }
 0x280   :  { %2235 = vpow2.f32 %v1818_v27  ;;  %v1822_v36 = vmul.f32 -1.442695, %v3021_v33  ;;  %v3026_v51 = vpop.f32.mrb[7].mxu1  ;;  %v3028_v54 = vpop.f32.mrb[23].mxu0  ;;  %v1824_v21 = vmul.f32 -1.442695, %v3023_v35 }
 0x281   :  { %2237 = vpow2.f32 %v1820_v28 }
 0x282   :  { %v2220_v56 = vpop.eup %2219  ;;  %2239 = vpow2.f32 %v1819_v31 }
 0x283   :  { %v2222_v57 = vpop.eup %2221  ;;  %v995_v60 = vadd.f32 1.0, %v2220_v56  ;;  %2241 = vpow2.f32 %v1821_v32 }
 0x284   :  { %v2224_v0 = vpop.eup %2223  ;;  %v997_v6 = vadd.f32 1.0, %v2222_v57  ;;  %2243 = vpow2.f32 %v1822_v36 }
 0x285   :  { %v2226_v7 = vpop.eup %2225  ;;  %2245 = vrcp.f32 %v995_v60  ;;  %v996_v11 = vadd.f32 1.0, %v2224_v0  ;;  %v3030_v12 = vpop.f32.mrb[8].mxu1 }
 0x286   :  { %v3032_v17 = vpop.f32.mrb[24].mxu0  ;;  %v2228_v22 = vpop.eup %2227  ;;  %2247 = vrcp.f32 %v997_v6  ;;  %v998_v23 = vadd.f32 1.0, %v2226_v7  ;;  %v1826_v2 = vmul.f32 -1.442695, %v3030_v12 }
 0x287   :  { %v3034_v24 = vpop.f32.mrb[9].mxu1  ;;  %v2230_v27 = vpop.eup %2229  ;;  %2249 = vrcp.f32 %v996_v11  ;;  %v999_v28 = vadd.f32 1.0, %v2228_v22  ;;  %v1828_v62 = vmul.f32 -1.442695, %v3032_v17 }
 0x288   :  { %3410 = vst [vmem:[#allocation21_spill] sm:$0xff] %v3034_v24  ;;  %v3036_v31 = vpop.f32.mrb[25].mxu0  ;;  %v3038_v32 = vpop.f32.mrb[10].mxu1  ;;  %2251 = vrcp.f32 %v998_v23  ;;  %v1001_v56 = vadd.f32 1.0, %v2230_v27 }
 0x289   :  { %3411 = vst [vmem:[#allocation22_spill] sm:$0xff] %v3036_v31  ;;  %v2232_v36 = vpop.eup %2231  ;;  %v3040_v57 = vpop.f32.mrb[26].mxu0  ;;  %2253 = vrcp.f32 %v999_v28  ;;  %v1829_v63 = vmul.f32 -1.442695, %v3036_v31  ;;  %v1830_v49 = vmul.f32 -1.442695, %v3038_v32 }
 0x28a   :  { %v2234_v60 = vpop.eup %2233  ;;  %v1000_v0 = vadd.f32 1.0, %v2232_v36  ;;  %v3042_v45 = vpop.f32.mrb[11].mxu1  ;;  %2255 = vrcp.f32 %v1001_v56  ;;  %v1832_v47 = vmul.f32 -1.442695, %v3040_v57 }
 0x28b   :  { %3412 = vst [vmem:[#allocation23_spill] sm:$0xff] %v3042_v45  ;;  %v3044_v6 = vpop.f32.mrb[27].mxu0  ;;  %v2236_v7 = vpop.eup %2235  ;;  %v1002_v11 = vadd.f32 1.0, %v2234_v60 }
 0x28c   :  { %v2238_v22 = vpop.eup %2237  ;;  %2257 = vrcp.f32 %v1000_v0  ;;  %v1003_v38 = vadd.f32 1.0, %v2236_v7  ;;  %v1823_v7 = vmul.f32 -1.442695, %v3026_v51 }
 0x28d   :  { %v2240_v46 = vpop.eup %2239  ;;  %2259 = vrcp.f32 %v1002_v11  ;;  %v1005_v39 = vadd.f32 1.0, %v2238_v22  ;;  %v3046_v20 = vpop.f32.mrb[12].mxu1  ;;  %v1825_v22 = vmul.f32 -1.442695, %v3028_v54 }
 0x28e   :  { %v2242_v23 = vpop.eup %2241  ;;  %2261 = vrcp.f32 %v1003_v38  ;;  %v1004_v27 = vadd.f32 1.0, %v2240_v46  ;;  %v3048_v28 = vpop.f32.mrb[28].mxu0 }
 0x28f   :  { %v2244_v36 = vpop.eup %2243  ;;  %2263 = vrcp.f32 %v1005_v39  ;;  %v1006_v14 = vadd.f32 1.0, %v2242_v23  ;;  %v3051_v56 = vpop.f32.mrb[13].mxu1 }
 0x290   :  { %v2246_v60 = vpop.eup %2245  ;;  %2265 = vrcp.f32 %v1004_v27  ;;  %v1007_v0 = vadd.f32 1.0, %v2244_v36  ;;  %v3054_v11 = vpop.f32.mrb[29].mxu0 }
 0x291   :  { %v3056_v38 = vpop.f32.mrb[14].mxu1  ;;  %v2248_v46 = vpop.eup %2247  ;;  %2267 = vrcp.f32 %v1006_v14  ;;  %v1827_v14 = vmul.f32 -1.442695, %v3034_v24  ;;  %v1187_v52 = vmul.f32 %v2246_v60, %v2985_v4 }
 0x292   :  { %v3059_v15 = vpop.f32.mrb[30].mxu0  ;;  %v3061_v39 = vpop.f32.mrb[15].mxu1  ;;  %2269 = vrcp.f32 %v1007_v0 }
 0x293   :  { %v2250_v23 = vpop.eup %2249  ;;  %v3064_v27 = vpop.f32.mrb[31].mxu0  ;;  %2271 = vpow2.f32 %v1824_v21  ;;  %v1189_v21 = vmul.f32 %v2248_v46, %v2987_v5 }
 0x294   :  { %v2252_v36 = vpop.eup %2251  ;;  %2273 = vpow2.f32 %v1823_v7  ;;  %v1831_v7 = vmul.f32 -1.442695, %v3042_v45  ;;  %v1188_v4 = vmul.f32 %v2250_v23, %v2991_v9 }
 0x295   :  { %v2254_v3 = vpop.eup %2253  ;;  %2275 = vpow2.f32 %v1825_v22  ;;  %v3076_v59 = vpop.f32.mrb[16].mxu1 }
 0x296   :  { %v2256_v44 = vpop.eup %2255  ;;  %v1191_v0 = vmul.f32 %v2254_v3, %v2997_v13  ;;  %2277 = vpow2.f32 %v1826_v2  ;;  %v3078_v31 = vpop.f32.mrb[32].mxu0 }
 0x297   :  { %v2258_v1 = vpop.eup %2257  ;;  %v1193_v61 = vmul.f32 %v2256_v44, %v2999_v16  ;;  %2279 = vpow2.f32 %v1828_v62  ;;  %v3082_v13 = vpop.f32.mrb[17].mxu1  ;;  %v1190_v44 = vmul.f32 %v2252_v36, %v2993_v10  ;;  %v1833_v62 = vmul.f32 -1.442695, %v3044_v6 }
 0x298   :  { %v2260_v24 = vpop.eup %2259  ;;  %v1251_v60 = vpack.c.bf16 %v1191_v0, %v1187_v52  ;;  %v1192_v3 = vmul.f32 %v2258_v1, %v3002_v18  ;;  %v3084_v22 = vpop.f32.mrb[33].mxu0  ;;  %2281 = vpow2.f32 %v1827_v14  ;;  %v1834_v10 = vmul.f32 -1.442695, %v3046_v20 }
 0x299   :  { %v2262_v5 = vpop.eup %2261  ;;  %v1253_v2 = vpack.c.bf16 %v1193_v61, %v1189_v21  ;;  %v1194_v16 = vmul.f32 %v2260_v24, %v3004_v19  ;;  %v3088_v46 = vpop.f32.mrb[18].mxu1  ;;  %2283 = vpow2.f32 %v1829_v63  ;;  %v1836_v24 = vmul.f32 -1.442695, %v3048_v28 }
 0x29a   :  { %v3090_v45 = vpop.f32.mrb[34].mxu0  ;;  %v3092_v9 = vpop.eup %2263  ;;  %v1252_v52 = vpack.c.bf16 %v1192_v3, %v1188_v4  ;;  %2285 = vpow2.f32 %v1830_v49  ;;  %v3106_v14 = vmul.f32 %v2262_v5, %v3009_v25 }
 0x29b   :  { %v3095_v1 = vpop.f32.mrb[19].mxu1  ;;  %v3097_v18 = vpop.f32.mrb[35].mxu0  ;;  %v1254_v61 = vpack.c.bf16 %v1194_v16, %v1190_v44  ;;  %2287 = vpow2.f32 %v1832_v47 }
 0x29c   :  { %v3099_v23 = vpop.eup %2265  ;;  %1571 = vmatprep.mubr.bf16.mxu1 %v1252_v52  ;;  %2289 = vpow2.f32 %v1831_v7 }
 0x29d   :  { %v3102_v19 = vpop.eup %2267  ;;  %1668 = vmatprep.mubr.bf16.mxu0 %v1254_v61  ;;  %1572 = vmatmul.mubr.bf16.vlgmr.msra.gmra.mrb[32].mxu1 %v1251_v60  ;;  %2291 = vpow2.f32 %v1833_v62  ;;  %v3112_v21 = vpop.f32.mrb[20].mxu1 }
 0x29e   :  { %v2270_v36 = vpop.eup %2269  ;;  %2090 = vmatpush3.bf16.msra.mxu1 %v2874_v34  ;;  %1669 = vmatmul.mubr.bf16.vlgmr.msra.gmra.mrb[48].mxu0 %v1253_v2  ;;  %2293 = vpow2.f32 %v1834_v10  ;;  %v3114_v4 = vpop.f32.mrb[36].mxu0 }
 0x29f   :  { %v2272_v63 = vpop.eup %2271  ;;  %v3109_v0 = vmul.f32 %v2270_v36, %v3021_v33  ;;  %2083 = vmatprep.subr.bf16.mxu1 %v2880_v8  ;;  %2295 = vpow2.f32 %v1836_v24  ;;  %v3119_v33 = vpop.f32.mrb[21].mxu1 }
 0x2a0   :  { %v2274_v49 = vpop.eup %2273  ;;  %v1009_v47 = vadd.f32 1.0, %v2272_v63  ;;  %v3121_v3 = vpop.f32.mrb[37].mxu0 }
 0x2a1   :  { %v2276_v7 = vpop.eup %2275  ;;  %v1008_v60 = vadd.f32 1.0, %v2274_v49  ;;  %v3123_v44 = vpop.f32.mrb[22].mxu1 }
 0x2a2   :  { %v2278_v34 = vpop.eup %2277  ;;  %2297 = vrcp.f32 %v1009_v47  ;;  %v1010_v5 = vadd.f32 1.0, %v2276_v7  ;;  %v3125_v52 = vpop.f32.mrb[38].mxu0  ;;  %2091 = vmatpush3.bf16.msra.mxu1 %v2885_v40 }
 0x2a3   :  { %v2280_v2 = vpop.eup %2279  ;;  %2299 = vrcp.f32 %v1008_v60  ;;  %v1011_v16 = vadd.f32 1.0, %v2278_v34  ;;  %v3128_v61 = vpop.f32.mrb[23].mxu1  ;;  %2084 = vmatprep.subr.bf16.mxu1 %v2898_v37 }
 0x2a4   :  { %v2282_v8 = vpop.eup %2281  ;;  %2301 = vrcp.f32 %v1010_v5  ;;  %v1013_v62 = vadd.f32 1.0, %v2280_v2  ;;  %v3130_v10 = vpop.f32.mrb[39].mxu0 }
 0x2a5   :  { %v2284_v24 = vpop.eup %2283  ;;  %2303 = vrcp.f32 %v1011_v16  ;;  %v1012_v36 = vadd.f32 1.0, %v2282_v8  ;;  %v3134_v34 = vpop.f32.mrb[24].mxu1 }
 0x2a6   :  { %v2286_v63 = vpop.eup %2285  ;;  %2305 = vrcp.f32 %v1013_v62  ;;  %v1014_v49 = vadd.f32 1.0, %v2284_v24  ;;  %2092 = vmatpush3.bf16.msra.mxu1 %v2903_v41  ;;  %v3136_v5 = vpop.f32.mrb[40].mxu0 }
 0x2a7   :  { %v2288_v47 = vpop.eup %2287  ;;  %2307 = vrcp.f32 %v1012_v36  ;;  %v1015_v7 = vadd.f32 1.0, %v2286_v63  ;;  %2085 = vmatprep.subr.bf16.mxu1 %v2910_v42  ;;  %v3139_v16 = vpop.f32.mrb[25].mxu1 }
 0x2a8   :  { %v2290_v40 = vpop.eup %2289  ;;  %2309 = vrcp.f32 %v1014_v49  ;;  %v1017_v60 = vadd.f32 1.0, %v2288_v47  ;;  %v3141_v24 = vpop.f32.mrb[41].mxu0  ;;  %v1835_v49 = vmul.f32 -1.442695, %v3051_v56  ;;  %v1837_v47 = vmul.f32 -1.442695, %v3054_v11 }
 0x2a9   :  { %v2292_v37 = vpop.eup %2291  ;;  %2311 = vrcp.f32 %v1015_v7  ;;  %v1016_v2 = vadd.f32 1.0, %v2290_v40  ;;  %3413 = vst [vmem:[#allocation24_spill] sm:$0xff] %v3141_v24  ;;  %v3143_v41 = vpop.f32.mrb[26].mxu1 }
 0x2aa   :  { %v2294_v8 = vpop.eup %2293  ;;  %2313 = vrcp.f32 %v1017_v60  ;;  %v1018_v62 = vadd.f32 1.0, %v2292_v37  ;;  %3414 = vst [vmem:[#allocation25_spill] sm:$0xff] %v3143_v41  ;;  %v3147_v42 = vpop.f32.mrb[42].mxu0  ;;  %2093 = vmatpush3.bf16.msra.mxu1 %v2915_v43  ;;  %v1838_v60 = vmul.f32 -1.442695, %v3056_v38 }
 0x2ab   :  { %v2296_v36 = vpop.eup %2295  ;;  %2315 = vrcp.f32 %v1016_v2  ;;  %v1019_v63 = vadd.f32 1.0, %v2294_v8  ;;  %3415 = vst [vmem:[#allocation26_spill] sm:$0xff] %v3147_v42  ;;  %v3151_v37 = vpop.f32.mrb[27].mxu1  ;;  %2086 = vmatprep.subr.bf16.mxu1 %v2922_v48  ;;  %v1197_v8 = vmul.f32 %v3092_v9, %v3011_v26  ;;  %v1840_v43 = vmul.f32 -1.442695, %v3059_v15 }
 0x2ac   :  { %v2298_v7 = vpop.eup %2297  ;;  %2317 = vrcp.f32 %v1018_v62  ;;  %v1021_v40 = vadd.f32 1.0, %v2296_v36  ;;  %3416 = vst [vmem:[#allocation27_spill] sm:$0xff] %v3151_v37  ;;  %v3153_v25 = vpop.f32.mrb[43].mxu0  ;;  %v1196_v62 = vmul.f32 %v3099_v23, %v3015_v29  ;;  %v1198_v48 = vmul.f32 %v3102_v19, %v3017_v30 }
 0x2ad   :  { %3417 = vst [vmem:[#allocation28_spill] sm:$0xff] %v3153_v25  ;;  %v2300_v2 = vpop.eup %2299  ;;  %v1201_v41 = vmul.f32 %v2298_v7, %v3023_v35  ;;  %2319 = vrcp.f32 %v1019_v63  ;;  %v1839_v25 = vmul.f32 -1.442695, %v3061_v39  ;;  %v1841_v29 = vmul.f32 -1.442695, %v3064_v27  ;;  %v3169_v23 = vpop.f32.mrb[28].mxu1 }
 0x2ae   :  { %v2302_v42 = vpop.eup %2301  ;;  %v1200_v36 = vmul.f32 %v2300_v2, %v3026_v51  ;;  %2321 = vrcp.f32 %v1021_v40  ;;  %2094 = vmatpush3.bf16.msra.mxu1 %v2927_v50  ;;  %v3171_v51 = vpop.f32.mrb[44].mxu0  ;;  %v1842_v30 = vmul.f32 -1.442695, %v3076_v59  ;;  %v1845_v40 = vmul.f32 -1.442695, %v3084_v22 }
 0x2af   :  { %v2304_v37 = vpop.eup %2303  ;;  %v1257_v24 = vpack.c.bf16 %v1201_v41, %v1197_v8  ;;  %v1202_v26 = vmul.f32 %v2302_v42, %v3028_v54  ;;  %2323 = vpow2.f32 %v1835_v49  ;;  %2087 = vmatprep.subr.bf16.mxu1 %v2937_v53  ;;  %v3175_v54 = vpop.f32.mrb[29].mxu1  ;;  %v1844_v41 = vmul.f32 -1.442695, %v3078_v31 }
 0x2b0   :  { %v2306_v35 = vpop.eup %2305  ;;  %v1256_v9 = vpack.c.bf16 %v1200_v36, %v1196_v62  ;;  %2325 = vpow2.f32 %v1837_v47  ;;  %v3177_v19 = vpop.f32.mrb[45].mxu0  ;;  %v1843_v49 = vmul.f32 -1.442695, %v3082_v13  ;;  %v3418_v2 = vpack.c.bf16 %v3109_v0, %v3106_v14 }
 0x2b1   :  { %v2308_v63 = vpop.eup %2307  ;;  %v1258_v7 = vpack.c.bf16 %v1202_v26, %v1198_v48  ;;  %2327 = vpow2.f32 %v1838_v60  ;;  %v3181_v47 = vpop.f32.mrb[30].mxu1  ;;  %v1846_v60 = vmul.f32 -1.442695, %v3088_v46  ;;  %v1203_v36 = vmul.f32 %v2304_v37, %v3030_v12  ;;  %v3420_v12 = vld [vmem:[#allocation21_spill] sm:$0xff] }
 0x2b2   :  { %v2310_v50 = vpop.eup %2309  ;;  %2329 = vpow2.f32 %v1840_v43  ;;  %1579 = vmatprep.mubr.bf16.mxu1 %v1256_v9  ;;  %v3183_v42 = vpop.f32.mrb[46].mxu0  ;;  %2095 = vmatpush3.bf16.msra.mxu1 %v2945_v55  ;;  %v1205_v9 = vmul.f32 %v2306_v35, %v3032_v17  ;;  %v1847_v0 = vmul.f32 -1.442695, %v3095_v1  ;;  %v1204_v37 = vmul.f32 %v2308_v63, %v3420_v12  ;;  %v3422_v55 = vld [vmem:[#allocation22_spill] sm:$0xff] }
 0x2b3   :  { %v2312_v53 = vpop.eup %2311  ;;  %2331 = vpow2.f32 %v1839_v25  ;;  %1676 = vmatprep.mubr.bf16.mxu0 %v1258_v7  ;;  %1580 = vmatmul.mubr.bf16.gmra.mrb[36].mxu1 %v3418_v2  ;;  %v3190_v8 = vpop.f32.mrb[31].mxu1  ;;  %v1848_v25 = vmul.f32 -1.442695, %v3090_v45  ;;  %v1206_v2 = vmul.f32 %v2310_v50, %v3422_v55 }
 0x2b4   :  { %v3192_v43 = vpop.f32.mrb[47].mxu0  ;;  %v2314_v62 = vpop.eup %2313  ;;  %v1207_v48 = vmul.f32 %v2312_v53, %v3038_v32  ;;  %2333 = vpow2.f32 %v1841_v29  ;;  %1677 = vmatmul.mubr.bf16.gmra.mrb[52].mxu0 %v1257_v24  ;;  %2088 = vmatprep.subr.bf16.mxu1 %v2958_v58  ;;  %v3421_v29 = vld [vmem:[#allocation23_spill] sm:$0xff]  ;;  %v3423_v58 = vld [vmem:[#allocation18_spill] sm:$0xff] }
 0x2b5   :  { %3419 = vst [vmem:[#allocation29_spill] sm:$0xff] %v3192_v43  ;;  %v2316_v26 = vpop.eup %2315  ;;  %v1209_v14 = vmul.f32 %v2314_v62, %v3040_v57  ;;  %2335 = vpow2.f32 %v1842_v30  ;;  %v3424_v62 = vld [vmem:[#allocation19_spill] sm:$0xff] }
 0x2b6   :  { %v2318_v7 = vpop.eup %2317  ;;  %v1259_v32 = vpack.c.bf16 %v1207_v48, %v1203_v36  ;;  %v1208_v53 = vmul.f32 %v2316_v26, %v3421_v29  ;;  %2337 = vpow2.f32 %v1844_v41  ;;  %2096 = vmatpush3.bf16.msra.mxu1 %v3423_v58 }
 0x2b7   :  { %v3204_v24 = vpop.eup %2319  ;;  %v1261_v43 = vpack.c.bf16 %v1209_v14, %v1205_v9  ;;  %v1210_v17 = vmul.f32 %v2318_v7, %v3044_v6  ;;  %2339 = vpow2.f32 %v1843_v49  ;;  %2089 = vmatprep.subr.bf16.mxu1 %v3424_v62 }
 0x2b8   :  { %v3208_v57 = vpop.eup %2321  ;;  %v1260_v35 = vpack.c.bf16 %v1208_v53, %v1204_v37  ;;  %2341 = vpow2.f32 %v1845_v40  ;;  %v3425_v40 = vld [vmem:[#allocation20_spill] sm:$0xff] }
 0x2b9   :  { %v2324_v30 = vpop.eup %2323  ;;  %v1262_v63 = vpack.c.bf16 %v1210_v17, %v1206_v2  ;;  %2343 = vpow2.f32 %v1846_v60 }
 0x2ba   :  { %v2326_v41 = vpop.eup %2325  ;;  %v1020_v36 = vadd.f32 1.0, %v2324_v30  ;;  %2345 = vpow2.f32 %v1848_v25  ;;  %1587 = vmatprep.mubr.bf16.mxu1 %v1260_v35  ;;  %2097 = vmatpush3.bf16.msra.mxu1 %v3425_v40  ;;  %v1849_v30 = vmul.f32 -1.442695, %v3097_v18  ;;  %v1854_v40 = vmul.f32 -1.442695, %v3123_v44 }
 0x2bb   :  { %v2328_v50 = vpop.eup %2327  ;;  %v1022_v48 = vadd.f32 1.0, %v2326_v41  ;;  %2347 = vpow2.f32 %v1847_v0  ;;  %1684 = vmatprep.mubr.bf16.mxu0 %v1262_v63  ;;  %1588 = vmatmul.mubr.bf16.gmra.mrb[40].mxu1 %v1259_v32  ;;  %v1850_v41 = vmul.f32 -1.442695, %v3112_v21 }
 0x2bc   :  { %v2330_v6 = vpop.eup %2329  ;;  %2349 = vrcp.f32 %v1020_v36  ;;  %v1023_v49 = vadd.f32 1.0, %v2328_v50  ;;  %1685 = vmatmul.mubr.bf16.gmra.mrb[56].mxu0 %v1261_v43  ;;  %v1852_v50 = vmul.f32 -1.442695, %v3114_v4 }
 0x2bd   :  { %v2332_v26 = vpop.eup %2331  ;;  %2351 = vrcp.f32 %v1022_v48  ;;  %v1025_v60 = vadd.f32 1.0, %v2330_v6  ;;  %v1851_v6 = vmul.f32 -1.442695, %v3119_v33 }
 0x2be   :  { %v2334_v9 = vpop.eup %2333  ;;  %2353 = vrcp.f32 %v1023_v49  ;;  %v1024_v14 = vadd.f32 1.0, %v2332_v26  ;;  %v1853_v49 = vmul.f32 -1.442695, %v3121_v3 }
 0x2bf   :  { %v2336_v7 = vpop.eup %2335  ;;  %2355 = vrcp.f32 %v1025_v60  ;;  %v1026_v25 = vadd.f32 1.0, %v2334_v9  ;;  %v1211_v60 = vmul.f32 %v3204_v24, %v3046_v20 }
 0x2c0   :  { %v2338_v12 = vpop.eup %2337  ;;  %2357 = vrcp.f32 %v1024_v14  ;;  %v1027_v0 = vadd.f32 1.0, %v2336_v7  ;;  %v1856_v14 = vmul.f32 -1.442695, %v3125_v52 }
 0x2c1   :  { %v2340_v37 = vpop.eup %2339  ;;  %2359 = vrcp.f32 %v1026_v25  ;;  %v1029_v32 = vadd.f32 1.0, %v2338_v12  ;;  %v1213_v25 = vmul.f32 %v3208_v57, %v3048_v28 }
 0x2c2   :  { %v2342_v29 = vpop.eup %2341  ;;  %2361 = vrcp.f32 %v1027_v0  ;;  %v1028_v43 = vadd.f32 1.0, %v2340_v37  ;;  %v1855_v0 = vmul.f32 -1.442695, %v3128_v61 }
 0x2c3   :  { %v2344_v53 = vpop.eup %2343  ;;  %2363 = vrcp.f32 %v1029_v32  ;;  %v1030_v55 = vadd.f32 1.0, %v2342_v29 }
 0x2c4   :  { %v2346_v2 = vpop.eup %2345  ;;  %2365 = vrcp.f32 %v1028_v43  ;;  %v1031_v17 = vadd.f32 1.0, %v2344_v53 }
 0x2c5   :  { %v2348_v35 = vpop.eup %2347  ;;  %2367 = vrcp.f32 %v1030_v55  ;;  %v1033_v58 = vadd.f32 1.0, %v2346_v2 }
 0x2c6   :  { %v2350_v63 = vpop.eup %2349  ;;  %2369 = vrcp.f32 %v1031_v17  ;;  %v1032_v62 = vadd.f32 1.0, %v2348_v35 }
 0x2c7   :  { %v2352_v36 = vpop.eup %2351  ;;  %2371 = vrcp.f32 %v1033_v58  ;;  %v1212_v32 = vmul.f32 %v2350_v63, %v3051_v56  ;;  %v1858_v56 = vmul.f32 -1.442695, %v3134_v34  ;;  %v3426_v63 = vld [vmem:[#allocation24_spill] sm:$0xff] }
 0x2c8   :  { %v2354_v48 = vpop.eup %2353  ;;  %2373 = vrcp.f32 %v1032_v62  ;;  %v1214_v24 = vmul.f32 %v2352_v36, %v3054_v11  ;;  %v1861_v62 = vmul.f32 -1.442695, %v3426_v63 }
 0x2c9   :  { %v2356_v26 = vpop.eup %2355  ;;  %v1215_v9 = vmul.f32 %v2354_v48, %v3056_v38  ;;  %2375 = vpow2.f32 %v1849_v30 }
 0x2ca   :  { %v2358_v7 = vpop.eup %2357  ;;  %v1217_v12 = vmul.f32 %v2356_v26, %v3059_v15  ;;  %2377 = vpow2.f32 %v1850_v41  ;;  %v1857_v15 = vmul.f32 -1.442695, %v3130_v10 }
 0x2cb   :  { %v2360_v37 = vpop.eup %2359  ;;  %v1263_v29 = vpack.c.bf16 %v1215_v9, %v1211_v60  ;;  %v1216_v20 = vmul.f32 %v2358_v7, %v3061_v39  ;;  %2379 = vpow2.f32 %v1852_v50  ;;  %v1860_v39 = vmul.f32 -1.442695, %v3136_v5 }
 0x2cc   :  { %v2362_v38 = vpop.eup %2361  ;;  %v1265_v43 = vpack.c.bf16 %v1217_v12, %v1213_v25  ;;  %v1218_v53 = vmul.f32 %v2360_v37, %v3064_v27  ;;  %2381 = vpow2.f32 %v1851_v6  ;;  %v1859_v27 = vmul.f32 -1.442695, %v3139_v16 }
 0x2cd   :  { %v2364_v28 = vpop.eup %2363  ;;  %v1264_v57 = vpack.c.bf16 %v1216_v20, %v1212_v32  ;;  %2383 = vpow2.f32 %v1853_v49  ;;  %v1219_v58 = vmul.f32 %v2362_v38, %v3076_v59 }
 0x2ce   :  { %v2366_v55 = vpop.eup %2365  ;;  %v1266_v2 = vpack.c.bf16 %v1218_v53, %v1214_v24  ;;  %2385 = vpow2.f32 %v1854_v40  ;;  %v3241_v36 = vmul.f32 %v2364_v28, %v3078_v31 }
 0x2cf   :  { %v3233_v17 = vpop.eup %2367  ;;  %2387 = vpow2.f32 %v1856_v14  ;;  %1595 = vmatprep.mubr.bf16.mxu1 %v1264_v57  ;;  %v1220_v6 = vmul.f32 %v2366_v55, %v3082_v13 }
 0x2d0   :  { %v2370_v11 = vpop.eup %2369  ;;  %2389 = vpow2.f32 %v1855_v0  ;;  %1692 = vmatprep.mubr.bf16.mxu0 %v1266_v2  ;;  %1596 = vmatmul.mubr.bf16.gmra.mrb[44].mxu1 %v1263_v29  ;;  %v3427_v2 = vld [vmem:[#allocation25_spill] sm:$0xff] }
 0x2d1   :  { %v2372_v35 = vpop.eup %2371  ;;  %v1223_v30 = vmul.f32 %v2370_v11, %v3088_v46  ;;  %2391 = vpow2.f32 %v1857_v15  ;;  %1693 = vmatmul.mubr.bf16.gmra.mrb[60].mxu0 %v1265_v43  ;;  %v3428_v11 = vld [vmem:[#allocation26_spill] sm:$0xff] }
 0x2d2   :  { %v2374_v41 = vpop.eup %2373  ;;  %v3244_v50 = vmul.f32 %v2372_v35, %v3090_v45  ;;  %2393 = vpow2.f32 %v1858_v56  ;;  %v1862_v56 = vmul.f32 -1.442695, %v3427_v2 }
 0x2d3   :  { %v2376_v48 = vpop.eup %2375  ;;  %v1267_v49 = vpack.c.bf16 %v1223_v30, %v1219_v58  ;;  %v1224_v59 = vmul.f32 %v2374_v41, %v3095_v1  ;;  %2395 = vpow2.f32 %v1860_v39  ;;  %v1222_v58 = vmul.f32 %v3233_v17, %v3084_v22 }
 0x2d4   :  { %v2378_v46 = vpop.eup %2377  ;;  %v1269_v40 = vpack.c.bf16 %v3244_v50, %v3241_v36  ;;  %v1034_v26 = vadd.f32 1.0, %v2376_v48  ;;  %2397 = vpow2.f32 %v1859_v27  ;;  %v1864_v27 = vmul.f32 -1.442695, %v3428_v11 }
 0x2d5   :  { %v2380_v60 = vpop.eup %2379  ;;  %v1268_v31 = vpack.c.bf16 %v1224_v59, %v1220_v6  ;;  %v1035_v9 = vadd.f32 1.0, %v2378_v46  ;;  %2399 = vpow2.f32 %v1861_v62  ;;  %v3429_v62 = vld [vmem:[#allocation27_spill] sm:$0xff]  ;;  %v3430_v6 = vld [vmem:[#allocation28_spill] sm:$0xff]  ;;  %v1867_v22 = vmul.f32 -1.442695, %v3175_v54 }
 0x2d6   :  { %v2382_v45 = vpop.eup %2381  ;;  %2401 = vrcp.f32 %v1034_v26  ;;  %v1037_v14 = vadd.f32 1.0, %v2380_v60  ;;  %v1863_v41 = vmul.f32 -1.442695, %v3429_v62  ;;  %v1866_v26 = vmul.f32 -1.442695, %v3169_v23 }
 0x2d7   :  { %v2384_v7 = vpop.eup %2383  ;;  %2403 = vrcp.f32 %v1035_v9  ;;  %v1036_v13 = vadd.f32 1.0, %v2382_v45  ;;  %1603 = vmatprep.mubr.bf16.mxu1 %v1268_v31  ;;  %v1868_v31 = vmul.f32 -1.442695, %v3171_v51  ;;  %v1870_v17 = vmul.f32 -1.442695, %v3181_v47 }
 0x2d8   :  { %v2386_v25 = vpop.eup %2385  ;;  %2405 = vrcp.f32 %v1037_v14  ;;  %v1038_v1 = vadd.f32 1.0, %v2384_v7  ;;  %1604 = vmatmul.mubr.bf16.gmra.mrb[48].mxu1 %v1267_v49  ;;  %v1865_v49 = vmul.f32 -1.442695, %v3430_v6 }
 0x2d9   :  { %v2388_v12 = vpop.eup %2387  ;;  %2407 = vrcp.f32 %v1036_v13  ;;  %v1039_v0 = vadd.f32 1.0, %v2386_v25  ;;  %v1872_v13 = vmul.f32 -1.442695, %v3183_v42 }
 0x2da   :  { %v2390_v37 = vpop.eup %2389  ;;  %2409 = vrcp.f32 %v1038_v1  ;;  %v1041_v32 = vadd.f32 1.0, %v2388_v12 }
 0x2db   :  { %v2392_v29 = vpop.eup %2391  ;;  %2411 = vrcp.f32 %v1039_v0  ;;  %v1040_v20 = vadd.f32 1.0, %v2390_v37  ;;  %v1871_v0 = vmul.f32 -1.442695, %v3190_v8 }
 0x2dc   :  { %v2394_v38 = vpop.eup %2393  ;;  %2413 = vrcp.f32 %v1041_v32  ;;  %v1042_v24 = vadd.f32 1.0, %v2392_v29 }
 0x2dd   :  { %v2396_v43 = vpop.eup %2395  ;;  %2415 = vrcp.f32 %v1040_v20  ;;  %v1043_v53 = vadd.f32 1.0, %v2394_v38 }
 0x2de   :  { %v2398_v28 = vpop.eup %2397  ;;  %2417 = vrcp.f32 %v1042_v24  ;;  %v1045_v57 = vadd.f32 1.0, %v2396_v43 }
 0x2df   :  { %v2400_v15 = vpop.eup %2399  ;;  %v1044_v55 = vadd.f32 1.0, %v2398_v28  ;;  %2419 = vrcp.f32 %v1043_v53 }
 0x2e0   :  { %v2402_v39 = vpop.eup %2401  ;;  %2421 = vrcp.f32 %v1045_v57  ;;  %v1046_v43 = vadd.f32 1.0, %v2400_v15 }
 0x2e1   :  { %v2404_v35 = vpop.eup %2403  ;;  %v1226_v30 = vmul.f32 %v2402_v39, %v3097_v18  ;;  %2423 = vrcp.f32 %v1044_v55  ;;  %v1869_v18 = vmul.f32 -1.442695, %v3177_v19 }
 0x2e2   :  { %v2406_v48 = vpop.eup %2405  ;;  %2425 = vpow2.f32 %v1862_v56  ;;  %v1227_v14 = vmul.f32 %v2404_v35, %v3112_v21 }
 0x2e3   :  { %v2408_v59 = vpop.eup %2407  ;;  %v1270_v46 = vpack.c.bf16 %v1226_v30, %v1222_v58  ;;  %2427 = vpow2.f32 %v1864_v27  ;;  %v1229_v1 = vmul.f32 %v2406_v48, %v3114_v4 }
 0x2e4   :  { %v2410_v60 = vpop.eup %2409  ;;  %2429 = vpow2.f32 %v1863_v41  ;;  %v1228_v21 = vmul.f32 %v2408_v59, %v3119_v33 }
 0x2e5   :  { %v2412_v9 = vpop.eup %2411  ;;  %1700 = vmatprep.mubr.bf16.mxu0 %v1270_v46  ;;  %2431 = vpow2.f32 %v1865_v49  ;;  %v1230_v29 = vmul.f32 %v2410_v60, %v3121_v3 }
 0x2e6   :  { %v2414_v45 = vpop.eup %2413  ;;  %v1231_v7 = vmul.f32 %v2412_v9, %v3123_v44  ;;  %1701 = vmatmul.mubr.bf16.gmra.mrb[64].mxu0 %v1269_v40  ;;  %2433 = vpow2.f32 %v1866_v26 }
 0x2e7   :  { %v2416_v25 = vpop.eup %2415  ;;  %v1233_v12 = vmul.f32 %v2414_v45, %v3125_v52  ;;  %2435 = vpow2.f32 %v1868_v31  ;;  %v3431_v52 = vld [vmem:[#allocation29_spill] sm:$0xff] }
 0x2e8   :  { %v2418_v37 = vpop.eup %2417  ;;  %v1271_v32 = vpack.c.bf16 %v1231_v7, %v1227_v14  ;;  %v1232_v44 = vmul.f32 %v2416_v25, %v3128_v61  ;;  %2437 = vpow2.f32 %v1867_v22  ;;  %v1873_v40 = vmul.f32 -1.442695, %v3431_v52 }
 0x2e9   :  { %v1273_v20 = vpack.c.bf16 %v1233_v12, %v1229_v1  ;;  %v1234_v36 = vmul.f32 %v2418_v37, %v3130_v10  ;;  %v2420_v50 = vpop.eup %2419  ;;  %2439 = vpow2.f32 %v1869_v18 }
 0x2ea   :  { %v1272_v4 = vpack.c.bf16 %v1232_v44, %v1228_v21  ;;  %v2422_v38 = vpop.eup %2421  ;;  %2441 = vpow2.f32 %v1870_v17  ;;  %v1235_v14 = vmul.f32 %v2420_v50, %v3134_v34 }
 0x2eb   :  { %v1274_v24 = vpack.c.bf16 %v1234_v36, %v1230_v29  ;;  %v2424_v33 = vpop.eup %2423  ;;  %2443 = vpow2.f32 %v1872_v13  ;;  %v1237_v25 = vmul.f32 %v2422_v38, %v3136_v5 }
 0x2ec   :  { %1611 = vmatprep.mubr.bf16.mxu1 %v1272_v4  ;;  %v2426_v61 = vpop.eup %2425  ;;  %2445 = vpow2.f32 %v1871_v0  ;;  %v1236_v0 = vmul.f32 %v2424_v33, %v3139_v16 }
 0x2ed   :  { %1708 = vmatprep.mubr.bf16.mxu0 %v1274_v24  ;;  %1612 = vmatmul.mubr.bf16.gmra.mrb[52].mxu1 %v1271_v32  ;;  %v2428_v3 = vpop.eup %2427  ;;  %v1047_v53 = vadd.f32 1.0, %v2426_v61  ;;  %2447 = vpow2.f32 %v1873_v40 }
 0x2ee   :  { %1709 = vmatmul.mubr.bf16.gmra.mrb[68].mxu0 %v1273_v20  ;;  %v2430_v10 = vpop.eup %2429  ;;  %2449 = vrcp.f32 %v1046_v43  ;;  %v1049_v28 = vadd.f32 1.0, %v2428_v3 }
 0x2ef   :  { %v2432_v57 = vpop.eup %2431  ;;  %2451 = vrcp.f32 %v1047_v53  ;;  %v1048_v55 = vadd.f32 1.0, %v2430_v10 }
 0x2f0   :  { %v2434_v56 = vpop.eup %2433  ;;  %2453 = vrcp.f32 %v1049_v28  ;;  %v1050_v15 = vadd.f32 1.0, %v2432_v57 }
 0x2f1   :  { %v2436_v39 = vpop.eup %2435  ;;  %2455 = vrcp.f32 %v1048_v55  ;;  %v1051_v27 = vadd.f32 1.0, %v2434_v56 }
 0x2f2   :  { %v2438_v35 = vpop.eup %2437  ;;  %2457 = vrcp.f32 %v1050_v15  ;;  %v1053_v58 = vadd.f32 1.0, %v2436_v39 }
 0x2f3   :  { %v2440_v30 = vpop.eup %2439  ;;  %2459 = vrcp.f32 %v1051_v27  ;;  %v1052_v41 = vadd.f32 1.0, %v2438_v35  ;;  %v3432_v27 = vld [vmem:[#allocation3_spill] sm:$0xff] }
 0x2f4   :  { %v2442_v48 = vpop.eup %2441  ;;  %2461 = vrcp.f32 %v1053_v58  ;;  %v1054_v49 = vadd.f32 1.0, %v2440_v30  ;;  %v3433_v30 = vld [vmem:[#allocation5_spill] sm:$0xff] }
 0x2f5   :  { %v2444_v59 = vpop.eup %2443  ;;  %2463 = vrcp.f32 %v1052_v41  ;;  %v1055_v46 = vadd.f32 1.0, %v2442_v48 }
 0x2f6   :  { %v2446_v26 = vpop.eup %2445  ;;  %2465 = vrcp.f32 %v1054_v49  ;;  %v1057_v60 = vadd.f32 1.0, %v2444_v59 }
 0x2f7   :  { %v2448_v31 = vpop.eup %2447  ;;  %2467 = vrcp.f32 %v1055_v46  ;;  %v1056_v9 = vadd.f32 1.0, %v2446_v26 }
 0x2f8   :  { %v2450_v22 = vpop.eup %2449  ;;  %2469 = vrcp.f32 %v1057_v60  ;;  %v1058_v18 = vadd.f32 1.0, %v2448_v31 }
 0x2f9   :  { %v2452_v17 = vpop.eup %2451  ;;  %2471 = vrcp.f32 %v1056_v9  ;;  %v1238_v44 = vmul.f32 %v2450_v22, %v3426_v63 }
 0x2fa   :  { %v2454_v45 = vpop.eup %2453  ;;  %v1239_v7 = vmul.f32 %v2452_v17, %v3427_v2  ;;  %2473 = vrcp.f32 %v1058_v18 }
 0x2fb   :  { %v2456_v13 = vpop.eup %2455  ;;  %v1241_v1 = vmul.f32 %v2454_v45, %v3428_v11 }
 0x2fc   :  { %v2458_v12 = vpop.eup %2457  ;;  %v1275_v37 = vpack.c.bf16 %v1239_v7, %v1235_v14  ;;  %v1240_v21 = vmul.f32 %v2456_v13, %v3429_v62  ;;  %v3434_v7 = vld [vmem:[#allocation2_spill] sm:$0xff] }
 0x2fd   :  { %v2460_v32 = vpop.eup %2459  ;;  %v1277_v29 = vpack.c.bf16 %v1241_v1, %v1237_v25  ;;  %v1242_v34 = vmul.f32 %v2458_v12, %v3430_v6  ;;  %v3435_v12 = vld [vmem:[#allocation4_spill] sm:$0xff] }
 0x2fe   :  { %v2462_v20 = vpop.eup %2461  ;;  %v1276_v2 = vpack.c.bf16 %v1240_v21, %v1236_v0  ;;  %v1243_v16 = vmul.f32 %v2460_v32, %v3169_v23 }
 0x2ff   :  { %v2464_v36 = vpop.eup %2463  ;;  %v1278_v50 = vpack.c.bf16 %v1242_v34, %v1238_v44  ;;  %v1245_v38 = vmul.f32 %v2462_v20, %v3171_v51 }
 0x300   :  { %v2466_v4 = vpop.eup %2465  ;;  %1619 = vmatprep.mubr.bf16.mxu1 %v1276_v2  ;;  %v1244_v6 = vmul.f32 %v2464_v36, %v3175_v54 }
 0x301   :  { %v2468_v5 = vpop.eup %2467  ;;  %1620 = vmatmul.mubr.bf16.gmra.mrb[56].mxu1 %v1275_v37  ;;  %v1246_v61 = vmul.f32 %v2466_v4, %v3177_v19 }
 0x302   :  { %v2470_v11 = vpop.eup %2469  ;;  %v1247_v40 = vmul.f32 %v2468_v5, %v3181_v47 }
 0x303   :  { %v2472_v62 = vpop.eup %2471  ;;  %v1249_v63 = vmul.f32 %v2470_v11, %v3183_v42  ;;  %v3436_v11 = vld [vmem:[#allocation7_spill] sm:$0xff] }
 0x304   :  { %v2474_v24 = vpop.eup %2473  ;;  %v1279_v43 = vpack.c.bf16 %v1247_v40, %v1243_v16  ;;  %v1248_v33 = vmul.f32 %v2472_v62, %v3190_v8  ;;  %v3437_v62 = vld [vmem:[#allocation9_spill] sm:$0xff] }
 0x305   :  { %v1281_v3 = vpack.c.bf16 %v1249_v63, %v1245_v38  ;;  %v1250_v53 = vmul.f32 %v2474_v24, %v3431_v52 }
 0x306   :  { %v1280_v10 = vpack.c.bf16 %v1248_v33, %v1244_v6 }
 0x307   :  { %v1282_v23 = vpack.c.bf16 %v1250_v53, %v1246_v61 }
 0x308   :  { %1627 = vmatprep.mubr.bf16.mxu1 %v1280_v10 }
 0x309   :  { %1628 = vmatmul.mubr.bf16.gmra.mrb[60].mxu1 %v1279_v43 }
 0x30a   :  { %1716 = vmatprep.mubr.bf16.mxu1 %v1278_v50 }
 0x311   :  { %1717 = vmatmul.mubr.bf16.vlgmr.msra.gmra.mrb[64].mxu1 %v1277_v29 }
 0x312   :  { %1724 = vmatprep.mubr.bf16.mxu1 %v1282_v23 }
 0x319   :  { %1725 = vmatmul.mubr.bf16.gmra.mrb[68].mxu1 %v1281_v3 }
 0x370   :  { %v1938_v51 = vpop.f32.mrb[32].mxu1 }
 0x371   :  { %v2002_v47 = vpop.f32.mrb[48].mxu0  ;;  %v1939_v42 = vpop.f32.mrb[33].mxu1 }
 0x372   :  { %v1940_v54 = vadd.f32 %v1939_v42, %v1938_v51  ;;  %v2003_v28 = vpop.f32.mrb[49].mxu0  ;;  %v1941_v57 = vpop.f32.mrb[34].mxu1 }
 0x373   :  { %v2004_v8 = vadd.f32 %v2003_v28, %v2002_v47  ;;  %v2005_v55 = vpop.f32.mrb[50].mxu0  ;;  %v1942_v19 = vpop.f32.mrb[35].mxu1 }
 0x374   :  { %v1943_v56 = vadd.f32 %v1942_v19, %v1941_v57  ;;  %v2006_v15 = vpop.f32.mrb[51].mxu0 }
 0x375   :  { %v1671_v52 = vadd.f32 %v2004_v8, %v1940_v54  ;;  %v2007_v39 = vadd.f32 %v2006_v15, %v2005_v55  ;;  %v3438_v54 = vld [vmem:[#allocation6_spill] sm:$0xff]  ;;  %v3439_v55 = vld [vmem:[#allocation8_spill] sm:$0xff] }
 0x377   :  { %v1733_v35 = vadd.f32 %v1671_v52, %v3432_v27  ;;  %v1674_v58 = vadd.f32 %v2007_v39, %v1943_v56 }
 0x379   :  { %1749 = vst [vmem:[%s3362_s6] sm:$0xff] %v1733_v35  ;;  %v1734_v41 = vadd.f32 %v1674_v58, %v3433_v30 }
 0x37b   :  { %1750 = vst [vmem:[%s3362_s6 + $0x8] sm:$0xff] %v1734_v41 }
 0x386   :  { %v1944_v48 = vpop.f32.mrb[36].mxu1 }
 0x387   :  { %v2008_v49 = vpop.f32.mrb[52].mxu0  ;;  %v1945_v59 = vpop.f32.mrb[37].mxu1 }
 0x388   :  { %v1946_v46 = vadd.f32 %v1945_v59, %v1944_v48  ;;  %v2009_v26 = vpop.f32.mrb[53].mxu0  ;;  %v1947_v60 = vpop.f32.mrb[38].mxu1 }
 0x389   :  { %v2010_v31 = vadd.f32 %v2009_v26, %v2008_v49  ;;  %v2011_v9 = vpop.f32.mrb[54].mxu0  ;;  %v1948_v22 = vpop.f32.mrb[39].mxu1 }
 0x38a   :  { %v1949_v18 = vadd.f32 %v1948_v22, %v1947_v60  ;;  %v2012_v17 = vpop.f32.mrb[55].mxu0 }
 0x38b   :  { %v1679_v45 = vadd.f32 %v2010_v31, %v1946_v46  ;;  %v2013_v14 = vadd.f32 %v2012_v17, %v2011_v9  ;;  %v3440_v46 = vld [vmem:[#allocation11_spill] sm:$0xff]  ;;  %v3441_v9 = vld [vmem:[#allocation13_spill] sm:$0xff] }
 0x38d   :  { %v1735_v13 = vadd.f32 %v1679_v45, %v3434_v7  ;;  %v1682_v25 = vadd.f32 %v2013_v14, %v1949_v18 }
 0x38e   :  { %v1950_v1 = vpop.f32.mrb[40].mxu1 }
 0x38f   :  { %1751 = vst [vmem:[%s3362_s6 + $0x10] sm:$0xff] %v1735_v13  ;;  %v1736_v0 = vadd.f32 %v1682_v25, %v3435_v12  ;;  %v2014_v37 = vpop.f32.mrb[56].mxu0  ;;  %v1951_v21 = vpop.f32.mrb[41].mxu1 }
 0x390   :  { %v1952_v32 = vadd.f32 %v1951_v21, %v1950_v1  ;;  %v2015_v44 = vpop.f32.mrb[57].mxu0  ;;  %v1953_v29 = vpop.f32.mrb[42].mxu1 }
 0x391   :  { %1752 = vst [vmem:[%s3362_s6 + $0x18] sm:$0xff] %v1736_v0  ;;  %v2016_v34 = vadd.f32 %v2015_v44, %v2014_v37  ;;  %v2017_v20 = vpop.f32.mrb[58].mxu0  ;;  %v1954_v2 = vpop.f32.mrb[43].mxu1 }
 0x392   :  { %v1955_v36 = vadd.f32 %v1954_v2, %v1953_v29  ;;  %v2018_v50 = vpop.f32.mrb[59].mxu0 }
 0x393   :  { %v1687_v4 = vadd.f32 %v2016_v34, %v1952_v32  ;;  %v2019_v5 = vadd.f32 %v2018_v50, %v2017_v20  ;;  %v3442_v32 = vld [vmem:[#allocation10_spill] sm:$0xff]  ;;  %v3443_v34 = vld [vmem:[#allocation12_spill] sm:$0xff] }
 0x395   :  { %v1737_v16 = vadd.f32 %v1687_v4, %v3436_v11  ;;  %v1690_v40 = vadd.f32 %v2019_v5, %v1955_v36 }
 0x397   :  { %1753 = vst [vmem:[%s3362_s6 + $0x20] sm:$0xff] %v1737_v16  ;;  %v1738_v38 = vadd.f32 %v1690_v40, %v3437_v62 }
 0x399   :  { %1754 = vst [vmem:[%s3362_s6 + $0x28] sm:$0xff] %v1738_v38 }
 0x3a3   :  { %v1956_v63 = vpop.f32.mrb[44].mxu1 }
 0x3a4   :  { %v2020_v24 = vpop.f32.mrb[60].mxu0  ;;  %v1957_v6 = vpop.f32.mrb[45].mxu1 }
 0x3a5   :  { %v1958_v43 = vadd.f32 %v1957_v6, %v1956_v63  ;;  %v2021_v33 = vpop.f32.mrb[61].mxu0  ;;  %v1959_v61 = vpop.f32.mrb[46].mxu1 }
 0x3a6   :  { %v2022_v3 = vadd.f32 %v2021_v33, %v2020_v24  ;;  %v2023_v53 = vpop.f32.mrb[62].mxu0  ;;  %v1960_v10 = vpop.f32.mrb[47].mxu1 }
 0x3a7   :  { %v1961_v23 = vadd.f32 %v1960_v10, %v1959_v61  ;;  %v2024_v51 = vpop.f32.mrb[63].mxu0 }
 0x3a8   :  { %v1695_v47 = vadd.f32 %v2022_v3, %v1958_v43  ;;  %v2025_v42 = vadd.f32 %v2024_v51, %v2023_v53 }
 0x3aa   :  { %v1739_v28 = vadd.f32 %v1695_v47, %v3438_v54  ;;  %v1698_v57 = vadd.f32 %v2025_v42, %v1961_v23  ;;  %v3444_v23 = vld [vmem:[#allocation15_spill] sm:$0xff]  ;;  %v3445_v42 = vld [vmem:[#allocation17_spill] sm:$0xff] }
 0x3ab   :  { %v1962_v8 = vpop.f32.mrb[48].mxu1 }
 0x3ac   :  { %1755 = vst [vmem:[%s3362_s6 + $0x30] sm:$0xff] %v1739_v28  ;;  %v1740_v19 = vadd.f32 %v1698_v57, %v3439_v55  ;;  %v1963_v56 = vpop.f32.mrb[49].mxu1 }
 0x3ad   :  { %v1964_v15 = vadd.f32 %v1963_v56, %v1962_v8  ;;  %v1965_v52 = vpop.f32.mrb[50].mxu1 }
 0x3ae   :  { %1756 = vst [vmem:[%s3362_s6 + $0x38] sm:$0xff] %v1740_v19  ;;  %v1966_v39 = vpop.f32.mrb[51].mxu1 }
 0x3af   :  { %v1967_v27 = vadd.f32 %v1966_v39, %v1965_v52  ;;  %v3446_v52 = vld [vmem:[#allocation14_spill] sm:$0xff] }
 0x3b9   :  { %v2026_v35 = vpop.f32.mrb[64].mxu0 }
 0x3ba   :  { %v2027_v58 = vpop.f32.mrb[65].mxu0 }
 0x3bb   :  { %v2028_v30 = vadd.f32 %v2027_v58, %v2026_v35  ;;  %v2029_v41 = vpop.f32.mrb[66].mxu0  ;;  %v3447_v35 = vld [vmem:[#allocation16_spill] sm:$0xff] }
 0x3bc   :  { %v2030_v48 = vpop.f32.mrb[67].mxu0 }
 0x3bd   :  { %v1703_v49 = vadd.f32 %v2028_v30, %v1964_v15  ;;  %v2031_v59 = vadd.f32 %v2030_v48, %v2029_v41 }
 0x3bf   :  { %v1741_v26 = vadd.f32 %v1703_v49, %v3440_v46  ;;  %v1706_v60 = vadd.f32 %v2031_v59, %v1967_v27 }
 0x3c0   :  { %v1968_v31 = vpop.f32.mrb[52].mxu1 }
 0x3c1   :  { %1757 = vst [vmem:[%s3362_s6 + $0x40] sm:$0xff] %v1741_v26  ;;  %v1742_v22 = vadd.f32 %v1706_v60, %v3441_v9  ;;  %v2032_v18 = vpop.f32.mrb[68].mxu0  ;;  %v1969_v17 = vpop.f32.mrb[53].mxu1 }
 0x3c2   :  { %v1970_v45 = vadd.f32 %v1969_v17, %v1968_v31  ;;  %v2033_v14 = vpop.f32.mrb[69].mxu0  ;;  %v1971_v7 = vpop.f32.mrb[54].mxu1 }
 0x3c3   :  { %1758 = vst [vmem:[%s3362_s6 + $0x48] sm:$0xff] %v1742_v22  ;;  %v2034_v13 = vadd.f32 %v2033_v14, %v2032_v18  ;;  %v2035_v25 = vpop.f32.mrb[70].mxu0  ;;  %v1972_v1 = vpop.f32.mrb[55].mxu1 }
 0x3c4   :  { %v1973_v12 = vadd.f32 %v1972_v1, %v1971_v7  ;;  %v2036_v0 = vpop.f32.mrb[71].mxu0 }
 0x3c5   :  { %v1711_v37 = vadd.f32 %v2034_v13, %v1970_v45  ;;  %v2037_v21 = vadd.f32 %v2036_v0, %v2035_v25 }
 0x3c7   :  { %v1743_v44 = vadd.f32 %v1711_v37, %v3442_v32  ;;  %v1714_v29 = vadd.f32 %v2037_v21, %v1973_v12 }
 0x3c9   :  { %1759 = vst [vmem:[%s3362_s6 + $0x50] sm:$0xff] %v1743_v44  ;;  %v1744_v20 = vadd.f32 %v1714_v29, %v3443_v34 }
 0x3cb   :  { %1760 = vst [vmem:[%s3362_s6 + $0x58] sm:$0xff] %v1744_v20 }
 0x3d4   :  { %v1974_v2 = vpop.f32.mrb[56].mxu1 }
 0x3d5   :  { %v1975_v36 = vpop.f32.mrb[57].mxu1 }
 0x3d6   :  { %v1976_v50 = vadd.f32 %v1975_v36, %v1974_v2  ;;  %v1977_v4 = vpop.f32.mrb[58].mxu1 }
 0x3d7   :  { %v1978_v5 = vpop.f32.mrb[59].mxu1 }
 0x3d8   :  { %v1979_v11 = vadd.f32 %v1978_v5, %v1977_v4 }
 0x3dc   :  { %v1980_v16 = vpop.f32.mrb[60].mxu1 }
 0x3dd   :  { %v1981_v40 = vpop.f32.mrb[61].mxu1 }
 0x3de   :  { %v1982_v62 = vadd.f32 %v1981_v40, %v1980_v16  ;;  %v1983_v38 = vpop.f32.mrb[62].mxu1 }
 0x3df   :  { %v1984_v63 = vpop.f32.mrb[63].mxu1 }
 0x3e0   :  { %v1985_v24 = vadd.f32 %v1984_v63, %v1983_v38 }
 0x3e4   :  { %v2038_v6 = vpop.f32.mrb[64].mxu1 }
 0x3e5   :  { %v2039_v43 = vpop.f32.mrb[65].mxu1 }
 0x3e6   :  { %v2040_v33 = vadd.f32 %v2039_v43, %v2038_v6  ;;  %v2041_v61 = vpop.f32.mrb[66].mxu1 }
 0x3e7   :  { %v2042_v3 = vpop.f32.mrb[67].mxu1 }
 0x3e8   :  { %v1719_v53 = vadd.f32 %v2040_v33, %v1976_v50  ;;  %v2043_v10 = vadd.f32 %v2042_v3, %v2041_v61 }
 0x3ea   :  { %v1745_v51 = vadd.f32 %v1719_v53, %v3444_v23  ;;  %v1722_v47 = vadd.f32 %v2043_v10, %v1979_v11 }
 0x3ec   :  { %1761 = vst [vmem:[%s3362_s6 + $0x60] sm:$0xff] %v1745_v51  ;;  %v1746_v54 = vadd.f32 %v1722_v47, %v3445_v42  ;;  %v2044_v28 = vpop.f32.mrb[68].mxu1 }
 0x3ed   :  { %v2045_v57 = vpop.f32.mrb[69].mxu1 }
 0x3ee   :  { %1762 = vst [vmem:[%s3362_s6 + $0x68] sm:$0xff] %v1746_v54  ;;  %v2046_v8 = vadd.f32 %v2045_v57, %v2044_v28  ;;  %v2047_v55 = vpop.f32.mrb[70].mxu1 }
 0x3ef   :  { %v2048_v19 = vpop.f32.mrb[71].mxu1 }
 0x3f0   :  { %v1727_v56 = vadd.f32 %v2046_v8, %v1982_v62  ;;  %v2049_v15 = vadd.f32 %v2048_v19, %v2047_v55 }
 0x3f2   :  { %v1747_v39 = vadd.f32 %v1727_v56, %v3446_v52  ;;  %v1730_v27 = vadd.f32 %v2049_v15, %v1985_v24 }
 0x3f4   :  { %1763 = vst [vmem:[%s3362_s6 + $0x70] sm:$0xff] %v1747_v39  ;;  %v1748_v58 = vadd.f32 %v1730_v27, %v3447_v35 }
 0x3f6   :  { %1764 = vst [vmem:[%s3362_s6 + $0x78] sm:$0xff] %v1748_v58 }

// kernel: minimal_llm_forward.8
= control target key start
LH: loop header
LB: loop body
LE: loop exit
PB: predicated region body
PF: predicated region fallthrough
CT: control target
= control target key end

     0   :  { %s5664_s18 = smov 0   ;;  %s5666_s19 = smov 0   ;;  %s7769_s0 = inlined_call_operand.vmem [shape: f32[2,64,384], index: 0, kind: input, shape index: {}, may-alias: {0,1,2}]   ;;  %s7770_s1 = inlined_call_operand.vmem [shape: f32[2,64,384], index: 1, kind: input, shape index: {}, may-alias: {0,1,2}]   ;;  %s7771_s2 = inlined_call_operand.vmem [shape: f32[2,64,384], index: 2, kind: input, shape index: {}, may-alias: {0,1,2}]   ;;  %s7772_s3 = inlined_call_operand.vmem [shape: f32[4,16], index: 3, kind: input, shape index: {}]   ;;  %s7773_s4 = inlined_call_operand.vmem [shape: f32[4,16], index: 4, kind: input, shape index: {}]   ;;  %s7774_s5 = inlined_call_operand.vmem [shape: f32[2,64,128], index: 5, kind: output, shape index: {}]  }
   0x1   :  { %s5668_s20 = smov 0  }
   0x2 LB: > { %s4178_s21 = sadd.s32 4294967295, %s5625_s20   ;;  %s5681_s22 = sadd.s32 1, %s5625_s20   ;;  %s5625_s20 = sphi %s5668_s20, %s7886_s20   ;;  %s5621_s19 = sphi %s5666_s19, %s7885_s19   ;;  %s5617_s18 = sphi %s5664_s18, %s7884_s18  }
   0x3   : > { %s19_s23 = ssub.s32 %s5625_s20, %s5681_s22  ;;  %s22_s24 = sadd.s32 1, %s5621_s19 }
   0x4   : > { %p20_p0 = scmp.eq.s32.totalorder %s19_s23, 0  ;;  %p29_p1 = scmp.ne.s32.totalorder %s5621_s19, %s5617_s18 }
   0x5   : > { %p30_p2 = scmp.eq.s32.totalorder %s5625_s20, 0  ;;  %p4181_p4 = scmp.ge.s32.totalorder %s5625_s20, 2 }
   0x6   : > { %s5690_s25 = scalar_select %p20_p0, %s5621_s19, %s22_s24  }
   0x7   : > { %p5692_p3 = por %p30_p2, %p29_p1  ;;  %181 = sbr.rel (%p4181_p4) target bundleno = 41 (0x29), region = 24 }
   0xe   : > { %184 = sbr.rel (!%p5692_p3) target bundleno = 23 (0x17), region = 28  ;;  %s186_s27 = sand.u32 (%p5692_p3), 1, %s5621_s19  }
   0xf   : > { %s5197_s28 = smul.u32 (%p5692_p3), 192, %s5625_s20  ;;  %s4182_s29 = sshll.u32 (%p5692_p3), %s186_s27, 6 }
  0x10   : > { %s188_s8 = scalar_lea.vmem (%p5692_p3), [#allocation2], %s4182_s29 }
  0x11   : > { %s191_s7 = scalar_lea.vmem (%p5692_p3), %s7769_s0, %s5197_s28 }
  0x12   : > { %v233_v0 = vld [vmem:[%s191_s7] sm:$0xff] (%p5692_p3)  ;;  %v235_v1 = vld [vmem:[%s191_s7 + $0x18] sm:$0xff] (%p5692_p3)  ;;  %v237_v2 = vld [vmem:[%s191_s7 + $0x30] sm:$0xff] (%p5692_p3) }
  0x13   : > { %234 = vst [vmem:[%s188_s8] sm:$0xff] (%p5692_p3), %v233_v0  ;;  %236 = vst [vmem:[%s188_s8 + $0x8] sm:$0xff] (%p5692_p3), %v235_v1  ;;  %v239_v3 = vld [vmem:[%s191_s7 + $0x48] sm:$0xff] (%p5692_p3)  ;;  %v241_v4 = vld [vmem:[%s191_s7 + $0x60] sm:$0xff] (%p5692_p3) }
  0x14   : > { %238 = vst [vmem:[%s188_s8 + $0x10] sm:$0xff] (%p5692_p3), %v237_v2  ;;  %v243_v5 = vld [vmem:[%s191_s7 + $0x78] sm:$0xff] (%p5692_p3)  ;;  %240 = vst [vmem:[%s188_s8 + $0x18] sm:$0xff] (%p5692_p3), %v239_v3  ;;  %v245_v6 = vld [vmem:[%s191_s7 + $0x90] sm:$0xff] (%p5692_p3) }
  0x15   : > { %242 = vst [vmem:[%s188_s8 + $0x20] sm:$0xff] %v241_v4  ;;  %244 = vst [vmem:[%s188_s8 + $0x28] sm:$0xff] %v243_v5  ;;  %v247_v7 = vld [vmem:[%s191_s7 + $0xa8] sm:$0xff] }
  0x16   : > { %246 = vst [vmem:[%s188_s8 + $0x30] sm:$0xff] %v245_v6  ;;  %248 = vst [vmem:[%s188_s8 + $0x38] sm:$0xff] %v247_v7 }
  0x17 PF: > { %254 = sbr.rel (!%p5692_p3) target bundleno = 32 (0x20), region = 66  ;;  %s256_s9 = sand.u32 (%p5692_p3), 1, %s5621_s19  }
  0x18   : > { %s4185_s10 = smul.u32 (%p5692_p3), 192, %s5625_s20  ;;  %s4184_s11 = sshll.u32 (%p5692_p3), %s256_s9, 6 }
  0x19   : > { %s258_s15 = scalar_lea.vmem (%p5692_p3), [#allocation3], %s4184_s11 }
  0x1a   : > { %s4106_s14 = scalar_lea.vmem (%p5692_p3), %s7770_s1, %s4185_s10 }
  0x1b   : > { %v4186_v8 = vld [vmem:[%s4106_s14 + $0x8] sm:$0xff] (%p5692_p3)  ;;  %v4187_v9 = vld [vmem:[%s4106_s14 + $0x20] sm:$0xff] (%p5692_p3)  ;;  %v4188_v10 = vld [vmem:[%s4106_s14 + $0x38] sm:$0xff] (%p5692_p3) }
  0x1c   : > { %305 = vst [vmem:[%s258_s15] sm:$0xff] (%p5692_p3), %v4186_v8  ;;  %307 = vst [vmem:[%s258_s15 + $0x8] sm:$0xff] (%p5692_p3), %v4187_v9  ;;  %v4189_v11 = vld [vmem:[%s4106_s14 + $0x50] sm:$0xff] (%p5692_p3)  ;;  %v4190_v12 = vld [vmem:[%s4106_s14 + $0x68] sm:$0xff] (%p5692_p3) }
  0x1d   : > { %309 = vst [vmem:[%s258_s15 + $0x10] sm:$0xff] (%p5692_p3), %v4188_v10  ;;  %v4191_v13 = vld [vmem:[%s4106_s14 + $0x80] sm:$0xff] (%p5692_p3)  ;;  %311 = vst [vmem:[%s258_s15 + $0x18] sm:$0xff] (%p5692_p3), %v4189_v11  ;;  %v4192_v14 = vld [vmem:[%s4106_s14 + $0x98] sm:$0xff] (%p5692_p3) }
  0x1e   : > { %313 = vst [vmem:[%s258_s15 + $0x20] sm:$0xff] %v4190_v12  ;;  %315 = vst [vmem:[%s258_s15 + $0x28] sm:$0xff] %v4191_v13  ;;  %v4193_v15 = vld [vmem:[%s4106_s14 + $0xb0] sm:$0xff] }
  0x1f   : > { %317 = vst [vmem:[%s258_s15 + $0x30] sm:$0xff] %v4192_v14  ;;  %319 = vst [vmem:[%s258_s15 + $0x38] sm:$0xff] %v4193_v15 }
  0x20 PF: > { %325 = sbr.rel (!%p5692_p3) target bundleno = 41 (0x29), region = 104  ;;  %s327_s16 = sand.u32 (%p5692_p3), 1, %s5621_s19  }
  0x21   : > { %s4195_s17 = smul.u32 (%p5692_p3), 192, %s5625_s20  ;;  %s4194_s23 = sshll.u32 (%p5692_p3), %s327_s16, 6 }
  0x22   : > { %s329_s29 = scalar_lea.vmem (%p5692_p3), [#allocation4], %s4194_s23 }
  0x23   : > { %s4112_s28 = scalar_lea.vmem (%p5692_p3), %s7771_s2, %s4195_s17 }
  0x24   : > { %v4196_v16 = vld [vmem:[%s4112_s28 + $0x10] sm:$0xff] (%p5692_p3)  ;;  %v4197_v17 = vld [vmem:[%s4112_s28 + $0x28] sm:$0xff] (%p5692_p3)  ;;  %v4198_v18 = vld [vmem:[%s4112_s28 + $0x40] sm:$0xff] (%p5692_p3) }
  0x25   : > { %376 = vst [vmem:[%s329_s29] sm:$0xff] (%p5692_p3), %v4196_v16  ;;  %378 = vst [vmem:[%s329_s29 + $0x8] sm:$0xff] (%p5692_p3), %v4197_v17  ;;  %v4199_v19 = vld [vmem:[%s4112_s28 + $0x58] sm:$0xff] (%p5692_p3)  ;;  %v4200_v20 = vld [vmem:[%s4112_s28 + $0x70] sm:$0xff] (%p5692_p3) }
  0x26   : > { %380 = vst [vmem:[%s329_s29 + $0x10] sm:$0xff] (%p5692_p3), %v4198_v18  ;;  %v4201_v21 = vld [vmem:[%s4112_s28 + $0x88] sm:$0xff] (%p5692_p3)  ;;  %382 = vst [vmem:[%s329_s29 + $0x18] sm:$0xff] (%p5692_p3), %v4199_v19  ;;  %v4202_v22 = vld [vmem:[%s4112_s28 + $0xa0] sm:$0xff] (%p5692_p3) }
  0x27   : > { %384 = vst [vmem:[%s329_s29 + $0x20] sm:$0xff] %v4200_v20  ;;  %386 = vst [vmem:[%s329_s29 + $0x28] sm:$0xff] %v4201_v21  ;;  %v4203_v23 = vld [vmem:[%s4112_s28 + $0xb8] sm:$0xff] }
  0x28   : > { %388 = vst [vmem:[%s329_s29 + $0x30] sm:$0xff] %v4202_v22  ;;  %390 = vst [vmem:[%s329_s29 + $0x38] sm:$0xff] %v4203_v23 }
  0x29 PF: > { %p4204_p5 = scmp.ge.s32.totalorder %s5625_s20, 1  ;;  %p395_p6 = scmp.lt.s32.totalorder %s5625_s20, 3 }
  0x2b   : > { %p396_p7 = pnand %p4204_p5, %p395_p6 }
  0x2d   : > { %399 = sbr.rel (%p396_p7) target bundleno = 3202 (0xc82), region = 142 }
  0x34   : > { %v5723_v24 = vld [vmem:[%s7772_s3] ss:$0 sm:$0xff]  ;;  %s402_s6 = sand.u32 1, %s5617_s18   ;;  %s5627_s7 = smov 16   ;;  %vm789_vm0 = vcmask 130048   ;;  %vm1096_vm3 = vcmask 523264  }
  0x35   : > { %570 = vrot.lane.b32.xlu0 %v5723_v24, %s5627_s7  ;;  %s5728_s8 = sshll.u32 %s402_s6, 6  ;;  %v5733_v25 = vld [vmem:[%s7773_s4] ss:$0 sm:$0xff]  ;;  %s5628_s12 = smov 112   ;;  %vm5927_vm1 = vmpackc.low %vm789_vm0, %vm789_vm0  ;;  %vm4043_vm11 = vcmask 261120   ;;  %vm4060_vm12 = vcmask 785408  }
  0x36   : > { %s5736_s11 = scalar_lea.vmem [#allocation3], %s5728_s8  ;;  %s5785_s18 = scalar_lea.vmem [#allocation2], %s5728_s8 }
  0x37   : > { %v5739_v26 = vld [vmem:[%s5736_s11 + $0x8] sm:$0xff]  ;;  %v5742_v27 = vld [vmem:[%s5736_s11] sm:$0xff]  ;;  %v5745_v28 = vld [vmem:[%s5736_s11 + $0x10] sm:$0xff]  ;;  %s5629_s15 = smov 32   ;;  %s5630_s16 = smov 48  }
  0x38   : > { %v694_v29 = vmul.f32 %v5733_v25, %v5739_v26  ;;  %v693_v30 = vmul.f32 %v5733_v25, %v5742_v27  ;;  %v5752_v31 = vld [vmem:[%s5736_s11 + $0x18] sm:$0xff]  ;;  %v695_v32 = vmul.f32 %v5733_v25, %v5745_v28  ;;  %v5761_v34 = vld [vmem:[%s5736_s11 + $0x20] sm:$0xff]  ;;  %v5764_v35 = vld [vmem:[%s5736_s11 + $0x28] sm:$0xff]  ;;  %s5631_s24 = smov 80   ;;  %s6139_s27 = scalar_lea.vmem [#allocation4], %s5728_s8 }
  0x39   : > { %v696_v33 = vmul.f32 %v5733_v25, %v5752_v31  ;;  %v697_v36 = vmul.f32 %v5733_v25, %v5761_v34  ;;  %v698_v37 = vmul.f32 %v5733_v25, %v5764_v35  ;;  %v5773_v38 = vld [vmem:[%s5736_s11 + $0x30] sm:$0xff]  ;;  %v5776_v39 = vld [vmem:[%s5736_s11 + $0x38] sm:$0xff]  ;;  %v5788_v42 = vld [vmem:[%s5785_s18] sm:$0xff]  ;;  %s5632_s28 = smov 96   ;;  %s5633_s30 = smov 64  }
  0x3a   : > { %711 = vrot.lane.b32.xlu1 %v694_v29, %s5627_s7  ;;  %709 = vrot.lane.b32.xlu0 %v693_v30, %s5627_s7  ;;  %v699_v40 = vmul.f32 %v5733_v25, %v5773_v38  ;;  %v700_v41 = vmul.f32 %v5733_v25, %v5776_v39  ;;  %v581_v43 = vmul.f32 %v5733_v25, %v5788_v42  ;;  %v5795_v44 = vld [vmem:[%s5785_s18 + $0x8] sm:$0xff]  ;;  %v5798_v45 = vld [vmem:[%s5785_s18 + $0x10] sm:$0xff]  ;;  %p451_p8 = scmp.lt.s32.totalorder %s4178_s21, 1 }
  0x3b   : > { %v582_v46 = vmul.f32 %v5733_v25, %v5795_v44  ;;  %v583_v47 = vmul.f32 %v5733_v25, %v5798_v45  ;;  %v5808_v48 = vld [vmem:[%s5785_s18 + $0x18] sm:$0xff]  ;;  %v5811_v49 = vld [vmem:[%s5785_s18 + $0x20] sm:$0xff]  ;;  %v5820_v52 = vld [vmem:[%s5785_s18 + $0x28] sm:$0xff] }
  0x3c   : > { %v584_v50 = vmul.f32 %v5733_v25, %v5808_v48  ;;  %v585_v51 = vmul.f32 %v5733_v25, %v5811_v49  ;;  %v586_v53 = vmul.f32 %v5733_v25, %v5820_v52  ;;  %v5827_v54 = vld [vmem:[%s5785_s18 + $0x30] sm:$0xff]  ;;  %v5844_v4 = vld [vmem:[%s5785_s18 + $0x38] sm:$0xff]  ;;  %s7888_s21 = smov (!%p451_p8, %s4178_s21), 1 }
  0x3d   : > { %v587_v55 = vmul.f32 %v5733_v25, %v5827_v54  ;;  %v588_v7 = vmul.f32 %v5733_v25, %v5844_v4 }
  0x3e   : > { %713 = vrot.lane.b32.xlu1 %v695_v32, %s5627_s7  ;;  %715 = vrot.lane.b32.xlu0 %v696_v33, %s5627_s7 }
  0x42   : > { %717 = vrot.lane.b32.xlu1 %v697_v36, %s5627_s7  ;;  %719 = vrot.lane.b32.xlu0 %v698_v37, %s5627_s7 }
  0x46   : > { %721 = vrot.lane.b32.xlu1 %v699_v40, %s5627_s7  ;;  %723 = vrot.lane.b32.xlu0 %v700_v41, %s5627_s7 }
  0x4a   : > { %518 = vrot.lane.b32.xlu1 %v5733_v25, %s5627_s7  ;;  %597 = vrot.lane.b32.xlu0 %v581_v43, %s5627_s7 }
  0x4e   : > { %599 = vrot.lane.b32.xlu1 %v582_v46, %s5627_s7  ;;  %601 = vrot.lane.b32.xlu0 %v583_v47, %s5627_s7 }
  0x52   : > { %603 = vrot.lane.b32.xlu1 %v584_v50, %s5627_s7  ;;  %605 = vrot.lane.b32.xlu0 %v585_v51, %s5627_s7 }
  0x56   : > { %607 = vrot.lane.b32.xlu1 %v586_v53, %s5627_s7 }
  0x5a   : > { %609 = vrot.lane.b32.xlu1 %v587_v55, %s5627_s7 }
  0xa7   : > { %v5833_v56 = vpop.permute.xlu0 %570 }
  0xa8   : > { %v686_v57 = vmul.f32 %v5833_v56, %v5739_v26  ;;  %v685_v58 = vmul.f32 %v5833_v56, %v5742_v27  ;;  %v687_v0 = vmul.f32 %v5833_v56, %v5745_v28  ;;  %v688_v1 = vmul.f32 %v5833_v56, %v5752_v31 }
  0xa9   : > { %v689_v9 = vmul.f32 %v5833_v56, %v5761_v34  ;;  %v690_v10 = vmul.f32 %v5833_v56, %v5764_v35  ;;  %v691_v16 = vmul.f32 %v5833_v56, %v5773_v38  ;;  %v692_v17 = vmul.f32 %v5833_v56, %v5776_v39 }
  0xaa   : > { %v573_v32 = vmul.f32 %v5833_v56, %v5788_v42  ;;  %v574_v37 = vmul.f32 %v5833_v56, %v5795_v44 }
  0xac   : > { %v712_v59 = vpop.permute.xlu1 %711  ;;  %v710_v60 = vpop.permute.xlu0 %709 }
  0xad   : > { %v734_v61 = vsub.f32 %v686_v57, %v712_v59  ;;  %v733_v62 = vsub.f32 %v685_v58, %v710_v60  ;;  %v575_v57 = vmul.f32 %v5833_v56, %v5798_v45  ;;  %v576_v60 = vmul.f32 %v5833_v56, %v5808_v48 }
  0xaf   : > { %v5229_v63 = vpack.i.bf16 %v734_v61, %v733_v62 }
  0xb0   : > { %v714_v2 = vpop.permute.xlu1 %713  ;;  %v716_v3 = vpop.permute.xlu0 %715 }
  0xb1   : > { %v735_v5 = vsub.f32 %v687_v0, %v714_v2  ;;  %v736_v6 = vsub.f32 %v688_v1, %v716_v3  ;;  %5230 = vrot.lane.b32.xlu0 %v5229_v63, %s5628_s12  ;;  %v577_v63 = vmul.f32 %v5833_v56, %v5811_v49  ;;  %v578_v1 = vmul.f32 %v5833_v56, %v5820_v52 }
  0xb3   : > { %v5234_v8 = vpack.i.bf16 %v736_v6, %v735_v5  ;;  %v579_v5 = vmul.f32 %v5833_v56, %v5827_v54 }
  0xb4   : > { %v718_v11 = vpop.permute.xlu1 %717  ;;  %v720_v12 = vpop.permute.xlu0 %719 }
  0xb5   : > { %v737_v13 = vsub.f32 %v689_v9, %v718_v11  ;;  %v738_v14 = vsub.f32 %v690_v10, %v720_v12  ;;  %5235 = vrot.lane.b32.xlu1 %v5234_v8, %s5628_s12  ;;  %611 = vrot.lane.b32.xlu0 %v588_v7, %s5627_s7  ;;  %v4253_v11 = vld [vmem:[%s7773_s4 + $0x1] ss:$0 sm:$0xff] }
  0xb7   : > { %v5239_v15 = vpack.i.bf16 %v738_v14, %v737_v13 }
  0xb8   : > { %v722_v18 = vpop.permute.xlu1 %721  ;;  %v724_v19 = vpop.permute.xlu0 %723 }
  0xb9   : > { %v739_v20 = vsub.f32 %v691_v16, %v722_v18  ;;  %v740_v21 = vsub.f32 %v692_v17, %v724_v19  ;;  %5240 = vrot.lane.b32.xlu0 %v5239_v15, %s5628_s12  ;;  %v7803_v15 = vmov 0  ;;  %v580_v16 = vmul.f32 %v5833_v56, %v5844_v4 }
  0xba   : > { %v7804_v15 = vsel %vm5927_vm1, 4294967295, %v7803_v15 }
  0xbb   : > { %v5244_v22 = vpack.i.bf16 %v740_v21, %v739_v20  ;;  %7805 = vst [vmem:[#allocation5_spill] sm:$0xff] %v7804_v15 }
  0xbc   : > { %v5860_v23 = vpop.permute.xlu1 %518  ;;  %v598_v30 = vpop.permute.xlu0 %597 }
  0xbd   : > { %5245 = vrot.lane.b32.xlu1 %v5244_v22, %s5628_s12  ;;  %v637_v25 = vmul.f32 %v5860_v23, %v5742_v27  ;;  %v638_v29 = vmul.f32 %v5860_v23, %v5739_v26  ;;  %v621_v36 = vsub.f32 %v573_v32, %v598_v30  ;;  %v639_v41 = vmul.f32 %v5860_v23, %v5745_v28 }
  0xbe   : > { %v640_v43 = vmul.f32 %v5860_v23, %v5752_v31  ;;  %v641_v46 = vmul.f32 %v5860_v23, %v5761_v34  ;;  %v642_v47 = vmul.f32 %v5860_v23, %v5764_v35  ;;  %v644_v51 = vmul.f32 %v5860_v23, %v5776_v39 }
  0xbf   : > { %653 = vrot.lane.b32.xlu0 %v637_v25, %s5628_s12  ;;  %v643_v55 = vmul.f32 %v5860_v23, %v5773_v38  ;;  %v521_v7 = vmul.f32 %v5860_v23, %v5788_v42  ;;  %v523_v8 = vmul.f32 %v5860_v23, %v5798_v45  ;;  %v525_v9 = vmul.f32 %v5860_v23, %v5811_v49 }
  0xc0   : > { %v600_v33 = vpop.permute.xlu1 %599  ;;  %v602_v53 = vpop.permute.xlu0 %601  ;;  %v527_v10 = vmul.f32 %v5860_v23, %v5827_v54  ;;  %v522_v56 = vmul.f32 %v5860_v23, %v5795_v44 }
  0xc1   : > { %655 = vrot.lane.b32.xlu1 %v638_v29, %s5628_s12  ;;  %v622_v40 = vsub.f32 %v574_v37, %v600_v33  ;;  %v623_v59 = vsub.f32 %v575_v57, %v602_v53  ;;  %v524_v37 = vmul.f32 %v5860_v23, %v5808_v48  ;;  %v630_v53 = vmul.f32 %v5723_v24, %v5739_v26 }
  0xc3   : > { %749 = vrot.lane.b32.xlu0 %v621_v36, %s5628_s12 }
  0xc4   : > { %v604_v50 = vpop.permute.xlu1 %603  ;;  %v606_v61 = vpop.permute.xlu0 %605 }
  0xc5   : > { %751 = vrot.lane.b32.xlu1 %v622_v40, %s5628_s12  ;;  %v624_v62 = vsub.f32 %v576_v60, %v604_v50  ;;  %v625_v0 = vsub.f32 %v577_v63, %v606_v61  ;;  %v4252_v63 = vld [vmem:[%s7772_s3 + $0x1] ss:$0 sm:$0xff] }
  0xc7   : > { %657 = vrot.lane.b32.xlu0 %v639_v41, %s5628_s12 }
  0xc8   : > { %v608_v58 = vpop.permute.xlu1 %607 }
  0xc9   : > { %659 = vrot.lane.b32.xlu1 %v640_v43, %s5628_s12  ;;  %v626_v3 = vsub.f32 %v578_v1, %v608_v58  ;;  %v528_v58 = vmul.f32 %v5860_v23, %v5844_v4 }
  0xcb   : > { %661 = vrot.lane.b32.xlu0 %v641_v46, %s5628_s12 }
  0xcc   : > { %v610_v2 = vpop.permute.xlu1 %609 }
  0xcd   : > { %663 = vrot.lane.b32.xlu1 %v642_v47, %s5628_s12  ;;  %v627_v6 = vsub.f32 %v579_v5, %v610_v2  ;;  %v526_v47 = vmul.f32 %v5860_v23, %v5820_v52  ;;  %v631_v23 = vmul.f32 %v5723_v24, %v5745_v28  ;;  %v632_v2 = vmul.f32 %v5723_v24, %v5752_v31 }
  0xcf   : > { %667 = vrot.lane.b32.xlu0 %v644_v51, %s5628_s12  ;;  %v629_v51 = vmul.f32 %v5723_v24, %v5742_v27 }
  0xd1   : > { %665 = vrot.lane.b32.xlu1 %v643_v55, %s5628_s12 }
  0xd3   : > { %753 = vrot.lane.b32.xlu0 %v623_v59, %s5628_s12 }
  0xd5   : > { %755 = vrot.lane.b32.xlu1 %v624_v62, %s5628_s12 }
  0xd7   : > { %757 = vrot.lane.b32.xlu0 %v625_v0, %s5628_s12 }
  0xd9   : > { %759 = vrot.lane.b32.xlu1 %v626_v3, %s5628_s12 }
  0xdb   : > { %761 = vrot.lane.b32.xlu0 %v627_v6, %s5628_s12 }
  0xdf   : > { %537 = vrot.lane.b32.xlu0 %v521_v7, %s5628_s12 }
  0xe3   : > { %541 = vrot.lane.b32.xlu0 %v523_v8, %s5628_s12 }
  0xe7   : > { %545 = vrot.lane.b32.xlu0 %v525_v9, %s5628_s12 }
  0xeb   : > { %549 = vrot.lane.b32.xlu0 %v527_v10, %s5628_s12 }
  0xef   : > { %1399 = vrot.lane.b32.xlu0 %v4253_v11, %s5629_s15 }
  0xf3   : > { %1337 = vrot.lane.b32.xlu0 %v4253_v11, %s5630_s16  ;;  %v633_v11 = vmul.f32 %v5723_v24, %v5761_v34 }
 0x123   : > { %v5231_v12 = vpop.permute.xlu0 %5230 }
 0x124   : > { %v5233_v13 = vunpack.i.h.bf16 %v5231_v12  ;;  %v5232_v14 = vunpack.i.l.bf16 %v5231_v12  ;;  %v634_v12 = vmul.f32 %v5723_v24, %v5764_v35 }
 0x126   : > { %v4909_v17 = vpack.c.bf16 %v5233_v13, %v5232_v14 }
 0x127   : > { %v5236_v18 = vpop.permute.xlu1 %5235  ;;  %v612_v19 = vpop.permute.xlu0 %611 }
 0x128   : > { %v5238_v20 = vunpack.i.h.bf16 %v5236_v18  ;;  %v5237_v21 = vunpack.i.l.bf16 %v5236_v18  ;;  %v628_v22 = vsub.f32 %v580_v16, %v612_v19  ;;  %4911 = vmatprep.subr.msk.bf16.mxu0 %vm5927_vm1, %v4909_v17 }
 0x129   : > { %4914 = vmatpush3.bf16.xpose.msk.msra.mxu0 %vm5927_vm1, %v4909_v17 }
 0x12a   : > { %v4915_v25 = vpack.c.bf16 %v5238_v20, %v5237_v21  ;;  %763 = vrot.lane.b32.xlu1 %v628_v22, %s5628_s12  ;;  %v636_v20 = vmul.f32 %v5723_v24, %v5776_v39  ;;  %v635_v21 = vmul.f32 %v5723_v24, %v5773_v38 }
 0x12b   : > { %v5241_v29 = vpop.permute.xlu0 %5240 }
 0x12c   : > { %v5243_v30 = vunpack.i.h.bf16 %v5241_v29  ;;  %v5242_v32 = vunpack.i.l.bf16 %v5241_v29  ;;  %4917 = vmatprep.subr.msk.bf16.mxu0 %vm5927_vm1, %v4915_v25 }
 0x12e   : > { %539 = vrot.lane.b32.xlu1 %v522_v56, %s5628_s12  ;;  %v4921_v36 = vpack.c.bf16 %v5243_v30, %v5242_v32 }
 0x12f   : > { %v5246_v33 = vpop.permute.xlu1 %5245 }
 0x130   : > { %v5248_v43 = vunpack.i.h.bf16 %v5246_v33  ;;  %v5247_v46 = vunpack.i.l.bf16 %v5246_v33 }
 0x131   : > { %v654_v40 = vpop.permute.xlu0 %653  ;;  %4920 = vmatpush3.bf16.xpose.msk.msra.mxu0 %vm5927_vm1, %v4915_v25 }
 0x132   : > { %543 = vrot.lane.b32.xlu1 %v524_v37, %s5628_s12  ;;  %4923 = vmatprep.subr.msk.bf16.mxu0 %vm5927_vm1, %v4921_v36  ;;  %v4927_v57 = vpack.c.bf16 %v5248_v43, %v5247_v46  ;;  %v677_v60 = vadd.f32 %v654_v40, %v629_v51 }
 0x133   : > { %v656_v41 = vpop.permute.xlu1 %655 }
 0x134   : > { %v678_v61 = vadd.f32 %v656_v41, %v630_v53 }
 0x135   : > { %v750_v50 = vpop.permute.xlu0 %749 }
 0x136   : > { %547 = vrot.lane.b32.xlu1 %v526_v47, %s5628_s12  ;;  %4589 = vmatprep.mubr.msk.f32.mxu0 %vm789_vm0, %v750_v50  ;;  %v4933_v1 = vpack.c.bf16 %v678_v61, %v677_v60 }
 0x137   : > { %v752_v55 = vpop.permute.xlu1 %751 }
 0x139   : > { %4926 = vmatpush3.bf16.xpose.msk.msra.mxu0 %vm5927_vm1, %v4921_v36  ;;  %v658_v59 = vpop.permute.xlu0 %657 }
 0x13a   : > { %551 = vrot.lane.b32.xlu1 %v528_v58, %s5628_s12  ;;  %4929 = vmatprep.subr.msk.bf16.mxu0 %vm5927_vm1, %v4927_v57  ;;  %v679_v6 = vadd.f32 %v658_v59, %v631_v23 }
 0x13b   : > { %v660_v62 = vpop.permute.xlu1 %659 }
 0x13c   : > { %v680_v7 = vadd.f32 %v660_v62, %v632_v2 }
 0x13d   : > { %v662_v0 = vpop.permute.xlu0 %661 }
 0x13e   : > { %1388 = vrot.lane.b32.xlu1 %v4252_v63, %s5630_s16  ;;  %v4939_v10 = vpack.c.bf16 %v680_v7, %v679_v6  ;;  %v681_v16 = vadd.f32 %v662_v0, %v633_v11 }
 0x13f   : > { %v664_v3 = vpop.permute.xlu1 %663 }
 0x140   : > { %v682_v17 = vadd.f32 %v664_v3, %v634_v12 }
 0x141   : > { %4932 = vmatpush3.bf16.xpose.msk.msra.mxu0 %vm5927_vm1, %v4927_v57  ;;  %v668_v5 = vpop.permute.xlu0 %667 }
 0x142   : > { %4935 = vmatprep.subr.msk.bf16.mxu0 %vm5927_vm1, %v4933_v1  ;;  %v4945_v19 = vpack.c.bf16 %v682_v17, %v681_v16  ;;  %v684_v29 = vadd.f32 %v668_v5, %v636_v20  ;;  %v509_v20 = vmul.f32 %v5723_v24, %v5811_v49 }
 0x143   : > { %v666_v8 = vpop.permute.xlu1 %665 }
 0x144   : > { %v683_v30 = vadd.f32 %v666_v8, %v635_v21 }
 0x145   : > { %v754_v9 = vpop.permute.xlu0 %753 }
 0x146   : > { %v4951_v56 = vpack.c.bf16 %v684_v29, %v683_v30  ;;  %v511_v29 = vmul.f32 %v5723_v24, %v5827_v54 }
 0x147   : > { %v756_v13 = vpop.permute.xlu1 %755 }
 0x148   : > { %4590 = vmatmul.mubr.msk.f32.vlgmr.msra.gmra.mrb[0].mxu0 %vm789_vm0, %v752_v55 }
 0x149   : > { %4592 = vmatprep.mubr.msk.f32.mxu0 %vm789_vm0, %v754_v9  ;;  %v758_v14 = vpop.permute.xlu0 %757  ;;  %4938 = vmatpush3.bf16.xpose.msk.msra.mxu0 %vm5927_vm1, %v4933_v1 }
 0x14a   : > { %4941 = vmatprep.subr.msk.bf16.mxu0 %vm5927_vm1, %v4939_v10 }
 0x14b   : > { %v760_v22 = vpop.permute.xlu1 %759 }
 0x14c   : > { %4593 = vmatmul.mubr.msk.f32.gmra.mrb[2].mxu0 %vm789_vm0, %v756_v13  ;;  %v506_v13 = vmul.f32 %v5723_v24, %v5795_v44 }
 0x14d   : > { %4595 = vmatprep.mubr.msk.f32.mxu0 %vm789_vm0, %v758_v14  ;;  %v762_v18 = vpop.permute.xlu0 %761  ;;  %v507_v14 = vmul.f32 %v5723_v24, %v5798_v45 }
 0x150   : > { %4596 = vmatmul.mubr.msk.f32.gmra.mrb[4].mxu0 %vm789_vm0, %v760_v22  ;;  %v510_v22 = vmul.f32 %v5723_v24, %v5820_v52 }
 0x151   : > { %4598 = vmatprep.mubr.msk.f32.mxu0 %vm789_vm0, %v762_v18  ;;  %v5995_v25 = vpop.permute.xlu0 %537  ;;  %4944 = vmatpush3.bf16.xpose.msk.msra.mxu0 %vm5927_vm1, %v4939_v10  ;;  %v505_v10 = vmul.f32 %v5723_v24, %v5788_v42  ;;  %v508_v18 = vmul.f32 %v5723_v24, %v5808_v48 }
 0x152   : > { %4947 = vmatprep.subr.msk.bf16.mxu0 %vm5927_vm1, %v4945_v19 }
 0x153   : > { %v561_v11 = vadd.f32 %v5995_v25, %v505_v10  ;;  %v6148_v10 = vld [vmem:[%s6139_s27 + $0x10] sm:$0xff] }
 0x155   : > { %v6001_v32 = vpop.permute.xlu0 %541 }
 0x159   : > { %v6003_v33 = vpop.permute.xlu0 %545  ;;  %4950 = vmatpush3.bf16.xpose.msk.msra.mxu0 %vm5927_vm1, %v4945_v19  ;;  %v563_v19 = vadd.f32 %v6001_v32, %v507_v14  ;;  %v6161_v14 = vld [vmem:[%s6139_s27 + $0x28] sm:$0xff] }
 0x15a   : > { %4953 = vmatprep.subr.msk.bf16.mxu0 %vm5927_vm1, %v4951_v56  ;;  %v565_v25 = vadd.f32 %v6003_v33, %v509_v20 }
 0x15d   : > { %v6009_v36 = vpop.permute.xlu0 %549 }
 0x161   : > { %4956 = vmatpush3.bf16.xpose.msk.msra.mxu0 %vm5927_vm1, %v4951_v56  ;;  %v1400_v37 = vpop.permute.xlu0 %1399  ;;  %v512_v56 = vmul.f32 %v5723_v24, %v5844_v4 }
 0x162   : > { %v1514_v40 = vmul.f32 %v1400_v37, %v5742_v27  ;;  %v1516_v41 = vmul.f32 %v1400_v37, %v5745_v28  ;;  %v1515_v43 = vmul.f32 %v1400_v37, %v5739_v26  ;;  %v1518_v46 = vmul.f32 %v1400_v37, %v5761_v34 }
 0x163   : > { %v1517_v47 = vmul.f32 %v1400_v37, %v5752_v31  ;;  %v1520_v50 = vmul.f32 %v1400_v37, %v5773_v38  ;;  %v1519_v51 = vmul.f32 %v1400_v37, %v5764_v35  ;;  %v1521_v55 = vmul.f32 %v1400_v37, %v5776_v39 }
 0x164   : > { %1530 = vrot.lane.b32.xlu0 %v1514_v40, %s5627_s7  ;;  %1534 = vrot.lane.b32.xlu1 %v1516_v41, %s5627_s7  ;;  %v1402_v60 = vmul.f32 %v1400_v37, %v5788_v42  ;;  %v1403_v62 = vmul.f32 %v1400_v37, %v5795_v44  ;;  %v1405_v1 = vmul.f32 %v1400_v37, %v5808_v48 }
 0x165   : > { %v6026_v53 = vpop.permute.xlu0 %1337  ;;  %v1404_v23 = vmul.f32 %v1400_v37, %v5798_v45  ;;  %v1407_v5 = vmul.f32 %v1400_v37, %v5820_v52  ;;  %v1406_v6 = vmul.f32 %v1400_v37, %v5811_v49  ;;  %v1408_v7 = vmul.f32 %v1400_v37, %v5827_v54 }
 0x166   : > { %v1459_v57 = vmul.f32 %v6026_v53, %v5739_v26  ;;  %v1458_v58 = vmul.f32 %v6026_v53, %v5742_v27  ;;  %v1460_v59 = vmul.f32 %v6026_v53, %v5745_v28  ;;  %v1462_v61 = vmul.f32 %v6026_v53, %v5761_v34 }
 0x167   : > { %v1461_v0 = vmul.f32 %v6026_v53, %v5752_v31  ;;  %v1465_v2 = vmul.f32 %v6026_v53, %v5776_v39  ;;  %v1464_v3 = vmul.f32 %v6026_v53, %v5773_v38  ;;  %v1409_v8 = vmul.f32 %v1400_v37, %v5844_v4 }
 0x168   : > { %1532 = vrot.lane.b32.xlu0 %v1515_v43, %s5627_s7  ;;  %1538 = vrot.lane.b32.xlu1 %v1518_v46, %s5627_s7  ;;  %v1341_v9 = vmul.f32 %v6026_v53, %v5795_v44  ;;  %v567_v37 = vadd.f32 %v6009_v36, %v511_v29 }
 0x16c   : > { %1536 = vrot.lane.b32.xlu0 %v1517_v47, %s5627_s7  ;;  %1542 = vrot.lane.b32.xlu1 %v1520_v50, %s5627_s7 }
 0x170   : > { %1540 = vrot.lane.b32.xlu0 %v1519_v51, %s5627_s7  ;;  %1321 = vrot.lane.b32.xlu1 %v4252_v63, %s5629_s15  ;;  %v1463_v63 = vmul.f32 %v6026_v53, %v5764_v35 }
 0x174   : > { %1544 = vrot.lane.b32.xlu0 %v1521_v55, %s5627_s7  ;;  %1476 = vrot.lane.b32.xlu1 %v1459_v57, %s5628_s12 }
 0x178   : > { %1474 = vrot.lane.b32.xlu0 %v1458_v58, %s5628_s12  ;;  %1478 = vrot.lane.b32.xlu1 %v1460_v59, %s5628_s12 }
 0x17c   : > { %1418 = vrot.lane.b32.xlu0 %v1402_v60, %s5627_s7  ;;  %1482 = vrot.lane.b32.xlu1 %v1462_v61, %s5628_s12 }
 0x180   : > { %1420 = vrot.lane.b32.xlu0 %v1403_v62, %s5627_s7  ;;  %1484 = vrot.lane.b32.xlu1 %v1463_v63, %s5628_s12 }
 0x184   : > { %1480 = vrot.lane.b32.xlu0 %v1461_v0, %s5628_s12  ;;  %1424 = vrot.lane.b32.xlu1 %v1405_v1, %s5627_s7 }
 0x188   : > { %1422 = vrot.lane.b32.xlu0 %v1404_v23, %s5627_s7  ;;  %1488 = vrot.lane.b32.xlu1 %v1465_v2, %s5628_s12 }
 0x18c   : > { %1486 = vrot.lane.b32.xlu0 %v1464_v3, %s5628_s12  ;;  %1428 = vrot.lane.b32.xlu1 %v1407_v5, %s5627_s7 }
 0x190   : > { %1426 = vrot.lane.b32.xlu0 %v1406_v6, %s5627_s7  ;;  %1430 = vrot.lane.b32.xlu1 %v1408_v7, %s5627_s7 }
 0x194   : > { %1432 = vrot.lane.b32.xlu0 %v1409_v8, %s5627_s7  ;;  %1358 = vrot.lane.b32.xlu1 %v1341_v9, %s5628_s12  ;;  %v1342_v8 = vmul.f32 %v6026_v53, %v5798_v45  ;;  %v6142_v45 = vld [vmem:[%s6139_s27] sm:$0xff] }
 0x19c   : > { %v764_v12 = vpop.permute.xlu1 %763 }
 0x19d   : > { %4599 = vmatmul.mubr.msk.f32.gmra.mrb[6].mxu0 %vm789_vm0, %v764_v12 }
 0x19e   : > { %4617 = vmatprep.mubr.msk.f32.mxu0 %vm789_vm0, %v561_v11  ;;  %v6153_v11 = vld [vmem:[%s6139_s27 + $0x18] sm:$0xff] }
 0x19f   : > { %v4961_v12 = vpack.c.bf16 %v6153_v11, %v6148_v10 }
 0x1a0   : > { %v540_v16 = vpop.permute.xlu1 %539 }
 0x1a1   : > { %v562_v17 = vadd.f32 %v540_v16, %v506_v13  ;;  %v6158_v13 = vld [vmem:[%s6139_s27 + $0x20] sm:$0xff] }
 0x1a3   : > { %4618 = vmatmul.mubr.msk.f32.vlgmr.msra.gmra.mrb[0].mxu0 %vm789_vm0, %v562_v17  ;;  %v4965_v17 = vpack.c.bf16 %v6161_v14, %v6158_v13 }
 0x1a4   : > { %v544_v21 = vpop.permute.xlu1 %543  ;;  %4620 = vmatprep.mubr.msk.f32.mxu0 %vm789_vm0, %v563_v19  ;;  %v6171_v19 = vld [vmem:[%s6139_s27 + $0x38] sm:$0xff] }
 0x1a5   : > { %v564_v44 = vadd.f32 %v544_v21, %v508_v18  ;;  %v6168_v18 = vld [vmem:[%s6139_s27 + $0x30] sm:$0xff] }
 0x1a6   : > { %v4969_v20 = vpack.c.bf16 %v6171_v19, %v6168_v18 }
 0x1a7   : > { %4621 = vmatmul.mubr.msk.f32.gmra.mrb[2].mxu0 %vm789_vm0, %v564_v44 }
 0x1a8   : > { %v548_v30 = vpop.permute.xlu1 %547  ;;  %4623 = vmatprep.mubr.msk.f32.mxu0 %vm789_vm0, %v565_v25 }
 0x1a9   : > { %v566_v32 = vadd.f32 %v548_v30, %v510_v22 }
 0x1ab   : > { %4624 = vmatmul.mubr.msk.f32.gmra.mrb[4].mxu0 %vm789_vm0, %v566_v32 }
 0x1ac   : > { %v552_v40 = vpop.permute.xlu1 %551  ;;  %4626 = vmatprep.mubr.msk.f32.mxu0 %vm789_vm0, %v567_v37 }
 0x1ad   : > { %v568_v33 = vadd.f32 %v552_v40, %v512_v56 }
 0x1af   : > { %4627 = vmatmul.mubr.msk.f32.gmra.mrb[6].mxu0 %vm789_vm0, %v568_v33 }
 0x1b0   : > { %v6104_v41 = vpop.permute.xlu1 %1388 }
 0x1b1   : > { %v1506_v43 = vmul.f32 %v6104_v41, %v5742_v27  ;;  %v1507_v47 = vmul.f32 %v6104_v41, %v5739_v26  ;;  %v1508_v36 = vmul.f32 %v6104_v41, %v5745_v28  ;;  %v1509_v57 = vmul.f32 %v6104_v41, %v5752_v31 }
 0x1b2   : > { %v1510_v60 = vmul.f32 %v6104_v41, %v5761_v34  ;;  %v1511_v0 = vmul.f32 %v6104_v41, %v5764_v35  ;;  %v1340_v28 = vmul.f32 %v6026_v53, %v5788_v42  ;;  %v1512_v31 = vmul.f32 %v6104_v41, %v5773_v38 }
 0x1b3   : > { %v1513_v34 = vmul.f32 %v6104_v41, %v5776_v39  ;;  %v1343_v35 = vmul.f32 %v6026_v53, %v5808_v48  ;;  %v1344_v39 = vmul.f32 %v6026_v53, %v5811_v49  ;;  %v6145_v48 = vld [vmem:[%s6139_s27 + $0x8] sm:$0xff] }
 0x1b4   : > { %v4957_v49 = vpack.c.bf16 %v6145_v48, %v6142_v45 }
 0x1b6   : > { %4958 = vmatprep.subr.bf16.mxu1 %v4957_v49 }
 0x1b7   : > { %4960 = vmatpush3.bf16.msra.mxu1 %v4957_v49 }
 0x1b8   : > { %4962 = vmatprep.subr.bf16.mxu1 %v4961_v12 }
 0x1bb   : > { %4964 = vmatpush3.bf16.msra.mxu1 %v4961_v12 }
 0x1bc   : > { %4966 = vmatprep.subr.bf16.mxu1 %v4965_v17 }
 0x1bf   : > { %4968 = vmatpush3.bf16.msra.mxu1 %v4965_v17 }
 0x1c0   : > { %4970 = vmatprep.subr.bf16.mxu1 %v4969_v20 }
 0x1c3   : > { %4972 = vmatpush3.bf16.msra.mxu1 %v4969_v20 }
 0x1d6   : > { %v1531_v46 = vpop.permute.xlu0 %1530  ;;  %v1535_v24 = vpop.permute.xlu1 %1534 }
 0x1d7   : > { %v1554_v50 = vsub.f32 %v1506_v43, %v1531_v46  ;;  %v1556_v59 = vsub.f32 %v1508_v36, %v1535_v24  ;;  %v480_v43 = vlaneseq }
 0x1d9   : > { %v6194_v46 = vshrl.u32 %v480_v43, 7  ;;  %v6199_v24 = vand.u32 127, %v480_v43 }
 0x1da   : > { %v1533_v51 = vpop.permute.xlu0 %1532  ;;  %v1539_v62 = vpop.permute.xlu1 %1538 }
 0x1db   : > { %v1555_v55 = vsub.f32 %v1507_v47, %v1533_v51  ;;  %v1558_v23 = vsub.f32 %v1510_v60, %v1539_v62  ;;  %7806 = vst [vmem:[#allocation6_spill] sm:$0xff] %v6194_v46  ;;  %v6197_v47 = vadd.s32 8, %v6194_v46  ;;  %7808 = vst [vmem:[#allocation8_spill] sm:$0xff] %v6199_v24  ;;  %v6204_v36 = vadd.s32 24, %v6194_v46 }
 0x1dc   : > { %vm491_vm4 = vcmp.le.s32.totalorder %v6199_v24, %v6194_v46 }
 0x1dd   : > { %v5249_v58 = vpack.i.bf16 %v1555_v55, %v1554_v50  ;;  %7807 = vst [vmem:[#allocation7_spill] sm:$0xff] %v6197_v47  ;;  %vm492_vm2 = vcmp.le.s32.totalorder %v6199_v24, %v6197_v47  ;;  %7809 = vst [vmem:[#allocation9_spill] sm:$0xff] %v6204_v36  ;;  %vm494_vm5 = vcmp.le.s32.totalorder %v6199_v24, %v6204_v36  ;;  %v6432_v47 = vld [vmem:[%s5785_s18 + $0x18] sm:$0xff] }
 0x1de   : > { %v1537_v61 = vpop.permute.xlu0 %1536  ;;  %v1543_v5 = vpop.permute.xlu1 %1542 }
 0x1df   : > { %v1557_v63 = vsub.f32 %v1509_v57, %v1537_v61  ;;  %5250 = vrot.lane.b32.xlu0 %v5249_v58, %s5631_s24  ;;  %v1560_v6 = vsub.f32 %v1512_v31, %v1543_v5  ;;  %v6209_v57 = vadd.s32 16, %v6194_v46  ;;  %v6250_v5 = vadd.s32 56, %v6194_v46 }
 0x1e1   : > { %v5254_v1 = vpack.i.bf16 %v1557_v63, %v1556_v59  ;;  %7810 = vst [vmem:[#allocation10_spill] sm:$0xff] %v6209_v57  ;;  %v6226_v63 = vadd.s32 40, %v6194_v46  ;;  %vm493_vm6 = vcmp.le.s32.totalorder %v6199_v24, %v6209_v57  ;;  %7813 = vst [vmem:[#allocation13_spill] sm:$0xff] %v6250_v5  ;;  %vm498_vm9 = vcmp.le.s32.totalorder %v6199_v24, %v6250_v5 }
 0x1e2   : > { %v1541_v2 = vpop.permute.xlu0 %1540 }
 0x1e3   : > { %v1559_v3 = vsub.f32 %v1511_v0, %v1541_v2  ;;  %1356 = vrot.lane.b32.xlu0 %v1340_v28, %s5628_s12  ;;  %5255 = vrot.lane.b32.xlu1 %v5254_v1, %s5631_s24  ;;  %7811 = vst [vmem:[#allocation11_spill] sm:$0xff] %v6226_v63  ;;  %vm496_vm7 = vcmp.le.s32.totalorder %v6199_v24, %v6226_v63 }
 0x1e5   : > { %v5259_v42 = vpack.i.bf16 %v1559_v3, %v1558_v23  ;;  %v6233_v23 = vadd.s32 32, %v6194_v46 }
 0x1e6   : > { %v1545_v7 = vpop.permute.xlu0 %1544 }
 0x1e7   : > { %5260 = vrot.lane.b32.xlu0 %v5259_v42, %s5631_s24  ;;  %v1561_v38 = vsub.f32 %v1513_v34, %v1545_v7  ;;  %1362 = vrot.lane.b32.xlu1 %v1343_v35, %s5628_s12  ;;  %7812 = vst [vmem:[#allocation12_spill] sm:$0xff] %v6233_v23  ;;  %vm495_vm8 = vcmp.le.s32.totalorder %v6199_v24, %v6233_v23 }
 0x1e9   : > { %v5264_v9 = vpack.i.bf16 %v1561_v38, %v1560_v6 }
 0x1ea   : > { %v6163_v16 = vpop.permute.xlu0 %1474 }
 0x1eb   : > { %1360 = vrot.lane.b32.xlu0 %v1342_v8, %s5628_s12  ;;  %5265 = vrot.lane.b32.xlu1 %v5264_v9, %s5631_s24  ;;  %v6262_v9 = vadd.s32 48, %v6194_v46 }
 0x1ed   : > { %7814 = vst [vmem:[#allocation14_spill] sm:$0xff] %v6262_v9  ;;  %vm497_vm10 = vcmp.le.s32.totalorder %v6199_v24, %v6262_v9 }
 0x1ee   : > { %v6175_v21 = vpop.permute.xlu0 %1418 }
 0x1ef   : > { %1364 = vrot.lane.b32.xlu0 %v1344_v39, %s5628_s12 }
 0x1f2   : > { %v6177_v44 = vpop.permute.xlu0 %1420 }
 0x1f6   : > { %v6179_v22 = vpop.permute.xlu0 %1480 }
 0x1fa   : > { %v6181_v25 = vpop.permute.xlu0 %1422 }
 0x1fe   : > { %v6183_v29 = vpop.permute.xlu0 %1486 }
 0x202   : > { %v6185_v30 = vpop.permute.xlu0 %1426 }
 0x206   : > { %v6187_v32 = vpop.permute.xlu0 %1432 }
 0x251   : > { %v5251_v56 = vpop.permute.xlu0 %5250 }
 0x252   : > { %v5253_v37 = vunpack.i.h.bf16 %v5251_v56  ;;  %v5252_v40 = vunpack.i.l.bf16 %v5251_v56 }
 0x254   : > { %v6189_v33 = vpack.c.bf16 %v5253_v37, %v5252_v40 }
 0x256   : > { %4975 = vmatprep.subr.msk.bf16.mxu1 %vm5927_vm1, %v6189_v33 }
 0x276   : > { %v4619_v50 = vpop.f32.mrb[0].mxu0 }
 0x277   : > { %v1081_v51 = vmul.f32 0.17677669, %v4619_v50  ;;  %v1041_v55 = vpop.f32.mrb[1].mxu0 }
 0x278   : > { %v1080_v58 = vmul.f32 0.17677669, %v1041_v55 }
 0x279   : > { %v6214_v59 = vsel %vm492_vm2, %v1081_v51, -1e+30  ;;  %v6286_v51 = vpop.permute.xlu1 %1321 }
 0x27a   : > { %v4622_v60 = vpop.f32.mrb[2].mxu0  ;;  %v1100_v61 = vsel %vm1096_vm3, %v6214_v59, -inf  ;;  %v6221_v62 = vsel %vm491_vm4, %v1080_v58, -1e+30  ;;  %v1451_v58 = vmul.f32 %v6286_v51, %v5739_v26 }
 0x27b   : > { %v1083_v0 = vmul.f32 0.17677669, %v4622_v60  ;;  %1101 = vmax.xlane.f32.xlu0 %v1100_v61  ;;  %v1051_v28 = vpop.f32.mrb[3].mxu0  ;;  %v1097_v1 = vsel %vm1096_vm3, %v6221_v62, -inf  ;;  %v1450_v60 = vmul.f32 %v6286_v51, %v5742_v27 }
 0x27c   : > { %v1082_v31 = vmul.f32 0.17677669, %v1051_v28  ;;  %1098 = vmax.xlane.f32.xlu1 %v1097_v1 }
 0x27d   : > { %v6238_v2 = vsel %vm494_vm5, %v1083_v0, -1e+30  ;;  %v1477_v61 = vpop.permute.xlu1 %1476  ;;  %v1498_v28 = vadd.f32 %v6163_v16, %v1450_v60 }
 0x27e   : > { %v4625_v3 = vpop.f32.mrb[4].mxu0  ;;  %v1106_v34 = vsel %vm1096_vm3, %v6238_v2, -inf  ;;  %v6245_v35 = vsel %vm493_vm6, %v1082_v31, -1e+30  ;;  %v1499_v0 = vadd.f32 %v1477_v61, %v1451_v58  ;;  %v1345_v31 = vmul.f32 %v6026_v53, %v5820_v52 }
 0x27f   : > { %v1085_v42 = vmul.f32 0.17677669, %v4625_v3  ;;  %v1061_v6 = vpop.f32.mrb[5].mxu0  ;;  %v1103_v7 = vsel %vm1096_vm3, %v6245_v35, -inf }
 0x280   : > { %v1084_v38 = vmul.f32 0.17677669, %v1061_v6  ;;  %1107 = vmax.xlane.f32.xlu1 %v1106_v34  ;;  %1104 = vmax.xlane.f32.xlu0 %v1103_v7  ;;  %v5269_v1 = vpack.i.bf16 %v1499_v0, %v1498_v28  ;;  %v6313_v7 = vpop.permute.xlu0 %1356 }
 0x281   : > { %v6259_v8 = vsel %vm496_vm7, %v1085_v42, -1e+30  ;;  %v6299_v3 = vpop.permute.xlu1 %1478 }
 0x282   : > { %v4628_v39 = vpop.f32.mrb[6].mxu0  ;;  %v1112_v49 = vsel %vm1096_vm3, %v6259_v8, -inf  ;;  %v1092_v12 = vsel %vm495_vm8, %v1084_v38, -1e+30 }
 0x283   : > { %v1087_v17 = vmul.f32 0.17677669, %v4628_v39  ;;  %v1071_v20 = vpop.f32.mrb[7].mxu0  ;;  %v1109_v56 = vsel %vm1096_vm3, %v1092_v12, -inf }
 0x284   : > { %v1086_v37 = vmul.f32 0.17677669, %v1071_v20  ;;  %1113 = vmax.xlane.f32.xlu1 %v1112_v49  ;;  %1110 = vmax.xlane.f32.xlu0 %v1109_v56  ;;  %v6317_v52 = vpop.permute.xlu0 %5260 }
 0x285   : > { %v6275_v40 = vsel %vm498_vm9, %v1087_v17, -1e+30  ;;  %v6301_v34 = vpop.permute.xlu1 %1482 }
 0x286   : > { %v1118_v43 = vsel %vm1096_vm3, %v6275_v40, -inf  ;;  %v6284_v50 = vsel %vm497_vm10, %v1086_v37, -1e+30 }
 0x287   : > { %v1115_v55 = vsel %vm1096_vm3, %v6284_v50, -inf }
 0x288   : > { %1119 = vmax.xlane.f32.xlu1 %v1118_v43  ;;  %v6321_v49 = vpop.permute.xlu0 %1360 }
 0x289   : > { %v6303_v26 = vpop.permute.xlu1 %1484 }
 0x28c   : > { %1116 = vmax.xlane.f32.xlu1 %v1115_v55  ;;  %v6325_v20 = vpop.permute.xlu0 %1364 }
 0x28d   : > { %v6305_v27 = vpop.permute.xlu1 %1424 }
 0x291   : > { %v6307_v42 = vpop.permute.xlu1 %1488 }
 0x295   : > { %v6309_v16 = vpop.permute.xlu1 %1428 }
 0x299   : > { %v6311_v6 = vpop.permute.xlu1 %1430 }
 0x29a   : > { %5270 = vrot.lane.b32.xlu0 %v5269_v1, %s5632_s28 }
 0x29d   : > { %1366 = vrot.lane.b32.xlu1 %v1345_v31, %s5628_s12  ;;  %v6315_v38 = vpop.permute.xlu1 %1358 }
 0x2a1   : > { %v6319_v39 = vpop.permute.xlu1 %5255 }
 0x2a5   : > { %v6323_v17 = vpop.permute.xlu1 %1362 }
 0x2a9   : > { %v6327_v56 = vpop.permute.xlu1 %5265 }
 0x308   : > { %v1102_v37 = vpop.xlane.xlu0 %1101 }
 0x309   : > { %v1122_v43 = vsub.f32 %v6214_v59, %v1102_v37  ;;  %v1099_v55 = vpop.xlane.xlu1 %1098 }
 0x30a   : > { %v1121_v58 = vsub.f32 %v6221_v62, %v1099_v55 }
 0x30b   : > { %v1131_v60 = vmul.f32 1.442695, %v1122_v43 }
 0x30c   : > { %v1129_v61 = vmul.f32 1.442695, %v1121_v58  ;;  %v1347_v58 = vmul.f32 %v6026_v53, %v5844_v4 }
 0x30d   : > { %5429 = vpow2.f32 %v1131_v60  ;;  %v1105_v0 = vpop.xlane.xlu0 %1104  ;;  %v1108_v43 = vpop.xlane.xlu1 %1107 }
 0x30e   : > { %5431 = vpow2.f32 %v1129_v61  ;;  %v1123_v28 = vsub.f32 %v6245_v35, %v1105_v0  ;;  %v1124_v61 = vsub.f32 %v6238_v2, %v1108_v43  ;;  %v6375_v43 = vld [vmem:[%s5736_s11 + $0x10] sm:$0xff] }
 0x310   : > { %v1133_v1 = vmul.f32 1.442695, %v1123_v28  ;;  %v1135_v0 = vmul.f32 1.442695, %v1124_v61  ;;  %v6385_v61 = vld [vmem:[%s5736_s11 + $0x18] sm:$0xff] }
 0x311   : > { %v1111_v31 = vpop.xlane.xlu0 %1110  ;;  %v1114_v55 = vpop.xlane.xlu1 %1113 }
 0x312   : > { %v1125_v9 = vsub.f32 %v1092_v12, %v1111_v31  ;;  %5433 = vpow2.f32 %v1133_v1  ;;  %v1346_v12 = vmul.f32 %v6026_v53, %v5827_v54  ;;  %v1126_v28 = vsub.f32 %v6259_v8, %v1114_v55 }
 0x313   : > { %v1452_v55 = vmul.f32 %v6375_v43, %v6286_v51 }
 0x314   : > { %v1137_v5 = vmul.f32 1.442695, %v1125_v9  ;;  %v1139_v31 = vmul.f32 1.442695, %v1126_v28 }
 0x315   : > { %v1120_v60 = vpop.xlane.xlu1 %1119  ;;  %v1500_v28 = vadd.f32 %v6299_v3, %v1452_v55  ;;  %v6419_v55 = vld [vmem:[%s5736_s11 + $0x30] sm:$0xff] }
 0x316   : > { %5435 = vpow2.f32 %v1137_v5 }
 0x317   : > { %v6332_v23 = vpop.eup %5429  ;;  %5437 = vpow2.f32 %v1135_v0  ;;  %v1453_v0 = vmul.f32 %v6385_v61, %v6286_v51 }
 0x318   : > { %v6334_v63 = vpop.eup %5431  ;;  %v1148_v59 = vsel %vm1096_vm3, %v6332_v23, 0.0  ;;  %5439 = vpow2.f32 %v1139_v31 }
 0x319   : > { %1149 = vadd.xlane.f32.xlu0 %v1148_v59  ;;  %v1145_v62 = vsel %vm1096_vm3, %v6334_v63, 0.0  ;;  %v1117_v1 = vpop.xlane.xlu1 %1116  ;;  %v1128_v59 = vsub.f32 %v6275_v40, %v1120_v60  ;;  %v1501_v31 = vadd.f32 %v6179_v22, %v1453_v0  ;;  %v6409_v22 = vld [vmem:[%s5785_s18 + $0x10] sm:$0xff] }
 0x31a   : > { %1146 = vadd.xlane.f32.xlu1 %v1145_v62  ;;  %v1127_v54 = vsub.f32 %v6284_v50, %v1117_v1  ;;  %v1393_v3 = vmul.f32 %v6409_v22, %v6104_v41 }
 0x31c   : > { %v6340_v37 = vpop.eup %5433  ;;  %v1141_v62 = vmul.f32 1.442695, %v1127_v54  ;;  %v6393_v54 = vld [vmem:[%s5736_s11 + $0x20] sm:$0xff] }
 0x31d   : > { %v1151_v35 = vsel %vm1096_vm3, %v6340_v37, 0.0 }
 0x31e   : > { %1152 = vadd.xlane.f32.xlu0 %v1151_v35  ;;  %v1143_v35 = vmul.f32 1.442695, %v1128_v59  ;;  %5441 = vpow2.f32 %v1141_v62  ;;  %v1454_v59 = vmul.f32 %v6393_v54, %v6286_v51  ;;  %v6398_v62 = vld [vmem:[%s5785_s18 + $0x8] sm:$0xff] }
 0x320   : > { %v6344_v9 = vpop.eup %5435  ;;  %5443 = vpow2.f32 %v1143_v35  ;;  %v1392_v35 = vmul.f32 %v6398_v62, %v6104_v41  ;;  %v1502_v0 = vadd.f32 %v6301_v34, %v1454_v59 }
 0x321   : > { %v1157_v5 = vsel %vm1096_vm3, %v6344_v9, 0.0  ;;  %v6358_v4 = vpop.eup %5437 }
 0x322   : > { %1158 = vadd.xlane.f32.xlu0 %v1157_v5  ;;  %v1154_v53 = vsel %vm1096_vm3, %v6358_v4, 0.0  ;;  %v6362_v2 = vpop.eup %5439 }
 0x323   : > { %v1160_v8 = vsel %vm1096_vm3, %v6362_v2, 0.0 }
 0x328   : > { %v6366_v40 = vpop.eup %5441 }
 0x329   : > { %v1163_v5 = vsel %vm1096_vm3, %v6366_v40, 0.0 }
 0x32a   : > { %v6368_v50 = vpop.eup %5443 }
 0x32b   : > { %1368 = vrot.lane.b32.xlu1 %v1346_v12, %s5628_s12  ;;  %v1166_v12 = vsel %vm1096_vm3, %v6368_v50, 0.0 }
 0x338   : > { %1370 = vrot.lane.b32.xlu0 %v1347_v58, %s5628_s12  ;;  %v6380_v58 = vld [vmem:[%s5785_s18] sm:$0xff] }
 0x339   : > { %v1391_v60 = vmul.f32 %v6380_v58, %v6104_v41 }
 0x33b   : > { %v1442_v1 = vsub.f32 %v1391_v60, %v6175_v21  ;;  %v5274_v21 = vpack.i.bf16 %v1501_v31, %v1500_v28  ;;  %v1456_v60 = vmul.f32 %v6419_v55, %v6286_v51  ;;  %v1443_v28 = vsub.f32 %v1392_v35, %v6177_v44 }
 0x33c   : > { %v1444_v31 = vsub.f32 %v1393_v3, %v6181_v25  ;;  %v1394_v44 = vmul.f32 %v6432_v47, %v6104_v41 }
 0x33d   : > { %v1504_v36 = vadd.f32 %v6183_v29, %v1456_v60  ;;  %v1326_v60 = vmul.f32 %v6409_v22, %v6286_v51 }
 0x33e   : > { %v1445_v29 = vsub.f32 %v1394_v44, %v6305_v27 }
 0x34f   : > { %1155 = vadd.xlane.f32.xlu1 %v1154_v53  ;;  %v6403_v53 = vld [vmem:[%s5736_s11 + $0x28] sm:$0xff] }
 0x353   : > { %1161 = vadd.xlane.f32.xlu1 %v1160_v8  ;;  %v1455_v8 = vmul.f32 %v6403_v53, %v6286_v51 }
 0x357   : > { %1164 = vadd.xlane.f32.xlu1 %v1163_v5  ;;  %1167 = vadd.xlane.f32.xlu0 %v1166_v12  ;;  %v6414_v5 = vld [vmem:[%s5736_s11 + $0x38] sm:$0xff] }
 0x358   : > { %v1457_v12 = vmul.f32 %v6414_v5, %v6286_v51 }
 0x35a   : > { %v1505_v57 = vadd.f32 %v6307_v42, %v1457_v12  ;;  %v6445_v42 = vld [vmem:[%s5785_s18 + $0x20] sm:$0xff]  ;;  %v1324_v12 = vmul.f32 %v6380_v58, %v6286_v51 }
 0x35b   : > { %v1395_v59 = vmul.f32 %v6445_v42, %v6104_v41 }
 0x35c   : > { %v5284_v34 = vpack.i.bf16 %v1505_v57, %v1504_v36  ;;  %v6459_v57 = vld [vmem:[%s5785_s18 + $0x30] sm:$0xff] }
 0x35d   : > { %v1397_v27 = vmul.f32 %v6459_v57, %v6104_v41 }
 0x35f   : > { %v1448_v3 = vsub.f32 %v1397_v27, %v6311_v6  ;;  %v5258_v27 = vunpack.i.h.bf16 %v6319_v39 }
 0x368   : > { %1570 = vrot.lane.b32.xlu1 %v1442_v1, %s5631_s24  ;;  %v1503_v1 = vadd.f32 %v6303_v26, %v1455_v8  ;;  %v6438_v26 = vld [vmem:[%s5785_s18 + $0x28] sm:$0xff]  ;;  %v6452_v8 = vld [vmem:[%s5785_s18 + $0x38] sm:$0xff] }
 0x369   : > { %v1396_v25 = vmul.f32 %v6438_v26, %v6104_v41  ;;  %v1398_v36 = vmul.f32 %v6452_v8, %v6104_v41  ;;  %v1327_v41 = vmul.f32 %v6432_v47, %v6286_v51 }
 0x36a   : > { %v5279_v46 = vpack.i.bf16 %v1503_v1, %v1502_v0  ;;  %v1367_v0 = vpop.permute.xlu1 %1366  ;;  %v1329_v1 = vmul.f32 %v6438_v26, %v6286_v51 }
 0x36b   : > { %v1447_v35 = vsub.f32 %v1396_v25, %v6309_v16  ;;  %v1325_v16 = vmul.f32 %v6398_v62, %v6286_v51  ;;  %v1383_v6 = vadd.f32 %v6323_v17, %v1327_v41  ;;  %v5271_v17 = vpop.permute.xlu0 %5270 }
 0x36c   : > { %5275 = vrot.lane.b32.xlu1 %v5274_v21, %s5632_s28  ;;  %v1449_v21 = vsub.f32 %v1398_v36, %v6187_v32  ;;  %v1380_v32 = vadd.f32 %v6313_v7, %v1324_v12  ;;  %v1385_v7 = vadd.f32 %v1367_v0, %v1329_v1 }
 0x36d   : > { %1572 = vrot.lane.b32.xlu0 %v1443_v28, %s5631_s24  ;;  %v1382_v28 = vadd.f32 %v6321_v49, %v1326_v60  ;;  %v5262_v60 = vunpack.i.l.bf16 %v6317_v52 }
 0x370   : > { %1574 = vrot.lane.b32.xlu1 %v1444_v31, %s5631_s24 }
 0x371   : > { %5280 = vrot.lane.b32.xlu0 %v5279_v46, %s5632_s28  ;;  %v1446_v46 = vsub.f32 %v1395_v59, %v6185_v30  ;;  %v1381_v30 = vadd.f32 %v6315_v38, %v1325_v16  ;;  %v1328_v38 = vmul.f32 %v6445_v42, %v6286_v51  ;;  %v1331_v16 = vmul.f32 %v6452_v8, %v6286_v51 }
 0x373   : > { %v1384_v31 = vadd.f32 %v6325_v20, %v1328_v38  ;;  %v4295_v20 = vld [vmem:[%s7773_s4 + $0x2] ss:$0 sm:$0xff] }
 0x374   : > { %5285 = vrot.lane.b32.xlu1 %v5284_v34, %s5632_s28  ;;  %v1330_v34 = vmul.f32 %v6459_v57, %v6286_v51  ;;  %v5263_v51 = vunpack.i.h.bf16 %v6317_v52  ;;  %v5273_v52 = vunpack.i.h.bf16 %v5271_v17 }
 0x375   : > { %1576 = vrot.lane.b32.xlu0 %v1445_v29, %s5631_s24 }
 0x378   : > { %1580 = vrot.lane.b32.xlu1 %v1447_v35, %s5631_s24 }
 0x379   : > { %1578 = vrot.lane.b32.xlu0 %v1446_v46, %s5631_s24 }
 0x37c   : > { %1584 = vrot.lane.b32.xlu1 %v1449_v21, %s5631_s24  ;;  %v5257_v21 = vunpack.i.l.bf16 %v6319_v39 }
 0x37d   : > { %1582 = vrot.lane.b32.xlu0 %v1448_v3, %s5631_s24 }
 0x380   : > { %1757 = vrot.lane.b32.xlu1 %v1381_v30, %s5632_s28 }
 0x381   : > { %1755 = vrot.lane.b32.xlu0 %v1380_v32, %s5632_s28  ;;  %v4979_v32 = vpack.c.bf16 %v5258_v27, %v5257_v21 }
 0x384   : > { %1761 = vrot.lane.b32.xlu1 %v1383_v6, %s5632_s28  ;;  %v5267_v6 = vunpack.i.l.bf16 %v6327_v56 }
 0x385   : > { %1759 = vrot.lane.b32.xlu0 %v1382_v28, %s5632_s28  ;;  %v5272_v28 = vunpack.i.l.bf16 %v5271_v17 }
 0x387   : > { %v4997_v38 = vpack.c.bf16 %v5273_v52, %v5272_v28 }
 0x388   : > { %1765 = vrot.lane.b32.xlu1 %v1385_v7, %s5632_s28 }
 0x389   : > { %1763 = vrot.lane.b32.xlu0 %v1384_v31, %s5632_s28 }
 0x3a6   : > { %v1150_v44 = vpop.xlane.xlu0 %1149 }
 0x3a7   : > { %5445 = vrcp.f32 %v1150_v44  ;;  %v1147_v49 = vpop.xlane.xlu1 %1146 }
 0x3a8   : > { %5447 = vrcp.f32 %v1147_v49 }
 0x3ab   : > { %v1369_v25 = vpop.permute.xlu1 %1368  ;;  %v1153_v29 = vpop.xlane.xlu0 %1152 }
 0x3ac   : > { %v1386_v59 = vadd.f32 %v1369_v25, %v1330_v34  ;;  %5449 = vrcp.f32 %v1153_v29 }
 0x3ae   : > { %1767 = vrot.lane.b32.xlu0 %v1386_v59, %s5632_s28 }
 0x3af   : > { %v1159_v35 = vpop.xlane.xlu0 %1158 }
 0x3b0   : > { %5451 = vrcp.f32 %v1159_v35 }
 0x3b1   : > { %v5446_v36 = vpop.eup %5445 }
 0x3b2   : > { %v5448_v46 = vpop.eup %5447  ;;  %2282 = vrot.lane.b32.xlu0 %v4295_v20, %s5633_s30  ;;  %v1178_v30 = vmul.f32 %v5446_v36, %v6332_v23  ;;  %v6518_v23 = vld [vmem:[%s7772_s3 + $0x2] ss:$0 sm:$0xff] }
 0x3b3   : > { %v1177_v3 = vmul.f32 %v5448_v46, %v6334_v63  ;;  %v1371_v12 = vpop.permute.xlu0 %1370 }
 0x3b4   : > { %v1387_v41 = vadd.f32 %v1371_v12, %v1331_v16 }
 0x3b5   : > { %4645 = vmatprep.mubr.msk.f32.mxu1 %vm1096_vm3, %v1177_v3 }
 0x3b6   : > { %4646 = vmatmul.mubr.msk.f32.vlgmr.msra.gmra.mrb[0].mxu1 %vm1096_vm3, %v1178_v30  ;;  %2220 = vrot.lane.b32.xlu0 %v4295_v20, %s5631_s24  ;;  %v5450_v39 = vpop.eup %5449 }
 0x3b7   : > { %1769 = vrot.lane.b32.xlu1 %v1387_v41, %s5632_s28  ;;  %4978 = vmatpush3.bf16.xpose.msk.msra.mxu1 %vm5927_vm1, %v6189_v33  ;;  %v1179_v63 = vmul.f32 %v5450_v39, %v6340_v37  ;;  %v4985_v33 = vpack.c.bf16 %v5263_v51, %v5262_v60  ;;  %v5268_v37 = vunpack.i.h.bf16 %v6327_v56 }
 0x3b8   : > { %4981 = vmatprep.subr.msk.bf16.mxu1 %vm5927_vm1, %v4979_v32 }
 0x3b9   : > { %4648 = vmatprep.mubr.msk.f32.mxu1 %vm1096_vm3, %v1179_v63  ;;  %v4991_v0 = vpack.c.bf16 %v5268_v37, %v5267_v6 }
 0x3ba   : > { %v5452_v44 = vpop.eup %5451 }
 0x3bb   : > { %2271 = vrot.lane.b32.xlu1 %v6518_v23, %s5631_s24  ;;  %v1181_v29 = vmul.f32 %v5452_v44, %v6344_v9  ;;  %v6583_v44 = vld [vmem:[%s5736_s11] sm:$0xff] }
 0x3bf   : > { %4984 = vmatpush3.bf16.xpose.msk.msra.mxu1 %vm5927_vm1, %v4979_v32 }
 0x3c0   : > { %4987 = vmatprep.subr.msk.bf16.mxu1 %vm5927_vm1, %v4985_v33 }
 0x3c7   : > { %4990 = vmatpush3.bf16.xpose.msk.msra.mxu1 %vm5927_vm1, %v4985_v33 }
 0x3c8   : > { %4993 = vmatprep.subr.msk.bf16.mxu1 %vm5927_vm1, %v4991_v0 }
 0x3cf   : > { %4996 = vmatpush3.bf16.xpose.msk.msra.mxu1 %vm5927_vm1, %v4991_v0 }
 0x3d0   : > { %4999 = vmatprep.subr.msk.bf16.mxu1 %vm5927_vm1, %v4997_v38 }
 0x3dc   : > { %v1156_v1 = vpop.xlane.xlu1 %1155 }
 0x3dd   : > { %5453 = vrcp.f32 %v1156_v1 }
 0x3e0   : > { %v1162_v56 = vpop.xlane.xlu1 %1161 }
 0x3e1   : > { %5455 = vrcp.f32 %v1162_v56 }
 0x3e4   : > { %v1165_v7 = vpop.xlane.xlu1 %1164  ;;  %v1168_v31 = vpop.xlane.xlu0 %1167 }
 0x3e5   : > { %5457 = vrcp.f32 %v1165_v7 }
 0x3e6   : > { %5459 = vrcp.f32 %v1168_v31 }
 0x3e7   : > { %v5454_v49 = vpop.eup %5453 }
 0x3e8   : > { %v1571_v34 = vpop.permute.xlu1 %1570  ;;  %v1180_v17 = vmul.f32 %v5454_v49, %v6358_v4  ;;  %v1573_v25 = vpop.permute.xlu0 %1572 }
 0x3ea   : > { %4649 = vmatmul.mubr.msk.f32.gmra.mrb[2].mxu1 %vm1096_vm3, %v1180_v17  ;;  %v6592_v17 = vld [vmem:[%s5736_s11 + $0x8] sm:$0xff] }
 0x3eb   : > { %v5456_v59 = vpop.eup %5455  ;;  %4651 = vmatprep.mubr.msk.f32.mxu1 %vm1096_vm3, %v1181_v29  ;;  %7815 = vst [vmem:[#allocation15_spill] sm:$0xff] %v6592_v17 }
 0x3ec   : > { %v5276_v20 = vpop.permute.xlu1 %5275  ;;  %v1182_v35 = vmul.f32 %v5456_v59, %v6362_v2  ;;  %v5281_v36 = vpop.permute.xlu0 %5280 }
 0x3ed   : > { %v5278_v9 = vunpack.i.h.bf16 %v5276_v20  ;;  %v5277_v12 = vunpack.i.l.bf16 %v5276_v20 }
 0x3ee   : > { %4652 = vmatmul.mubr.msk.f32.gmra.mrb[4].mxu1 %vm1096_vm3, %v1182_v35 }
 0x3ef   : > { %v5458_v46 = vpop.eup %5457  ;;  %v5003_v30 = vpack.c.bf16 %v5278_v9, %v5277_v12 }
 0x3f0   : > { %v5460_v27 = vpop.eup %5459  ;;  %v1575_v21 = vpop.permute.xlu1 %1574  ;;  %v1183_v16 = vmul.f32 %v5458_v46, %v6366_v40  ;;  %v5283_v40 = vunpack.i.h.bf16 %v5281_v36 }
 0x3f1   : > { %v1577_v4 = vpop.permute.xlu0 %1576  ;;  %v1184_v3 = vmul.f32 %v5460_v27, %v6368_v50  ;;  %v5282_v50 = vunpack.i.l.bf16 %v5281_v36 }
 0x3f2   : > { %4654 = vmatprep.mubr.msk.f32.mxu1 %vm1096_vm3, %v1183_v16 }
 0x3f3   : > { %4655 = vmatmul.mubr.msk.f32.gmra.mrb[6].mxu1 %vm1096_vm3, %v1184_v3  ;;  %v5009_v63 = vpack.c.bf16 %v5283_v40, %v5282_v50 }
 0x3f4   : > { %4673 = vmatprep.mubr.msk.f32.mxu1 %vm789_vm0, %v1571_v34  ;;  %v5286_v2 = vpop.permute.xlu1 %5285 }
 0x3f5   : > { %v1579_v41 = vpop.permute.xlu0 %1578  ;;  %v5288_v60 = vunpack.i.h.bf16 %v5286_v2  ;;  %v5287_v33 = vunpack.i.l.bf16 %v5286_v2 }
 0x3f7   : > { %4674 = vmatmul.mubr.msk.f32.vlgmr.msra.gmra.mrb[8].mxu1 %vm789_vm0, %v1573_v25  ;;  %v5015_v6 = vpack.c.bf16 %v5288_v60, %v5287_v33 }
 0x3f8   : > { %5002 = vmatpush3.bf16.xpose.msk.msra.mxu1 %vm5927_vm1, %v4997_v38  ;;  %4676 = vmatprep.mubr.msk.f32.mxu1 %vm789_vm0, %v1575_v21  ;;  %v1581_v32 = vpop.permute.xlu1 %1580  ;;  %v5289_v21 = vpack.i.bf16 %v6145_v48, %v6142_v45  ;;  %v5294_v45 = vpack.i.bf16 %v6153_v11, %v6148_v10  ;;  %v5304_v10 = vpack.i.bf16 %v6171_v19, %v6168_v18 }
 0x3f9   : > { %5005 = vmatprep.subr.msk.bf16.mxu1 %vm5927_vm1, %v5003_v30  ;;  %v1583_v39 = vpop.permute.xlu0 %1582  ;;  %v5299_v11 = vpack.i.bf16 %v6161_v14, %v6158_v13 }
 0x3fb   : > { %4677 = vmatmul.mubr.msk.f32.gmra.mrb[10].mxu1 %vm789_vm0, %v1577_v4 }
 0x3fc   : > { %4679 = vmatprep.mubr.msk.f32.mxu1 %vm789_vm0, %v1579_v41  ;;  %v1585_v51 = vpop.permute.xlu1 %1584 }
 0x3fd   : > { %v1756_v37 = vpop.permute.xlu0 %1755 }
 0x3ff   : > { %4680 = vmatmul.mubr.msk.f32.gmra.mrb[12].mxu1 %vm789_vm0, %v1581_v32 }
 0x400   : > { %5008 = vmatpush3.bf16.xpose.msk.msra.mxu1 %vm5927_vm1, %v5003_v30  ;;  %4682 = vmatprep.mubr.msk.f32.mxu1 %vm789_vm0, %v1583_v39  ;;  %v1758_v0 = vpop.permute.xlu1 %1757 }
 0x401   : > { %5011 = vmatprep.subr.msk.bf16.mxu1 %vm5927_vm1, %v5009_v63  ;;  %v1760_v52 = vpop.permute.xlu0 %1759 }
 0x403   : > { %4683 = vmatmul.mubr.msk.f32.gmra.mrb[14].mxu1 %vm789_vm0, %v1585_v51 }
 0x404   : > { %4701 = vmatprep.mubr.msk.f32.mxu1 %vm789_vm0, %v1756_v37  ;;  %v1762_v28 = vpop.permute.xlu1 %1761 }
 0x405   : > { %v1764_v38 = vpop.permute.xlu0 %1763 }
 0x408   : > { %5014 = vmatpush3.bf16.xpose.msk.msra.mxu1 %vm5927_vm1, %v5009_v63  ;;  %v1766_v1 = vpop.permute.xlu1 %1765 }
 0x409   : > { %5017 = vmatprep.subr.msk.bf16.mxu1 %vm5927_vm1, %v5015_v6 }
 0x410   : > { %5020 = vmatpush3.bf16.xpose.msk.msra.mxu1 %vm5927_vm1, %v5015_v6 }
 0x417   : > { %4702 = vmatmul.mubr.msk.f32.vlgmr.msra.gmra.mrb[8].mxu1 %vm789_vm0, %v1758_v0 }
 0x418   : > { %4704 = vmatprep.mubr.msk.f32.mxu1 %vm789_vm0, %v1760_v52 }
 0x41b   : > { %4705 = vmatmul.mubr.msk.f32.gmra.mrb[10].mxu1 %vm789_vm0, %v1762_v28 }
 0x41c   : > { %4707 = vmatprep.mubr.msk.f32.mxu1 %vm789_vm0, %v1764_v38 }
 0x41f   : > { %4708 = vmatmul.mubr.msk.f32.gmra.mrb[12].mxu1 %vm789_vm0, %v1766_v1 }
 0x420   : > { %v1768_v56 = vpop.permute.xlu0 %1767 }
 0x421   : > { %4710 = vmatprep.mubr.msk.f32.mxu1 %vm789_vm0, %v1768_v56 }
 0x424   : > { %v6578_v7 = vpop.permute.xlu0 %2282 }
 0x425   : > { %v2399_v31 = vmul.f32 %v6375_v43, %v6578_v7  ;;  %v2397_v49 = vmul.f32 %v6583_v44, %v6578_v7  ;;  %v2401_v34 = vmul.f32 %v6393_v54, %v6578_v7  ;;  %v2398_v25 = vmul.f32 %v6592_v17, %v6578_v7 }
 0x426   : > { %v2403_v59 = vmul.f32 %v6419_v55, %v6578_v7  ;;  %v2400_v20 = vmul.f32 %v6385_v61, %v6578_v7  ;;  %v2402_v35 = vmul.f32 %v6403_v53, %v6578_v7  ;;  %v2404_v46 = vmul.f32 %v6414_v5, %v6578_v7 }
 0x427   : > { %2417 = vrot.lane.b32.xlu1 %v2399_v31, %s5627_s7  ;;  %2413 = vrot.lane.b32.xlu0 %v2397_v49, %s5627_s7  ;;  %v2285_v4 = vmul.f32 %v6380_v58, %v6578_v7  ;;  %v2286_v48 = vmul.f32 %v6398_v62, %v6578_v7  ;;  %v2288_v2 = vmul.f32 %v6432_v47, %v6578_v7 }
 0x428   : > { %v6607_v36 = vpop.permute.xlu0 %2220  ;;  %v2287_v13 = vmul.f32 %v6409_v22, %v6578_v7  ;;  %v2290_v19 = vmul.f32 %v6438_v26, %v6578_v7  ;;  %v2291_v30 = vmul.f32 %v6459_v57, %v6578_v7  ;;  %v2289_v41 = vmul.f32 %v6445_v42, %v6578_v7 }
 0x429   : > { %v1770_v29 = vpop.permute.xlu1 %1769  ;;  %v2342_v27 = vmul.f32 %v6592_v17, %v6607_v36  ;;  %v2341_v16 = vmul.f32 %v6583_v44, %v6607_v36  ;;  %v2345_v3 = vmul.f32 %v6393_v54, %v6607_v36  ;;  %v2343_v9 = vmul.f32 %v6375_v43, %v6607_v36 }
 0x42a   : > { %4711 = vmatmul.mubr.msk.f32.gmra.mrb[14].mxu1 %vm789_vm0, %v1770_v29  ;;  %v2346_v12 = vmul.f32 %v6403_v53, %v6607_v36  ;;  %v2348_v18 = vmul.f32 %v6414_v5, %v6607_v36  ;;  %v2347_v14 = vmul.f32 %v6419_v55, %v6607_v36  ;;  %v2224_v40 = vmul.f32 %v6398_v62, %v6607_v36 }
 0x42b   : > { %2421 = vrot.lane.b32.xlu1 %v2401_v34, %s5627_s7  ;;  %2415 = vrot.lane.b32.xlu0 %v2398_v25, %s5627_s7 }
 0x42d   : > { %v6679_v39 = vpop.permute.xlu1 %2271 }
 0x42e   : > { %v2389_v63 = vmul.f32 %v6583_v44, %v6679_v39  ;;  %v2390_v33 = vmul.f32 %v6592_v17, %v6679_v39  ;;  %v2391_v6 = vmul.f32 %v6375_v43, %v6679_v39  ;;  %v2392_v38 = vmul.f32 %v6385_v61, %v6679_v39 }
 0x42f   : > { %2425 = vrot.lane.b32.xlu1 %v2403_v59, %s5627_s7  ;;  %2419 = vrot.lane.b32.xlu0 %v2400_v20, %s5627_s7  ;;  %v2393_v34 = vmul.f32 %v6393_v54, %v6679_v39  ;;  %v2394_v29 = vmul.f32 %v6403_v53, %v6679_v39  ;;  %v2395_v20 = vmul.f32 %v6419_v55, %v6679_v39 }
 0x433   : > { %2204 = vrot.lane.b32.xlu1 %v6518_v23, %s5633_s30  ;;  %2423 = vrot.lane.b32.xlu0 %v2402_v35, %s5627_s7  ;;  %v2344_v23 = vmul.f32 %v6385_v61, %v6607_v36  ;;  %v2292_v35 = vmul.f32 %v6452_v8, %v6578_v7 }
 0x437   : > { %2427 = vrot.lane.b32.xlu0 %v2404_v46, %s5627_s7  ;;  %2359 = vrot.lane.b32.xlu1 %v2342_v27, %s5628_s12 }
 0x43b   : > { %5290 = vrot.lane.b32.xlu1 %v5289_v21, %s5632_s28  ;;  %2357 = vrot.lane.b32.xlu0 %v2341_v16, %s5628_s12 }
 0x43f   : > { %2363 = vrot.lane.b32.xlu1 %v2344_v23, %s5628_s12  ;;  %2301 = vrot.lane.b32.xlu0 %v2285_v4, %s5627_s7  ;;  %v2396_v23 = vmul.f32 %v6414_v5, %v6679_v39 }
 0x443   : > { %5295 = vrot.lane.b32.xlu1 %v5294_v45, %s5632_s28  ;;  %2303 = vrot.lane.b32.xlu0 %v2286_v48, %s5627_s7  ;;  %v2223_v45 = vmul.f32 %v6380_v58, %v6607_v36 }
 0x447   : > { %2365 = vrot.lane.b32.xlu1 %v2345_v3, %s5628_s12  ;;  %2361 = vrot.lane.b32.xlu0 %v2343_v9, %s5628_s12 }
 0x44b   : > { %5305 = vrot.lane.b32.xlu1 %v5304_v10, %s5632_s28  ;;  %5300 = vrot.lane.b32.xlu0 %v5299_v11, %s5632_s28 }
 0x44f   : > { %2307 = vrot.lane.b32.xlu1 %v2288_v2, %s5627_s7  ;;  %2367 = vrot.lane.b32.xlu0 %v2346_v12, %s5628_s12 }
 0x453   : > { %2371 = vrot.lane.b32.xlu1 %v2348_v18, %s5628_s12  ;;  %2305 = vrot.lane.b32.xlu0 %v2287_v13, %s5627_s7  ;;  %v2225_v13 = vmul.f32 %v6409_v22, %v6607_v36 }
 0x457   : > { %2311 = vrot.lane.b32.xlu1 %v2290_v19, %s5627_s7  ;;  %2369 = vrot.lane.b32.xlu0 %v2347_v14, %s5628_s12  ;;  %v2226_v14 = vmul.f32 %v6432_v47, %v6607_v36 }
 0x45b   : > { %2313 = vrot.lane.b32.xlu1 %v2291_v30, %s5627_s7  ;;  %2309 = vrot.lane.b32.xlu0 %v2289_v41, %s5627_s7 }
 0x45f   : > { %2241 = vrot.lane.b32.xlu1 %v2224_v40, %s5628_s12  ;;  %v2227_v40 = vmul.f32 %v6445_v42, %v6607_v36 }
 0x489   : > { %v6675_v50 = vpop.f32.mrb[0].mxu1 }
 0x48a   : > { %7816 = vst [vmem:[#allocation16_spill] sm:$0xff] %v6675_v50  ;;  %v6677_v32 = vpop.f32.mrb[1].mxu1 }
 0x48b   : > { %7817 = vst [vmem:[#allocation17_spill] sm:$0xff] %v6677_v32 }
 0x499   : > { %v2414_v51 = vpop.permute.xlu0 %2413  ;;  %v2418_v60 = vpop.permute.xlu1 %2417 }
 0x49a   : > { %v2437_v37 = vsub.f32 %v2389_v63, %v2414_v51  ;;  %v2439_v1 = vsub.f32 %v2391_v6, %v2418_v60 }
 0x49d   : > { %v2416_v0 = vpop.permute.xlu0 %2415  ;;  %v2422_v52 = vpop.permute.xlu1 %2421 }
 0x49e   : > { %v2438_v28 = vsub.f32 %v2390_v33, %v2416_v0  ;;  %v2441_v21 = vsub.f32 %v2393_v34, %v2422_v52 }
 0x4a0   : > { %v5309_v56 = vpack.i.bf16 %v2438_v28, %v2437_v37 }
 0x4a1   : > { %v2420_v31 = vpop.permute.xlu0 %2419  ;;  %v2426_v49 = vpop.permute.xlu1 %2425 }
 0x4a2   : > { %v2440_v25 = vsub.f32 %v2392_v38, %v2420_v31  ;;  %5310 = vrot.lane.b32.xlu0 %v5309_v56, %s5630_s16  ;;  %v2443_v4 = vsub.f32 %v2395_v20, %v2426_v49 }
 0x4a4   : > { %v5314_v59 = vpack.i.bf16 %v2440_v25, %v2439_v1 }
 0x4a5   : > { %v2424_v46 = vpop.permute.xlu0 %2423  ;;  %v6698_v27 = vpop.permute.xlu1 %2204 }
 0x4a6   : > { %v2442_v16 = vsub.f32 %v2394_v29, %v2424_v46  ;;  %2315 = vrot.lane.b32.xlu0 %v2292_v35, %s5627_s7  ;;  %5315 = vrot.lane.b32.xlu1 %v5314_v59, %s5630_s16 }
 0x4a8   : > { %v5319_v7 = vpack.i.bf16 %v2442_v16, %v2441_v21 }
 0x4a9   : > { %v2428_v48 = vpop.permute.xlu0 %2427  ;;  %v6706_v3 = vpop.permute.xlu1 %2359 }
 0x4aa   : > { %v2444_v9 = vsub.f32 %v2396_v23, %v2428_v48  ;;  %2239 = vrot.lane.b32.xlu0 %v2223_v45, %s5628_s12 }
 0x4ac   : > { %v5324_v10 = vpack.i.bf16 %v2444_v9, %v2443_v4 }
 0x4ad   : > { %v6709_v11 = vpop.permute.xlu0 %2357  ;;  %v5291_v12 = vpop.permute.xlu1 %5290 }
 0x4ae   : > { %v5293_v2 = vunpack.i.h.bf16 %v5291_v12  ;;  %v5292_v18 = vunpack.i.l.bf16 %v5291_v12  ;;  %5320 = vrot.lane.b32.xlu0 %v5319_v7, %s5630_s16  ;;  %5325 = vrot.lane.b32.xlu1 %v5324_v10, %s5630_s16 }
 0x4b0   : > { %v5021_v19 = vpack.c.bf16 %v5293_v2, %v5292_v18 }
 0x4b1   : > { %v6717_v30 = vpop.permute.xlu0 %2301  ;;  %v6719_v41 = vpop.permute.xlu1 %2363 }
 0x4b2   : > { %2243 = vrot.lane.b32.xlu0 %v2225_v13, %s5628_s12  ;;  %2245 = vrot.lane.b32.xlu1 %v2226_v14, %s5628_s12 }
 0x4b3   : > { %5022 = vmatprep.subr.bf16.mxu0 %v5021_v19 }
 0x4b4   : > { %5024 = vmatpush3.bf16.msra.mxu0 %v5021_v19 }
 0x4b5   : > { %v6725_v63 = vpop.permute.xlu0 %2303  ;;  %v5296_v51 = vpop.permute.xlu1 %5295 }
 0x4b6   : > { %v5298_v60 = vunpack.i.h.bf16 %v5296_v51  ;;  %v5297_v33 = vunpack.i.l.bf16 %v5296_v51  ;;  %2247 = vrot.lane.b32.xlu0 %v2227_v40, %s5628_s12 }
 0x4b8   : > { %v5025_v37 = vpack.c.bf16 %v5298_v60, %v5297_v33 }
 0x4b9   : > { %v6728_v6 = vpop.permute.xlu0 %2361  ;;  %v6730_v0 = vpop.permute.xlu1 %2365 }
 0x4ba   : > { %5026 = vmatprep.subr.bf16.mxu0 %v5025_v37 }
 0x4bb   : > { %5028 = vmatpush3.bf16.msra.mxu0 %v5025_v37 }
 0x4bd   : > { %v5301_v52 = vpop.permute.xlu0 %5300  ;;  %v6732_v28 = vpop.f32.mrb[2].mxu1 }
 0x4be   : > { %7818 = vst [vmem:[#allocation18_spill] sm:$0xff] %v6732_v28  ;;  %v5303_v38 = vunpack.i.h.bf16 %v5301_v52  ;;  %v5302_v1 = vunpack.i.l.bf16 %v5301_v52  ;;  %v5306_v56 = vpop.permute.xlu1 %5305  ;;  %v6734_v31 = vpop.f32.mrb[3].mxu1 }
 0x4bf   : > { %7819 = vst [vmem:[#allocation19_spill] sm:$0xff] %v6734_v31  ;;  %v5308_v49 = vunpack.i.h.bf16 %v5306_v56  ;;  %v5307_v34 = vunpack.i.l.bf16 %v5306_v56 }
 0x4c0   : > { %v5029_v25 = vpack.c.bf16 %v5303_v38, %v5302_v1 }
 0x4c1   : > { %v6736_v29 = vpop.f32.mrb[4].mxu1  ;;  %v5033_v59 = vpack.c.bf16 %v5308_v49, %v5307_v34 }
 0x4c2   : > { %7820 = vst [vmem:[#allocation20_spill] sm:$0xff] %v6736_v29  ;;  %v6738_v20 = vpop.f32.mrb[5].mxu1  ;;  %5030 = vmatprep.subr.bf16.mxu0 %v5029_v25 }
 0x4c3   : > { %7821 = vst [vmem:[#allocation21_spill] sm:$0xff] %v6738_v20  ;;  %5032 = vmatpush3.bf16.msra.mxu0 %v5029_v25 }
 0x4c4   : > { %5034 = vmatprep.subr.bf16.mxu0 %v5033_v59 }
 0x4c6   : > { %v6740_v35 = vpop.f32.mrb[6].mxu1 }
 0x4c7   : > { %7822 = vst [vmem:[#allocation22_spill] sm:$0xff] %v6740_v35  ;;  %v6742_v46 = vpop.f32.mrb[7].mxu1  ;;  %5036 = vmatpush3.bf16.msra.mxu0 %v5033_v59  ;;  %v2228_v35 = vmul.f32 %v6438_v26, %v6607_v36 }
 0x4c8   : > { %7823 = vst [vmem:[#allocation23_spill] sm:$0xff] %v6742_v46 }
 0x4ea   : > { %v4703_v21 = vpop.f32.mrb[8].mxu1 }
 0x4eb   : > { %v1933_v16 = vmul.f32 0.17677669, %v4703_v21  ;;  %v1893_v23 = vpop.f32.mrb[9].mxu1 }
 0x4ec   : > { %v1932_v4 = vmul.f32 0.17677669, %v1893_v23 }
 0x4ed   : > { %v6747_v48 = vsel %vm492_vm2, %v1933_v16, -1e+30 }
 0x4ee   : > { %v6752_v9 = vsel %vm491_vm4, %v1932_v4, -1e+30  ;;  %v4706_v10 = vpop.f32.mrb[10].mxu1  ;;  %v1951_v12 = vsel %vm1096_vm3, %v6747_v48, -inf  ;;  %v6783_v4 = vpop.permute.xlu0 %2367 }
 0x4ef   : > { %v1935_v2 = vmul.f32 0.17677669, %v4706_v10  ;;  %1952 = vmax.xlane.f32.xlu0 %v1951_v12  ;;  %v1903_v18 = vpop.f32.mrb[11].mxu1  ;;  %v1948_v13 = vsel %vm1096_vm3, %v6752_v9, -inf }
 0x4f0   : > { %v1934_v14 = vmul.f32 0.17677669, %v1903_v18  ;;  %1949 = vmax.xlane.f32.xlu1 %v1948_v13 }
 0x4f1   : > { %v6761_v40 = vsel %vm494_vm5, %v1935_v2, -1e+30 }
 0x4f2   : > { %v6766_v60 = vsel %vm493_vm6, %v1934_v14, -1e+30  ;;  %v4709_v33 = vpop.f32.mrb[12].mxu1  ;;  %v1957_v37 = vsel %vm1096_vm3, %v6761_v40, -inf }
 0x4f3   : > { %v1937_v52 = vmul.f32 0.17677669, %v4709_v33  ;;  %v1913_v38 = vpop.f32.mrb[13].mxu1  ;;  %v1954_v1 = vsel %vm1096_vm3, %v6766_v60, -inf  ;;  %v2334_v33 = vmul.f32 %v6592_v17, %v6698_v27 }
 0x4f4   : > { %v1936_v56 = vmul.f32 0.17677669, %v1913_v38  ;;  %1958 = vmax.xlane.f32.xlu1 %v1957_v37  ;;  %1955 = vmax.xlane.f32.xlu0 %v1954_v1  ;;  %v2333_v37 = vmul.f32 %v6583_v44, %v6698_v27  ;;  %v6801_v1 = vpop.permute.xlu0 %2305 }
 0x4f5   : > { %v6775_v34 = vsel %vm496_vm7, %v1937_v52, -1e+30 }
 0x4f6   : > { %v1944_v59 = vsel %vm495_vm8, %v1936_v56, -1e+30  ;;  %v1963_v21 = vsel %vm1096_vm3, %v6775_v34, -inf }
 0x4f7   : > { %v1960_v16 = vsel %vm1096_vm3, %v1944_v59, -inf }
 0x4f8   : > { %1964 = vmax.xlane.f32.xlu1 %v1963_v21  ;;  %1961 = vmax.xlane.f32.xlu0 %v1960_v16  ;;  %v2382_v21 = vadd.f32 %v6706_v3, %v2334_v33  ;;  %v2381_v16 = vadd.f32 %v6709_v11, %v2333_v37  ;;  %v6820_v3 = vpop.permute.xlu1 %2307 }
 0x4fc   : > { %v6822_v11 = vpop.permute.xlu1 %2371 }
 0x4fd   : > { %v4712_v23 = vpop.f32.mrb[14].mxu1 }
 0x4fe   : > { %v1939_v10 = vmul.f32 0.17677669, %v4712_v23  ;;  %v1923_v12 = vpop.f32.mrb[15].mxu1  ;;  %v5329_v23 = vpack.i.bf16 %v2382_v21, %v2381_v16 }
 0x4ff   : > { %v1938_v2 = vmul.f32 0.17677669, %v1923_v12 }
 0x500   : > { %v6788_v13 = vsel %vm498_vm9, %v1939_v10, -1e+30  ;;  %v6807_v10 = vpop.permute.xlu0 %2369  ;;  %v6824_v33 = vpop.permute.xlu1 %2311 }
 0x501   : > { %v1969_v14 = vsel %vm1096_vm3, %v6788_v13, -inf  ;;  %v6799_v38 = vsel %vm497_vm10, %v1938_v2, -1e+30 }
 0x502   : > { %1970 = vmax.xlane.f32.xlu1 %v1969_v14  ;;  %v1966_v56 = vsel %vm1096_vm3, %v6799_v38, -inf }
 0x504   : > { %v6810_v12 = vpop.permute.xlu0 %2309 }
 0x506   : > { %1967 = vmax.xlane.f32.xlu1 %v1966_v56  ;;  %v6828_v56 = vpop.permute.xlu1 %2313 }
 0x50e   : > { %5330 = vrot.lane.b32.xlu0 %v5329_v23, %s5633_s30 }
 0x514   : > { %v5311_v2 = vpop.permute.xlu0 %5310 }
 0x515   : > { %v5313_v46 = vunpack.i.h.bf16 %v5311_v2  ;;  %v5312_v14 = vunpack.i.l.bf16 %v5311_v2 }
 0x517   : > { %v6814_v20 = vpack.c.bf16 %v5313_v46, %v5312_v14  ;;  %2249 = vrot.lane.b32.xlu1 %v2228_v35, %s5628_s12  ;;  %v6832_v46 = vpop.permute.xlu1 %2241 }
 0x518   : > { %v6826_v37 = vpop.permute.xlu0 %2315 }
 0x519   : > { %5039 = vmatprep.subr.msk.bf16.mxu0 %vm5927_vm1, %v6814_v20 }
 0x51b   : > { %v6836_v35 = vpop.permute.xlu1 %5315 }
 0x51c   : > { %v6830_v21 = vpop.permute.xlu0 %2239 }
 0x520   : > { %v6834_v16 = vpop.permute.xlu0 %5320  ;;  %v6840_v2 = vpop.permute.xlu1 %5325 }
 0x524   : > { %v6838_v23 = vpop.permute.xlu0 %2243  ;;  %v6844_v29 = vpop.permute.xlu1 %2245 }
 0x528   : > { %v6842_v14 = vpop.permute.xlu0 %2247 }
 0x57c   : > { %v1953_v31 = vpop.xlane.xlu0 %1952 }
 0x57d   : > { %v1973_v28 = vsub.f32 %v6747_v48, %v1953_v31  ;;  %v1950_v32 = vpop.xlane.xlu1 %1949 }
 0x57e   : > { %v1972_v50 = vsub.f32 %v6752_v9, %v1950_v32 }
 0x57f   : > { %v1982_v52 = vmul.f32 1.442695, %v1973_v28 }
 0x580   : > { %v1980_v18 = vmul.f32 1.442695, %v1972_v50 }
 0x581   : > { %5461 = vpow2.f32 %v1982_v52  ;;  %v1956_v25 = vpop.xlane.xlu0 %1955  ;;  %v1959_v9 = vpop.xlane.xlu1 %1958 }
 0x582   : > { %5463 = vpow2.f32 %v1980_v18  ;;  %v1974_v49 = vsub.f32 %v6766_v60, %v1956_v25 }
 0x584   : > { %v1984_v51 = vmul.f32 1.442695, %v1974_v49  ;;  %v1975_v49 = vsub.f32 %v6761_v40, %v1959_v9 }
 0x585   : > { %v1962_v19 = vpop.xlane.xlu0 %1961 }
 0x586   : > { %v1976_v7 = vsub.f32 %v1944_v59, %v1962_v19  ;;  %5465 = vpow2.f32 %v1984_v51  ;;  %v1965_v19 = vpop.xlane.xlu1 %1964  ;;  %v2230_v51 = vmul.f32 %v6452_v8, %v6607_v36  ;;  %v1986_v25 = vmul.f32 1.442695, %v1975_v49 }
 0x587   : > { %v1977_v59 = vsub.f32 %v6775_v34, %v1965_v19  ;;  %v2335_v49 = vmul.f32 %v6375_v43, %v6698_v27  ;;  %v2340_v43 = vmul.f32 %v6414_v5, %v6698_v27 }
 0x588   : > { %v1988_v45 = vmul.f32 1.442695, %v1976_v7  ;;  %v2229_v7 = vmul.f32 %v6459_v57, %v6607_v36 }
 0x589   : > { %v1990_v52 = vmul.f32 1.442695, %v1977_v59 }
 0x58a   : > { %5467 = vpow2.f32 %v1988_v45 }
 0x58b   : > { %v6849_v24 = vpop.eup %5461  ;;  %5469 = vpow2.f32 %v1986_v25 }
 0x58c   : > { %v6851_v17 = vpop.eup %5463  ;;  %v1999_v32 = vsel %vm1096_vm3, %v6849_v24, 0.0  ;;  %5471 = vpow2.f32 %v1990_v52  ;;  %v2275_v52 = vmul.f32 %v6398_v62, %v6679_v39 }
 0x58d   : > { %2000 = vadd.xlane.f32.xlu0 %v1999_v32  ;;  %v1996_v50 = vsel %vm1096_vm3, %v6851_v17, 0.0 }
 0x58e   : > { %1997 = vadd.xlane.f32.xlu1 %v1996_v50 }
 0x58f   : > { %v1971_v60 = vpop.xlane.xlu1 %1970 }
 0x590   : > { %v6857_v28 = vpop.eup %5465  ;;  %v1979_v50 = vsub.f32 %v6788_v13, %v1971_v60  ;;  %v2336_v60 = vmul.f32 %v6385_v61, %v6698_v27 }
 0x591   : > { %v2002_v31 = vsel %vm1096_vm3, %v6857_v28, 0.0 }
 0x592   : > { %2003 = vadd.xlane.f32.xlu0 %v2002_v31  ;;  %v2384_v59 = vadd.f32 %v6719_v41, %v2336_v60  ;;  %v2326_v41 = vsub.f32 %v2275_v52, %v6725_v63  ;;  %v2277_v63 = vmul.f32 %v6432_v47, %v6679_v39 }
 0x593   : > { %v1968_v18 = vpop.xlane.xlu1 %1967 }
 0x594   : > { %v6861_v48 = vpop.eup %5467  ;;  %v1978_v32 = vsub.f32 %v6799_v38, %v1968_v18  ;;  %v2383_v18 = vadd.f32 %v6728_v6, %v2335_v49 }
 0x595   : > { %v2008_v45 = vsel %vm1096_vm3, %v6861_v48, 0.0  ;;  %v6875_v36 = vpop.eup %5469 }
 0x596   : > { %2009 = vadd.xlane.f32.xlu0 %v2008_v45  ;;  %v1992_v31 = vmul.f32 1.442695, %v1978_v32  ;;  %v1994_v45 = vmul.f32 1.442695, %v1979_v50  ;;  %v2005_v40 = vsel %vm1096_vm3, %v6875_v36, 0.0  ;;  %v2337_v32 = vmul.f32 %v6393_v54, %v6698_v27 }
 0x597   : > { %v2338_v50 = vmul.f32 %v6403_v53, %v6698_v27  ;;  %v5334_v61 = vpack.i.bf16 %v2384_v59, %v2383_v18  ;;  %v2276_v54 = vmul.f32 %v6409_v22, %v6679_v39 }
 0x598   : > { %5473 = vpow2.f32 %v1992_v31  ;;  %v2385_v6 = vadd.f32 %v6730_v0, %v2337_v32 }
 0x599   : > { %5475 = vpow2.f32 %v1994_v45  ;;  %v2386_v31 = vadd.f32 %v6783_v4, %v2338_v50  ;;  %v2327_v53 = vsub.f32 %v2276_v54, %v6801_v1  ;;  %v2388_v45 = vadd.f32 %v6822_v11, %v2340_v43 }
 0x59a   : > { %v2328_v4 = vsub.f32 %v2277_v63, %v6820_v3  ;;  %v2279_v1 = vmul.f32 %v6438_v26, %v6679_v39  ;;  %v2278_v11 = vmul.f32 %v6445_v42, %v6679_v39  ;;  %v2280_v3 = vmul.f32 %v6459_v57, %v6679_v39 }
 0x59b   : > { %v5318_v50 = vunpack.i.h.bf16 %v6836_v35 }
 0x59f   : > { %2251 = vrot.lane.b32.xlu1 %v2229_v7, %s5628_s12  ;;  %v6879_v7 = vpop.eup %5471 }
 0x5a0   : > { %v2011_v34 = vsel %vm1096_vm3, %v6879_v7, 0.0 }
 0x5a2   : > { %v6883_v9 = vpop.eup %5473 }
 0x5a3   : > { %v6885_v13 = vpop.eup %5475  ;;  %v2014_v38 = vsel %vm1096_vm3, %v6883_v9, 0.0 }
 0x5a4   : > { %v2017_v19 = vsel %vm1096_vm3, %v6885_v13, 0.0 }
 0x5ac   : > { %2253 = vrot.lane.b32.xlu0 %v2230_v51, %s5628_s12  ;;  %v2274_v51 = vmul.f32 %v6380_v58, %v6679_v39 }
 0x5ae   : > { %v2325_v25 = vsub.f32 %v2274_v51, %v6717_v30  ;;  %v2339_v30 = vmul.f32 %v6419_v55, %v6698_v27  ;;  %v5339_v55 = vpack.i.bf16 %v2386_v31, %v2385_v6  ;;  %v2207_v51 = vmul.f32 %v6380_v58, %v6698_v27 }
 0x5af   : > { %v2212_v58 = vmul.f32 %v6438_v26, %v6698_v27  ;;  %v2213_v26 = vmul.f32 %v6459_v57, %v6698_v27  ;;  %v2214_v57 = vmul.f32 %v6452_v8, %v6698_v27 }
 0x5b0   : > { %v2387_v5 = vadd.f32 %v6807_v10, %v2339_v30  ;;  %v2330_v10 = vsub.f32 %v2279_v1, %v6824_v33 }
 0x5b2   : > { %v5344_v0 = vpack.i.bf16 %v2388_v45, %v2387_v5 }
 0x5c3   : > { %2006 = vadd.xlane.f32.xlu1 %v2005_v40  ;;  %v2329_v40 = vsub.f32 %v2278_v11, %v6810_v12 }
 0x5c7   : > { %2012 = vadd.xlane.f32.xlu1 %v2011_v34  ;;  %v2281_v34 = vmul.f32 %v6452_v8, %v6679_v39  ;;  %v2263_v39 = vadd.f32 %v6830_v21, %v2207_v51  ;;  %v6993_v8 = vld [vmem:[%s7772_s3 + $0x3] ss:$0 sm:$0xff] }
 0x5c9   : > { %v2332_v33 = vsub.f32 %v2281_v34, %v6826_v37  ;;  %v2209_v37 = vmul.f32 %v6409_v22, %v6698_v27 }
 0x5cb   : > { %2015 = vadd.xlane.f32.xlu1 %v2014_v38  ;;  %2018 = vadd.xlane.f32.xlu0 %v2017_v19  ;;  %v2208_v38 = vmul.f32 %v6398_v62, %v6698_v27  ;;  %v2331_v19 = vsub.f32 %v2280_v3, %v6828_v56  ;;  %v2210_v62 = vmul.f32 %v6432_v47, %v6698_v27 }
 0x5cc   : > { %v2265_v60 = vadd.f32 %v6838_v23, %v2209_v37  ;;  %v2211_v47 = vmul.f32 %v6445_v42, %v6698_v27  ;;  %v5322_v27 = vunpack.i.l.bf16 %v6834_v16 }
 0x5cd   : > { %v2264_v12 = vadd.f32 %v6832_v46, %v2208_v38  ;;  %v2266_v56 = vadd.f32 %v6844_v29, %v2210_v62  ;;  %v2250_v46 = vpop.permute.xlu1 %2249  ;;  %v5331_v29 = vpop.permute.xlu0 %5330 }
 0x5ce   : > { %v2268_v21 = vadd.f32 %v2250_v46, %v2212_v58  ;;  %v2267_v22 = vadd.f32 %v6842_v14, %v2211_v47  ;;  %v4337_v14 = vld [vmem:[%s7773_s4 + $0x3] ss:$0 sm:$0xff]  ;;  %v5332_v45 = vunpack.i.l.bf16 %v5331_v29 }
 0x5dc   : > { %2453 = vrot.lane.b32.xlu1 %v2325_v25, %s5630_s16 }
 0x5e0   : > { %5335 = vrot.lane.b32.xlu1 %v5334_v61, %s5633_s30  ;;  %v5317_v61 = vunpack.i.l.bf16 %v6836_v35  ;;  %v5328_v35 = vunpack.i.h.bf16 %v6840_v2 }
 0x5e1   : > { %2455 = vrot.lane.b32.xlu0 %v2326_v41, %s5630_s16 }
 0x5e2   : > { %v5043_v31 = vpack.c.bf16 %v5318_v50, %v5317_v61  ;;  %v7056_v50 = vld [vmem:[%s5736_s11 + $0x10] sm:$0xff] }
 0x5e4   : > { %2457 = vrot.lane.b32.xlu1 %v2327_v53, %s5630_s16 }
 0x5e5   : > { %5340 = vrot.lane.b32.xlu0 %v5339_v55, %s5633_s30 }
 0x5e8   : > { %5345 = vrot.lane.b32.xlu1 %v5344_v0, %s5633_s30 }
 0x5e9   : > { %2459 = vrot.lane.b32.xlu0 %v2328_v4, %s5630_s16 }
 0x5ec   : > { %2463 = vrot.lane.b32.xlu1 %v2330_v10, %s5630_s16 }
 0x5ed   : > { %2461 = vrot.lane.b32.xlu0 %v2329_v40, %s5630_s16 }
 0x5f0   : > { %2467 = vrot.lane.b32.xlu1 %v2332_v33, %s5630_s16 }
 0x5f1   : > { %2465 = vrot.lane.b32.xlu0 %v2331_v19, %s5630_s16 }
 0x5f4   : > { %2640 = vrot.lane.b32.xlu1 %v2264_v12, %s5633_s30 }
 0x5f5   : > { %2638 = vrot.lane.b32.xlu0 %v2263_v39, %s5633_s30 }
 0x5f8   : > { %2644 = vrot.lane.b32.xlu1 %v2266_v56, %s5633_s30 }
 0x5f9   : > { %2642 = vrot.lane.b32.xlu0 %v2265_v60, %s5633_s30 }
 0x5fc   : > { %2648 = vrot.lane.b32.xlu1 %v2268_v21, %s5633_s30 }
 0x5fd   : > { %2646 = vrot.lane.b32.xlu0 %v2267_v22, %s5633_s30 }
 0x61a   : > { %v2001_v49 = vpop.xlane.xlu0 %2000 }
 0x61b   : > { %5477 = vrcp.f32 %v2001_v49  ;;  %v1998_v23 = vpop.xlane.xlu1 %1997 }
 0x61c   : > { %5479 = vrcp.f32 %v1998_v23 }
 0x61f   : > { %v2252_v25 = vpop.permute.xlu1 %2251  ;;  %v2004_v59 = vpop.xlane.xlu0 %2003 }
 0x620   : > { %v2269_v42 = vadd.f32 %v2252_v25, %v2213_v26  ;;  %5481 = vrcp.f32 %v2004_v59 }
 0x622   : > { %2650 = vrot.lane.b32.xlu0 %v2269_v42, %s5633_s30 }
 0x623   : > { %v2010_v18 = vpop.xlane.xlu0 %2009 }
 0x624   : > { %5483 = vrcp.f32 %v2010_v18 }
 0x625   : > { %v5478_v52 = vpop.eup %5477 }
 0x626   : > { %v5480_v32 = vpop.eup %5479  ;;  %3157 = vrot.lane.b32.xlu0 %v4337_v14, %s5632_s28  ;;  %v2029_v30 = vmul.f32 %v5478_v52, %v6849_v24 }
 0x627   : > { %v2028_v43 = vmul.f32 %v5480_v32, %v6851_v17  ;;  %v2254_v41 = vpop.permute.xlu0 %2253  ;;  %v5323_v17 = vunpack.i.h.bf16 %v6834_v16  ;;  %v5333_v16 = vunpack.i.h.bf16 %v5331_v29 }
 0x628   : > { %v2270_v6 = vadd.f32 %v2254_v41, %v2214_v57  ;;  %v7832_v41 = vld [vmem:[#allocation15_spill] sm:$0xff] }
 0x629   : > { %4729 = vmatprep.mubr.msk.f32.mxu0 %vm1096_vm3, %v2028_v43  ;;  %v5061_v5 = vpack.c.bf16 %v5333_v16, %v5332_v45  ;;  %v7065_v43 = vld [vmem:[%s5736_s11 + $0x20] sm:$0xff] }
 0x62a   : > { %4730 = vmatmul.mubr.msk.f32.vlgmr.msra.gmra.mrb[8].mxu0 %vm1096_vm3, %v2029_v30  ;;  %3095 = vrot.lane.b32.xlu0 %v4337_v14, %s5628_s12  ;;  %v5482_v54 = vpop.eup %5481 }
 0x62b   : > { %2652 = vrot.lane.b32.xlu1 %v2270_v6, %s5633_s30  ;;  %5042 = vmatpush3.bf16.xpose.msk.msra.mxu0 %vm5927_vm1, %v6814_v20  ;;  %v2030_v24 = vmul.f32 %v5482_v54, %v6857_v28  ;;  %v5049_v20 = vpack.c.bf16 %v5323_v17, %v5322_v27  ;;  %v5327_v28 = vunpack.i.l.bf16 %v6840_v2  ;;  %v7075_v54 = vld [vmem:[%s5736_s11 + $0x30] sm:$0xff]  ;;  %v7080_v17 = vld [vmem:[%s5736_s11 + $0x18] sm:$0xff] }
 0x62c   : > { %5045 = vmatprep.subr.msk.bf16.mxu0 %vm5927_vm1, %v5043_v31 }
 0x62d   : > { %4732 = vmatprep.mubr.msk.f32.mxu0 %vm1096_vm3, %v2030_v24  ;;  %v5055_v53 = vpack.c.bf16 %v5328_v35, %v5327_v28 }
 0x62e   : > { %v5484_v4 = vpop.eup %5483 }
 0x62f   : > { %3146 = vrot.lane.b32.xlu1 %v6993_v8, %s5628_s12  ;;  %v2032_v34 = vmul.f32 %v5484_v4, %v6861_v48 }
 0x633   : > { %5048 = vmatpush3.bf16.xpose.msk.msra.mxu0 %vm5927_vm1, %v5043_v31 }
 0x634   : > { %5051 = vmatprep.subr.msk.bf16.mxu0 %vm5927_vm1, %v5049_v20 }
 0x63b   : > { %5054 = vmatpush3.bf16.xpose.msk.msra.mxu0 %vm5927_vm1, %v5049_v20  ;;  %v7087_v20 = vld [vmem:[%s5736_s11 + $0x28] sm:$0xff] }
 0x63c   : > { %5057 = vmatprep.subr.msk.bf16.mxu0 %vm5927_vm1, %v5055_v53 }
 0x643   : > { %5060 = vmatpush3.bf16.xpose.msk.msra.mxu0 %vm5927_vm1, %v5055_v53  ;;  %v7097_v53 = vld [vmem:[%s5736_s11 + $0x38] sm:$0xff] }
 0x644   : > { %5063 = vmatprep.subr.msk.bf16.mxu0 %vm5927_vm1, %v5061_v5 }
 0x650   : > { %v2007_v55 = vpop.xlane.xlu1 %2006 }
 0x651   : > { %5485 = vrcp.f32 %v2007_v55  ;;  %v5580_v55 = vld [vmem:[%s6139_s27 + $0x8] sm:$0xff] }
 0x654   : > { %v2013_v2 = vpop.xlane.xlu1 %2012 }
 0x655   : > { %5487 = vrcp.f32 %v2013_v2 }
 0x658   : > { %v2016_v63 = vpop.xlane.xlu1 %2015  ;;  %v2019_v0 = vpop.xlane.xlu0 %2018 }
 0x659   : > { %5489 = vrcp.f32 %v2016_v63 }
 0x65a   : > { %5491 = vrcp.f32 %v2019_v0  ;;  %v7117_v0 = vld [vmem:[%s5785_s18] sm:$0xff] }
 0x65b   : > { %v5486_v1 = vpop.eup %5485 }
 0x65c   : > { %v2454_v10 = vpop.permute.xlu1 %2453  ;;  %v2031_v11 = vmul.f32 %v5486_v1, %v6875_v36  ;;  %v2456_v40 = vpop.permute.xlu0 %2455  ;;  %v5583_v1 = vld [vmem:[%s6139_s27 + $0x18] sm:$0xff] }
 0x65e   : > { %4733 = vmatmul.mubr.msk.f32.gmra.mrb[10].mxu0 %vm1096_vm3, %v2031_v11  ;;  %v7126_v11 = vld [vmem:[%s5785_s18 + $0x8] sm:$0xff] }
 0x65f   : > { %v5488_v3 = vpop.eup %5487  ;;  %4735 = vmatprep.mubr.msk.f32.mxu0 %vm1096_vm3, %v2032_v34 }
 0x660   : > { %v5336_v38 = vpop.permute.xlu1 %5335  ;;  %v2033_v33 = vmul.f32 %v5488_v3, %v6879_v7  ;;  %v5341_v19 = vpop.permute.xlu0 %5340 }
 0x661   : > { %v5338_v48 = vunpack.i.h.bf16 %v5336_v38  ;;  %v5337_v56 = vunpack.i.l.bf16 %v5336_v38  ;;  %v5585_v38 = vld [vmem:[%s6139_s27 + $0x30] sm:$0xff] }
 0x662   : > { %4736 = vmatmul.mubr.msk.f32.gmra.mrb[12].mxu0 %vm1096_vm3, %v2033_v33  ;;  %v5586_v33 = vld [vmem:[%s6139_s27 + $0x38] sm:$0xff] }
 0x663   : > { %v5490_v12 = vpop.eup %5489  ;;  %v5067_v46 = vpack.c.bf16 %v5338_v48, %v5337_v56  ;;  %v7156_v56 = vld [vmem:[%s5785_s18 + $0x10] sm:$0xff] }
 0x664   : > { %v5492_v51 = vpop.eup %5491  ;;  %v2458_v39 = vpop.permute.xlu1 %2457  ;;  %v2034_v62 = vmul.f32 %v5490_v12, %v6883_v9  ;;  %v5343_v9 = vunpack.i.h.bf16 %v5341_v19  ;;  %v5587_v12 = vld [vmem:[%s6139_s27 + $0x20] sm:$0xff] }
 0x665   : > { %v2460_v36 = vpop.permute.xlu0 %2459  ;;  %v2035_v37 = vmul.f32 %v5492_v51, %v6885_v13  ;;  %v5342_v13 = vunpack.i.l.bf16 %v5341_v19  ;;  %v5364_v19 = vpack.i.bf16 %v5586_v33, %v5585_v38  ;;  %v5588_v51 = vld [vmem:[%s6139_s27 + $0x28] sm:$0xff] }
 0x666   : > { %4738 = vmatprep.mubr.msk.f32.mxu0 %vm1096_vm3, %v2034_v62 }
 0x667   : > { %4739 = vmatmul.mubr.msk.f32.gmra.mrb[14].mxu0 %vm1096_vm3, %v2035_v37  ;;  %v5073_v21 = vpack.c.bf16 %v5343_v9, %v5342_v13  ;;  %v7172_v13 = vld [vmem:[%s5785_s18 + $0x30] sm:$0xff] }
 0x668   : > { %4757 = vmatprep.mubr.msk.f32.mxu0 %vm789_vm0, %v2454_v10  ;;  %v5346_v7 = vpop.permute.xlu1 %5345 }
 0x669   : > { %v2462_v60 = vpop.permute.xlu0 %2461  ;;  %v5348_v29 = vunpack.i.h.bf16 %v5346_v7  ;;  %v5347_v49 = vunpack.i.l.bf16 %v5346_v7 }
 0x66b   : > { %4758 = vmatmul.mubr.msk.f32.vlgmr.msra.gmra.mrb[16].mxu0 %vm789_vm0, %v2456_v40  ;;  %v5079_v26 = vpack.c.bf16 %v5348_v29, %v5347_v49 }
 0x66c   : > { %5066 = vmatpush3.bf16.xpose.msk.msra.mxu0 %vm5927_vm1, %v5061_v5  ;;  %4760 = vmatprep.mubr.msk.f32.mxu0 %vm789_vm0, %v2458_v39  ;;  %v2464_v58 = vpop.permute.xlu1 %2463  ;;  %v5579_v5 = vld [vmem:[%s6139_s27] sm:$0xff]  ;;  %v5359_v39 = vpack.i.bf16 %v5588_v51, %v5587_v12 }
 0x66d   : > { %5069 = vmatprep.subr.msk.bf16.mxu0 %vm5927_vm1, %v5067_v46  ;;  %v2466_v47 = vpop.permute.xlu0 %2465 }
 0x66f   : > { %4761 = vmatmul.mubr.msk.f32.gmra.mrb[18].mxu0 %vm789_vm0, %v2460_v36  ;;  %v7147_v36 = vld [vmem:[%s5785_s18 + $0x18] sm:$0xff] }
 0x670   : > { %4763 = vmatprep.mubr.msk.f32.mxu0 %vm789_vm0, %v2462_v60  ;;  %v2468_v22 = vpop.permute.xlu1 %2467  ;;  %v7165_v60 = vld [vmem:[%s5785_s18 + $0x28] sm:$0xff] }
 0x671   : > { %v2639_v23 = vpop.permute.xlu0 %2638 }
 0x673   : > { %4764 = vmatmul.mubr.msk.f32.gmra.mrb[20].mxu0 %vm789_vm0, %v2464_v58 }
 0x674   : > { %5072 = vmatpush3.bf16.xpose.msk.msra.mxu0 %vm5927_vm1, %v5067_v46  ;;  %4766 = vmatprep.mubr.msk.f32.mxu0 %vm789_vm0, %v2466_v47  ;;  %v2641_v25 = vpop.permute.xlu1 %2640  ;;  %v7177_v47 = vld [vmem:[%s5785_s18 + $0x20] sm:$0xff] }
 0x675   : > { %5075 = vmatprep.subr.msk.bf16.mxu0 %vm5927_vm1, %v5073_v21  ;;  %v2643_v59 = vpop.permute.xlu0 %2642 }
 0x677   : > { %4767 = vmatmul.mubr.msk.f32.gmra.mrb[22].mxu0 %vm789_vm0, %v2468_v22 }
 0x678   : > { %4785 = vmatprep.mubr.msk.f32.mxu0 %vm789_vm0, %v2639_v23  ;;  %v2645_v42 = vpop.permute.xlu1 %2644 }
 0x679   : > { %v2647_v14 = vpop.permute.xlu0 %2646 }
 0x67c   : > { %5078 = vmatpush3.bf16.xpose.msk.msra.mxu0 %vm5927_vm1, %v5073_v21  ;;  %v2649_v18 = vpop.permute.xlu1 %2648 }
 0x67d   : > { %5081 = vmatprep.subr.msk.bf16.mxu0 %vm5927_vm1, %v5079_v26 }
 0x684   : > { %5084 = vmatpush3.bf16.xpose.msk.msra.mxu0 %vm5927_vm1, %v5079_v26  ;;  %v7193_v26 = vld [vmem:[%s5736_s11] sm:$0xff] }
 0x68b   : > { %4786 = vmatmul.mubr.msk.f32.vlgmr.msra.gmra.mrb[16].mxu0 %vm789_vm0, %v2641_v25 }
 0x68c   : > { %4788 = vmatprep.mubr.msk.f32.mxu0 %vm789_vm0, %v2643_v59 }
 0x68f   : > { %4789 = vmatmul.mubr.msk.f32.gmra.mrb[18].mxu0 %vm789_vm0, %v2645_v42 }
 0x690   : > { %4791 = vmatprep.mubr.msk.f32.mxu0 %vm789_vm0, %v2647_v14  ;;  %v7198_v14 = vld [vmem:[%s5736_s11 + $0x8] sm:$0xff] }
 0x693   : > { %4792 = vmatmul.mubr.msk.f32.gmra.mrb[20].mxu0 %vm789_vm0, %v2649_v18 }
 0x694   : > { %v2651_v52 = vpop.permute.xlu0 %2650 }
 0x695   : > { %4794 = vmatprep.mubr.msk.f32.mxu0 %vm789_vm0, %v2651_v52 }
 0x698   : > { %v7053_v32 = vpop.permute.xlu0 %3157 }
 0x699   : > { %v3274_v61 = vmul.f32 %v7056_v50, %v7053_v32  ;;  %v3272_v57 = vmul.f32 %v6583_v44, %v7053_v32  ;;  %v3276_v30 = vmul.f32 %v7065_v43, %v7053_v32  ;;  %v3273_v6 = vmul.f32 %v7832_v41, %v7053_v32 }
 0x69a   : > { %v3278_v24 = vmul.f32 %v7075_v54, %v7053_v32  ;;  %v3275_v27 = vmul.f32 %v7080_v17, %v7053_v32  ;;  %v3277_v35 = vmul.f32 %v7087_v20, %v7053_v32  ;;  %v3279_v16 = vmul.f32 %v7097_v53, %v7053_v32 }
 0x69b   : > { %3292 = vrot.lane.b32.xlu1 %v3274_v61, %s5627_s7  ;;  %3288 = vrot.lane.b32.xlu0 %v3272_v57, %s5627_s7  ;;  %v3160_v4 = vmul.f32 %v7117_v0, %v7053_v32  ;;  %v3161_v40 = vmul.f32 %v7126_v11, %v7053_v32  ;;  %v3163_v37 = vmul.f32 %v7147_v36, %v7053_v32 }
 0x69c   : > { %v7091_v28 = vpop.permute.xlu0 %3095  ;;  %v3162_v7 = vmul.f32 %v7156_v56, %v7053_v32  ;;  %v3165_v9 = vmul.f32 %v7165_v60, %v7053_v32  ;;  %v3166_v58 = vmul.f32 %v7172_v13, %v7053_v32  ;;  %v3164_v21 = vmul.f32 %v7177_v47, %v7053_v32 }
 0x69d   : > { %v2653_v31 = vpop.permute.xlu1 %2652  ;;  %v3217_v45 = vmul.f32 %v7832_v41, %v7091_v28  ;;  %v3216_v2 = vmul.f32 %v6583_v44, %v7091_v28  ;;  %v3219_v63 = vmul.f32 %v7080_v17, %v7091_v28  ;;  %v5582_v44 = vld [vmem:[%s6139_s27 + $0x10] sm:$0xff]  ;;  %v3220_v34 = vmul.f32 %v7065_v43, %v7091_v28 }
 0x69e   : > { %4795 = vmatmul.mubr.msk.f32.gmra.mrb[22].mxu0 %vm789_vm0, %v2653_v31  ;;  %v5354_v10 = vpack.i.bf16 %v5583_v1, %v5582_v44  ;;  %v3218_v3 = vmul.f32 %v7056_v50, %v7091_v28  ;;  %v3221_v62 = vmul.f32 %v7087_v20, %v7091_v28  ;;  %v3223_v48 = vmul.f32 %v7097_v53, %v7091_v28 }
 0x69f   : > { %3296 = vrot.lane.b32.xlu1 %v3276_v30, %s5627_s7  ;;  %3290 = vrot.lane.b32.xlu0 %v3273_v6, %s5627_s7  ;;  %v3222_v46 = vmul.f32 %v7075_v54, %v7091_v28  ;;  %v3099_v22 = vmul.f32 %v7126_v11, %v7091_v28  ;;  %v3101_v44 = vmul.f32 %v7147_v36, %v7091_v28 }
 0x6a1   : > { %v7190_v23 = vpop.permute.xlu1 %3146 }
 0x6a2   : > { %v3264_v25 = vmul.f32 %v7193_v26, %v7190_v23  ;;  %v3265_v18 = vmul.f32 %v7198_v14, %v7190_v23  ;;  %v3266_v61 = vmul.f32 %v7056_v50, %v7190_v23  ;;  %v3267_v6 = vmul.f32 %v7080_v17, %v7190_v23 }
 0x6a3   : > { %3300 = vrot.lane.b32.xlu1 %v3278_v24, %s5627_s7  ;;  %3294 = vrot.lane.b32.xlu0 %v3275_v27, %s5627_s7 }
 0x6a7   : > { %3079 = vrot.lane.b32.xlu1 %v6993_v8, %s5632_s28  ;;  %3298 = vrot.lane.b32.xlu0 %v3277_v35, %s5627_s7  ;;  %v7107_v8 = vpack.i.bf16 %v5580_v55, %v5579_v5  ;;  %v7210_v5 = vld [vmem:[%s5785_s18 + $0x38] sm:$0xff] }
 0x6a8   : > { %v3167_v55 = vmul.f32 %v7210_v5, %v7053_v32  ;;  %v3268_v32 = vmul.f32 %v7065_v43, %v7190_v23 }
 0x6a9   : > { %7833 = vst [vmem:[#allocation15_spill] sm:$0xff] %v7107_v8 }
 0x6ab   : > { %3302 = vrot.lane.b32.xlu0 %v3279_v16, %s5627_s7  ;;  %3234 = vrot.lane.b32.xlu1 %v3217_v45, %s5628_s12 }
 0x6af   : > { %5350 = vrot.lane.b32.xlu1 %v7107_v8, %s5633_s30  ;;  %3232 = vrot.lane.b32.xlu0 %v3216_v2, %s5628_s12 }
 0x6b3   : > { %3238 = vrot.lane.b32.xlu1 %v3219_v63, %s5628_s12  ;;  %3176 = vrot.lane.b32.xlu0 %v3160_v4, %s5627_s7  ;;  %v3098_v4 = vmul.f32 %v7117_v0, %v7091_v28 }
 0x6b7   : > { %5355 = vrot.lane.b32.xlu1 %v5354_v10, %s5633_s30  ;;  %3178 = vrot.lane.b32.xlu0 %v3161_v40, %s5627_s7  ;;  %v3269_v40 = vmul.f32 %v7087_v20, %v7190_v23 }
 0x6bb   : > { %3240 = vrot.lane.b32.xlu1 %v3220_v34, %s5628_s12  ;;  %3236 = vrot.lane.b32.xlu0 %v3218_v3, %s5628_s12  ;;  %v3100_v34 = vmul.f32 %v7156_v56, %v7091_v28  ;;  %v3103_v3 = vmul.f32 %v7165_v60, %v7091_v28 }
 0x6bf   : > { %5365 = vrot.lane.b32.xlu1 %v5364_v19, %s5633_s30  ;;  %5360 = vrot.lane.b32.xlu0 %v5359_v39, %s5633_s30 }
 0x6c3   : > { %3182 = vrot.lane.b32.xlu1 %v3163_v37, %s5627_s7  ;;  %3242 = vrot.lane.b32.xlu0 %v3221_v62, %s5628_s12  ;;  %v3102_v62 = vmul.f32 %v7177_v47, %v7091_v28 }
 0x6c7   : > { %3246 = vrot.lane.b32.xlu1 %v3223_v48, %s5628_s12  ;;  %3180 = vrot.lane.b32.xlu0 %v3162_v7, %s5627_s7 }
 0x6cb   : > { %3186 = vrot.lane.b32.xlu1 %v3165_v9, %s5627_s7  ;;  %3244 = vrot.lane.b32.xlu0 %v3222_v46, %s5628_s12 }
 0x6cf   : > { %3188 = vrot.lane.b32.xlu1 %v3166_v58, %s5627_s7  ;;  %3184 = vrot.lane.b32.xlu0 %v3164_v21, %s5627_s7 }
 0x6d3   : > { %3116 = vrot.lane.b32.xlu1 %v3099_v22, %s5628_s12 }
 0x6fd   : > { %v7186_v29 = vpop.f32.mrb[8].mxu0 }
 0x6fe   : > { %7834 = vst [vmem:[#allocation24_spill] sm:$0xff] %v7186_v29  ;;  %v7188_v49 = vpop.f32.mrb[9].mxu0 }
 0x6ff   : > { %7835 = vst [vmem:[#allocation25_spill] sm:$0xff] %v7188_v49 }
 0x70d   : > { %v3289_v59 = vpop.permute.xlu0 %3288  ;;  %v3293_v42 = vpop.permute.xlu1 %3292 }
 0x70e   : > { %v3312_v52 = vsub.f32 %v3264_v25, %v3289_v59  ;;  %v3314_v31 = vsub.f32 %v3266_v61, %v3293_v42 }
 0x711   : > { %v3291_v57 = vpop.permute.xlu0 %3290  ;;  %v3297_v30 = vpop.permute.xlu1 %3296 }
 0x712   : > { %v3313_v41 = vsub.f32 %v3265_v18, %v3291_v57  ;;  %v3316_v19 = vsub.f32 %v3268_v32, %v3297_v30 }
 0x714   : > { %v5369_v24 = vpack.i.bf16 %v3313_v41, %v3312_v52 }
 0x715   : > { %v3295_v27 = vpop.permute.xlu0 %3294  ;;  %v7206_v35 = vpop.permute.xlu1 %3300 }
 0x716   : > { %v3315_v16 = vsub.f32 %v3267_v6, %v3295_v27  ;;  %5370 = vrot.lane.b32.xlu0 %v5369_v24, %s5627_s7 }
 0x718   : > { %v5374_v45 = vpack.i.bf16 %v3315_v16, %v3314_v31 }
 0x719   : > { %v3299_v2 = vpop.permute.xlu0 %3298  ;;  %v7214_v63 = vpop.permute.xlu1 %3079 }
 0x71a   : > { %3190 = vrot.lane.b32.xlu0 %v3167_v55, %s5627_s7  ;;  %5375 = vrot.lane.b32.xlu1 %v5374_v45, %s5627_s7  ;;  %v3317_v12 = vsub.f32 %v3269_v40, %v3299_v2 }
 0x71c   : > { %v5379_v46 = vpack.i.bf16 %v3317_v12, %v3316_v19 }
 0x71d   : > { %v7222_v1 = vpop.permute.xlu0 %3302  ;;  %v7224_v10 = vpop.permute.xlu1 %3234 }
 0x71e   : > { %3114 = vrot.lane.b32.xlu0 %v3098_v4, %s5628_s12  ;;  %3120 = vrot.lane.b32.xlu1 %v3101_v44, %s5628_s12 }
 0x721   : > { %v7236_v38 = vpop.permute.xlu0 %3232  ;;  %v5351_v33 = vpop.permute.xlu1 %5350 }
 0x722   : > { %v5353_v51 = vunpack.i.h.bf16 %v5351_v33  ;;  %v5352_v39 = vunpack.i.l.bf16 %v5351_v33  ;;  %3118 = vrot.lane.b32.xlu0 %v3100_v34, %s5628_s12  ;;  %3124 = vrot.lane.b32.xlu1 %v3103_v3, %s5628_s12 }
 0x724   : > { %v5085_v37 = vpack.c.bf16 %v5353_v51, %v5352_v39 }
 0x725   : > { %v7242_v48 = vpop.permute.xlu0 %3176  ;;  %v7244_v7 = vpop.permute.xlu1 %3238 }
 0x726   : > { %3122 = vrot.lane.b32.xlu0 %v3102_v62, %s5628_s12  ;;  %5086 = vmatprep.subr.bf16.mxu1 %v5085_v37 }
 0x727   : > { %5088 = vmatpush3.bf16.msra.mxu1 %v5085_v37 }
 0x729   : > { %v7247_v9 = vpop.permute.xlu0 %3178  ;;  %v5356_v58 = vpop.permute.xlu1 %5355 }
 0x72a   : > { %v5358_v21 = vunpack.i.h.bf16 %v5356_v58  ;;  %v5357_v22 = vunpack.i.l.bf16 %v5356_v58  ;;  %5380 = vrot.lane.b32.xlu0 %v5379_v46, %s5627_s7 }
 0x72c   : > { %v5089_v25 = vpack.c.bf16 %v5358_v21, %v5357_v22 }
 0x72d   : > { %v7250_v59 = vpop.permute.xlu0 %3236  ;;  %v7252_v42 = vpop.permute.xlu1 %3240 }
 0x72e   : > { %5090 = vmatprep.subr.bf16.mxu1 %v5089_v25 }
 0x72f   : > { %5092 = vmatpush3.bf16.msra.mxu1 %v5089_v25 }
 0x731   : > { %v5361_v18 = vpop.permute.xlu0 %5360  ;;  %v7254_v52 = vpop.f32.mrb[10].mxu0 }
 0x732   : > { %7836 = vst [vmem:[#allocation26_spill] sm:$0xff] %v7254_v52  ;;  %v5363_v61 = vunpack.i.h.bf16 %v5361_v18  ;;  %v5362_v57 = vunpack.i.l.bf16 %v5361_v18  ;;  %v5366_v30 = vpop.permute.xlu1 %5365  ;;  %v7256_v41 = vpop.f32.mrb[11].mxu0 }
 0x733   : > { %7837 = vst [vmem:[#allocation27_spill] sm:$0xff] %v7256_v41  ;;  %v5368_v6 = vunpack.i.h.bf16 %v5366_v30  ;;  %v5367_v31 = vunpack.i.l.bf16 %v5366_v30 }
 0x734   : > { %v5093_v24 = vpack.c.bf16 %v5363_v61, %v5362_v57 }
 0x735   : > { %v7258_v27 = vpop.f32.mrb[12].mxu0  ;;  %v5097_v16 = vpack.c.bf16 %v5368_v6, %v5367_v31 }
 0x736   : > { %7838 = vst [vmem:[#allocation28_spill] sm:$0xff] %v7258_v27  ;;  %v7260_v45 = vpop.f32.mrb[13].mxu0  ;;  %5094 = vmatprep.subr.bf16.mxu1 %v5093_v24 }
 0x737   : > { %7839 = vst [vmem:[#allocation29_spill] sm:$0xff] %v7260_v45  ;;  %5096 = vmatpush3.bf16.msra.mxu1 %v5093_v24 }
 0x738   : > { %5098 = vmatprep.subr.bf16.mxu1 %v5097_v16 }
 0x73a   : > { %v7262_v55 = vpop.f32.mrb[14].mxu0 }
 0x73b   : > { %7840 = vst [vmem:[#allocation30_spill] sm:$0xff] %v7262_v55  ;;  %v7264_v2 = vpop.f32.mrb[15].mxu0  ;;  %5100 = vmatpush3.bf16.msra.mxu1 %v5097_v16 }
 0x73c   : > { %7841 = vst [vmem:[#allocation31_spill] sm:$0xff] %v7264_v2 }
 0x75e   : > { %v4787_v4 = vpop.f32.mrb[16].mxu0 }
 0x75f   : > { %v2816_v44 = vmul.f32 0.17677669, %v4787_v4  ;;  %v2776_v32 = vpop.f32.mrb[17].mxu0 }
 0x760   : > { %v2815_v40 = vmul.f32 0.17677669, %v2776_v32 }
 0x761   : > { %v7269_v33 = vsel %vm492_vm2, %v2816_v44, -1e+30 }
 0x762   : > { %v7274_v12 = vsel %vm491_vm4, %v2815_v40, -1e+30  ;;  %v4790_v51 = vpop.f32.mrb[18].mxu0  ;;  %v2834_v39 = vsel %vm1096_vm3, %v7269_v33, -inf }
 0x763   : > { %v2818_v62 = vmul.f32 0.17677669, %v4790_v51  ;;  %2835 = vmax.xlane.f32.xlu0 %v2834_v39  ;;  %v2786_v37 = vpop.f32.mrb[19].mxu0  ;;  %v2831_v46 = vsel %vm1096_vm3, %v7274_v12, -inf }
 0x764   : > { %v2817_v58 = vmul.f32 0.17677669, %v2786_v37  ;;  %2832 = vmax.xlane.f32.xlu1 %v2831_v46 }
 0x765   : > { %v7283_v22 = vsel %vm494_vm5, %v2818_v62, -1e+30  ;;  %v7302_v62 = vpop.permute.xlu0 %3242 }
 0x766   : > { %v2825_v18 = vsel %vm493_vm6, %v2817_v58, -1e+30  ;;  %v4793_v61 = vpop.f32.mrb[20].mxu0  ;;  %v2840_v57 = vsel %vm1096_vm3, %v7283_v22, -inf }
 0x767   : > { %v2820_v30 = vmul.f32 0.17677669, %v4793_v61  ;;  %v2796_v6 = vpop.f32.mrb[21].mxu0  ;;  %v2837_v31 = vsel %vm1096_vm3, %v2825_v18, -inf }
 0x768   : > { %v2819_v24 = vmul.f32 0.17677669, %v2796_v6  ;;  %2841 = vmax.xlane.f32.xlu1 %v2840_v57  ;;  %2838 = vmax.xlane.f32.xlu0 %v2837_v31 }
 0x769   : > { %v7294_v4 = vsel %vm496_vm7, %v2820_v30, -1e+30 }
 0x76a   : > { %v2827_v32 = vsel %vm495_vm8, %v2819_v24, -1e+30  ;;  %v2846_v40 = vsel %vm1096_vm3, %v7294_v4, -inf  ;;  %v7316_v24 = vpop.permute.xlu0 %3180 }
 0x76b   : > { %v2843_v51 = vsel %vm1096_vm3, %v2827_v32, -inf }
 0x76c   : > { %2847 = vmax.xlane.f32.xlu1 %v2846_v40  ;;  %2844 = vmax.xlane.f32.xlu0 %v2843_v51 }
 0x76e   : > { %v7320_v51 = vpop.permute.xlu0 %3244 }
 0x771   : > { %v4796_v39 = vpop.f32.mrb[22].mxu0 }
 0x772   : > { %v2822_v37 = vmul.f32 0.17677669, %v4796_v39  ;;  %v2806_v46 = vpop.f32.mrb[23].mxu0  ;;  %v3105_v39 = vmul.f32 %v7210_v5, %v7091_v28 }
 0x773   : > { %v2821_v58 = vmul.f32 0.17677669, %v2806_v46 }
 0x774   : > { %v7307_v57 = vsel %vm498_vm9, %v2822_v37, -1e+30  ;;  %v7325_v37 = vpop.permute.xlu0 %3184 }
 0x775   : > { %v2852_v30 = vsel %vm1096_vm3, %v7307_v57, -inf  ;;  %v7314_v31 = vsel %vm497_vm10, %v2821_v58, -1e+30 }
 0x776   : > { %2853 = vmax.xlane.f32.xlu1 %v2852_v30  ;;  %v2849_v40 = vsel %vm1096_vm3, %v7314_v31, -inf  ;;  %v3104_v30 = vmul.f32 %v7172_v13, %v7091_v28 }
 0x77a   : > { %2850 = vmax.xlane.f32.xlu1 %v2849_v40  ;;  %v7335_v40 = vpop.permute.xlu1 %3182 }
 0x77e   : > { %v7337_v55 = vpop.permute.xlu1 %3246 }
 0x782   : > { %3128 = vrot.lane.b32.xlu0 %v3105_v39, %s5628_s12  ;;  %v7339_v39 = vpop.permute.xlu1 %3186 }
 0x788   : > { %v5371_v46 = vpop.permute.xlu0 %5370 }
 0x789   : > { %v5373_v2 = vunpack.i.h.bf16 %v5371_v46  ;;  %v5372_v58 = vunpack.i.l.bf16 %v5371_v46  ;;  %v7343_v46 = vpop.permute.xlu1 %3188 }
 0x78b   : > { %v7329_v45 = vpack.c.bf16 %v5373_v2, %v5372_v58  ;;  %3126 = vrot.lane.b32.xlu1 %v3104_v30, %s5628_s12 }
 0x78c   : > { %v7341_v41 = vpop.permute.xlu0 %3190 }
 0x78d   : > { %7851 = vst [vmem:[#allocation32_spill] sm:$0xff] %v7329_v45  ;;  %5103 = vmatprep.subr.msk.bf16.mxu1 %vm5927_vm1, %v7329_v45  ;;  %v7347_v28 = vpop.permute.xlu1 %3116 }
 0x790   : > { %v7345_v27 = vpop.permute.xlu0 %3114 }
 0x791   : > { %v7349_v2 = vpop.permute.xlu1 %5375 }
 0x792   : > { %7852 = vst [vmem:[#allocation33_spill] sm:$0xff] %v7349_v2 }
 0x794   : > { %v7351_v58 = vpop.permute.xlu0 %3118 }
 0x795   : > { %v7353_v30 = vpop.permute.xlu1 %3120 }
 0x798   : > { %v7355_v52 = vpop.permute.xlu0 %3122 }
 0x799   : > { %v7359_v49 = vpop.permute.xlu1 %3124 }
 0x79c   : > { %v7357_v29 = vpop.permute.xlu0 %5380 }
 0x79d   : > { %7853 = vst [vmem:[#allocation34_spill] sm:$0xff] %v7357_v29 }
 0x7f0   : > { %v2836_v8 = vpop.xlane.xlu0 %2835 }
 0x7f1   : > { %v2856_v61 = vsub.f32 %v7269_v33, %v2836_v8  ;;  %v2833_v6 = vpop.xlane.xlu1 %2832 }
 0x7f2   : > { %v2855_v16 = vsub.f32 %v7274_v12, %v2833_v6 }
 0x7f3   : > { %v2865_v44 = vmul.f32 1.442695, %v2856_v61 }
 0x7f4   : > { %v2863_v21 = vmul.f32 1.442695, %v2855_v16 }
 0x7f5   : > { %5493 = vpow2.f32 %v2865_v44  ;;  %v2839_v25 = vpop.xlane.xlu0 %2838  ;;  %v2842_v16 = vpop.xlane.xlu1 %2841  ;;  %v3209_v44 = vmul.f32 %v7198_v14, %v7214_v63 }
 0x7f6   : > { %5495 = vpow2.f32 %v2863_v21  ;;  %v2857_v19 = vsub.f32 %v2825_v18, %v2839_v25 }
 0x7f7   : > { %v3257_v61 = vadd.f32 %v7224_v10, %v3209_v44  ;;  %v3149_v44 = vmul.f32 %v7117_v0, %v7190_v23 }
 0x7f8   : > { %v2867_v3 = vmul.f32 1.442695, %v2857_v19 }
 0x7f9   : > { %v2845_v34 = vpop.xlane.xlu0 %2844 }
 0x7fa   : > { %v2859_v15 = vsub.f32 %v2827_v32, %v2845_v34  ;;  %5497 = vpow2.f32 %v2867_v3  ;;  %v3271_v3 = vmul.f32 %v7097_v53, %v7190_v23  ;;  %v3208_v32 = vmul.f32 %v7193_v26, %v7214_v63 }
 0x7fc   : > { %v2871_v45 = vmul.f32 1.442695, %v2859_v15  ;;  %v3319_v25 = vsub.f32 %v3271_v3, %v7222_v1  ;;  %v3256_v6 = vadd.f32 %v7236_v38, %v3208_v32  ;;  %v3211_v32 = vmul.f32 %v7080_v17, %v7214_v63 }
 0x7fe   : > { %5499 = vpow2.f32 %v2871_v45  ;;  %v3270_v45 = vmul.f32 %v7075_v54, %v7190_v23 }
 0x7ff   : > { %v7363_v29 = vpop.eup %5493 }
 0x800   : > { %v7365_v2 = vpop.eup %5495  ;;  %v2882_v8 = vsel %vm1096_vm3, %v7363_v29, 0.0  ;;  %v3318_v21 = vsub.f32 %v3270_v45, %v7206_v35  ;;  %v2858_v35 = vsub.f32 %v7283_v22, %v2842_v16 }
 0x801   : > { %2883 = vadd.xlane.f32.xlu0 %v2882_v8  ;;  %v2879_v33 = vsel %vm1096_vm3, %v7365_v2, 0.0  ;;  %v2848_v8 = vpop.xlane.xlu1 %2847 }
 0x802   : > { %2880 = vadd.xlane.f32.xlu1 %v2879_v33  ;;  %v5384_v18 = vpack.i.bf16 %v3319_v25, %v3318_v21  ;;  %v5389_v33 = vpack.i.bf16 %v3257_v61, %v3256_v6  ;;  %v2869_v1 = vmul.f32 1.442695, %v2858_v35  ;;  %v2860_v45 = vsub.f32 %v7294_v4, %v2848_v8 }
 0x803   : > { %v3210_v61 = vmul.f32 %v7056_v50, %v7214_v63  ;;  %v3200_v6 = vsub.f32 %v3149_v44, %v7242_v48  ;;  %v3259_v8 = vadd.f32 %v7244_v7, %v3211_v32  ;;  %v3212_v35 = vmul.f32 %v7065_v43, %v7214_v63  ;;  %v7854_v44 = vld [vmem:[#allocation33_spill] sm:$0xff] }
 0x804   : > { %v7371_v12 = vpop.eup %5497  ;;  %5501 = vpow2.f32 %v2869_v1  ;;  %v2873_v14 = vmul.f32 1.442695, %v2860_v45  ;;  %v3213_v1 = vmul.f32 %v7087_v20, %v7214_v63  ;;  %v3215_v50 = vmul.f32 %v7097_v53, %v7214_v63 }
 0x805   : > { %v2885_v34 = vsel %vm1096_vm3, %v7371_v12, 0.0  ;;  %v3214_v48 = vmul.f32 %v7075_v54, %v7214_v63  ;;  %v3151_v43 = vmul.f32 %v7156_v56, %v7190_v23  ;;  %v5378_v32 = vunpack.i.h.bf16 %v7854_v44 }
 0x806   : > { %2886 = vadd.xlane.f32.xlu0 %v2885_v34  ;;  %v2854_v34 = vpop.xlane.xlu1 %2853  ;;  %5503 = vpow2.f32 %v2873_v14  ;;  %v3261_v45 = vadd.f32 %v7302_v62, %v3213_v1  ;;  %v7857_v1 = vld [vmem:[#allocation34_spill] sm:$0xff] }
 0x807   : > { %v2862_v26 = vsub.f32 %v7307_v57, %v2854_v34  ;;  %v3150_v34 = vmul.f32 %v7126_v11, %v7190_v23  ;;  %v3202_v20 = vsub.f32 %v3151_v43, %v7316_v24  ;;  %v3262_v53 = vadd.f32 %v7320_v51, %v3214_v48 }
 0x808   : > { %v7375_v15 = vpop.eup %5499  ;;  %v3154_v24 = vmul.f32 %v7165_v60, %v7190_v23  ;;  %v3153_v51 = vmul.f32 %v7177_v47, %v7190_v23 }
 0x809   : > { %v2891_v19 = vsel %vm1096_vm3, %v7375_v15, 0.0  ;;  %v2877_v38 = vmul.f32 1.442695, %v2862_v26  ;;  %v3201_v7 = vsub.f32 %v3150_v34, %v7247_v9  ;;  %v3152_v9 = vmul.f32 %v7147_v36, %v7190_v23 }
 0x80a   : > { %2892 = vadd.xlane.f32.xlu0 %v2891_v19  ;;  %v2851_v3 = vpop.xlane.xlu1 %2850  ;;  %v3204_v14 = vsub.f32 %v3153_v51, %v7325_v37  ;;  %v3083_v26 = vmul.f32 %v7126_v11, %v7214_v63  ;;  %v3085_v11 = vmul.f32 %v7147_v36, %v7214_v63  ;;  %v3086_v36 = vmul.f32 %v7177_v47, %v7214_v63 }
 0x80b   : > { %v2861_v19 = vsub.f32 %v7314_v31, %v2851_v3  ;;  %v3263_v3 = vadd.f32 %v7337_v55, %v3215_v50  ;;  %v3203_v62 = vsub.f32 %v3152_v9, %v7335_v40  ;;  %v3205_v55 = vsub.f32 %v3154_v24, %v7339_v39 }
 0x80c   : > { %v3155_v40 = vmul.f32 %v7172_v13, %v7190_v23  ;;  %v3139_v37 = vadd.f32 %v7347_v28, %v3083_v26 }
 0x80d   : > { %v2875_v10 = vmul.f32 1.442695, %v2861_v19  ;;  %v3156_v19 = vmul.f32 %v7210_v5, %v7190_v23 }
 0x80e   : > { %v7397_v21 = vpop.eup %5501 }
 0x80f   : > { %5505 = vpow2.f32 %v2875_v10  ;;  %v2888_v22 = vsel %vm1096_vm3, %v7397_v21, 0.0  ;;  %v3207_v39 = vsub.f32 %v3156_v19, %v7341_v41  ;;  %v3206_v10 = vsub.f32 %v3155_v40, %v7343_v46 }
 0x810   : > { %5507 = vpow2.f32 %v2877_v38  ;;  %v7401_v25 = vpop.eup %5503  ;;  %v3082_v38 = vmul.f32 %v7117_v0, %v7214_v63  ;;  %v3141_v41 = vadd.f32 %v7353_v30, %v3085_v11  ;;  %v3084_v46 = vmul.f32 %v7156_v56, %v7214_v63  ;;  %v3129_v30 = vpop.permute.xlu0 %3128 }
 0x811   : > { %v2894_v4 = vsel %vm1096_vm3, %v7401_v25, 0.0  ;;  %v3087_v0 = vmul.f32 %v7165_v60, %v7214_v63  ;;  %v3089_v56 = vmul.f32 %v7210_v5, %v7214_v63  ;;  %v3088_v60 = vmul.f32 %v7172_v13, %v7214_v63 }
 0x812   : > { %v3138_v23 = vadd.f32 %v7345_v27, %v3082_v38  ;;  %v3140_v28 = vadd.f32 %v7351_v58, %v3084_v46  ;;  %v3127_v58 = vpop.permute.xlu1 %3126 }
 0x813   : > { %5385 = vrot.lane.b32.xlu1 %v5384_v18, %s5627_s7  ;;  %v3143_v27 = vadd.f32 %v7359_v49, %v3087_v0  ;;  %v3144_v49 = vadd.f32 %v3127_v58, %v3088_v60 }
 0x819   : > { %v7405_v18 = vpop.eup %5505 }
 0x81a   : > { %v7407_v57 = vpop.eup %5507  ;;  %v2897_v31 = vsel %vm1096_vm3, %v7405_v18, 0.0 }
 0x81b   : > { %v2900_v16 = vsel %vm1096_vm3, %v7407_v57, 0.0 }
 0x820   : > { %5390 = vrot.lane.b32.xlu0 %v5389_v33, %s5629_s15  ;;  %v3258_v33 = vadd.f32 %v7250_v59, %v3210_v61  ;;  %v3260_v59 = vadd.f32 %v7252_v42, %v3212_v35  ;;  %v5404_v42 = vpack.i.bf16 %v3263_v3, %v3262_v53  ;;  %v5377_v61 = vunpack.i.l.bf16 %v7854_v44 }
 0x822   : > { %v5394_v17 = vpack.i.bf16 %v3259_v8, %v3258_v33  ;;  %v5399_v54 = vpack.i.bf16 %v3261_v45, %v3260_v59  ;;  %v7855_v33 = vld [vmem:[#allocation32_spill] sm:$0xff] }
 0x837   : > { %2889 = vadd.xlane.f32.xlu1 %v2888_v22  ;;  %v3142_v22 = vadd.f32 %v7355_v52, %v3086_v36 }
 0x83b   : > { %2895 = vadd.xlane.f32.xlu1 %v2894_v4  ;;  %v3145_v4 = vadd.f32 %v3129_v30, %v3089_v56 }
 0x83f   : > { %2898 = vadd.xlane.f32.xlu1 %v2897_v31  ;;  %2901 = vadd.xlane.f32.xlu0 %v2900_v16 }
 0x850   : > { %3328 = vrot.lane.b32.xlu1 %v3200_v6, %s5627_s7  ;;  %v5107_v6 = vpack.c.bf16 %v5378_v32, %v5377_v61 }
 0x854   : > { %5395 = vrot.lane.b32.xlu1 %v5394_v17, %s5629_s15  ;;  %v5383_v17 = vunpack.i.h.bf16 %v7857_v1 }
 0x855   : > { %3330 = vrot.lane.b32.xlu0 %v3201_v7, %s5627_s7 }
 0x858   : > { %3332 = vrot.lane.b32.xlu1 %v3202_v20, %s5627_s7 }
 0x859   : > { %5400 = vrot.lane.b32.xlu0 %v5399_v54, %s5629_s15 }
 0x85c   : > { %5405 = vrot.lane.b32.xlu1 %v5404_v42, %s5629_s15 }
 0x85d   : > { %3334 = vrot.lane.b32.xlu0 %v3203_v62, %s5627_s7 }
 0x860   : > { %3338 = vrot.lane.b32.xlu1 %v3205_v55, %s5627_s7 }
 0x861   : > { %3336 = vrot.lane.b32.xlu0 %v3204_v14, %s5627_s7 }
 0x864   : > { %3342 = vrot.lane.b32.xlu1 %v3207_v39, %s5627_s7 }
 0x865   : > { %3340 = vrot.lane.b32.xlu0 %v3206_v10, %s5627_s7  ;;  %s4380_s7 = sshll.u32 %s7888_s21, 6 }
 0x866   : > { %s7719_s12 = scalar_lea.vmem %s7774_s5, %s4380_s7 }
 0x868   : > { %3515 = vrot.lane.b32.xlu1 %v3139_v37, %s5629_s15 }
 0x869   : > { %3513 = vrot.lane.b32.xlu0 %v3138_v23, %s5629_s15 }
 0x86c   : > { %3519 = vrot.lane.b32.xlu1 %v3141_v41, %s5629_s15 }
 0x86d   : > { %3517 = vrot.lane.b32.xlu0 %v3140_v28, %s5629_s15 }
 0x870   : > { %3523 = vrot.lane.b32.xlu1 %v3143_v27, %s5629_s15 }
 0x871   : > { %3521 = vrot.lane.b32.xlu0 %v3142_v22, %s5629_s15 }
 0x874   : > { %3527 = vrot.lane.b32.xlu1 %v3145_v4, %s5629_s15 }
 0x875   : > { %3525 = vrot.lane.b32.xlu0 %v3144_v49, %s5629_s15 }
 0x88e   : > { %v2884_v47 = vpop.xlane.xlu0 %2883 }
 0x88f   : > { %5509 = vrcp.f32 %v2884_v47  ;;  %v2881_v52 = vpop.xlane.xlu1 %2880 }
 0x890   : > { %5511 = vrcp.f32 %v2881_v52 }
 0x893   : > { %v2887_v31 = vpop.xlane.xlu0 %2886  ;;  %v5386_v50 = vpop.permute.xlu1 %5385 }
 0x894   : > { %5513 = vrcp.f32 %v2887_v31  ;;  %v5388_v7 = vunpack.i.h.bf16 %v5386_v50  ;;  %v5387_v59 = vunpack.i.l.bf16 %v5386_v50 }
 0x896   : > { %v5119_v45 = vpack.c.bf16 %v5388_v7, %v5387_v59 }
 0x897   : > { %v2893_v48 = vpop.xlane.xlu0 %2892 }
 0x898   : > { %5515 = vrcp.f32 %v2893_v48 }
 0x899   : > { %v5510_v5 = vpop.eup %5509 }
 0x89a   : > { %v5512_v16 = vpop.eup %5511  ;;  %v2912_v63 = vmul.f32 %v5510_v5, %v7363_v29 }
 0x89b   : > { %v2911_v13 = vmul.f32 %v5512_v16, %v7365_v2  ;;  %v5382_v2 = vunpack.i.l.bf16 %v7857_v1  ;;  %v5391_v43 = vpop.permute.xlu0 %5390 }
 0x89c   : > { %v5392_v20 = vunpack.i.l.bf16 %v5391_v43 }
 0x89d   : > { %4813 = vmatprep.mubr.msk.f32.mxu1 %vm1096_vm3, %v2911_v13  ;;  %v5113_v29 = vpack.c.bf16 %v5383_v17, %v5382_v2 }
 0x89e   : > { %4814 = vmatmul.mubr.msk.f32.vlgmr.msra.gmra.mrb[16].mxu1 %vm1096_vm3, %v2912_v63  ;;  %v5514_v8 = vpop.eup %5513 }
 0x89f   : > { %5106 = vmatpush3.bf16.xpose.msk.msra.mxu1 %vm5927_vm1, %v7855_v33  ;;  %v2913_v35 = vmul.f32 %v5514_v8, %v7371_v12  ;;  %v5393_v12 = vunpack.i.h.bf16 %v5391_v43 }
 0x8a0   : > { %5109 = vmatprep.subr.msk.bf16.mxu1 %vm5927_vm1, %v5107_v6 }
 0x8a1   : > { %4816 = vmatprep.mubr.msk.f32.mxu1 %vm1096_vm3, %v2913_v35  ;;  %v5125_v3 = vpack.c.bf16 %v5393_v12, %v5392_v20 }
 0x8a2   : > { %v5516_v62 = vpop.eup %5515 }
 0x8a3   : > { %v2915_v19 = vmul.f32 %v5516_v62, %v7375_v15 }
 0x8a7   : > { %5112 = vmatpush3.bf16.xpose.msk.msra.mxu1 %vm5927_vm1, %v5107_v6 }
 0x8a8   : > { %5115 = vmatprep.subr.msk.bf16.mxu1 %vm5927_vm1, %v5113_v29 }
 0x8af   : > { %5118 = vmatpush3.bf16.xpose.msk.msra.mxu1 %vm5927_vm1, %v5113_v29 }
 0x8b0   : > { %5121 = vmatprep.subr.msk.bf16.mxu1 %vm5927_vm1, %v5119_v45 }
 0x8b7   : > { %5124 = vmatpush3.bf16.xpose.msk.msra.mxu1 %vm5927_vm1, %v5119_v45 }
 0x8b8   : > { %5127 = vmatprep.subr.msk.bf16.mxu1 %vm5927_vm1, %v5125_v3 }
 0x8c4   : > { %v2890_v53 = vpop.xlane.xlu1 %2889 }
 0x8c5   : > { %5517 = vrcp.f32 %v2890_v53 }
 0x8c8   : > { %v2896_v54 = vpop.xlane.xlu1 %2895 }
 0x8c9   : > { %5519 = vrcp.f32 %v2896_v54 }
 0x8cc   : > { %v2899_v9 = vpop.xlane.xlu1 %2898  ;;  %v2902_v42 = vpop.xlane.xlu0 %2901 }
 0x8cd   : > { %5521 = vrcp.f32 %v2899_v9 }
 0x8ce   : > { %5523 = vrcp.f32 %v2902_v42 }
 0x8cf   : > { %v5518_v24 = vpop.eup %5517 }
 0x8d0   : > { %v3329_v55 = vpop.permute.xlu1 %3328  ;;  %v2914_v51 = vmul.f32 %v5518_v24, %v7397_v21  ;;  %v3331_v14 = vpop.permute.xlu0 %3330 }
 0x8d2   : > { %4817 = vmatmul.mubr.msk.f32.gmra.mrb[18].mxu1 %vm1096_vm3, %v2914_v51 }
 0x8d3   : > { %v5520_v40 = vpop.eup %5519  ;;  %4819 = vmatprep.mubr.msk.f32.mxu1 %vm1096_vm3, %v2915_v19 }
 0x8d4   : > { %v5396_v26 = vpop.permute.xlu1 %5395  ;;  %v2916_v39 = vmul.f32 %v5520_v40, %v7401_v25  ;;  %v5401_v10 = vpop.permute.xlu0 %5400 }
 0x8d5   : > { %v5398_v15 = vunpack.i.h.bf16 %v5396_v26  ;;  %v5397_v46 = vunpack.i.l.bf16 %v5396_v26 }
 0x8d6   : > { %4820 = vmatmul.mubr.msk.f32.gmra.mrb[20].mxu1 %vm1096_vm3, %v2916_v39 }
 0x8d7   : > { %v5522_v37 = vpop.eup %5521  ;;  %v5131_v28 = vpack.c.bf16 %v5398_v15, %v5397_v46  ;;  %v5600_v15 = vld [vmem:[%s6139_s27 + $0x38] sm:$0xff] }
 0x8d8   : > { %v5524_v38 = vpop.eup %5523  ;;  %v3333_v23 = vpop.permute.xlu1 %3332  ;;  %v2917_v11 = vmul.f32 %v5522_v37, %v7405_v18  ;;  %v5403_v18 = vunpack.i.h.bf16 %v5401_v10 }
 0x8d9   : > { %v3335_v21 = vpop.permute.xlu0 %3334  ;;  %v2918_v41 = vmul.f32 %v5524_v38, %v7407_v57  ;;  %v5402_v57 = vunpack.i.l.bf16 %v5401_v10 }
 0x8da   : > { %4822 = vmatprep.mubr.msk.f32.mxu1 %vm1096_vm3, %v2917_v11 }
 0x8db   : > { %4823 = vmatmul.mubr.msk.f32.gmra.mrb[22].mxu1 %vm1096_vm3, %v2918_v41  ;;  %v5137_v30 = vpack.c.bf16 %v5403_v18, %v5402_v57 }
 0x8dc   : > { %4841 = vmatprep.mubr.msk.f32.mxu1 %vm789_vm0, %v3329_v55  ;;  %v5406_v25 = vpop.permute.xlu1 %5405 }
 0x8dd   : > { %v3337_v0 = vpop.permute.xlu0 %3336  ;;  %v5408_v56 = vunpack.i.h.bf16 %v5406_v25  ;;  %v5407_v58 = vunpack.i.l.bf16 %v5406_v25 }
 0x8df   : > { %4842 = vmatmul.mubr.msk.f32.vlgmr.msra.gmra.mrb[24].mxu1 %vm789_vm0, %v3331_v14  ;;  %v5143_v60 = vpack.c.bf16 %v5408_v56, %v5407_v58 }
 0x8e0   : > { %5130 = vmatpush3.bf16.xpose.msk.msra.mxu1 %vm5927_vm1, %v5125_v3  ;;  %4844 = vmatprep.mubr.msk.f32.mxu1 %vm789_vm0, %v3333_v23  ;;  %v3339_v27 = vpop.permute.xlu1 %3338  ;;  %v5597_v23 = vld [vmem:[%s6139_s27 + $0x20] sm:$0xff] }
 0x8e1   : > { %5133 = vmatprep.subr.msk.bf16.mxu1 %vm5927_vm1, %v5131_v28  ;;  %v3341_v36 = vpop.permute.xlu0 %3340 }
 0x8e3   : > { %4845 = vmatmul.mubr.msk.f32.gmra.mrb[26].mxu1 %vm789_vm0, %v3335_v21 }
 0x8e4   : > { %4847 = vmatprep.mubr.msk.f32.mxu1 %vm789_vm0, %v3337_v0  ;;  %v3343_v22 = vpop.permute.xlu1 %3342  ;;  %v5601_v0 = vld [vmem:[%s6139_s27 + $0x10] sm:$0xff] }
 0x8e5   : > { %v3514_v4 = vpop.permute.xlu0 %3513 }
 0x8e7   : > { %4848 = vmatmul.mubr.msk.f32.gmra.mrb[28].mxu1 %vm789_vm0, %v3339_v27  ;;  %v7867_v27 = vld [vmem:[#allocation15_spill] sm:$0xff] }
 0x8e8   : > { %5136 = vmatpush3.bf16.xpose.msk.msra.mxu1 %vm5927_vm1, %v5131_v28  ;;  %4850 = vmatprep.mubr.msk.f32.mxu1 %vm789_vm0, %v3341_v36  ;;  %v3516_v49 = vpop.permute.xlu1 %3515 }
 0x8e9   : > { %5139 = vmatprep.subr.msk.bf16.mxu1 %vm5927_vm1, %v5137_v30  ;;  %v3518_v47 = vpop.permute.xlu0 %3517 }
 0x8eb   : > { %4851 = vmatmul.mubr.msk.f32.gmra.mrb[30].mxu1 %vm789_vm0, %v3343_v22 }
 0x8ec   : > { %4869 = vmatprep.mubr.msk.f32.mxu1 %vm789_vm0, %v3514_v4  ;;  %v3520_v52 = vpop.permute.xlu1 %3519 }
 0x8ed   : > { %v3522_v31 = vpop.permute.xlu0 %3521 }
 0x8f0   : > { %5142 = vmatpush3.bf16.xpose.msk.msra.mxu1 %vm5927_vm1, %v5137_v30  ;;  %v3524_v5 = vpop.permute.xlu1 %3523 }
 0x8f1   : > { %5145 = vmatprep.subr.msk.bf16.mxu1 %vm5927_vm1, %v5143_v60  ;;  %v3526_v16 = vpop.permute.xlu0 %3525 }
 0x8f4   : > { %v3528_v44 = vpop.permute.xlu1 %3527 }
 0x8f8   : > { %5148 = vmatpush3.bf16.xpose.msk.msra.mxu1 %vm5927_vm1, %v5143_v60 }
 0x8ff   : > { %4870 = vmatmul.mubr.msk.f32.vlgmr.msra.gmra.mrb[24].mxu1 %vm789_vm0, %v3516_v49 }
 0x900   : > { %4872 = vmatprep.mubr.msk.f32.mxu1 %vm789_vm0, %v3518_v47 }
 0x903   : > { %4873 = vmatmul.mubr.msk.f32.gmra.mrb[26].mxu1 %vm789_vm0, %v3520_v52 }
 0x904   : > { %4875 = vmatprep.mubr.msk.f32.mxu1 %vm789_vm0, %v3522_v31 }
 0x907   : > { %4876 = vmatmul.mubr.msk.f32.gmra.mrb[28].mxu1 %vm789_vm0, %v3524_v5 }
 0x908   : > { %4878 = vmatprep.mubr.msk.f32.mxu1 %vm789_vm0, %v3526_v16 }
 0x90b   : > { %4879 = vmatmul.mubr.msk.f32.gmra.mrb[30].mxu1 %vm789_vm0, %v3528_v44 }
 0x971   : > { %v7563_v32 = vpop.f32.mrb[16].mxu1 }
 0x972   : > { %v7565_v61 = vpop.f32.mrb[17].mxu1 }
 0x9a5   : > { %v7567_v13 = vpop.f32.mrb[18].mxu1 }
 0x9a6   : > { %v7569_v63 = vpop.f32.mrb[19].mxu1 }
 0x9a9   : > { %v7571_v6 = vpop.f32.mrb[20].mxu1 }
 0x9aa   : > { %v7573_v8 = vpop.f32.mrb[21].mxu1 }
 0x9ae   : > { %v7575_v33 = vpop.f32.mrb[22].mxu1 }
 0x9af   : > { %v7577_v34 = vpop.f32.mrb[23].mxu1 }
 0x9d2   : > { %v4871_v35 = vpop.f32.mrb[24].mxu1 }
 0x9d3   : > { %v3691_v1 = vmul.f32 0.17677669, %v4871_v35  ;;  %v3651_v17 = vpop.f32.mrb[25].mxu1 }
 0x9d4   : > { %v3690_v2 = vmul.f32 0.17677669, %v3651_v17 }
 0x9d5   : > { %v3699_v48 = vsel %vm492_vm2, %v3691_v1, -1e+30 }
 0x9d6   : > { %v3698_v59 = vsel %vm491_vm4, %v3690_v2, -1e+30  ;;  %v4874_v45 = vpop.f32.mrb[26].mxu1  ;;  %v3709_v43 = vsel %vm1096_vm3, %v3699_v48, -inf }
 0x9d7   : > { %3710 = vmax.xlane.f32.xlu1 %v3709_v43  ;;  %v3661_v12 = vpop.f32.mrb[27].mxu1  ;;  %v3706_v20 = vsel %vm1096_vm3, %v3698_v59, -inf  ;;  %v3693_v3 = vmul.f32 0.17677669, %v4874_v45 }
 0x9d8   : > { %v3692_v53 = vmul.f32 0.17677669, %v3661_v12  ;;  %3707 = vmax.xlane.f32.xlu0 %v3706_v20 }
 0x9d9   : > { %v3701_v51 = vsel %vm494_vm5, %v3693_v3, -1e+30 }
 0x9da   : > { %v3700_v9 = vsel %vm493_vm6, %v3692_v53, -1e+30  ;;  %v4877_v42 = vpop.f32.mrb[28].mxu1  ;;  %v3715_v37 = vsel %vm1096_vm3, %v3701_v51, -inf }
 0x9db   : > { %v3671_v62 = vpop.f32.mrb[29].mxu1  ;;  %v3712_v24 = vsel %vm1096_vm3, %v3700_v9, -inf  ;;  %v3695_v14 = vmul.f32 0.17677669, %v4877_v42 }
 0x9dc   : > { %v3694_v19 = vmul.f32 0.17677669, %v3671_v62  ;;  %3713 = vmax.xlane.f32.xlu0 %v3712_v24 }
 0x9dd   : > { %v3703_v11 = vsel %vm496_vm7, %v3695_v14, -1e+30 }
 0x9de   : > { %v3702_v26 = vsel %vm495_vm8, %v3694_v19, -1e+30  ;;  %v4880_v39 = vpop.f32.mrb[30].mxu1  ;;  %v3721_v25 = vsel %vm1096_vm3, %v3703_v11, -inf }
 0x9df   : > { %v3681_v10 = vpop.f32.mrb[31].mxu1  ;;  %v3718_v38 = vsel %vm1096_vm3, %v3702_v26, -inf  ;;  %v3697_v21 = vmul.f32 0.17677669, %v4880_v39 }
 0x9e0   : > { %v3696_v41 = vmul.f32 0.17677669, %v3681_v10  ;;  %3716 = vmax.xlane.f32.xlu0 %v3715_v37  ;;  %3719 = vmax.xlane.f32.xlu1 %v3718_v38 }
 0x9e1   : > { %v3705_v18 = vsel %vm498_vm9, %v3697_v21, -1e+30 }
 0x9e2   : > { %v3704_v46 = vsel %vm497_vm10, %v3696_v41, -1e+30  ;;  %v3727_v57 = vsel %vm1096_vm3, %v3705_v18, -inf  ;;  %v5599_v41 = vld [vmem:[%s6139_s27 + $0x30] sm:$0xff] }
 0x9e3   : > { %v3724_v28 = vsel %vm1096_vm3, %v3704_v46, -inf }
 0x9e4   : > { %3722 = vmax.xlane.f32.xlu0 %v3721_v25  ;;  %3725 = vmax.xlane.f32.xlu1 %v3724_v28  ;;  %v7868_v25 = vld [vmem:[#allocation25_spill] sm:$0xff]  ;;  %v7869_v28 = vld [vmem:[#allocation24_spill] sm:$0xff] }
 0x9e8   : > { %3728 = vmax.xlane.f32.xlu0 %v3727_v57 }
 0x9f5   : > { %5410 = vrot.lane.b32.xlu1 %v7867_v27, %s5629_s15  ;;  %v7870_v27 = vld [vmem:[#allocation26_spill] sm:$0xff] }
 0xa64   : > { %v3711_v36 = vpop.xlane.xlu1 %3710 }
 0xa65   : > { %v3731_v30 = vsub.f32 %v3699_v48, %v3711_v36  ;;  %v3708_v22 = vpop.xlane.xlu0 %3707  ;;  %v7871_v36 = vld [vmem:[#allocation28_spill] sm:$0xff] }
 0xa66   : > { %v3730_v56 = vsub.f32 %v3698_v59, %v3708_v22  ;;  %v7873_v22 = vld [vmem:[#allocation30_spill] sm:$0xff] }
 0xa67   : > { %v3740_v58 = vmul.f32 1.442695, %v3731_v30  ;;  %v7872_v30 = vld [vmem:[#allocation27_spill] sm:$0xff] }
 0xa68   : > { %v3738_v4 = vmul.f32 1.442695, %v3730_v56  ;;  %v7874_v56 = vld [vmem:[#allocation29_spill] sm:$0xff] }
 0xa69   : > { %5525 = vpow2.f32 %v3740_v58  ;;  %v3714_v60 = vpop.xlane.xlu0 %3713  ;;  %v7875_v58 = vld [vmem:[#allocation31_spill] sm:$0xff] }
 0xa6a   : > { %5527 = vpow2.f32 %v3738_v4  ;;  %v3732_v49 = vsub.f32 %v3700_v9, %v3714_v60 }
 0xa6c   : > { %v3742_v47 = vmul.f32 1.442695, %v3732_v49 }
 0xa6d   : > { %v3717_v52 = vpop.xlane.xlu0 %3716  ;;  %v3720_v31 = vpop.xlane.xlu1 %3719 }
 0xa6e   : > { %5529 = vpow2.f32 %v3742_v47  ;;  %v3733_v5 = vsub.f32 %v3701_v51, %v3717_v52  ;;  %v3734_v16 = vsub.f32 %v3702_v26, %v3720_v31 }
 0xa70   : > { %v3744_v44 = vmul.f32 1.442695, %v3733_v5  ;;  %v3746_v35 = vmul.f32 1.442695, %v3734_v16 }
 0xa71   : > { %v3723_v1 = vpop.xlane.xlu0 %3722  ;;  %v3726_v17 = vpop.xlane.xlu1 %3725 }
 0xa72   : > { %5531 = vpow2.f32 %v3744_v44  ;;  %v3735_v2 = vsub.f32 %v3703_v11, %v3723_v1  ;;  %v3736_v7 = vsub.f32 %v3704_v46, %v3726_v17  ;;  %v5598_v11 = vld [vmem:[%s6139_s27 + $0x28] sm:$0xff]  ;;  %v5424_v46 = vpack.i.bf16 %v5600_v15, %v5599_v41 }
 0xa73   : > { %v7613_v29 = vpop.eup %5525  ;;  %5533 = vpow2.f32 %v3746_v35  ;;  %v5419_v21 = vpack.i.bf16 %v5598_v11, %v5597_v23 }
 0xa74   : > { %v7615_v50 = vpop.eup %5527  ;;  %v3748_v48 = vmul.f32 1.442695, %v3735_v2  ;;  %v3757_v59 = vsel %vm1096_vm3, %v7613_v29, 0.0  ;;  %v3750_v9 = vmul.f32 1.442695, %v3736_v7 }
 0xa75   : > { %3758 = vadd.xlane.f32.xlu0 %v3757_v59  ;;  %v3729_v45 = vpop.xlane.xlu0 %3728  ;;  %v3754_v43 = vsel %vm1096_vm3, %v7615_v50, 0.0  ;;  %v5411_v12 = vpop.permute.xlu1 %5410 }
 0xa76   : > { %5535 = vpow2.f32 %v3748_v48  ;;  %v3737_v20 = vsub.f32 %v3705_v18, %v3729_v45  ;;  %3755 = vadd.xlane.f32.xlu1 %v3754_v43  ;;  %v5413_v3 = vunpack.i.h.bf16 %v5411_v12  ;;  %v5412_v53 = vunpack.i.l.bf16 %v5411_v12  ;;  %v5602_v18 = vld [vmem:[%s6139_s27 + $0x18] sm:$0xff] }
 0xa77   : > { %v5414_v57 = vpack.i.bf16 %v5602_v18, %v5601_v0 }
 0xa78   : > { %v7621_v54 = vpop.eup %5529  ;;  %v3752_v42 = vmul.f32 1.442695, %v3737_v20  ;;  %v5149_v62 = vpack.c.bf16 %v5413_v3, %v5412_v53 }
 0xa79   : > { %v3760_v24 = vsel %vm1096_vm3, %v7621_v54, 0.0 }
 0xa7a   : > { %5537 = vpow2.f32 %v3752_v42  ;;  %3761 = vadd.xlane.f32.xlu1 %v3760_v24  ;;  %5150 = vmatprep.subr.bf16.mxu0 %v5149_v62 }
 0xa7b   : > { %5152 = vmatpush3.bf16.msra.mxu0 %v5149_v62  ;;  %5539 = vpow2.f32 %v3750_v9 }
 0xa7c   : > { %v7625_v55 = vpop.eup %5531 }
 0xa7d   : > { %v7627_v51 = vpop.eup %5533  ;;  %v3763_v14 = vsel %vm1096_vm3, %v7625_v55, 0.0 }
 0xa7e   : > { %3764 = vadd.xlane.f32.xlu0 %v3763_v14  ;;  %v3766_v19 = vsel %vm1096_vm3, %v7627_v51, 0.0 }
 0xa7f   : > { %3767 = vadd.xlane.f32.xlu1 %v3766_v19 }
 0xa80   : > { %v7633_v40 = vpop.eup %5535 }
 0xa81   : > { %v3769_v26 = vsel %vm1096_vm3, %v7633_v40, 0.0 }
 0xa82   : > { %3770 = vadd.xlane.f32.xlu0 %v3769_v26 }
 0xa84   : > { %v7637_v39 = vpop.eup %5537 }
 0xa85   : > { %v3775_v10 = vsel %vm1096_vm3, %v7637_v39, 0.0  ;;  %v7641_v37 = vpop.eup %5539 }
 0xa86   : > { %3776 = vadd.xlane.f32.xlu0 %v3775_v10  ;;  %v3772_v38 = vsel %vm1096_vm3, %v7641_v37, 0.0 }
 0xa8a   : > { %3773 = vadd.xlane.f32.xlu0 %v3772_v38 }
 0xa90   : > { %5420 = vrot.lane.b32.xlu1 %v5419_v21, %s5629_s15 }
 0xa94   : > { %5425 = vrot.lane.b32.xlu1 %v5424_v46, %s5629_s15 }
 0xa98   : > { %3955 = vrot.lane.b32.xlu1 %v7868_v25, %s5629_s15 }
 0xa9c   : > { %3957 = vrot.lane.b32.xlu1 %v7869_v28, %s5629_s15 }
 0xaa0   : > { %3961 = vrot.lane.b32.xlu1 %v7870_v27, %s5629_s15  ;;  %5415 = vrot.lane.b32.xlu0 %v5414_v57, %s5629_s15 }
 0xaa4   : > { %3965 = vrot.lane.b32.xlu1 %v7871_v36, %s5629_s15  ;;  %3959 = vrot.lane.b32.xlu0 %v7872_v30, %s5629_s15  ;;  %v7876_v30 = vld [vmem:[#allocation16_spill] sm:$0xff] }
 0xaa8   : > { %3969 = vrot.lane.b32.xlu1 %v7873_v22, %s5629_s15  ;;  %3963 = vrot.lane.b32.xlu0 %v7874_v56, %s5629_s15  ;;  %v7877_v56 = vld [vmem:[#allocation17_spill] sm:$0xff] }
 0xaac   : > { %3989 = vrot.lane.b32.xlu1 %v7563_v32, %s5633_s30  ;;  %3967 = vrot.lane.b32.xlu0 %v7875_v58, %s5629_s15 }
 0xab0   : > { %3993 = vrot.lane.b32.xlu1 %v7567_v13, %s5633_s30  ;;  %3987 = vrot.lane.b32.xlu0 %v7565_v61, %s5633_s30 }
 0xab4   : > { %3997 = vrot.lane.b32.xlu1 %v7571_v6, %s5633_s30  ;;  %3991 = vrot.lane.b32.xlu0 %v7569_v63, %s5633_s30 }
 0xab8   : > { %4001 = vrot.lane.b32.xlu1 %v7575_v33, %s5633_s30  ;;  %3995 = vrot.lane.b32.xlu0 %v7573_v8, %s5633_s30 }
 0xabc   : > { %3999 = vrot.lane.b32.xlu0 %v7577_v34, %s5633_s30 }
 0xb02   : > { %v3759_v13 = vpop.xlane.xlu0 %3758 }
 0xb03   : > { %v3756_v32 = vpop.xlane.xlu1 %3755 }
 0xb04   : > { %5541 = vrcp.f32 %v3756_v32 }
 0xb05   : > { %5543 = vrcp.f32 %v3759_v13 }
 0xb07   : > { %v3762_v4 = vpop.xlane.xlu1 %3761 }
 0xb08   : > { %5545 = vrcp.f32 %v3762_v4 }
 0xb0b   : > { %v3765_v61 = vpop.xlane.xlu0 %3764 }
 0xb0c   : > { %v3768_v47 = vpop.xlane.xlu1 %3767  ;;  %5547 = vrcp.f32 %v3765_v61 }
 0xb0d   : > { %5549 = vrcp.f32 %v3768_v47 }
 0xb0e   : > { %v5542_v60 = vpop.eup %5541 }
 0xb0f   : > { %v3771_v49 = vpop.xlane.xlu0 %3770  ;;  %v3786_v6 = vmul.f32 %v5542_v60, %v7615_v50  ;;  %v5544_v48 = vpop.eup %5543 }
 0xb10   : > { %v5421_v33 = vpop.permute.xlu1 %5420  ;;  %5551 = vrcp.f32 %v3771_v49  ;;  %v3787_v59 = vmul.f32 %v5544_v48, %v7613_v29 }
 0xb11   : > { %4897 = vmatprep.mubr.msk.f32.mxu0 %vm1096_vm3, %v3786_v6  ;;  %v5423_v31 = vunpack.i.h.bf16 %v5421_v33  ;;  %v5422_v8 = vunpack.i.l.bf16 %v5421_v33  ;;  %v7878_v6 = vld [vmem:[#allocation18_spill] sm:$0xff] }
 0xb12   : > { %v5546_v7 = vpop.eup %5545 }
 0xb13   : > { %v3777_v63 = vpop.xlane.xlu0 %3776  ;;  %v5157_v35 = vpack.c.bf16 %v5423_v31, %v5422_v8  ;;  %v3788_v43 = vmul.f32 %v5546_v7, %v7621_v54 }
 0xb14   : > { %v5426_v44 = vpop.permute.xlu1 %5425 }
 0xb15   : > { %v5428_v1 = vunpack.i.h.bf16 %v5426_v44  ;;  %v5427_v17 = vunpack.i.l.bf16 %v5426_v44  ;;  %v7880_v44 = vld [vmem:[#allocation20_spill] sm:$0xff] }
 0xb16   : > { %v5548_v45 = vpop.eup %5547 }
 0xb17   : > { %v3774_v52 = vpop.xlane.xlu0 %3773  ;;  %v5161_v50 = vpack.c.bf16 %v5428_v1, %v5427_v17  ;;  %v5550_v12 = vpop.eup %5549  ;;  %v3789_v20 = vmul.f32 %v5548_v45, %v7625_v55  ;;  %v7881_v1 = vld [vmem:[#allocation21_spill] sm:$0xff] }
 0xb18   : > { %5553 = vrcp.f32 %v3774_v52  ;;  %v3790_v53 = vmul.f32 %v5550_v12, %v7627_v51  ;;  %v3956_v10 = vpop.permute.xlu1 %3955 }
 0xb19   : > { %5555 = vrcp.f32 %v3777_v63  ;;  %v4044_v58 = vsel %vm4043_vm11, %v7877_v56, %v3956_v10  ;;  %v7879_v63 = vld [vmem:[#allocation19_spill] sm:$0xff] }
 0xb1a   : > { %v5552_v3 = vpop.eup %5551 }
 0xb1b   : > { %v5416_v5 = vpop.permute.xlu0 %5415  ;;  %v3791_v29 = vmul.f32 %v5552_v3, %v7633_v40 }
 0xb1c   : > { %v5418_v34 = vunpack.i.h.bf16 %v5416_v5  ;;  %v5417_v16 = vunpack.i.l.bf16 %v5416_v5 }
 0xb1e   : > { %v5153_v2 = vpack.c.bf16 %v5418_v34, %v5417_v16 }
 0xb1f   : > { %v3960_v23 = vpop.permute.xlu0 %3959 }
 0xb20   : > { %5154 = vmatprep.subr.bf16.mxu0 %v5153_v2  ;;  %v4046_v33 = vsel %vm4043_vm11, %v7879_v63, %v3960_v23 }
 0xb21   : > { %5156 = vmatpush3.bf16.msra.mxu0 %v5153_v2 }
 0xb22   : > { %5158 = vmatprep.subr.bf16.mxu0 %v5157_v35  ;;  %v5554_v9 = vpop.eup %5553 }
 0xb23   : > { %v5556_v42 = vpop.eup %5555  ;;  %v3792_v54 = vmul.f32 %v5554_v9, %v7641_v37  ;;  %v3958_v37 = vpop.permute.xlu1 %3957 }
 0xb24   : > { %v3793_v62 = vmul.f32 %v5556_v42, %v7637_v39  ;;  %v3964_v21 = vpop.permute.xlu0 %3963  ;;  %v4045_v22 = vsel %vm4043_vm11, %v7876_v30, %v3958_v37 }
 0xb25   : > { %5160 = vmatpush3.bf16.msra.mxu0 %v5157_v35  ;;  %v4048_v17 = vsel %vm4043_vm11, %v7881_v1, %v3964_v21 }
 0xb26   : > { %5162 = vmatprep.subr.bf16.mxu0 %v5161_v50 }
 0xb27   : > { %v3962_v38 = vpop.permute.xlu1 %3961 }
 0xb28   : > { %v3968_v15 = vpop.permute.xlu0 %3967  ;;  %v4047_v47 = vsel %vm4043_vm11, %v7878_v6, %v3962_v38 }
 0xb29   : > { %5164 = vmatpush3.bf16.msra.mxu0 %v5161_v50 }
 0xb2b   : > { %v3966_v11 = vpop.permute.xlu1 %3965 }
 0xb2c   : > { %4898 = vmatmul.mubr.msk.f32.vlgmr.msra.gmra.mrb[24].mxu0 %vm1096_vm3, %v3787_v59  ;;  %v3988_v25 = vpop.permute.xlu0 %3987  ;;  %v4049_v35 = vsel %vm4043_vm11, %v7880_v44, %v3966_v11 }
 0xb2d   : > { %4900 = vmatprep.mubr.msk.f32.mxu0 %vm1096_vm3, %v3788_v43  ;;  %v4052_v4 = vsel %vm1096_vm3, %v4044_v58, %v3988_v25  ;;  %v7882_v43 = vld [vmem:[#allocation22_spill] sm:$0xff] }
 0xb2f   : > { %v3970_v41 = vpop.permute.xlu1 %3969 }
 0xb30   : > { %4901 = vmatmul.mubr.msk.f32.gmra.mrb[26].mxu0 %vm1096_vm3, %v3789_v20  ;;  %v3992_v0 = vpop.permute.xlu0 %3991  ;;  %v4051_v12 = vsel %vm4043_vm11, %v7882_v43, %v3970_v41  ;;  %v7883_v20 = vld [vmem:[#allocation23_spill] sm:$0xff] }
 0xb31   : > { %4903 = vmatprep.mubr.msk.f32.mxu0 %vm1096_vm3, %v3790_v53  ;;  %v4054_v8 = vsel %vm1096_vm3, %v4046_v33, %v3992_v0  ;;  %v4050_v3 = vsel %vm4043_vm11, %v7883_v20, %v3968_v15 }
 0xb33   : > { %v3990_v46 = vpop.permute.xlu1 %3989 }
 0xb34   : > { %4904 = vmatmul.mubr.msk.f32.gmra.mrb[28].mxu0 %vm1096_vm3, %v3791_v29  ;;  %v3996_v57 = vpop.permute.xlu0 %3995  ;;  %v4053_v32 = vsel %vm1096_vm3, %v4045_v22, %v3990_v46 }
 0xb35   : > { %4906 = vmatprep.mubr.msk.f32.mxu0 %vm1096_vm3, %v3792_v54  ;;  %v4056_v48 = vsel %vm1096_vm3, %v4048_v17, %v3996_v57 }
 0xb37   : > { %v3994_v28 = vpop.permute.xlu1 %3993 }
 0xb38   : > { %4907 = vmatmul.mubr.msk.f32.gmra.mrb[30].mxu0 %vm1096_vm3, %v3793_v62  ;;  %v4000_v36 = vpop.permute.xlu0 %3999  ;;  %v4055_v52 = vsel %vm1096_vm3, %v4047_v47, %v3994_v28 }
 0xb39   : > { %v4058_v29 = vsel %vm1096_vm3, %v4050_v3, %v4000_v36 }
 0xb3b   : > { %v3998_v18 = vpop.permute.xlu1 %3997 }
 0xb3c   : > { %v4057_v2 = vsel %vm1096_vm3, %v4049_v35, %v3998_v18 }
 0xb3f   : > { %v4002_v27 = vpop.permute.xlu1 %4001 }
 0xb40   : > { %v4059_v53 = vsel %vm1096_vm3, %v4051_v12, %v4002_v27 }
 0xbff   : > { %v4899_v24 = vpop.f32.mrb[24].mxu0 }
 0xc00   : > { %4021 = vrot.lane.b32.xlu1 %v4899_v24, %s5632_s28  ;;  %v3908_v55 = vpop.f32.mrb[25].mxu0 }
 0xc01   : > { %4019 = vrot.lane.b32.xlu0 %v3908_v55, %s5632_s28 }
 0xc03   : > { %v4902_v51 = vpop.f32.mrb[26].mxu0 }
 0xc04   : > { %4025 = vrot.lane.b32.xlu1 %v4902_v51, %s5632_s28  ;;  %v3918_v14 = vpop.f32.mrb[27].mxu0 }
 0xc05   : > { %4023 = vrot.lane.b32.xlu0 %v3918_v14, %s5632_s28 }
 0xc07   : > { %v4905_v19 = vpop.f32.mrb[28].mxu0 }
 0xc08   : > { %4029 = vrot.lane.b32.xlu1 %v4905_v19, %s5632_s28  ;;  %v3928_v40 = vpop.f32.mrb[29].mxu0 }
 0xc09   : > { %4027 = vrot.lane.b32.xlu0 %v3928_v40, %s5632_s28 }
 0xc0b   : > { %v4908_v26 = vpop.f32.mrb[30].mxu0 }
 0xc0c   : > { %4033 = vrot.lane.b32.xlu1 %v4908_v26, %s5632_s28  ;;  %v3938_v39 = vpop.f32.mrb[31].mxu0 }
 0xc0d   : > { %4031 = vrot.lane.b32.xlu0 %v3938_v39, %s5632_s28 }
 0xc72   : > { %v4022_v13 = vpop.permute.xlu1 %4021 }
 0xc73   : > { %v4062_v61 = vsel %vm4060_vm12, %v4053_v32, %v4022_v13  ;;  %v4020_v60 = vpop.permute.xlu0 %4019 }
 0xc74   : > { %4070 = vst [vmem:[%s7719_s12 + $0x8] sm:$0xff] %v4062_v61  ;;  %v4061_v49 = vsel %vm4060_vm12, %v4052_v4, %v4020_v60 }
 0xc75   : > { %4069 = vst [vmem:[%s7719_s12] sm:$0xff] %v4061_v49 }
 0xc76   : > { %v4026_v31 = vpop.permute.xlu1 %4025 }
 0xc77   : > { %v4064_v5 = vsel %vm4060_vm12, %v4055_v52, %v4026_v31  ;;  %v4024_v34 = vpop.permute.xlu0 %4023 }
 0xc78   : > { %4072 = vst [vmem:[%s7719_s12 + $0x18] sm:$0xff] %v4064_v5  ;;  %v4063_v16 = vsel %vm4060_vm12, %v4054_v8, %v4024_v34 }
 0xc79   : > { %4071 = vst [vmem:[%s7719_s12 + $0x10] sm:$0xff] %v4063_v16 }
 0xc7a   : > { %v4030_v50 = vpop.permute.xlu1 %4029 }
 0xc7b   : > { %v4066_v7 = vsel %vm4060_vm12, %v4057_v2, %v4030_v50  ;;  %v4028_v59 = vpop.permute.xlu0 %4027 }
 0xc7c   : > { %4074 = vst [vmem:[%s7719_s12 + $0x28] sm:$0xff] %v4066_v7  ;;  %v4065_v45 = vsel %vm4060_vm12, %v4056_v48, %v4028_v59 }
 0xc7d   : > { %4073 = vst [vmem:[%s7719_s12 + $0x20] sm:$0xff] %v4065_v45 }
 0xc7e   : > { %v4034_v9 = vpop.permute.xlu1 %4033 }
 0xc7f   : > { %v4068_v42 = vsel %vm4060_vm12, %v4059_v53, %v4034_v9  ;;  %v4032_v54 = vpop.permute.xlu0 %4031 }
 0xc80   : > { %4076 = vst [vmem:[%s7719_s12 + $0x38] sm:$0xff] %v4068_v42  ;;  %v4067_v62 = vsel %vm4060_vm12, %v4058_v29, %v4032_v54 }
 0xc81   : > { %4075 = vst [vmem:[%s7719_s12 + $0x30] sm:$0xff] %v4067_v62 }
 0xc82 PF: > { %p12_p9 = scmp.ge.s32.totalorder %s5681_s22, 4   ;;  %s7884_s18 = smov %s5621_s19 }
 0xc83   : > { %s7885_s19 = smov %s5690_s25  ;;  %s7886_s20 = smov %s5681_s22 }
 0xc84   :  { %14 = sbr.rel (!%p12_p9) target bundleno = 2 (0x2), region = 205 }

</bundles_post_ra>
